<compile_context>
chip_gen: v6e
topology: v6e:2x2x1
jax: 0.10.0
libtpu: 0.0.40
codegen_flags: <defaults>
</compile_context>

<pallas_src>
import jax
import jax.numpy as jnp
import numpy as np
from jax.experimental import pallas as pl
from jax.experimental.pallas import tpu as pltpu


# ----------------------------------------------------------------------------
# In-kernel helpers
# ----------------------------------------------------------------------------
def _zero_halo(ref):
    """Zero only the pad=1 halo faces (D and H borders) of a padded scratch."""
    Dp, Hp, C = ref.shape
    z_d = jnp.zeros((1, Hp, C), ref.dtype)
    z_h = jnp.zeros((Dp, 1, C), ref.dtype)
    ref[0:1, :, :] = z_d
    ref[Dp - 1:Dp, :, :] = z_d
    ref[:, 0:1, :] = z_h
    ref[:, Hp - 1:Hp, :] = z_h


def _conv3x3(src_ref, tw_ref, acc_ref, D, H):
    """3x3x3 conv as 9 width-block-Toeplitz MXU dots (bf16 ops, f32 accum).

    src_ref: (D+2, H+2, K) f32 zero-padded activations.
    tw_ref:  (9, K, Nout) bf16 slabs, g = kd*3 + kh (BN scale folded into columns).
    acc_ref: (D*H, Nout) f32 accumulator scratch (3 writes total, no zero-init).
    Returns the full f32 conv result of shape (D*H, Nout).
    """
    M = D * H
    K = src_ref.shape[-1]

    def kd_taps(kd):
        part = None
        for kh in range(3):
            rows = src_ref[kd:kd + D, kh:kh + H, :].reshape(M, K)
            d = jnp.dot(rows.astype(jnp.bfloat16), tw_ref[kd * 3 + kh],
                        preferred_element_type=jnp.float32)
            part = d if part is None else part + d
        return part

    acc_ref[...] = kd_taps(0)            # first kd assigns: no zero-init store
    acc_ref[...] += kd_taps(1)           # single RMW
    return acc_ref[...] + kd_taps(2)     # last kd stays in registers (fused epilogue)


# ----------------------------------------------------------------------------
# Fused kernel: conv1 -> BN -> ReLU -> conv2 -> BN -> ReLU -> MaxPool3d(2,2)
# ----------------------------------------------------------------------------
def _unet_down3d_kernel(x_ref, tw1_ref, sh1_ref, tw2_ref, sh2_ref,
                        o_ref, xp_ref, ap_ref, acc1_ref, acc2_ref):
    # x_ref:   (D, H, W*Cin) bf16     one batch element, (w, c) flattened on lanes
    # tw1_ref: (9, W*Cin,  W*Cmid)    bf16 conv1 Toeplitz slabs (BN scale folded)
    # tw2_ref: (9, W*Cmid, W*Cout)    bf16 conv2 slabs, output lanes pool-permuted
    # sh1/sh2: (1, W*C) f32           folded conv-bias + BN shift, tiled over w
    # o_ref:   (Do, Ho, Wo*Cout) f32  pooled output
    # scratch: xp/ap padded activations (f32); acc1/acc2 f32 accumulators
    D, H, _ = x_ref.shape
    N1 = acc1_ref.shape[-1]          # W*Cmid
    Do, Ho, half = o_ref.shape       # half == Wo*Cout

    # ------------------- conv1 + BN + ReLU -------------------
    _zero_halo(xp_ref)
    xp_ref[1:D + 1, 1:H + 1, :] = x_ref[...].astype(jnp.float32)
    y1 = jnp.maximum(_conv3x3(xp_ref, tw1_ref, acc1_ref, D, H) + sh1_ref[...], 0.0)

    # ------------------- conv2 + BN + ReLU -------------------
    _zero_halo(ap_ref)
    ap_ref[1:D + 1, 1:H + 1, :] = y1.reshape(D, H, N1)
    y2 = jnp.maximum(_conv3x3(ap_ref, tw2_ref, acc2_ref, D, H) + sh2_ref[...], 0.0)

    # ------------------- fused MaxPool3d(2, 2) -------------------
    # conv2 output lanes are ordered (w parity, w//2, cout): width pairs sit in
    # opposite lane halves, so the W reduction is one elementwise maximum.
    m = jnp.maximum(y2[:, :half], y2[:, half:])           # pool W -> (D*H, Wo*Cout)
    m = m.reshape(D, H, half)
    m = jnp.max(m.reshape(Do, 2, H, half), axis=1)        # pool D
    m = jnp.max(m.reshape(Do, Ho, 2, half), axis=2)       # pool H
    o_ref[...] = m


# ----------------------------------------------------------------------------
# Weight / BN preprocessing (wrapper-side, tiny, fused by XLA)
# ----------------------------------------------------------------------------
def _fold_bn(bias, bn, eps=1e-5):
    gamma, beta, mean, var = bn
    scale = gamma / jnp.sqrt(var + eps)
    shift = beta + (bias - mean) * scale
    return scale, shift


def _toeplitz_weights(w, scale, W, permute_out=False):
    # w: (Cout, Cin, 3, 3, 3) PyTorch OIDHW.  Returns bf16 (9, W*Cin, W*Cout):
    # slab g = kd*3+kh maps a flattened input row (w_in, c_in) to a flattened
    # output column (w_out, c_out), realizing the kw taps (pad=1, zero boundary)
    # inside the contraction.  The BN scale is folded into the output columns.
    Cout, Cin = w.shape[0], w.shape[1]
    sel = np.zeros((3, W, W), np.float32)
    for kw in range(3):
        for wo in range(W):
            wi = wo + kw - 1
            if 0 <= wi < W:
                sel[kw, wi, wo] = 1.0
    wt = jnp.transpose(w, (2, 3, 4, 1, 0)).reshape(9, 3, Cin, Cout)   # (g,kw,ci,co)
    t = jnp.einsum('kiw,gkcd->gicwd', jnp.asarray(sel), wt)           # (g,wi,ci,wo,co)
    t = t.reshape(9, W * Cin, W * Cout)
    t = t * jnp.tile(scale, W)[None, None, :]          # fold BN scale into columns
    if permute_out:
        # output-lane order -> (w parity, w//2, cout) for the fused maxpool
        Wo = W // 2
        lane = ((2 * np.arange(Wo)[None, :, None]
                 + np.arange(2)[:, None, None]) * Cout
                + np.arange(Cout)[None, None, :]).reshape(-1)
        t = t[:, :, lane]
    return t.astype(jnp.bfloat16)


# ----------------------------------------------------------------------------
# Wrapper (channels-last NDHWC — no layout transposes around the kernel)
# ----------------------------------------------------------------------------
def unet_down3d_ndhwc(x, params):
    # x: (N, D, H, W, Cin)
    N, D, H, W, Cin = x.shape
    Cmid = params['w1'].shape[0]
    Cout = params['w2'].shape[0]
    assert D % 2 == 0 and H % 2 == 0 and W % 2 == 0
    Do, Ho, Wo = D // 2, H // 2, W // 2

    sc1, sh1 = _fold_bn(params['b1'], params['bn1'])
    sc2, sh2 = _fold_bn(params['b2'], params['bn2'])
    tw1 = _toeplitz_weights(params['w1'], sc1, W)                     # (9,W*Cin, W*Cmid)
    tw2 = _toeplitz_weights(params['w2'], sc2, W, permute_out=True)   # (9,W*Cmid,W*Cout)
    # the output-lane permutation keeps whole channel blocks, so plain tiling works
    sh1_l = jnp.tile(sh1, W)[None, :].astype(jnp.float32)
    sh2_l = jnp.tile(sh2, W)[None, :].astype(jnp.float32)

    x2 = x.reshape(N, D, H, W * Cin).astype(jnp.bfloat16)   # free reshape + half DMA

    out = pl.pallas_call(
        _unet_down3d_kernel,
        out_shape=jax.ShapeDtypeStruct((N, Do, Ho, Wo * Cout), jnp.float32),
        grid=(N,),
        in_specs=[
            pl.BlockSpec((None, D, H, W * Cin), lambda n: (n, 0, 0, 0)),
            pl.BlockSpec((9, W * Cin, W * Cmid), lambda n: (0, 0, 0)),
            pl.BlockSpec((1, W * Cmid), lambda n: (0, 0)),
            pl.BlockSpec((9, W * Cmid, W * Cout), lambda n: (0, 0, 0)),
            pl.BlockSpec((1, W * Cout), lambda n: (0, 0)),
        ],
        out_specs=pl.BlockSpec((None, Do, Ho, Wo * Cout),
                               lambda n: (n, 0, 0, 0)),
        scratch_shapes=[
            pltpu.VMEM((D + 2, H + 2, W * Cin), jnp.float32),    # padded input
            pltpu.VMEM((D + 2, H + 2, W * Cmid), jnp.float32),   # padded conv1 act
            pltpu.VMEM((D * H, W * Cmid), jnp.float32),          # conv1 accumulator
            pltpu.VMEM((D * H, W * Cout), jnp.float32),          # conv2 accumulator
        ],
        compiler_params=pltpu.CompilerParams(
            dimension_semantics=("parallel",)),
    )(x2, tw1, sh1_l, tw2, sh2_l)

    return out.reshape(N, Do, Ho, Wo, Cout)


@jax.jit
def unet_down3d(x_ndhwc, params):
    """Primary entry: channels-last in/out, no full-volume HBM transposes."""
    return unet_down3d_ndhwc(x_ndhwc, params)


@jax.jit
def unet_down3d_ncdhw(x_ncdhw, params):
    """Exact layout parity with the PyTorch module (NCDHW).  Adds two full-volume
    HBM transposes; prefer `unet_down3d` (NDHWC) in real pipelines."""
    x = jnp.transpose(x_ncdhw, (0, 2, 3, 4, 1)).astype(jnp.float32)
    y = unet_down3d_ndhwc(x, params)
    return jnp.transpose(y, (0, 4, 1, 2, 3))


# ----------------------------------------------------------------------------
# Parameters (deterministic init; shapes dictated by the module's __init__)
# ----------------------------------------------------------------------------
def init_params(key, in_channels, out_channels):
    insert = out_channels if in_channels > out_channels else out_channels // 2
    ks = jax.random.split(key, 12)

    def conv_init(kw, kb, cin, cout):
        fan_in = cin * 27
        bound = 1.0 / np.sqrt(fan_in)
        w = jax.random.uniform(kw, (cout, cin, 3, 3, 3), jnp.float32,
                               -bound, bound)
        b = jax.random.uniform(kb, (cout,), jnp.float32, -bound, bound)
        return w, b

    def bn_init(kg, kb, km, kv, c):
        gamma = 1.0 + 0.1 * jax.random.normal(kg, (c,), jnp.float32)
        beta = 0.1 * jax.random.normal(kb, (c,), jnp.float32)
        mean = 0.1 * jax.random.normal(km, (c,), jnp.float32)
        var = 1.0 + 0.1 * jnp.abs(jax.random.normal(kv, (c,), jnp.float32))
        return gamma, beta, mean, var

    w1, b1 = conv_init(ks[0], ks[1], in_channels, insert)
    bn1 = bn_init(ks[2], ks[3], ks[4], ks[5], insert)
    w2, b2 = conv_init(ks[6], ks[7], insert, out_channels)
    bn2 = bn_init(ks[8], ks[9], ks[10], ks[11], out_channels)
    return dict(w1=w1, b1=b1, bn1=bn1, w2=w2, b2=b2, bn2=bn2)


# ----------------------------------------------------------------------------
# Pure-JAX f32 reference (NCDHW, exactly the PyTorch module's math)
# ----------------------------------------------------------------------------
def reference(x, params, eps=1e-5):
    def block(x, w, b, bn):
        gamma, beta, mean, var = bn
        y = jax.lax.conv_general_dilated(
            x, w, window_strides=(1, 1, 1), padding='SAME',
            dimension_numbers=('NCDHW', 'OIDHW', 'NCDHW'),
            precision=jax.lax.Precision.HIGHEST)
        y = y + b[None, :, None, None, None]
        y = (y - mean[None, :, None, None, None]) / jnp.sqrt(
            var[None, :, None, None, None] + eps)
        y = y * gamma[None, :, None, None, None] + beta[None, :, None, None, None]
        return jnp.maximum(y, 0.0)

    y = block(x, params['w1'], params['b1'], params['bn1'])
    y = block(y, params['w2'], params['b2'], params['bn2'])
    return jax.lax.reduce_window(y, -jnp.inf, jax.lax.max,
                                 (1, 1, 2, 2, 2), (1, 1, 2, 2, 2), 'VALID')


if __name__ == "__main__":
    key = jax.random.PRNGKey(0)
    kx, kp = jax.random.split(key)
    in_channels, out_channels = 4, 8
    N, D, H, W = 2, 16, 16, 16

    x = jax.random.normal(kx, (N, D, H, W, in_channels), jnp.float32)   # NDHWC
    params = init_params(kp, in_channels, out_channels)

    out = jax.block_until_ready(unet_down3d(x, params))                 # NDHWC out

    # f32 reference in the module's native NCDHW layout, compared channels-last
    x_ncdhw = jnp.transpose(x, (0, 4, 1, 2, 3))
    ref = jnp.transpose(reference(x_ncdhw, params), (0, 2, 3, 4, 1))

    assert out.shape == (N, D // 2, H // 2, W // 2, out_channels), out.shape
    # bf16 MXU operands (with BN scale folded into the weights) vs f32 reference:
    # tolerances loosened accordingly.
    np.testing.assert_allclose(np.asarray(out), np.asarray(ref),
                               rtol=3e-2, atol=3e-2)
    print("KERNEL_OK")
</pallas_src>

<mosaic_0001>
module attributes {stable_mosaic.version = 11 : i64} {
  func.func @_unet_down3d_kernel(%arg0: i32, %arg1: memref<1x16x16x64xbf16, #tpu.memory_space<vmem>>, %arg2: memref<9x64x64xbf16, #tpu.memory_space<vmem>>, %arg3: memref<1x64xf32, #tpu.memory_space<vmem>>, %arg4: memref<9x64x128xbf16, #tpu.memory_space<vmem>>, %arg5: memref<1x128xf32, #tpu.memory_space<vmem>>, %arg6: memref<1x8x8x64xf32, #tpu.memory_space<vmem>>, %arg7: memref<18x18x64xf32, #tpu.memory_space<vmem>>, %arg8: memref<18x18x64xf32, #tpu.memory_space<vmem>>, %arg9: memref<256x64xf32, #tpu.memory_space<vmem>>, %arg10: memref<256x128xf32, #tpu.memory_space<vmem>>) attributes {dimension_semantics = [#tpu.dimension_semantics<parallel>], iteration_bounds = array<i64: 2>, scalar_prefetch = 0 : i64, scratch_operands = 4 : i64, tpu.core_type = #tpu.core_type<tc>, window_params = [{transform_indices = @transform_0, window_bounds = array<i64: 1, 16, 16, 64>}, {pipeline_mode = #tpu.pipeline_mode<synchronous>, transform_indices = @transform_1, window_bounds = array<i64: 9, 64, 64>}, {pipeline_mode = #tpu.pipeline_mode<synchronous>, transform_indices = @transform_2, window_bounds = array<i64: 1, 64>}, {pipeline_mode = #tpu.pipeline_mode<synchronous>, transform_indices = @transform_3, window_bounds = array<i64: 9, 64, 128>}, {pipeline_mode = #tpu.pipeline_mode<synchronous>, transform_indices = @transform_4, window_bounds = array<i64: 1, 128>}, {transform_indices = @transform_5, window_bounds = array<i64: 1, 8, 8, 64>}]} {
    %cst = arith.constant 0.000000e+00 : f32
    %0 = vector.broadcast %cst : f32 to vector<1x18x64xf32>
    %cst_0 = arith.constant 0.000000e+00 : f32
    %1 = vector.broadcast %cst_0 : f32 to vector<18x1x64xf32>
    %c0 = arith.constant 0 : index
    %c0_1 = arith.constant 0 : index
    %c0_2 = arith.constant 0 : index
    %2 = vector.load %arg7[%c0, %c0_1, %c0_2] : memref<18x18x64xf32, #tpu.memory_space<vmem>>, vector<1x18x64xf32>
    tpu.vector_store %arg7[%c0, %c0_1, %c0_2], %0 {strides = array<i32>} : memref<18x18x64xf32, #tpu.memory_space<vmem>>, vector<1x18x64xf32>,
    %c17 = arith.constant 17 : index
    %c0_3 = arith.constant 0 : index
    %c0_4 = arith.constant 0 : index
    %3 = vector.load %arg7[%c17, %c0_3, %c0_4] : memref<18x18x64xf32, #tpu.memory_space<vmem>>, vector<1x18x64xf32>
    tpu.vector_store %arg7[%c17, %c0_3, %c0_4], %0 {strides = array<i32>} : memref<18x18x64xf32, #tpu.memory_space<vmem>>, vector<1x18x64xf32>,
    %c0_5 = arith.constant 0 : index
    %c0_6 = arith.constant 0 : index
    %c0_7 = arith.constant 0 : index
    %4 = vector.load %arg7[%c0_5, %c0_6, %c0_7] : memref<18x18x64xf32, #tpu.memory_space<vmem>>, vector<18x1x64xf32>
    tpu.vector_store %arg7[%c0_5, %c0_6, %c0_7], %1 {strides = array<i32>} : memref<18x18x64xf32, #tpu.memory_space<vmem>>, vector<18x1x64xf32>,
    %c0_8 = arith.constant 0 : index
    %c17_9 = arith.constant 17 : index
    %c0_10 = arith.constant 0 : index
    %5 = vector.load %arg7[%c0_8, %c17_9, %c0_10] : memref<18x18x64xf32, #tpu.memory_space<vmem>>, vector<18x1x64xf32>
    tpu.vector_store %arg7[%c0_8, %c17_9, %c0_10], %1 {strides = array<i32>} : memref<18x18x64xf32, #tpu.memory_space<vmem>>, vector<18x1x64xf32>,
    %c0_11 = arith.constant 0 : index
    %c0_12 = arith.constant 0 : index
    %c0_13 = arith.constant 0 : index
    %c0_14 = arith.constant 0 : index
    %6 = vector.load %arg1[%c0_11, %c0_12, %c0_13, %c0_14] : memref<1x16x16x64xbf16, #tpu.memory_space<vmem>>, vector<1x16x16x64xbf16>
    %7 = vector.shape_cast %6 : vector<1x16x16x64xbf16> to vector<16x16x64xbf16>
    %8 = arith.extf %7 : vector<16x16x64xbf16> to vector<16x16x64xf32>
    %c1 = arith.constant 1 : index
    %c1_15 = arith.constant 1 : index
    %c0_16 = arith.constant 0 : index
    %9 = vector.load %arg7[%c1, %c1_15, %c0_16] : memref<18x18x64xf32, #tpu.memory_space<vmem>>, vector<16x16x64xf32>
    tpu.vector_store %arg7[%c1, %c1_15, %c0_16], %8 {strides = array<i32>} : memref<18x18x64xf32, #tpu.memory_space<vmem>>, vector<16x16x64xf32>,
    %c0_17 = arith.constant 0 : index
    %c0_18 = arith.constant 0 : index
    %c0_19 = arith.constant 0 : index
    %10 = vector.load %arg7[%c0_17, %c0_18, %c0_19] : memref<18x18x64xf32, #tpu.memory_space<vmem>>, vector<16x16x64xf32>
    %11 = vector.shape_cast %10 : vector<16x16x64xf32> to vector<256x64xf32>
    %12 = arith.truncf %11 : vector<256x64xf32> to vector<256x64xbf16>
    %c0_20 = arith.constant 0 : index
    %c0_21 = arith.constant 0 : index
    %c0_22 = arith.constant 0 : index
    %13 = vector.load %arg2[%c0_20, %c0_21, %c0_22] : memref<9x64x64xbf16, #tpu.memory_space<vmem>>, vector<1x64x64xbf16>
    %14 = vector.shape_cast %13 : vector<1x64x64xbf16> to vector<64x64xbf16>
    %cst_23 = arith.constant dense<0.000000e+00> : vector<256x64xf32>
    %15 = tpu.matmul %12, %14, %cst_23 {dimension_numbers = #tpu.dot_dimension_numbers<[1], [0], [0], [1], [0, 0, 1, 1], [], []>} : vector<256x64xbf16>, vector<64x64xbf16>, vector<256x64xf32> -> vector<256x64xf32>
    %c0_24 = arith.constant 0 : index
    %c1_25 = arith.constant 1 : index
    %c0_26 = arith.constant 0 : index
    %16 = vector.load %arg7[%c0_24, %c1_25, %c0_26] : memref<18x18x64xf32, #tpu.memory_space<vmem>>, vector<16x16x64xf32>
    %17 = vector.shape_cast %16 : vector<16x16x64xf32> to vector<256x64xf32>
    %18 = arith.truncf %17 : vector<256x64xf32> to vector<256x64xbf16>
    %c1_27 = arith.constant 1 : index
    %c0_28 = arith.constant 0 : index
    %c0_29 = arith.constant 0 : index
    %19 = vector.load %arg2[%c1_27, %c0_28, %c0_29] : memref<9x64x64xbf16, #tpu.memory_space<vmem>>, vector<1x64x64xbf16>
    %20 = vector.shape_cast %19 : vector<1x64x64xbf16> to vector<64x64xbf16>
    %cst_30 = arith.constant dense<0.000000e+00> : vector<256x64xf32>
    %21 = tpu.matmul %18, %20, %cst_30 {dimension_numbers = #tpu.dot_dimension_numbers<[1], [0], [0], [1], [0, 0, 1, 1], [], []>} : vector<256x64xbf16>, vector<64x64xbf16>, vector<256x64xf32> -> vector<256x64xf32>
    %22 = arith.addf %15, %21 : vector<256x64xf32>
    %c0_31 = arith.constant 0 : index
    %c2 = arith.constant 2 : index
    %c0_32 = arith.constant 0 : index
    %23 = vector.load %arg7[%c0_31, %c2, %c0_32] : memref<18x18x64xf32, #tpu.memory_space<vmem>>, vector<16x16x64xf32>
    %24 = vector.shape_cast %23 : vector<16x16x64xf32> to vector<256x64xf32>
    %25 = arith.truncf %24 : vector<256x64xf32> to vector<256x64xbf16>
    %c2_33 = arith.constant 2 : index
    %c0_34 = arith.constant 0 : index
    %c0_35 = arith.constant 0 : index
    %26 = vector.load %arg2[%c2_33, %c0_34, %c0_35] : memref<9x64x64xbf16, #tpu.memory_space<vmem>>, vector<1x64x64xbf16>
    %27 = vector.shape_cast %26 : vector<1x64x64xbf16> to vector<64x64xbf16>
    %cst_36 = arith.constant dense<0.000000e+00> : vector<256x64xf32>
    %28 = tpu.matmul %25, %27, %cst_36 {dimension_numbers = #tpu.dot_dimension_numbers<[1], [0], [0], [1], [0, 0, 1, 1], [], []>} : vector<256x64xbf16>, vector<64x64xbf16>, vector<256x64xf32> -> vector<256x64xf32>
    %29 = arith.addf %22, %28 : vector<256x64xf32>
    %c0_37 = arith.constant 0 : index
    %c0_38 = arith.constant 0 : index
    %30 = vector.load %arg9[%c0_37, %c0_38] : memref<256x64xf32, #tpu.memory_space<vmem>>, vector<256x64xf32>
    tpu.vector_store %arg9[%c0_37, %c0_38], %29 {strides = array<i32>} : memref<256x64xf32, #tpu.memory_space<vmem>>, vector<256x64xf32>,
    %c0_39 = arith.constant 0 : index
    %c0_40 = arith.constant 0 : index
    %31 = vector.load %arg9[%c0_39, %c0_40] : memref<256x64xf32, #tpu.memory_space<vmem>>, vector<256x64xf32>
    %c1_41 = arith.constant 1 : index
    %c0_42 = arith.constant 0 : index
    %c0_43 = arith.constant 0 : index
    %32 = vector.load %arg7[%c1_41, %c0_42, %c0_43] : memref<18x18x64xf32, #tpu.memory_space<vmem>>, vector<16x16x64xf32>
    %33 = vector.shape_cast %32 : vector<16x16x64xf32> to vector<256x64xf32>
    %34 = arith.truncf %33 : vector<256x64xf32> to vector<256x64xbf16>
    %c3 = arith.constant 3 : index
    %c0_44 = arith.constant 0 : index
    %c0_45 = arith.constant 0 : index
    %35 = vector.load %arg2[%c3, %c0_44, %c0_45] : memref<9x64x64xbf16, #tpu.memory_space<vmem>>, vector<1x64x64xbf16>
    %36 = vector.shape_cast %35 : vector<1x64x64xbf16> to vector<64x64xbf16>
    %cst_46 = arith.constant dense<0.000000e+00> : vector<256x64xf32>
    %37 = tpu.matmul %34, %36, %cst_46 {dimension_numbers = #tpu.dot_dimension_numbers<[1], [0], [0], [1], [0, 0, 1, 1], [], []>} : vector<256x64xbf16>, vector<64x64xbf16>, vector<256x64xf32> -> vector<256x64xf32>
    %c1_47 = arith.constant 1 : index
    %c1_48 = arith.constant 1 : index
    %c0_49 = arith.constant 0 : index
    %38 = vector.load %arg7[%c1_47, %c1_48, %c0_49] : memref<18x18x64xf32, #tpu.memory_space<vmem>>, vector<16x16x64xf32>
    %39 = vector.shape_cast %38 : vector<16x16x64xf32> to vector<256x64xf32>
    %40 = arith.truncf %39 : vector<256x64xf32> to vector<256x64xbf16>
    %c4 = arith.constant 4 : index
    %c0_50 = arith.constant 0 : index
    %c0_51 = arith.constant 0 : index
    %41 = vector.load %arg2[%c4, %c0_50, %c0_51] : memref<9x64x64xbf16, #tpu.memory_space<vmem>>, vector<1x64x64xbf16>
    %42 = vector.shape_cast %41 : vector<1x64x64xbf16> to vector<64x64xbf16>
    %cst_52 = arith.constant dense<0.000000e+00> : vector<256x64xf32>
    %43 = tpu.matmul %40, %42, %cst_52 {dimension_numbers = #tpu.dot_dimension_numbers<[1], [0], [0], [1], [0, 0, 1, 1], [], []>} : vector<256x64xbf16>, vector<64x64xbf16>, vector<256x64xf32> -> vector<256x64xf32>
    %44 = arith.addf %37, %43 : vector<256x64xf32>
    %c1_53 = arith.constant 1 : index
    %c2_54 = arith.constant 2 : index
    %c0_55 = arith.constant 0 : index
    %45 = vector.load %arg7[%c1_53, %c2_54, %c0_55] : memref<18x18x64xf32, #tpu.memory_space<vmem>>, vector<16x16x64xf32>
    %46 = vector.shape_cast %45 : vector<16x16x64xf32> to vector<256x64xf32>
    %47 = arith.truncf %46 : vector<256x64xf32> to vector<256x64xbf16>
    %c5 = arith.constant 5 : index
    %c0_56 = arith.constant 0 : index
    %c0_57 = arith.constant 0 : index
    %48 = vector.load %arg2[%c5, %c0_56, %c0_57] : memref<9x64x64xbf16, #tpu.memory_space<vmem>>, vector<1x64x64xbf16>
    %49 = vector.shape_cast %48 : vector<1x64x64xbf16> to vector<64x64xbf16>
    %cst_58 = arith.constant dense<0.000000e+00> : vector<256x64xf32>
    %50 = tpu.matmul %47, %49, %cst_58 {dimension_numbers = #tpu.dot_dimension_numbers<[1], [0], [0], [1], [0, 0, 1, 1], [], []>} : vector<256x64xbf16>, vector<64x64xbf16>, vector<256x64xf32> -> vector<256x64xf32>
    %51 = arith.addf %44, %50 : vector<256x64xf32>
    %52 = arith.addf %31, %51 : vector<256x64xf32>
    %c0_59 = arith.constant 0 : index
    %c0_60 = arith.constant 0 : index
    %53 = vector.load %arg9[%c0_59, %c0_60] : memref<256x64xf32, #tpu.memory_space<vmem>>, vector<256x64xf32>
    tpu.vector_store %arg9[%c0_59, %c0_60], %52 {strides = array<i32>} : memref<256x64xf32, #tpu.memory_space<vmem>>, vector<256x64xf32>,
    %c0_61 = arith.constant 0 : index
    %c0_62 = arith.constant 0 : index
    %54 = vector.load %arg9[%c0_61, %c0_62] : memref<256x64xf32, #tpu.memory_space<vmem>>, vector<256x64xf32>
    %c2_63 = arith.constant 2 : index
    %c0_64 = arith.constant 0 : index
    %c0_65 = arith.constant 0 : index
    %55 = vector.load %arg7[%c2_63, %c0_64, %c0_65] : memref<18x18x64xf32, #tpu.memory_space<vmem>>, vector<16x16x64xf32>
    %56 = vector.shape_cast %55 : vector<16x16x64xf32> to vector<256x64xf32>
    %57 = arith.truncf %56 : vector<256x64xf32> to vector<256x64xbf16>
    %c6 = arith.constant 6 : index
    %c0_66 = arith.constant 0 : index
    %c0_67 = arith.constant 0 : index
    %58 = vector.load %arg2[%c6, %c0_66, %c0_67] : memref<9x64x64xbf16, #tpu.memory_space<vmem>>, vector<1x64x64xbf16>
    %59 = vector.shape_cast %58 : vector<1x64x64xbf16> to vector<64x64xbf16>
    %cst_68 = arith.constant dense<0.000000e+00> : vector<256x64xf32>
    %60 = tpu.matmul %57, %59, %cst_68 {dimension_numbers = #tpu.dot_dimension_numbers<[1], [0], [0], [1], [0, 0, 1, 1], [], []>} : vector<256x64xbf16>, vector<64x64xbf16>, vector<256x64xf32> -> vector<256x64xf32>
    %c2_69 = arith.constant 2 : index
    %c1_70 = arith.constant 1 : index
    %c0_71 = arith.constant 0 : index
    %61 = vector.load %arg7[%c2_69, %c1_70, %c0_71] : memref<18x18x64xf32, #tpu.memory_space<vmem>>, vector<16x16x64xf32>
    %62 = vector.shape_cast %61 : vector<16x16x64xf32> to vector<256x64xf32>
    %63 = arith.truncf %62 : vector<256x64xf32> to vector<256x64xbf16>
    %c7 = arith.constant 7 : index
    %c0_72 = arith.constant 0 : index
    %c0_73 = arith.constant 0 : index
    %64 = vector.load %arg2[%c7, %c0_72, %c0_73] : memref<9x64x64xbf16, #tpu.memory_space<vmem>>, vector<1x64x64xbf16>
    %65 = vector.shape_cast %64 : vector<1x64x64xbf16> to vector<64x64xbf16>
    %cst_74 = arith.constant dense<0.000000e+00> : vector<256x64xf32>
    %66 = tpu.matmul %63, %65, %cst_74 {dimension_numbers = #tpu.dot_dimension_numbers<[1], [0], [0], [1], [0, 0, 1, 1], [], []>} : vector<256x64xbf16>, vector<64x64xbf16>, vector<256x64xf32> -> vector<256x64xf32>
    %67 = arith.addf %60, %66 : vector<256x64xf32>
    %c2_75 = arith.constant 2 : index
    %c2_76 = arith.constant 2 : index
    %c0_77 = arith.constant 0 : index
    %68 = vector.load %arg7[%c2_75, %c2_76, %c0_77] : memref<18x18x64xf32, #tpu.memory_space<vmem>>, vector<16x16x64xf32>
    %69 = vector.shape_cast %68 : vector<16x16x64xf32> to vector<256x64xf32>
    %70 = arith.truncf %69 : vector<256x64xf32> to vector<256x64xbf16>
    %c8 = arith.constant 8 : index
    %c0_78 = arith.constant 0 : index
    %c0_79 = arith.constant 0 : index
    %71 = vector.load %arg2[%c8, %c0_78, %c0_79] : memref<9x64x64xbf16, #tpu.memory_space<vmem>>, vector<1x64x64xbf16>
    %72 = vector.shape_cast %71 : vector<1x64x64xbf16> to vector<64x64xbf16>
    %cst_80 = arith.constant dense<0.000000e+00> : vector<256x64xf32>
    %73 = tpu.matmul %70, %72, %cst_80 {dimension_numbers = #tpu.dot_dimension_numbers<[1], [0], [0], [1], [0, 0, 1, 1], [], []>} : vector<256x64xbf16>, vector<64x64xbf16>, vector<256x64xf32> -> vector<256x64xf32>
    %74 = arith.addf %67, %73 : vector<256x64xf32>
    %75 = arith.addf %54, %74 : vector<256x64xf32>
    %c0_81 = arith.constant 0 : index
    %c0_82 = arith.constant 0 : index
    %76 = vector.load %arg3[%c0_81, %c0_82] : memref<1x64xf32, #tpu.memory_space<vmem>>, vector<1x64xf32>
    %77 = vector.broadcast %76 : vector<1x64xf32> to vector<256x64xf32>
    %78 = arith.addf %75, %77 : vector<256x64xf32>
    %cst_83 = arith.constant 0.000000e+00 : f32
    %79 = vector.broadcast %cst_83 : f32 to vector<256x64xf32>
    %80 = arith.maximumf %78, %79 : vector<256x64xf32>
    %cst_84 = arith.constant 0.000000e+00 : f32
    %81 = vector.broadcast %cst_84 : f32 to vector<1x18x64xf32>
    %cst_85 = arith.constant 0.000000e+00 : f32
    %82 = vector.broadcast %cst_85 : f32 to vector<18x1x64xf32>
    %c0_86 = arith.constant 0 : index
    %c0_87 = arith.constant 0 : index
    %c0_88 = arith.constant 0 : index
    %83 = vector.load %arg8[%c0_86, %c0_87, %c0_88] : memref<18x18x64xf32, #tpu.memory_space<vmem>>, vector<1x18x64xf32>
    tpu.vector_store %arg8[%c0_86, %c0_87, %c0_88], %81 {strides = array<i32>} : memref<18x18x64xf32, #tpu.memory_space<vmem>>, vector<1x18x64xf32>,
    %c17_89 = arith.constant 17 : index
    %c0_90 = arith.constant 0 : index
    %c0_91 = arith.constant 0 : index
    %84 = vector.load %arg8[%c17_89, %c0_90, %c0_91] : memref<18x18x64xf32, #tpu.memory_space<vmem>>, vector<1x18x64xf32>
    tpu.vector_store %arg8[%c17_89, %c0_90, %c0_91], %81 {strides = array<i32>} : memref<18x18x64xf32, #tpu.memory_space<vmem>>, vector<1x18x64xf32>,
    %c0_92 = arith.constant 0 : index
    %c0_93 = arith.constant 0 : index
    %c0_94 = arith.constant 0 : index
    %85 = vector.load %arg8[%c0_92, %c0_93, %c0_94] : memref<18x18x64xf32, #tpu.memory_space<vmem>>, vector<18x1x64xf32>
    tpu.vector_store %arg8[%c0_92, %c0_93, %c0_94], %82 {strides = array<i32>} : memref<18x18x64xf32, #tpu.memory_space<vmem>>, vector<18x1x64xf32>,
    %c0_95 = arith.constant 0 : index
    %c17_96 = arith.constant 17 : index
    %c0_97 = arith.constant 0 : index
    %86 = vector.load %arg8[%c0_95, %c17_96, %c0_97] : memref<18x18x64xf32, #tpu.memory_space<vmem>>, vector<18x1x64xf32>
    tpu.vector_store %arg8[%c0_95, %c17_96, %c0_97], %82 {strides = array<i32>} : memref<18x18x64xf32, #tpu.memory_space<vmem>>, vector<18x1x64xf32>,
    %87 = vector.shape_cast %80 : vector<256x64xf32> to vector<16x16x64xf32>
    %c1_98 = arith.constant 1 : index
    %c1_99 = arith.constant 1 : index
    %c0_100 = arith.constant 0 : index
    %88 = vector.load %arg8[%c1_98, %c1_99, %c0_100] : memref<18x18x64xf32, #tpu.memory_space<vmem>>, vector<16x16x64xf32>
    tpu.vector_store %arg8[%c1_98, %c1_99, %c0_100], %87 {strides = array<i32>} : memref<18x18x64xf32, #tpu.memory_space<vmem>>, vector<16x16x64xf32>,
    %c0_101 = arith.constant 0 : index
    %c0_102 = arith.constant 0 : index
    %c0_103 = arith.constant 0 : index
    %89 = vector.load %arg8[%c0_101, %c0_102, %c0_103] : memref<18x18x64xf32, #tpu.memory_space<vmem>>, vector<16x16x64xf32>
    %90 = vector.shape_cast %89 : vector<16x16x64xf32> to vector<256x64xf32>
    %91 = arith.truncf %90 : vector<256x64xf32> to vector<256x64xbf16>
    %c0_104 = arith.constant 0 : index
    %c0_105 = arith.constant 0 : index
    %c0_106 = arith.constant 0 : index
    %92 = vector.load %arg4[%c0_104, %c0_105, %c0_106] : memref<9x64x128xbf16, #tpu.memory_space<vmem>>, vector<1x64x128xbf16>
    %93 = vector.shape_cast %92 : vector<1x64x128xbf16> to vector<64x128xbf16>
    %cst_107 = arith.constant dense<0.000000e+00> : vector<256x128xf32>
    %94 = tpu.matmul %91, %93, %cst_107 {dimension_numbers = #tpu.dot_dimension_numbers<[1], [0], [0], [1], [0, 0, 1, 1], [], []>} : vector<256x64xbf16>, vector<64x128xbf16>, vector<256x128xf32> -> vector<256x128xf32>
    %c0_108 = arith.constant 0 : index
    %c1_109 = arith.constant 1 : index
    %c0_110 = arith.constant 0 : index
    %95 = vector.load %arg8[%c0_108, %c1_109, %c0_110] : memref<18x18x64xf32, #tpu.memory_space<vmem>>, vector<16x16x64xf32>
    %96 = vector.shape_cast %95 : vector<16x16x64xf32> to vector<256x64xf32>
    %97 = arith.truncf %96 : vector<256x64xf32> to vector<256x64xbf16>
    %c1_111 = arith.constant 1 : index
    %c0_112 = arith.constant 0 : index
    %c0_113 = arith.constant 0 : index
    %98 = vector.load %arg4[%c1_111, %c0_112, %c0_113] : memref<9x64x128xbf16, #tpu.memory_space<vmem>>, vector<1x64x128xbf16>
    %99 = vector.shape_cast %98 : vector<1x64x128xbf16> to vector<64x128xbf16>
    %cst_114 = arith.constant dense<0.000000e+00> : vector<256x128xf32>
    %100 = tpu.matmul %97, %99, %cst_114 {dimension_numbers = #tpu.dot_dimension_numbers<[1], [0], [0], [1], [0, 0, 1, 1], [], []>} : vector<256x64xbf16>, vector<64x128xbf16>, vector<256x128xf32> -> vector<256x128xf32>
    %101 = arith.addf %94, %100 : vector<256x128xf32>
    %c0_115 = arith.constant 0 : index
    %c2_116 = arith.constant 2 : index
    %c0_117 = arith.constant 0 : index
    %102 = vector.load %arg8[%c0_115, %c2_116, %c0_117] : memref<18x18x64xf32, #tpu.memory_space<vmem>>, vector<16x16x64xf32>
    %103 = vector.shape_cast %102 : vector<16x16x64xf32> to vector<256x64xf32>
    %104 = arith.truncf %103 : vector<256x64xf32> to vector<256x64xbf16>
    %c2_118 = arith.constant 2 : index
    %c0_119 = arith.constant 0 : index
    %c0_120 = arith.constant 0 : index
    %105 = vector.load %arg4[%c2_118, %c0_119, %c0_120] : memref<9x64x128xbf16, #tpu.memory_space<vmem>>, vector<1x64x128xbf16>
    %106 = vector.shape_cast %105 : vector<1x64x128xbf16> to vector<64x128xbf16>
    %cst_121 = arith.constant dense<0.000000e+00> : vector<256x128xf32>
    %107 = tpu.matmul %104, %106, %cst_121 {dimension_numbers = #tpu.dot_dimension_numbers<[1], [0], [0], [1], [0, 0, 1, 1], [], []>} : vector<256x64xbf16>, vector<64x128xbf16>, vector<256x128xf32> -> vector<256x128xf32>
    %108 = arith.addf %101, %107 : vector<256x128xf32>
    %c0_122 = arith.constant 0 : index
    %c0_123 = arith.constant 0 : index
    %109 = vector.load %arg10[%c0_122, %c0_123] : memref<256x128xf32, #tpu.memory_space<vmem>>, vector<256x128xf32>
    tpu.vector_store %arg10[%c0_122, %c0_123], %108 {strides = array<i32>} : memref<256x128xf32, #tpu.memory_space<vmem>>, vector<256x128xf32>,
    %c0_124 = arith.constant 0 : index
    %c0_125 = arith.constant 0 : index
    %110 = vector.load %arg10[%c0_124, %c0_125] : memref<256x128xf32, #tpu.memory_space<vmem>>, vector<256x128xf32>
    %c1_126 = arith.constant 1 : index
    %c0_127 = arith.constant 0 : index
    %c0_128 = arith.constant 0 : index
    %111 = vector.load %arg8[%c1_126, %c0_127, %c0_128] : memref<18x18x64xf32, #tpu.memory_space<vmem>>, vector<16x16x64xf32>
    %112 = vector.shape_cast %111 : vector<16x16x64xf32> to vector<256x64xf32>
    %113 = arith.truncf %112 : vector<256x64xf32> to vector<256x64xbf16>
    %c3_129 = arith.constant 3 : index
    %c0_130 = arith.constant 0 : index
    %c0_131 = arith.constant 0 : index
    %114 = vector.load %arg4[%c3_129, %c0_130, %c0_131] : memref<9x64x128xbf16, #tpu.memory_space<vmem>>, vector<1x64x128xbf16>
    %115 = vector.shape_cast %114 : vector<1x64x128xbf16> to vector<64x128xbf16>
    %cst_132 = arith.constant dense<0.000000e+00> : vector<256x128xf32>
    %116 = tpu.matmul %113, %115, %cst_132 {dimension_numbers = #tpu.dot_dimension_numbers<[1], [0], [0], [1], [0, 0, 1, 1], [], []>} : vector<256x64xbf16>, vector<64x128xbf16>, vector<256x128xf32> -> vector<256x128xf32>
    %c1_133 = arith.constant 1 : index
    %c1_134 = arith.constant 1 : index
    %c0_135 = arith.constant 0 : index
    %117 = vector.load %arg8[%c1_133, %c1_134, %c0_135] : memref<18x18x64xf32, #tpu.memory_space<vmem>>, vector<16x16x64xf32>
    %118 = vector.shape_cast %117 : vector<16x16x64xf32> to vector<256x64xf32>
    %119 = arith.truncf %118 : vector<256x64xf32> to vector<256x64xbf16>
    %c4_136 = arith.constant 4 : index
    %c0_137 = arith.constant 0 : index
    %c0_138 = arith.constant 0 : index
    %120 = vector.load %arg4[%c4_136, %c0_137, %c0_138] : memref<9x64x128xbf16, #tpu.memory_space<vmem>>, vector<1x64x128xbf16>
    %121 = vector.shape_cast %120 : vector<1x64x128xbf16> to vector<64x128xbf16>
    %cst_139 = arith.constant dense<0.000000e+00> : vector<256x128xf32>
    %122 = tpu.matmul %119, %121, %cst_139 {dimension_numbers = #tpu.dot_dimension_numbers<[1], [0], [0], [1], [0, 0, 1, 1], [], []>} : vector<256x64xbf16>, vector<64x128xbf16>, vector<256x128xf32> -> vector<256x128xf32>
    %123 = arith.addf %116, %122 : vector<256x128xf32>
    %c1_140 = arith.constant 1 : index
    %c2_141 = arith.constant 2 : index
    %c0_142 = arith.constant 0 : index
    %124 = vector.load %arg8[%c1_140, %c2_141, %c0_142] : memref<18x18x64xf32, #tpu.memory_space<vmem>>, vector<16x16x64xf32>
    %125 = vector.shape_cast %124 : vector<16x16x64xf32> to vector<256x64xf32>
    %126 = arith.truncf %125 : vector<256x64xf32> to vector<256x64xbf16>
    %c5_143 = arith.constant 5 : index
    %c0_144 = arith.constant 0 : index
    %c0_145 = arith.constant 0 : index
    %127 = vector.load %arg4[%c5_143, %c0_144, %c0_145] : memref<9x64x128xbf16, #tpu.memory_space<vmem>>, vector<1x64x128xbf16>
    %128 = vector.shape_cast %127 : vector<1x64x128xbf16> to vector<64x128xbf16>
    %cst_146 = arith.constant dense<0.000000e+00> : vector<256x128xf32>
    %129 = tpu.matmul %126, %128, %cst_146 {dimension_numbers = #tpu.dot_dimension_numbers<[1], [0], [0], [1], [0, 0, 1, 1], [], []>} : vector<256x64xbf16>, vector<64x128xbf16>, vector<256x128xf32> -> vector<256x128xf32>
    %130 = arith.addf %123, %129 : vector<256x128xf32>
    %131 = arith.addf %110, %130 : vector<256x128xf32>
    %c0_147 = arith.constant 0 : index
    %c0_148 = arith.constant 0 : index
    %132 = vector.load %arg10[%c0_147, %c0_148] : memref<256x128xf32, #tpu.memory_space<vmem>>, vector<256x128xf32>
    tpu.vector_store %arg10[%c0_147, %c0_148], %131 {strides = array<i32>} : memref<256x128xf32, #tpu.memory_space<vmem>>, vector<256x128xf32>,
    %c0_149 = arith.constant 0 : index
    %c0_150 = arith.constant 0 : index
    %133 = vector.load %arg10[%c0_149, %c0_150] : memref<256x128xf32, #tpu.memory_space<vmem>>, vector<256x128xf32>
    %c2_151 = arith.constant 2 : index
    %c0_152 = arith.constant 0 : index
    %c0_153 = arith.constant 0 : index
    %134 = vector.load %arg8[%c2_151, %c0_152, %c0_153] : memref<18x18x64xf32, #tpu.memory_space<vmem>>, vector<16x16x64xf32>
    %135 = vector.shape_cast %134 : vector<16x16x64xf32> to vector<256x64xf32>
    %136 = arith.truncf %135 : vector<256x64xf32> to vector<256x64xbf16>
    %c6_154 = arith.constant 6 : index
    %c0_155 = arith.constant 0 : index
    %c0_156 = arith.constant 0 : index
    %137 = vector.load %arg4[%c6_154, %c0_155, %c0_156] : memref<9x64x128xbf16, #tpu.memory_space<vmem>>, vector<1x64x128xbf16>
    %138 = vector.shape_cast %137 : vector<1x64x128xbf16> to vector<64x128xbf16>
    %cst_157 = arith.constant dense<0.000000e+00> : vector<256x128xf32>
    %139 = tpu.matmul %136, %138, %cst_157 {dimension_numbers = #tpu.dot_dimension_numbers<[1], [0], [0], [1], [0, 0, 1, 1], [], []>} : vector<256x64xbf16>, vector<64x128xbf16>, vector<256x128xf32> -> vector<256x128xf32>
    %c2_158 = arith.constant 2 : index
    %c1_159 = arith.constant 1 : index
    %c0_160 = arith.constant 0 : index
    %140 = vector.load %arg8[%c2_158, %c1_159, %c0_160] : memref<18x18x64xf32, #tpu.memory_space<vmem>>, vector<16x16x64xf32>
    %141 = vector.shape_cast %140 : vector<16x16x64xf32> to vector<256x64xf32>
    %142 = arith.truncf %141 : vector<256x64xf32> to vector<256x64xbf16>
    %c7_161 = arith.constant 7 : index
    %c0_162 = arith.constant 0 : index
    %c0_163 = arith.constant 0 : index
    %143 = vector.load %arg4[%c7_161, %c0_162, %c0_163] : memref<9x64x128xbf16, #tpu.memory_space<vmem>>, vector<1x64x128xbf16>
    %144 = vector.shape_cast %143 : vector<1x64x128xbf16> to vector<64x128xbf16>
    %cst_164 = arith.constant dense<0.000000e+00> : vector<256x128xf32>
    %145 = tpu.matmul %142, %144, %cst_164 {dimension_numbers = #tpu.dot_dimension_numbers<[1], [0], [0], [1], [0, 0, 1, 1], [], []>} : vector<256x64xbf16>, vector<64x128xbf16>, vector<256x128xf32> -> vector<256x128xf32>
    %146 = arith.addf %139, %145 : vector<256x128xf32>
    %c2_165 = arith.constant 2 : index
    %c2_166 = arith.constant 2 : index
    %c0_167 = arith.constant 0 : index
    %147 = vector.load %arg8[%c2_165, %c2_166, %c0_167] : memref<18x18x64xf32, #tpu.memory_space<vmem>>, vector<16x16x64xf32>
    %148 = vector.shape_cast %147 : vector<16x16x64xf32> to vector<256x64xf32>
    %149 = arith.truncf %148 : vector<256x64xf32> to vector<256x64xbf16>
    %c8_168 = arith.constant 8 : index
    %c0_169 = arith.constant 0 : index
    %c0_170 = arith.constant 0 : index
    %150 = vector.load %arg4[%c8_168, %c0_169, %c0_170] : memref<9x64x128xbf16, #tpu.memory_space<vmem>>, vector<1x64x128xbf16>
    %151 = vector.shape_cast %150 : vector<1x64x128xbf16> to vector<64x128xbf16>
    %cst_171 = arith.constant dense<0.000000e+00> : vector<256x128xf32>
    %152 = tpu.matmul %149, %151, %cst_171 {dimension_numbers = #tpu.dot_dimension_numbers<[1], [0], [0], [1], [0, 0, 1, 1], [], []>} : vector<256x64xbf16>, vector<64x128xbf16>, vector<256x128xf32> -> vector<256x128xf32>
    %153 = arith.addf %146, %152 : vector<256x128xf32>
    %154 = arith.addf %133, %153 : vector<256x128xf32>
    %c0_172 = arith.constant 0 : index
    %c0_173 = arith.constant 0 : index
    %155 = vector.load %arg5[%c0_172, %c0_173] : memref<1x128xf32, #tpu.memory_space<vmem>>, vector<1x128xf32>
    %156 = vector.broadcast %155 : vector<1x128xf32> to vector<256x128xf32>
    %157 = arith.addf %154, %156 : vector<256x128xf32>
    %cst_174 = arith.constant 0.000000e+00 : f32
    %158 = vector.broadcast %cst_174 : f32 to vector<256x128xf32>
    %159 = arith.maximumf %157, %158 : vector<256x128xf32>
    %160 = vector.extract_strided_slice %159 {offsets = [0, 0], sizes = [256, 64], strides = [1, 1]} : vector<256x128xf32> to vector<256x64xf32>
    %161 = vector.extract_strided_slice %159 {offsets = [0, 64], sizes = [256, 64], strides = [1, 1]} : vector<256x128xf32> to vector<256x64xf32>
    %162 = arith.maximumf %160, %161 : vector<256x64xf32>
    %163 = vector.shape_cast %162 : vector<256x64xf32> to vector<16x16x64xf32>
    %164 = vector.shape_cast %163 : vector<16x16x64xf32> to vector<8x2x16x64xf32>
    %cst_175 = arith.constant dense<0xFF800000> : vector<8x16x64xf32>
    %165 = vector.multi_reduction <maximumf>, %164, %cst_175 [1] : vector<8x2x16x64xf32> to vector<8x16x64xf32>
    %166 = vector.shape_cast %165 : vector<8x16x64xf32> to vector<8x8x2x64xf32>
    %cst_176 = arith.constant dense<0xFF800000> : vector<8x8x64xf32>
    %167 = vector.multi_reduction <maximumf>, %166, %cst_176 [2] : vector<8x8x2x64xf32> to vector<8x8x64xf32>
    %c0_177 = arith.constant 0 : index
    %c0_178 = arith.constant 0 : index
    %c0_179 = arith.constant 0 : index
    %c0_180 = arith.constant 0 : index
    %168 = vector.load %arg6[%c0_177, %c0_178, %c0_179, %c0_180] : memref<1x8x8x64xf32, #tpu.memory_space<vmem>>, vector<1x8x8x64xf32>
    %169 = vector.shape_cast %168 : vector<1x8x8x64xf32> to vector<8x8x64xf32>
    %170 = vector.shape_cast %167 : vector<8x8x64xf32> to vector<1x8x8x64xf32>
    tpu.vector_store %arg6[%c0_177, %c0_178, %c0_179, %c0_180], %170 {strides = array<i32>} : memref<1x8x8x64xf32, #tpu.memory_space<vmem>>, vector<1x8x8x64xf32>,
    return
  }
  func.func @transform_0(%arg0: i32) -> (i32, i32, i32, i32) {
    %c0_i32 = arith.constant 0 : i32
    %c0_i32_0 = arith.constant 0 : i32
    %c0_i32_1 = arith.constant 0 : i32
    %c0_i32_2 = arith.constant 0 : i32
    return %arg0, %c0_i32, %c0_i32_0, %c0_i32_1 : i32, i32, i32, i32
  }
  func.func @transform_1(%arg0: i32) -> (i32, i32, i32) {
    %c0_i32 = arith.constant 0 : i32
    %c0_i32_0 = arith.constant 0 : i32
    %c0_i32_1 = arith.constant 0 : i32
    %c0_i32_2 = arith.constant 0 : i32
    return %c0_i32, %c0_i32_0, %c0_i32_1 : i32, i32, i32
  }
  func.func @transform_2(%arg0: i32) -> (i32, i32) {
    %c0_i32 = arith.constant 0 : i32
    %c0_i32_0 = arith.constant 0 : i32
    %c0_i32_1 = arith.constant 0 : i32
    return %c0_i32, %c0_i32_0 : i32, i32
  }
  func.func @transform_3(%arg0: i32) -> (i32, i32, i32) {
    %c0_i32 = arith.constant 0 : i32
    %c0_i32_0 = arith.constant 0 : i32
    %c0_i32_1 = arith.constant 0 : i32
    %c0_i32_2 = arith.constant 0 : i32
    return %c0_i32, %c0_i32_0, %c0_i32_1 : i32, i32, i32
  }
  func.func @transform_4(%arg0: i32) -> (i32, i32) {
    %c0_i32 = arith.constant 0 : i32
    %c0_i32_0 = arith.constant 0 : i32
    %c0_i32_1 = arith.constant 0 : i32
    return %c0_i32, %c0_i32_0 : i32, i32
  }
  func.func @transform_5(%arg0: i32) -> (i32, i32, i32, i32) {
    %c0_i32 = arith.constant 0 : i32
    %c0_i32_0 = arith.constant 0 : i32
    %c0_i32_1 = arith.constant 0 : i32
    %c0_i32_2 = arith.constant 0 : i32
    return %arg0, %c0_i32, %c0_i32_0, %c0_i32_1 : i32, i32, i32, i32
  }
}

</mosaic_0001>

<bundles_post_ra>
// kernel: tile.28
= control target key start
LH: loop header
LB: loop body
LE: loop exit
PB: predicated region body
PF: predicated region fallthrough
CT: control target
= control target key end

     0   :  { %s28_s0 = inlined_call_operand.vmem [shape: f32[8], index: 0, kind: input, shape index: {}]   ;;  %s29_s1 = inlined_call_operand.vmem [shape: f32[16,8], index: 1, kind: output, shape index: {}]  }
   0x1   :  { %v4_v0 = vld [vmem:[%s28_s0] ss:$0 sm:$0xff] }
   0x2   :  { %5 = vst [vmem:[%s29_s1] sm:$0xff] %v4_v0  ;;  %8 = vst [vmem:[%s29_s1 + $0x8] sm:$0xff] %v4_v0 }

// kernel: mul.17
= control target key start
LH: loop header
LB: loop body
LE: loop exit
PB: predicated region body
PF: predicated region fallthrough
CT: control target
= control target key end

     0   :  { %s133_s10 = smov 120   ;;  %s134_s11 = smov 104   ;;  %vm3_vm0 = vcmask 64512   ;;  %vm9_vm1 = vcmask 1048512   ;;  %vm15_vm2 = vcmask 982912   ;;  %vm21_vm3 = vcmask 917312   ;;  %s209_s0 = inlined_call_operand.vmem [shape: f32[16,8], index: 0, kind: input, shape index: {}]   ;;  %s210_s1 = inlined_call_operand.vmem [shape: f32[128], index: 1, kind: output, shape index: {}]  }
   0x1   :  { %v103_v0 = vld [vmem:[%s209_s0 + $0xf] sm:$0x1]   ;;  %v105_v1 = vld [vmem:[%s209_s0 + $0xd] sm:$0x1]   ;;  %v104_v2 = vld [vmem:[%s209_s0 + $0xe] sm:$0x1]  }
   0x2   :  { %7 = vrot.lane.b32.xlu0 %v103_v0, %s133_s10  ;;  %19 = vrot.lane.b32.xlu1 %v105_v1, %s134_s11  ;;  %v106_v3 = vld [vmem:[%s209_s0 + $0xc] sm:$0x1]   ;;  %s135_s16 = smov 112   ;;  %s136_s17 = smov 96   ;;  %v107_v4 = vld [vmem:[%s209_s0 + $0xb] sm:$0x1]  }
   0x3   :  { %v108_v5 = vld [vmem:[%s209_s0 + $0xa] sm:$0x1]   ;;  %v2_v6 = vld [vmem:[%s209_s0] sm:$0x1]   ;;  %s137_s24 = smov 88   ;;  %s138_s25 = smov 80  }
   0x4   :  { %4 = vst.msk [vmem:[#allocation0] sm:$0x1] %vm3_vm0, %v2_v6   ;;  %v109_v7 = vld [vmem:[%s209_s0 + $0x9] sm:$0x1]   ;;  %v110_v8 = vld [vmem:[%s209_s0 + $0x8] sm:$0x1]  }
   0x5   :  { %s139_s30 = smov 72   ;;  %s140_s2 = smov 64   ;;  %v111_v9 = vld [vmem:[%s209_s0 + $0x7] sm:$0x1]   ;;  %v112_v10 = vld [vmem:[%s209_s0 + $0x6] sm:$0x1]  }
   0x6   :  { %13 = vrot.lane.b32.xlu0 %v104_v2, %s135_s16  ;;  %25 = vrot.lane.b32.xlu1 %v106_v3, %s136_s17  ;;  %s141_s7 = smov 56   ;;  %s142_s8 = smov 48   ;;  %v113_v11 = vld [vmem:[%s209_s0 + $0x5] sm:$0x1]   ;;  %v114_v12 = vld [vmem:[%s209_s0 + $0x4] sm:$0x1]  }
   0x7   :  { %s143_s13 = smov 40   ;;  %s144_s14 = smov 32   ;;  %v115_v13 = vld [vmem:[%s209_s0 + $0x3] sm:$0x1]   ;;  %v116_v14 = vld [vmem:[%s209_s0 + $0x2] sm:$0x1]  }
   0x8   :  { %s145_s19 = smov 24   ;;  %s146_s20 = smov 16   ;;  %v117_v15 = vld [vmem:[%s209_s0 + $0x1] sm:$0x1]   ;;  %vm27_vm4 = vcmask 851712   ;;  %vm33_vm5 = vcmask 786112  }
   0x9   :  { %s147_s0 = smov 8   ;;  %vm39_vm6 = vcmask 720512   ;;  %vm45_vm7 = vcmask 654912   ;;  %vm51_vm8 = vcmask 589312   ;;  %vm57_vm9 = vcmask 523712  }
   0xa   :  { %31 = vrot.lane.b32.xlu0 %v107_v4, %s137_s24  ;;  %37 = vrot.lane.b32.xlu1 %v108_v5, %s138_s25  ;;  %vm63_vm10 = vcmask 458112   ;;  %vm69_vm11 = vcmask 392512   ;;  %vm75_vm12 = vcmask 326912   ;;  %vm81_vm13 = vcmask 261312  }
   0xb   :  { %vm87_vm14 = vcmask 195712   ;;  %vm93_vm15 = vcmask 130112  }
   0xe   :  { %43 = vrot.lane.b32.xlu0 %v109_v7, %s139_s30  ;;  %49 = vrot.lane.b32.xlu1 %v110_v8, %s140_s2 }
  0x12   :  { %55 = vrot.lane.b32.xlu0 %v111_v9, %s141_s7  ;;  %61 = vrot.lane.b32.xlu1 %v112_v10, %s142_s8 }
  0x16   :  { %67 = vrot.lane.b32.xlu0 %v113_v11, %s143_s13  ;;  %73 = vrot.lane.b32.xlu1 %v114_v12, %s144_s14 }
  0x1a   :  { %79 = vrot.lane.b32.xlu0 %v115_v13, %s145_s19  ;;  %85 = vrot.lane.b32.xlu1 %v116_v14, %s146_s20 }
  0x1e   :  { %91 = vrot.lane.b32.xlu0 %v117_v15, %s147_s0 }
  0x74   :  { %v8_v16 = vpop.permute.xlu0 %7   ;;  %v20_v17 = vpop.permute.xlu1 %19  }
  0x75   :  { %10 = vst.msk [vmem:[#allocation0] sm:$0x1] %vm9_vm1, %v8_v16  }
  0x78   :  { %v14_v18 = vpop.permute.xlu0 %13   ;;  %v26_v19 = vpop.permute.xlu1 %25  }
  0x79   :  { %16 = vst.msk [vmem:[#allocation0] sm:$0x1] %vm15_vm2, %v14_v18  }
  0x7a   :  { %22 = vst.msk [vmem:[#allocation0] sm:$0x1] %vm21_vm3, %v20_v17  }
  0x7b   :  { %28 = vst.msk [vmem:[#allocation0] sm:$0x1] %vm27_vm4, %v26_v19  }
  0x7c   :  { %v32_v20 = vpop.permute.xlu0 %31   ;;  %v38_v21 = vpop.permute.xlu1 %37  }
  0x7d   :  { %34 = vst.msk [vmem:[#allocation0] sm:$0x1] %vm33_vm5, %v32_v20  }
  0x7e   :  { %40 = vst.msk [vmem:[#allocation0] sm:$0x1] %vm39_vm6, %v38_v21  }
  0x80   :  { %v44_v22 = vpop.permute.xlu0 %43   ;;  %v50_v23 = vpop.permute.xlu1 %49  }
  0x81   :  { %46 = vst.msk [vmem:[#allocation0] sm:$0x1] %vm45_vm7, %v44_v22  }
  0x82   :  { %52 = vst.msk [vmem:[#allocation0] sm:$0x1] %vm51_vm8, %v50_v23  }
  0x84   :  { %v56_v24 = vpop.permute.xlu0 %55   ;;  %v62_v25 = vpop.permute.xlu1 %61  }
  0x85   :  { %58 = vst.msk [vmem:[#allocation0] sm:$0x1] %vm57_vm9, %v56_v24  }
  0x86   :  { %64 = vst.msk [vmem:[#allocation0] sm:$0x1] %vm63_vm10, %v62_v25  }
  0x88   :  { %v68_v26 = vpop.permute.xlu0 %67   ;;  %v74_v27 = vpop.permute.xlu1 %73  }
  0x89   :  { %70 = vst.msk [vmem:[#allocation0] sm:$0x1] %vm69_vm11, %v68_v26  }
  0x8a   :  { %76 = vst.msk [vmem:[#allocation0] sm:$0x1] %vm75_vm12, %v74_v27  }
  0x8c   :  { %v80_v28 = vpop.permute.xlu0 %79   ;;  %v86_v29 = vpop.permute.xlu1 %85  }
  0x8d   :  { %82 = vst.msk [vmem:[#allocation0] sm:$0x1] %vm81_vm13, %v80_v28  }
  0x8e   :  { %88 = vst.msk [vmem:[#allocation0] sm:$0x1] %vm87_vm14, %v86_v29  }
  0x90   :  { %v92_v30 = vpop.permute.xlu0 %91  }
  0x91   :  { %94 = vst.msk [vmem:[#allocation0] sm:$0x1] %vm93_vm15, %v92_v30  }
  0x98   :  { %v99_v31 = vld [vmem:[#allocation0] sm:$0x1] }
  0x99   :  { %102 = vst [vmem:[%s210_s1] sm:$0x1] %v99_v31 }

// kernel: tile.23
= control target key start
LH: loop header
LB: loop body
LE: loop exit
PB: predicated region body
PF: predicated region fallthrough
CT: control target
= control target key end

     0   :  { %s28_s0 = inlined_call_operand.vmem [shape: f32[4], index: 0, kind: input, shape index: {}]   ;;  %s29_s1 = inlined_call_operand.vmem [shape: f32[16,4], index: 1, kind: output, shape index: {}]  }
   0x1   :  { %v4_v0 = vld [vmem:[%s28_s0] ss:$0 sm:$0xff] }
   0x2   :  { %5 = vst [vmem:[%s29_s1] sm:$0xff] %v4_v0  ;;  %8 = vst [vmem:[%s29_s1 + $0x8] sm:$0xff] %v4_v0 }

// kernel: mul.13
= control target key start
LH: loop header
LB: loop body
LE: loop exit
PB: predicated region body
PF: predicated region fallthrough
CT: control target
= control target key end

     0   :  { %s133_s10 = smov 60   ;;  %s134_s11 = smov 52   ;;  %vm3_vm0 = vcmask 31744   ;;  %vm9_vm1 = vcmask 523744   ;;  %vm15_vm2 = vcmask 490944   ;;  %vm21_vm3 = vcmask 458144   ;;  %s209_s0 = inlined_call_operand.vmem [shape: f32[16,4], index: 0, kind: input, shape index: {}]   ;;  %s210_s1 = inlined_call_operand.vmem [shape: f32[64], index: 1, kind: output, shape index: {}]  }
   0x1   :  { %v103_v0 = vld [vmem:[%s209_s0 + $0xf] sm:$0x1]   ;;  %v105_v1 = vld [vmem:[%s209_s0 + $0xd] sm:$0x1]   ;;  %v104_v2 = vld [vmem:[%s209_s0 + $0xe] sm:$0x1]  }
   0x2   :  { %7 = vrot.lane.b32.xlu0 %v103_v0, %s133_s10  ;;  %19 = vrot.lane.b32.xlu1 %v105_v1, %s134_s11  ;;  %v106_v3 = vld [vmem:[%s209_s0 + $0xc] sm:$0x1]   ;;  %s135_s16 = smov 56   ;;  %s136_s17 = smov 48   ;;  %v107_v4 = vld [vmem:[%s209_s0 + $0xb] sm:$0x1]  }
   0x3   :  { %v108_v5 = vld [vmem:[%s209_s0 + $0xa] sm:$0x1]   ;;  %v2_v6 = vld [vmem:[%s209_s0] sm:$0x1]   ;;  %s137_s24 = smov 44   ;;  %s138_s25 = smov 40  }
   0x4   :  { %4 = vst.msk [vmem:[#allocation0] sm:$0x1] %vm3_vm0, %v2_v6   ;;  %v109_v7 = vld [vmem:[%s209_s0 + $0x9] sm:$0x1]   ;;  %v110_v8 = vld [vmem:[%s209_s0 + $0x8] sm:$0x1]  }
   0x5   :  { %s139_s30 = smov 36   ;;  %s140_s2 = smov 32   ;;  %v111_v9 = vld [vmem:[%s209_s0 + $0x7] sm:$0x1]   ;;  %v112_v10 = vld [vmem:[%s209_s0 + $0x6] sm:$0x1]  }
   0x6   :  { %13 = vrot.lane.b32.xlu0 %v104_v2, %s135_s16  ;;  %25 = vrot.lane.b32.xlu1 %v106_v3, %s136_s17  ;;  %s141_s7 = smov 28   ;;  %s142_s8 = smov 24   ;;  %v113_v11 = vld [vmem:[%s209_s0 + $0x5] sm:$0x1]   ;;  %v114_v12 = vld [vmem:[%s209_s0 + $0x4] sm:$0x1]  }
   0x7   :  { %s143_s13 = smov 20   ;;  %s144_s14 = smov 16   ;;  %v115_v13 = vld [vmem:[%s209_s0 + $0x3] sm:$0x1]   ;;  %v116_v14 = vld [vmem:[%s209_s0 + $0x2] sm:$0x1]  }
   0x8   :  { %s145_s19 = smov 12   ;;  %s146_s20 = smov 8   ;;  %v117_v15 = vld [vmem:[%s209_s0 + $0x1] sm:$0x1]   ;;  %vm27_vm4 = vcmask 425344   ;;  %vm33_vm5 = vcmask 392544  }
   0x9   :  { %s147_s0 = smov 4   ;;  %vm39_vm6 = vcmask 359744   ;;  %vm45_vm7 = vcmask 326944   ;;  %vm51_vm8 = vcmask 294144   ;;  %vm57_vm9 = vcmask 261344  }
   0xa   :  { %31 = vrot.lane.b32.xlu0 %v107_v4, %s137_s24  ;;  %37 = vrot.lane.b32.xlu1 %v108_v5, %s138_s25  ;;  %vm63_vm10 = vcmask 228544   ;;  %vm69_vm11 = vcmask 195744   ;;  %vm75_vm12 = vcmask 162944   ;;  %vm81_vm13 = vcmask 130144  }
   0xb   :  { %vm87_vm14 = vcmask 97344   ;;  %vm93_vm15 = vcmask 64544  }
   0xe   :  { %43 = vrot.lane.b32.xlu0 %v109_v7, %s139_s30  ;;  %49 = vrot.lane.b32.xlu1 %v110_v8, %s140_s2 }
  0x12   :  { %55 = vrot.lane.b32.xlu0 %v111_v9, %s141_s7  ;;  %61 = vrot.lane.b32.xlu1 %v112_v10, %s142_s8 }
  0x16   :  { %67 = vrot.lane.b32.xlu0 %v113_v11, %s143_s13  ;;  %73 = vrot.lane.b32.xlu1 %v114_v12, %s144_s14 }
  0x1a   :  { %79 = vrot.lane.b32.xlu0 %v115_v13, %s145_s19  ;;  %85 = vrot.lane.b32.xlu1 %v116_v14, %s146_s20 }
  0x1e   :  { %91 = vrot.lane.b32.xlu0 %v117_v15, %s147_s0 }
  0x74   :  { %v8_v16 = vpop.permute.xlu0 %7   ;;  %v20_v17 = vpop.permute.xlu1 %19  }
  0x75   :  { %10 = vst.msk [vmem:[#allocation0] sm:$0x1] %vm9_vm1, %v8_v16  }
  0x78   :  { %v14_v18 = vpop.permute.xlu0 %13   ;;  %v26_v19 = vpop.permute.xlu1 %25  }
  0x79   :  { %16 = vst.msk [vmem:[#allocation0] sm:$0x1] %vm15_vm2, %v14_v18  }
  0x7a   :  { %22 = vst.msk [vmem:[#allocation0] sm:$0x1] %vm21_vm3, %v20_v17  }
  0x7b   :  { %28 = vst.msk [vmem:[#allocation0] sm:$0x1] %vm27_vm4, %v26_v19  }
  0x7c   :  { %v32_v20 = vpop.permute.xlu0 %31   ;;  %v38_v21 = vpop.permute.xlu1 %37  }
  0x7d   :  { %34 = vst.msk [vmem:[#allocation0] sm:$0x1] %vm33_vm5, %v32_v20  }
  0x7e   :  { %40 = vst.msk [vmem:[#allocation0] sm:$0x1] %vm39_vm6, %v38_v21  }
  0x80   :  { %v44_v22 = vpop.permute.xlu0 %43   ;;  %v50_v23 = vpop.permute.xlu1 %49  }
  0x81   :  { %46 = vst.msk [vmem:[#allocation0] sm:$0x1] %vm45_vm7, %v44_v22  }
  0x82   :  { %52 = vst.msk [vmem:[#allocation0] sm:$0x1] %vm51_vm8, %v50_v23  }
  0x84   :  { %v56_v24 = vpop.permute.xlu0 %55   ;;  %v62_v25 = vpop.permute.xlu1 %61  }
  0x85   :  { %58 = vst.msk [vmem:[#allocation0] sm:$0x1] %vm57_vm9, %v56_v24  }
  0x86   :  { %64 = vst.msk [vmem:[#allocation0] sm:$0x1] %vm63_vm10, %v62_v25  }
  0x88   :  { %v68_v26 = vpop.permute.xlu0 %67   ;;  %v74_v27 = vpop.permute.xlu1 %73  }
  0x89   :  { %70 = vst.msk [vmem:[#allocation0] sm:$0x1] %vm69_vm11, %v68_v26  }
  0x8a   :  { %76 = vst.msk [vmem:[#allocation0] sm:$0x1] %vm75_vm12, %v74_v27  }
  0x8c   :  { %v80_v28 = vpop.permute.xlu0 %79   ;;  %v86_v29 = vpop.permute.xlu1 %85  }
  0x8d   :  { %82 = vst.msk [vmem:[#allocation0] sm:$0x1] %vm81_vm13, %v80_v28  }
  0x8e   :  { %88 = vst.msk [vmem:[#allocation0] sm:$0x1] %vm87_vm14, %v86_v29  }
  0x90   :  { %v92_v30 = vpop.permute.xlu0 %91  }
  0x91   :  { %94 = vst.msk [vmem:[#allocation0] sm:$0x1] %vm93_vm15, %v92_v30  }
  0x98   :  { %v99_v31 = vld [vmem:[#allocation0] sm:$0x1] }
  0x99   :  { %102 = vst [vmem:[%s210_s1] sm:$0x1] %v99_v31 }

// kernel: tile.34
= control target key start
LH: loop header
LB: loop body
LE: loop exit
PB: predicated region body
PF: predicated region fallthrough
CT: control target
= control target key end

     0   :  { %s133_s10 = smov 60   ;;  %s134_s11 = smov 52   ;;  %vm3_vm0 = vcmask 31744   ;;  %vm9_vm1 = vcmask 523744   ;;  %vm15_vm2 = vcmask 490944   ;;  %vm21_vm3 = vcmask 458144   ;;  %s209_s0 = inlined_call_operand.vmem [shape: f32[16,4], index: 0, kind: input, shape index: {}]   ;;  %s210_s1 = inlined_call_operand.vmem [shape: f32[1,64], index: 1, kind: output, shape index: {}]  }
   0x1   :  { %v103_v0 = vld [vmem:[%s209_s0 + $0xf] sm:$0x1]   ;;  %v105_v1 = vld [vmem:[%s209_s0 + $0xd] sm:$0x1]   ;;  %v104_v2 = vld [vmem:[%s209_s0 + $0xe] sm:$0x1]  }
   0x2   :  { %7 = vrot.lane.b32.xlu0 %v103_v0, %s133_s10  ;;  %19 = vrot.lane.b32.xlu1 %v105_v1, %s134_s11  ;;  %v106_v3 = vld [vmem:[%s209_s0 + $0xc] sm:$0x1]   ;;  %s135_s16 = smov 56   ;;  %s136_s17 = smov 48   ;;  %v107_v4 = vld [vmem:[%s209_s0 + $0xb] sm:$0x1]  }
   0x3   :  { %v108_v5 = vld [vmem:[%s209_s0 + $0xa] sm:$0x1]   ;;  %v2_v6 = vld [vmem:[%s209_s0] sm:$0x1]   ;;  %s137_s24 = smov 44   ;;  %s138_s25 = smov 40  }
   0x4   :  { %4 = vst.msk [vmem:[#allocation0] sm:$0x1] %vm3_vm0, %v2_v6   ;;  %v109_v7 = vld [vmem:[%s209_s0 + $0x9] sm:$0x1]   ;;  %v110_v8 = vld [vmem:[%s209_s0 + $0x8] sm:$0x1]  }
   0x5   :  { %s139_s30 = smov 36   ;;  %s140_s2 = smov 32   ;;  %v111_v9 = vld [vmem:[%s209_s0 + $0x7] sm:$0x1]   ;;  %v112_v10 = vld [vmem:[%s209_s0 + $0x6] sm:$0x1]  }
   0x6   :  { %13 = vrot.lane.b32.xlu0 %v104_v2, %s135_s16  ;;  %25 = vrot.lane.b32.xlu1 %v106_v3, %s136_s17  ;;  %s141_s7 = smov 28   ;;  %s142_s8 = smov 24   ;;  %v113_v11 = vld [vmem:[%s209_s0 + $0x5] sm:$0x1]   ;;  %v114_v12 = vld [vmem:[%s209_s0 + $0x4] sm:$0x1]  }
   0x7   :  { %s143_s13 = smov 20   ;;  %s144_s14 = smov 16   ;;  %v115_v13 = vld [vmem:[%s209_s0 + $0x3] sm:$0x1]   ;;  %v116_v14 = vld [vmem:[%s209_s0 + $0x2] sm:$0x1]  }
   0x8   :  { %s145_s19 = smov 12   ;;  %s146_s20 = smov 8   ;;  %v117_v15 = vld [vmem:[%s209_s0 + $0x1] sm:$0x1]   ;;  %vm27_vm4 = vcmask 425344   ;;  %vm33_vm5 = vcmask 392544  }
   0x9   :  { %s147_s0 = smov 4   ;;  %vm39_vm6 = vcmask 359744   ;;  %vm45_vm7 = vcmask 326944   ;;  %vm51_vm8 = vcmask 294144   ;;  %vm57_vm9 = vcmask 261344  }
   0xa   :  { %31 = vrot.lane.b32.xlu0 %v107_v4, %s137_s24  ;;  %37 = vrot.lane.b32.xlu1 %v108_v5, %s138_s25  ;;  %vm63_vm10 = vcmask 228544   ;;  %vm69_vm11 = vcmask 195744   ;;  %vm75_vm12 = vcmask 162944   ;;  %vm81_vm13 = vcmask 130144  }
   0xb   :  { %vm87_vm14 = vcmask 97344   ;;  %vm93_vm15 = vcmask 64544  }
   0xe   :  { %43 = vrot.lane.b32.xlu0 %v109_v7, %s139_s30  ;;  %49 = vrot.lane.b32.xlu1 %v110_v8, %s140_s2 }
  0x12   :  { %55 = vrot.lane.b32.xlu0 %v111_v9, %s141_s7  ;;  %61 = vrot.lane.b32.xlu1 %v112_v10, %s142_s8 }
  0x16   :  { %67 = vrot.lane.b32.xlu0 %v113_v11, %s143_s13  ;;  %73 = vrot.lane.b32.xlu1 %v114_v12, %s144_s14 }
  0x1a   :  { %79 = vrot.lane.b32.xlu0 %v115_v13, %s145_s19  ;;  %85 = vrot.lane.b32.xlu1 %v116_v14, %s146_s20 }
  0x1e   :  { %91 = vrot.lane.b32.xlu0 %v117_v15, %s147_s0 }
  0x74   :  { %v8_v16 = vpop.permute.xlu0 %7   ;;  %v20_v17 = vpop.permute.xlu1 %19  }
  0x75   :  { %10 = vst.msk [vmem:[#allocation0] sm:$0x1] %vm9_vm1, %v8_v16  }
  0x78   :  { %v14_v18 = vpop.permute.xlu0 %13   ;;  %v26_v19 = vpop.permute.xlu1 %25  }
  0x79   :  { %16 = vst.msk [vmem:[#allocation0] sm:$0x1] %vm15_vm2, %v14_v18  }
  0x7a   :  { %22 = vst.msk [vmem:[#allocation0] sm:$0x1] %vm21_vm3, %v20_v17  }
  0x7b   :  { %28 = vst.msk [vmem:[#allocation0] sm:$0x1] %vm27_vm4, %v26_v19  }
  0x7c   :  { %v32_v20 = vpop.permute.xlu0 %31   ;;  %v38_v21 = vpop.permute.xlu1 %37  }
  0x7d   :  { %34 = vst.msk [vmem:[#allocation0] sm:$0x1] %vm33_vm5, %v32_v20  }
  0x7e   :  { %40 = vst.msk [vmem:[#allocation0] sm:$0x1] %vm39_vm6, %v38_v21  }
  0x80   :  { %v44_v22 = vpop.permute.xlu0 %43   ;;  %v50_v23 = vpop.permute.xlu1 %49  }
  0x81   :  { %46 = vst.msk [vmem:[#allocation0] sm:$0x1] %vm45_vm7, %v44_v22  }
  0x82   :  { %52 = vst.msk [vmem:[#allocation0] sm:$0x1] %vm51_vm8, %v50_v23  }
  0x84   :  { %v56_v24 = vpop.permute.xlu0 %55   ;;  %v62_v25 = vpop.permute.xlu1 %61  }
  0x85   :  { %58 = vst.msk [vmem:[#allocation0] sm:$0x1] %vm57_vm9, %v56_v24  }
  0x86   :  { %64 = vst.msk [vmem:[#allocation0] sm:$0x1] %vm63_vm10, %v62_v25  }
  0x88   :  { %v68_v26 = vpop.permute.xlu0 %67   ;;  %v74_v27 = vpop.permute.xlu1 %73  }
  0x89   :  { %70 = vst.msk [vmem:[#allocation0] sm:$0x1] %vm69_vm11, %v68_v26  }
  0x8a   :  { %76 = vst.msk [vmem:[#allocation0] sm:$0x1] %vm75_vm12, %v74_v27  }
  0x8c   :  { %v80_v28 = vpop.permute.xlu0 %79   ;;  %v86_v29 = vpop.permute.xlu1 %85  }
  0x8d   :  { %82 = vst.msk [vmem:[#allocation0] sm:$0x1] %vm81_vm13, %v80_v28  }
  0x8e   :  { %88 = vst.msk [vmem:[#allocation0] sm:$0x1] %vm87_vm14, %v86_v29  }
  0x90   :  { %v92_v30 = vpop.permute.xlu0 %91  }
  0x91   :  { %94 = vst.msk [vmem:[#allocation0] sm:$0x1] %vm93_vm15, %v92_v30  }
  0x98   :  { %v99_v31 = vld [vmem:[#allocation0] sm:$0x1] }
  0x99   :  { %102 = vst [vmem:[%s210_s1] sm:$0x1] %v99_v31 }

// kernel: tile.39
= control target key start
LH: loop header
LB: loop body
LE: loop exit
PB: predicated region body
PF: predicated region fallthrough
CT: control target
= control target key end

     0   :  { %s133_s10 = smov 120   ;;  %s134_s11 = smov 104   ;;  %vm3_vm0 = vcmask 64512   ;;  %vm9_vm1 = vcmask 1048512   ;;  %vm15_vm2 = vcmask 982912   ;;  %vm21_vm3 = vcmask 917312   ;;  %s209_s0 = inlined_call_operand.vmem [shape: f32[16,8], index: 0, kind: input, shape index: {}]   ;;  %s210_s1 = inlined_call_operand.vmem [shape: f32[1,128], index: 1, kind: output, shape index: {}]  }
   0x1   :  { %v103_v0 = vld [vmem:[%s209_s0 + $0xf] sm:$0x1]   ;;  %v105_v1 = vld [vmem:[%s209_s0 + $0xd] sm:$0x1]   ;;  %v104_v2 = vld [vmem:[%s209_s0 + $0xe] sm:$0x1]  }
   0x2   :  { %7 = vrot.lane.b32.xlu0 %v103_v0, %s133_s10  ;;  %19 = vrot.lane.b32.xlu1 %v105_v1, %s134_s11  ;;  %v106_v3 = vld [vmem:[%s209_s0 + $0xc] sm:$0x1]   ;;  %s135_s16 = smov 112   ;;  %s136_s17 = smov 96   ;;  %v107_v4 = vld [vmem:[%s209_s0 + $0xb] sm:$0x1]  }
   0x3   :  { %v108_v5 = vld [vmem:[%s209_s0 + $0xa] sm:$0x1]   ;;  %v2_v6 = vld [vmem:[%s209_s0] sm:$0x1]   ;;  %s137_s24 = smov 88   ;;  %s138_s25 = smov 80  }
   0x4   :  { %4 = vst.msk [vmem:[#allocation0] sm:$0x1] %vm3_vm0, %v2_v6   ;;  %v109_v7 = vld [vmem:[%s209_s0 + $0x9] sm:$0x1]   ;;  %v110_v8 = vld [vmem:[%s209_s0 + $0x8] sm:$0x1]  }
   0x5   :  { %s139_s30 = smov 72   ;;  %s140_s2 = smov 64   ;;  %v111_v9 = vld [vmem:[%s209_s0 + $0x7] sm:$0x1]   ;;  %v112_v10 = vld [vmem:[%s209_s0 + $0x6] sm:$0x1]  }
   0x6   :  { %13 = vrot.lane.b32.xlu0 %v104_v2, %s135_s16  ;;  %25 = vrot.lane.b32.xlu1 %v106_v3, %s136_s17  ;;  %s141_s7 = smov 56   ;;  %s142_s8 = smov 48   ;;  %v113_v11 = vld [vmem:[%s209_s0 + $0x5] sm:$0x1]   ;;  %v114_v12 = vld [vmem:[%s209_s0 + $0x4] sm:$0x1]  }
   0x7   :  { %s143_s13 = smov 40   ;;  %s144_s14 = smov 32   ;;  %v115_v13 = vld [vmem:[%s209_s0 + $0x3] sm:$0x1]   ;;  %v116_v14 = vld [vmem:[%s209_s0 + $0x2] sm:$0x1]  }
   0x8   :  { %s145_s19 = smov 24   ;;  %s146_s20 = smov 16   ;;  %v117_v15 = vld [vmem:[%s209_s0 + $0x1] sm:$0x1]   ;;  %vm27_vm4 = vcmask 851712   ;;  %vm33_vm5 = vcmask 786112  }
   0x9   :  { %s147_s0 = smov 8   ;;  %vm39_vm6 = vcmask 720512   ;;  %vm45_vm7 = vcmask 654912   ;;  %vm51_vm8 = vcmask 589312   ;;  %vm57_vm9 = vcmask 523712  }
   0xa   :  { %31 = vrot.lane.b32.xlu0 %v107_v4, %s137_s24  ;;  %37 = vrot.lane.b32.xlu1 %v108_v5, %s138_s25  ;;  %vm63_vm10 = vcmask 458112   ;;  %vm69_vm11 = vcmask 392512   ;;  %vm75_vm12 = vcmask 326912   ;;  %vm81_vm13 = vcmask 261312  }
   0xb   :  { %vm87_vm14 = vcmask 195712   ;;  %vm93_vm15 = vcmask 130112  }
   0xe   :  { %43 = vrot.lane.b32.xlu0 %v109_v7, %s139_s30  ;;  %49 = vrot.lane.b32.xlu1 %v110_v8, %s140_s2 }
  0x12   :  { %55 = vrot.lane.b32.xlu0 %v111_v9, %s141_s7  ;;  %61 = vrot.lane.b32.xlu1 %v112_v10, %s142_s8 }
  0x16   :  { %67 = vrot.lane.b32.xlu0 %v113_v11, %s143_s13  ;;  %73 = vrot.lane.b32.xlu1 %v114_v12, %s144_s14 }
  0x1a   :  { %79 = vrot.lane.b32.xlu0 %v115_v13, %s145_s19  ;;  %85 = vrot.lane.b32.xlu1 %v116_v14, %s146_s20 }
  0x1e   :  { %91 = vrot.lane.b32.xlu0 %v117_v15, %s147_s0 }
  0x74   :  { %v8_v16 = vpop.permute.xlu0 %7   ;;  %v20_v17 = vpop.permute.xlu1 %19  }
  0x75   :  { %10 = vst.msk [vmem:[#allocation0] sm:$0x1] %vm9_vm1, %v8_v16  }
  0x78   :  { %v14_v18 = vpop.permute.xlu0 %13   ;;  %v26_v19 = vpop.permute.xlu1 %25  }
  0x79   :  { %16 = vst.msk [vmem:[#allocation0] sm:$0x1] %vm15_vm2, %v14_v18  }
  0x7a   :  { %22 = vst.msk [vmem:[#allocation0] sm:$0x1] %vm21_vm3, %v20_v17  }
  0x7b   :  { %28 = vst.msk [vmem:[#allocation0] sm:$0x1] %vm27_vm4, %v26_v19  }
  0x7c   :  { %v32_v20 = vpop.permute.xlu0 %31   ;;  %v38_v21 = vpop.permute.xlu1 %37  }
  0x7d   :  { %34 = vst.msk [vmem:[#allocation0] sm:$0x1] %vm33_vm5, %v32_v20  }
  0x7e   :  { %40 = vst.msk [vmem:[#allocation0] sm:$0x1] %vm39_vm6, %v38_v21  }
  0x80   :  { %v44_v22 = vpop.permute.xlu0 %43   ;;  %v50_v23 = vpop.permute.xlu1 %49  }
  0x81   :  { %46 = vst.msk [vmem:[#allocation0] sm:$0x1] %vm45_vm7, %v44_v22  }
  0x82   :  { %52 = vst.msk [vmem:[#allocation0] sm:$0x1] %vm51_vm8, %v50_v23  }
  0x84   :  { %v56_v24 = vpop.permute.xlu0 %55   ;;  %v62_v25 = vpop.permute.xlu1 %61  }
  0x85   :  { %58 = vst.msk [vmem:[#allocation0] sm:$0x1] %vm57_vm9, %v56_v24  }
  0x86   :  { %64 = vst.msk [vmem:[#allocation0] sm:$0x1] %vm63_vm10, %v62_v25  }
  0x88   :  { %v68_v26 = vpop.permute.xlu0 %67   ;;  %v74_v27 = vpop.permute.xlu1 %73  }
  0x89   :  { %70 = vst.msk [vmem:[#allocation0] sm:$0x1] %vm69_vm11, %v68_v26  }
  0x8a   :  { %76 = vst.msk [vmem:[#allocation0] sm:$0x1] %vm75_vm12, %v74_v27  }
  0x8c   :  { %v80_v28 = vpop.permute.xlu0 %79   ;;  %v86_v29 = vpop.permute.xlu1 %85  }
  0x8d   :  { %82 = vst.msk [vmem:[#allocation0] sm:$0x1] %vm81_vm13, %v80_v28  }
  0x8e   :  { %88 = vst.msk [vmem:[#allocation0] sm:$0x1] %vm87_vm14, %v86_v29  }
  0x90   :  { %v92_v30 = vpop.permute.xlu0 %91  }
  0x91   :  { %94 = vst.msk [vmem:[#allocation0] sm:$0x1] %vm93_vm15, %v92_v30  }
  0x98   :  { %v99_v31 = vld [vmem:[#allocation0] sm:$0x1] }
  0x99   :  { %102 = vst [vmem:[%s210_s1] sm:$0x1] %v99_v31 }

// kernel: unet_down3d.1
= control target key start
LH: loop header
LB: loop body
LE: loop exit
PB: predicated region body
PF: predicated region fallthrough
CT: control target
= control target key end

     0   :  { %s9375_s18 = smov 0   ;;  %s12128_s0 = inlined_call_operand.vmem [shape: bf16[2,16,16,64], index: 0, kind: input, shape index: {}]   ;;  %s12129_s1 = inlined_call_operand.vmem [shape: bf16[9,64,64], index: 1, kind: input, shape index: {}]   ;;  %s12130_s2 = inlined_call_operand.vmem [shape: f32[1,64], index: 2, kind: input, shape index: {}]   ;;  %s12131_s3 = inlined_call_operand.vmem [shape: bf16[9,64,128], index: 3, kind: input, shape index: {}]   ;;  %s12132_s4 = inlined_call_operand.vmem [shape: f32[1,128], index: 4, kind: input, shape index: {}]   ;;  %s12133_s5 = inlined_call_operand.vmem [shape: f32[2,8,8,64], index: 5, kind: output, shape index: {}]  }
   0x1 LB: > { %s7589_s19 = sadd.s32 4294967295, %s9340_s18   ;;  %p7593_p0 = scmp.ge.s32.totalorder %s9340_s18, 1  ;;  %s9340_s18 = sphi %s9375_s18, %s15_s18  }
   0x2   : > { %p187_p1 = scmp.lt.s32.totalorder %s9340_s18, 3 }
   0x4   : > { %p188_p2 = pnand %p7593_p0, %p187_p1 }
   0x6   : > { %191 = sbr.rel (%p188_p2) target bundleno = 1299 (0x513), region = 40 }
   0xb   : > { %v9262_v0 = vld [vmem:[%s12129_s1 + $0x38] sm:$0xff]   ;;  %vm226_vm0 = vcmask 523264   ;;  %v9392_v2 = vld [vmem:[%s12129_s1 + $0x30] sm:$0xff]   ;;  %v9342_v3 = vmov 0.0   ;;  %vm229_vm1 = vcmask 517120   ;;  %vm235_vm2 = vcmask 516096  }
   0xc   : > { %v9263_v1 = vld [vmem:[%s12129_s1 + $0x18] sm:$0xff]   ;;  %8531 = vmatprep.subr.bf16.mxu0 %v9262_v0  ;;  %227 = vst.msk [vmem:[#allocation2] sm:$0xff] %vm226_vm0, %v9342_v3  ;;  %228 = vst.msk [vmem:[#allocation2 + $0x8] sm:$0xff] %vm226_vm0, %v9342_v3  ;;  %v9413_v4 = vld [vmem:[%s12129_s1 + $0x10] sm:$0xff]   ;;  %p215_p3 = scmp.lt.s32.totalorder %s7589_s19, 1  ;;  %s9343_s9 = smov 64  }
   0xd   : > { %232 = vst.msk [vmem:[#allocation2 + $0x198] sm:$0xff] %vm226_vm0, %v9342_v3  ;;  %233 = vst.msk [vmem:[#allocation2 + $0x1a0] sm:$0xff] %vm226_vm0, %v9342_v3  ;;  %8571 = vmatprep.subr.bf16.mxu1 %v9263_v1  ;;  %8532 = vmatpush3.bf16.msra.mxu0 %v9262_v0  ;;  %v9427_v5 = vld [vmem:[%s12129_s1 + $0x28] sm:$0xff]   ;;  %v9268_v7 = vld [vmem:[%s12129_s1 + $0x20] sm:$0xff]   ;;  %vm7455_vm3 = vcmask 1041409   ;;  %vm7457_vm4 = vcmask 1042434  }
   0xe   : > { %3338 = vst.msk [vmem:[#allocation3] sm:$0xff] %vm226_vm0, %v9342_v3  ;;  %3339 = vst.msk [vmem:[#allocation3 + $0x8] sm:$0xff] %vm226_vm0, %v9342_v3  ;;  %8572 = vmatpush3.bf16.msra.mxu1 %v9263_v1  ;;  %8533 = vmatprep.subr.bf16.mxu0 %v9392_v2  ;;  %v9267_v6 = vld [vmem:[%s12129_s1 + $0x8] sm:$0xff]   ;;  %s12312_s19 = smov (!%p215_p3, %s7589_s19), 1  ;;  %v9269_v8 = vld [vmem:[%s12129_s1] sm:$0xff]   ;;  %vm7459_vm5 = vcmask 1043459  }
   0xf   : > { %3342 = vst.msk [vmem:[#allocation3 + $0x198] sm:$0xff] %vm226_vm0, %v9342_v3  ;;  %3343 = vst.msk [vmem:[#allocation3 + $0x1a0] sm:$0xff] %vm226_vm0, %v9342_v3  ;;  %8573 = vmatprep.subr.bf16.mxu1 %v9413_v4  ;;  %s8090_s11 = sshll.u32 %s12312_s19, 7  ;;  %v9606_v22 = vld [vmem:[%s12129_s1 + $0x58] sm:$0xff]   ;;  %vm7461_vm6 = vcmask 1044484   ;;  %vm7463_vm7 = vcmask 1045509  }
  0x10   : > { %230 = vst.msk [vmem:[#allocation2 + $0x10] sm:$0x3] %vm229_vm1, %v9342_v3  ;;  %234 = vst.msk [vmem:[#allocation2 + $0x1a8] sm:$0x3] %vm229_vm1, %v9342_v3  ;;  %s9596_s14 = scalar_lea.vmem %s12128_s0, %s8090_s11  ;;  %v9274_v55 = vld [vmem:[%s12129_s1 + $0x98] sm:$0xff]   ;;  %vm7465_vm8 = vcmask 1046534  }
  0x11   : > { %3340 = vst.msk [vmem:[#allocation3 + $0x10] sm:$0x3] %vm229_vm1, %v9342_v3  ;;  %3344 = vst.msk [vmem:[#allocation3 + $0x1a8] sm:$0x3] %vm229_vm1, %v9342_v3  ;;  %8534 = vmatpush3.bf16.msra.mxu0 %v9392_v2  ;;  %v8093_v12 = vld [vmem:[%s9596_s14] sm:$0xff]   ;;  %v8156_v13 = vld [vmem:[%s9596_s14 + $0x8] sm:$0xff]  }
  0x12   : > { %254 = vst.msk [vmem:[#allocation2 + $0x11] sm:$0x1] %vm235_vm2, %v9342_v3  ;;  %236 = vst.msk [vmem:[#allocation2] sm:$0x1] %vm235_vm2, %v9342_v3  ;;  %8574 = vmatpush3.bf16.msra.mxu1 %v9413_v4  ;;  %8535 = vmatprep.subr.bf16.mxu0 %v9427_v5  ;;  %v8094_v16 = vunpack.c.l.bf16 %v8093_v12  ;;  %v8095_v17 = vunpack.c.h.bf16 %v8093_v12  ;;  %v8098_v18 = vunpack.c.l.bf16 %v8156_v13  ;;  %v8157_v19 = vld [vmem:[%s9596_s14 + $0x10] sm:$0xff]   ;;  %v8158_v20 = vld [vmem:[%s9596_s14 + $0x18] sm:$0xff]   ;;  %v8099_v23 = vunpack.c.h.bf16 %v8156_v13 }
  0x13   : > { %237 = vst.msk [vmem:[#allocation2 + $0x18] sm:$0x1] %vm235_vm2, %v9342_v3  ;;  %238 = vst.msk [vmem:[#allocation2 + $0x30] sm:$0x1] %vm235_vm2, %v9342_v3  ;;  %8575 = vmatprep.subr.bf16.mxu1 %v9267_v6  ;;  %v425_v9 = vld [vmem:[#allocation2 + $0x1] sm:$0xff]  ;;  %v8102_v24 = vunpack.c.l.bf16 %v8157_v19  ;;  %v8103_v25 = vunpack.c.h.bf16 %v8157_v19  ;;  %v8106_v27 = vunpack.c.l.bf16 %v8158_v20  ;;  %v8107_v28 = vunpack.c.h.bf16 %v8158_v20  ;;  %v8161_v32 = vld [vmem:[%s9596_s14 + $0x30] sm:$0xff]  }
  0x14   : > { %239 = vst.msk [vmem:[#allocation2 + $0x48] sm:$0x1] %vm235_vm2, %v9342_v3  ;;  %240 = vst.msk [vmem:[#allocation2 + $0x60] sm:$0x1] %vm235_vm2, %v9342_v3  ;;  %v370_v10 = vld [vmem:[#allocation2 + $0x8] sm:$0xff]  ;;  %v8159_v26 = vld [vmem:[%s9596_s14 + $0x20] sm:$0xff]   ;;  %v8118_v36 = vunpack.c.l.bf16 %v8161_v32  ;;  %v8119_v37 = vunpack.c.h.bf16 %v8161_v32 }
  0x15   : > { %241 = vst.msk [vmem:[#allocation2 + $0x78] sm:$0x1] %vm235_vm2, %v9342_v3  ;;  %242 = vst.msk [vmem:[#allocation2 + $0x90] sm:$0x1] %vm235_vm2, %v9342_v3  ;;  %8536 = vmatpush3.bf16.msra.mxu0 %v9427_v5  ;;  %v8110_v29 = vunpack.c.l.bf16 %v8159_v26  ;;  %v8111_v30 = vunpack.c.h.bf16 %v8159_v26  ;;  %v8160_v31 = vld [vmem:[%s9596_s14 + $0x28] sm:$0xff]   ;;  %v8162_v33 = vld [vmem:[%s9596_s14 + $0x38] sm:$0xff]  }
  0x16   : > { %243 = vst.msk [vmem:[#allocation2 + $0xa8] sm:$0x1] %vm235_vm2, %v9342_v3  ;;  %244 = vst.msk [vmem:[#allocation2 + $0xc0] sm:$0x1] %vm235_vm2, %v9342_v3  ;;  %8576 = vmatpush3.bf16.msra.mxu1 %v9267_v6  ;;  %8537 = vmatprep.subr.bf16.mxu0 %v9268_v7  ;;  %v8114_v34 = vunpack.c.l.bf16 %v8160_v31  ;;  %v8115_v35 = vunpack.c.h.bf16 %v8160_v31  ;;  %v8163_v38 = vld [vmem:[%s9596_s14 + $0x40] sm:$0xff]   ;;  %v8122_v39 = vunpack.c.l.bf16 %v8162_v33  ;;  %v8123_v40 = vunpack.c.h.bf16 %v8162_v33  ;;  %v8164_v43 = vld [vmem:[%s9596_s14 + $0x48] sm:$0xff]  }
  0x17   : > { %245 = vst.msk [vmem:[#allocation2 + $0xd8] sm:$0x1] %vm235_vm2, %v9342_v3  ;;  %246 = vst.msk [vmem:[#allocation2 + $0xf0] sm:$0x1] %vm235_vm2, %v9342_v3  ;;  %v426_v11 = vld [vmem:[#allocation2 + $0x9] sm:$0xff]  ;;  %8577 = vmatprep.subr.bf16.mxu1 %v9269_v8  ;;  %v8126_v41 = vunpack.c.l.bf16 %v8163_v38  ;;  %v8127_v42 = vunpack.c.h.bf16 %v8163_v38  ;;  %v8130_v45 = vunpack.c.l.bf16 %v8164_v43  ;;  %v8131_v46 = vunpack.c.h.bf16 %v8164_v43  ;;  %v8166_v49 = vld [vmem:[%s9596_s14 + $0x58] sm:$0xff]  }
  0x18   : > { %247 = vst.msk [vmem:[#allocation2 + $0x108] sm:$0x1] %vm235_vm2, %v9342_v3  ;;  %248 = vst.msk [vmem:[#allocation2 + $0x120] sm:$0x1] %vm235_vm2, %v9342_v3  ;;  %v457_v14 = vpack.c.bf16 %v426_v11, %v425_v9  ;;  %v8165_v44 = vld [vmem:[%s9596_s14 + $0x50] sm:$0xff]   ;;  %v8167_v50 = vld [vmem:[%s9596_s14 + $0x60] sm:$0xff]   ;;  %v8138_v51 = vunpack.c.l.bf16 %v8166_v49  ;;  %v8139_v52 = vunpack.c.h.bf16 %v8166_v49 }
  0x19   : > { %249 = vst.msk [vmem:[#allocation2 + $0x138] sm:$0x1] %vm235_vm2, %v9342_v3  ;;  %250 = vst.msk [vmem:[#allocation2 + $0x150] sm:$0x1] %vm235_vm2, %v9342_v3  ;;  %v369_v15 = vld [vmem:[#allocation2] sm:$0xff]  ;;  %8538 = vmatpush3.bf16.msra.mxu0 %v9268_v7  ;;  %v8134_v47 = vunpack.c.l.bf16 %v8165_v44  ;;  %v8135_v48 = vunpack.c.h.bf16 %v8165_v44  ;;  %v8142_v53 = vunpack.c.l.bf16 %v8167_v50  ;;  %v8143_v54 = vunpack.c.h.bf16 %v8167_v50  ;;  %v8168_v56 = vld [vmem:[%s9596_s14 + $0x68] sm:$0xff]  }
  0x1a   : > { %251 = vst.msk [vmem:[#allocation2 + $0x168] sm:$0x1] %vm235_vm2, %v9342_v3  ;;  %252 = vst.msk [vmem:[#allocation2 + $0x180] sm:$0x1] %vm235_vm2, %v9342_v3  ;;  %v401_v21 = vpack.c.bf16 %v370_v10, %v369_v15  ;;  %8539 = vmatprep.mubr.msk.bf16.mxu0 %vm226_vm0, %v457_v14  ;;  %8578 = vmatpush3.bf16.msra.mxu1 %v9269_v8  ;;  %v8146_v60 = vunpack.c.l.bf16 %v8168_v56  ;;  %v8147_v61 = vunpack.c.h.bf16 %v8168_v56  ;;  %v9271_v6 = vld [vmem:[%s12129_s1 + $0x50] sm:$0xff]   ;;  %v9272_v8 = vld [vmem:[%s12129_s1 + $0x48] sm:$0xff]  }
  0x1b   : > { %255 = vst.msk [vmem:[#allocation2 + $0x29] sm:$0x1] %vm235_vm2, %v9342_v3  ;;  %256 = vst.msk [vmem:[#allocation2 + $0x41] sm:$0x1] %vm235_vm2, %v9342_v3  ;;  %8611 = vmatprep.subr.bf16.mxu0 %v9606_v22  ;;  %8651 = vmatprep.subr.bf16.mxu1 %v9274_v55  ;;  %v9275_v9 = vld [vmem:[%s12129_s1 + $0x90] sm:$0xff]   ;;  %v9277_v43 = vld [vmem:[%s12129_s1 + $0x80] sm:$0xff]  }
  0x1c   : > { %257 = vst.msk [vmem:[#allocation2 + $0x59] sm:$0x1] %vm235_vm2, %v9342_v3  ;;  %258 = vst.msk [vmem:[#allocation2 + $0x71] sm:$0x1] %vm235_vm2, %v9342_v3  ;;  %8579 = vmatprep.mubr.msk.bf16.mxu1 %vm226_vm0, %v401_v21  ;;  %v9727_v49 = vld [vmem:[%s12129_s1 + $0x78] sm:$0xff]   ;;  %vm7467_vm9 = vcmask 1047559  }
  0x1d   : > { %259 = vst.msk [vmem:[#allocation2 + $0x89] sm:$0x1] %vm235_vm2, %v9342_v3  ;;  %260 = vst.msk [vmem:[#allocation2 + $0xa1] sm:$0x1] %vm235_vm2, %v9342_v3  ;;  %s8091_s10 = sshll.u32 %s12312_s19, 6 }
  0x1e   : > { %261 = vst.msk [vmem:[#allocation2 + $0xb9] sm:$0x1] %vm235_vm2, %v9342_v3  ;;  %262 = vst.msk [vmem:[#allocation2 + $0xd1] sm:$0x1] %vm235_vm2, %v9342_v3  ;;  %s11894_s19 = scalar_lea.vmem %s12133_s5, %s8091_s10 }
  0x1f   : > { %263 = vst.msk [vmem:[#allocation2 + $0xe9] sm:$0x1] %vm235_vm2, %v9342_v3  ;;  %264 = vst.msk [vmem:[#allocation2 + $0x101] sm:$0x1] %vm235_vm2, %v9342_v3 }
  0x20   : > { %265 = vst.msk [vmem:[#allocation2 + $0x119] sm:$0x1] %vm235_vm2, %v9342_v3  ;;  %266 = vst.msk [vmem:[#allocation2 + $0x131] sm:$0x1] %vm235_vm2, %v9342_v3 }
  0x21   : > { %267 = vst.msk [vmem:[#allocation2 + $0x149] sm:$0x1] %vm235_vm2, %v9342_v3  ;;  %268 = vst.msk [vmem:[#allocation2 + $0x161] sm:$0x1] %vm235_vm2, %v9342_v3 }
  0x22   : > { %269 = vst.msk [vmem:[#allocation2 + $0x179] sm:$0x1] %vm235_vm2, %v9342_v3  ;;  %270 = vst.msk [vmem:[#allocation2 + $0x191] sm:$0x1] %vm235_vm2, %v9342_v3 }
  0x23   : > { %3346 = vst.msk [vmem:[#allocation3 + $0x18] sm:$0x1] %vm235_vm2, %v9342_v3  ;;  %3347 = vst.msk [vmem:[#allocation3 + $0x30] sm:$0x1] %vm235_vm2, %v9342_v3 }
  0x24   : > { %3348 = vst.msk [vmem:[#allocation3 + $0x48] sm:$0x1] %vm235_vm2, %v9342_v3  ;;  %3349 = vst.msk [vmem:[#allocation3 + $0x60] sm:$0x1] %vm235_vm2, %v9342_v3 }
  0x25   : > { %3350 = vst.msk [vmem:[#allocation3 + $0x78] sm:$0x1] %vm235_vm2, %v9342_v3  ;;  %3351 = vst.msk [vmem:[#allocation3 + $0x90] sm:$0x1] %vm235_vm2, %v9342_v3 }
  0x26   : > { %3352 = vst.msk [vmem:[#allocation3 + $0xa8] sm:$0x1] %vm235_vm2, %v9342_v3  ;;  %3353 = vst.msk [vmem:[#allocation3 + $0xc0] sm:$0x1] %vm235_vm2, %v9342_v3 }
  0x27   : > { %3354 = vst.msk [vmem:[#allocation3 + $0xd8] sm:$0x1] %vm235_vm2, %v9342_v3  ;;  %3355 = vst.msk [vmem:[#allocation3 + $0xf0] sm:$0x1] %vm235_vm2, %v9342_v3 }
  0x28   : > { %3356 = vst.msk [vmem:[#allocation3 + $0x108] sm:$0x1] %vm235_vm2, %v9342_v3  ;;  %3357 = vst.msk [vmem:[#allocation3 + $0x120] sm:$0x1] %vm235_vm2, %v9342_v3 }
  0x29   : > { %3358 = vst.msk [vmem:[#allocation3 + $0x138] sm:$0x1] %vm235_vm2, %v9342_v3  ;;  %3359 = vst.msk [vmem:[#allocation3 + $0x150] sm:$0x1] %vm235_vm2, %v9342_v3 }
  0x2a   : > { %3360 = vst.msk [vmem:[#allocation3 + $0x168] sm:$0x1] %vm235_vm2, %v9342_v3  ;;  %3361 = vst.msk [vmem:[#allocation3 + $0x180] sm:$0x1] %vm235_vm2, %v9342_v3 }
  0x2b   : > { %3364 = vst.msk [vmem:[#allocation3 + $0x29] sm:$0x1] %vm235_vm2, %v9342_v3  ;;  %3365 = vst.msk [vmem:[#allocation3 + $0x41] sm:$0x1] %vm235_vm2, %v9342_v3 }
  0x2c   : > { %3366 = vst.msk [vmem:[#allocation3 + $0x59] sm:$0x1] %vm235_vm2, %v9342_v3  ;;  %3367 = vst.msk [vmem:[#allocation3 + $0x71] sm:$0x1] %vm235_vm2, %v9342_v3 }
  0x2d   : > { %3368 = vst.msk [vmem:[#allocation3 + $0x89] sm:$0x1] %vm235_vm2, %v9342_v3  ;;  %3369 = vst.msk [vmem:[#allocation3 + $0xa1] sm:$0x1] %vm235_vm2, %v9342_v3 }
  0x2e   : > { %3370 = vst.msk [vmem:[#allocation3 + $0xb9] sm:$0x1] %vm235_vm2, %v9342_v3  ;;  %3371 = vst.msk [vmem:[#allocation3 + $0xd1] sm:$0x1] %vm235_vm2, %v9342_v3 }
  0x2f   : > { %3372 = vst.msk [vmem:[#allocation3 + $0xe9] sm:$0x1] %vm235_vm2, %v9342_v3  ;;  %3373 = vst.msk [vmem:[#allocation3 + $0x101] sm:$0x1] %vm235_vm2, %v9342_v3 }
  0x30   : > { %3374 = vst.msk [vmem:[#allocation3 + $0x119] sm:$0x1] %vm235_vm2, %v9342_v3  ;;  %3375 = vst.msk [vmem:[#allocation3 + $0x131] sm:$0x1] %vm235_vm2, %v9342_v3 }
  0x31   : > { %3376 = vst.msk [vmem:[#allocation3 + $0x149] sm:$0x1] %vm235_vm2, %v9342_v3  ;;  %3377 = vst.msk [vmem:[#allocation3 + $0x161] sm:$0x1] %vm235_vm2, %v9342_v3 }
  0x32   : > { %3378 = vst.msk [vmem:[#allocation3 + $0x179] sm:$0x1] %vm235_vm2, %v9342_v3  ;;  %3379 = vst.msk [vmem:[#allocation3 + $0x191] sm:$0x1] %vm235_vm2, %v9342_v3 }
  0x33   : > { %253 = vst.msk [vmem:[#allocation2 + $0x198] sm:$0x1] %vm235_vm2, %v9342_v3  ;;  %271 = vst.msk [vmem:[#allocation2 + $0x1a9] sm:$0x1] %vm235_vm2, %v9342_v3 }
  0x34   : > { %3345 = vst.msk [vmem:[#allocation3] sm:$0x1] %vm235_vm2, %v9342_v3  ;;  %3362 = vst.msk [vmem:[#allocation3 + $0x198] sm:$0x1] %vm235_vm2, %v9342_v3 }
  0x35   : > { %3363 = vst.msk [vmem:[#allocation3 + $0x11] sm:$0x1] %vm235_vm2, %v9342_v3  ;;  %3380 = vst.msk [vmem:[#allocation3 + $0x1a9] sm:$0x1] %vm235_vm2, %v9342_v3 }
  0x36   : > { %337 = vst.msk [vmem:[#allocation2 + $0x19] sm:$0xff] %vm226_vm0, %v8094_v16  ;;  %338 = vst.msk [vmem:[#allocation2 + $0x21] sm:$0xff] %vm226_vm0, %v8095_v17 }
  0x37   : > { %339 = vst.msk [vmem:[#allocation2 + $0x31] sm:$0xff] %vm226_vm0, %v8098_v18  ;;  %340 = vst.msk [vmem:[#allocation2 + $0x39] sm:$0xff] %vm226_vm0, %v8099_v23 }
  0x38   : > { %341 = vst.msk [vmem:[#allocation2 + $0x49] sm:$0xff] %vm226_vm0, %v8102_v24  ;;  %342 = vst.msk [vmem:[#allocation2 + $0x51] sm:$0xff] %vm226_vm0, %v8103_v25 }
  0x39   : > { %343 = vst.msk [vmem:[#allocation2 + $0x61] sm:$0xff] %vm226_vm0, %v8106_v27  ;;  %344 = vst.msk [vmem:[#allocation2 + $0x69] sm:$0xff] %vm226_vm0, %v8107_v28 }
  0x3a   : > { %345 = vst.msk [vmem:[#allocation2 + $0x79] sm:$0xff] %vm226_vm0, %v8110_v29  ;;  %346 = vst.msk [vmem:[#allocation2 + $0x81] sm:$0xff] %vm226_vm0, %v8111_v30 }
  0x3b   : > { %347 = vst.msk [vmem:[#allocation2 + $0x91] sm:$0xff] %vm226_vm0, %v8114_v34  ;;  %348 = vst.msk [vmem:[#allocation2 + $0x99] sm:$0xff] %vm226_vm0, %v8115_v35 }
  0x3c   : > { %349 = vst.msk [vmem:[#allocation2 + $0xa9] sm:$0xff] %vm226_vm0, %v8118_v36  ;;  %350 = vst.msk [vmem:[#allocation2 + $0xb1] sm:$0xff] %vm226_vm0, %v8119_v37  ;;  %v8169_v37 = vld [vmem:[%s9596_s14 + $0x70] sm:$0xff]  }
  0x3d   : > { %351 = vst.msk [vmem:[#allocation2 + $0xc1] sm:$0xff] %vm226_vm0, %v8122_v39  ;;  %352 = vst.msk [vmem:[#allocation2 + $0xc9] sm:$0xff] %vm226_vm0, %v8123_v40  ;;  %v427_v57 = vld [vmem:[#allocation2 + $0x19] sm:$0xff]  ;;  %v428_v58 = vld [vmem:[#allocation2 + $0x21] sm:$0xff]  ;;  %v8150_v40 = vunpack.c.l.bf16 %v8169_v37 }
  0x3e   : > { %353 = vst.msk [vmem:[#allocation2 + $0xd9] sm:$0xff] %vm226_vm0, %v8126_v41  ;;  %354 = vst.msk [vmem:[#allocation2 + $0xe1] sm:$0xff] %vm226_vm0, %v8127_v42  ;;  %v371_v59 = vld [vmem:[#allocation2 + $0x18] sm:$0xff]  ;;  %v9650_v62 = vpack.c.bf16 %v428_v58, %v427_v57  ;;  %v372_v63 = vld [vmem:[#allocation2 + $0x20] sm:$0xff]  ;;  %v8151_v41 = vunpack.c.h.bf16 %v8169_v37 }
  0x3f   : > { %355 = vst.msk [vmem:[#allocation2 + $0xf1] sm:$0xff] %vm226_vm0, %v8130_v45  ;;  %356 = vst.msk [vmem:[#allocation2 + $0xf9] sm:$0xff] %vm226_vm0, %v8131_v46  ;;  %v429_v0 = vld [vmem:[#allocation2 + $0x31] sm:$0xff]  ;;  %v430_v1 = vld [vmem:[#allocation2 + $0x39] sm:$0xff]  ;;  %v9652_v2 = vpack.c.bf16 %v372_v63, %v371_v59 }
  0x40   : > { %357 = vst.msk [vmem:[#allocation2 + $0x109] sm:$0xff] %vm226_vm0, %v8134_v47  ;;  %358 = vst.msk [vmem:[#allocation2 + $0x111] sm:$0xff] %vm226_vm0, %v8135_v48  ;;  %v9654_v3 = vpack.c.bf16 %v430_v1, %v429_v0  ;;  %v373_v4 = vld [vmem:[#allocation2 + $0x30] sm:$0xff]  ;;  %v374_v5 = vld [vmem:[#allocation2 + $0x38] sm:$0xff]  ;;  %8540 = vmatmul.mubr.msk.bf16.vlgmr.msra.gmra.mxu0 %vm226_vm0, %v9650_v62 }
  0x41   : > { %359 = vst.msk [vmem:[#allocation2 + $0x121] sm:$0xff] %vm226_vm0, %v8138_v51  ;;  %360 = vst.msk [vmem:[#allocation2 + $0x129] sm:$0xff] %vm226_vm0, %v8139_v52  ;;  %v9663_v7 = vpack.c.bf16 %v374_v5, %v373_v4  ;;  %8580 = vmatmul.mubr.msk.bf16.vlgmr.msra.gmra.mxu1 %vm226_vm0, %v9652_v2  ;;  %8612 = vmatpush3.bf16.msra.mxu0 %v9606_v22  ;;  %v431_v10 = vld [vmem:[#allocation2 + $0x49] sm:$0xff]  ;;  %v432_v11 = vld [vmem:[#allocation2 + $0x51] sm:$0xff] }
  0x42   : > { %361 = vst.msk [vmem:[#allocation2 + $0x139] sm:$0xff] %vm226_vm0, %v8142_v53  ;;  %362 = vst.msk [vmem:[#allocation2 + $0x141] sm:$0xff] %vm226_vm0, %v8143_v54  ;;  %v375_v12 = vld [vmem:[#allocation2 + $0x48] sm:$0xff]  ;;  %8543 = vmatprep.mubr.msk.bf16.mxu0 %vm226_vm0, %v9654_v3  ;;  %v376_v13 = vld [vmem:[#allocation2 + $0x50] sm:$0xff]  ;;  %8613 = vmatprep.subr.bf16.mxu0 %v9271_v6  ;;  %v9678_v18 = vpack.c.bf16 %v432_v11, %v431_v10 }
  0x43   : > { %363 = vst.msk [vmem:[#allocation2 + $0x151] sm:$0xff] %vm226_vm0, %v8146_v60  ;;  %364 = vst.msk [vmem:[#allocation2 + $0x159] sm:$0xff] %vm226_vm0, %v8147_v61  ;;  %8583 = vmatprep.mubr.msk.bf16.mxu1 %vm226_vm0, %v9663_v7  ;;  %v433_v14 = vld [vmem:[#allocation2 + $0x61] sm:$0xff]  ;;  %v434_v15 = vld [vmem:[#allocation2 + $0x69] sm:$0xff]  ;;  %8652 = vmatpush3.bf16.msra.mxu1 %v9274_v55  ;;  %v9680_v19 = vpack.c.bf16 %v376_v13, %v375_v12 }
  0x44   : > { %v377_v16 = vld [vmem:[#allocation2 + $0x60] sm:$0xff]  ;;  %v378_v17 = vld [vmem:[#allocation2 + $0x68] sm:$0xff]  ;;  %8653 = vmatprep.subr.bf16.mxu1 %v9275_v9  ;;  %v9682_v20 = vpack.c.bf16 %v434_v15, %v433_v14  ;;  %v379_v25 = vld [vmem:[#allocation2 + $0x78] sm:$0xff]  ;;  %365 = vst.msk [vmem:[#allocation2 + $0x169] sm:$0xff] %vm226_vm0, %v8150_v40 }
  0x45   : > { %8614 = vmatpush3.bf16.msra.mxu0 %v9271_v6  ;;  %v9684_v21 = vpack.c.bf16 %v378_v17, %v377_v16  ;;  %v9273_v22 = vld [vmem:[%s12129_s1 + $0x40] sm:$0xff]   ;;  %v437_v27 = vld [vmem:[#allocation2 + $0x91] sm:$0xff]  ;;  %v439_v35 = vld [vmem:[#allocation2 + $0xa9] sm:$0xff]  ;;  %366 = vst.msk [vmem:[#allocation2 + $0x171] sm:$0xff] %vm226_vm0, %v8151_v41 }
  0x46   : > { %8615 = vmatprep.subr.bf16.mxu0 %v9272_v8  ;;  %v435_v23 = vld [vmem:[#allocation2 + $0x79] sm:$0xff]  ;;  %v436_v24 = vld [vmem:[#allocation2 + $0x81] sm:$0xff]  ;;  %v381_v29 = vld [vmem:[#allocation2 + $0x90] sm:$0xff] }
  0x47   : > { %8654 = vmatpush3.bf16.msra.mxu1 %v9275_v9  ;;  %v380_v26 = vld [vmem:[#allocation2 + $0x80] sm:$0xff]  ;;  %v382_v30 = vld [vmem:[#allocation2 + $0x98] sm:$0xff]  ;;  %v9697_v31 = vpack.c.bf16 %v436_v24, %v435_v23  ;;  %v383_v38 = vld [vmem:[#allocation2 + $0xa8] sm:$0xff] }
  0x48   : > { %8544 = vmatmul.mubr.msk.bf16.gmra.mxu0 %vm226_vm0, %v9678_v18  ;;  %v438_v28 = vld [vmem:[#allocation2 + $0x99] sm:$0xff]  ;;  %v9699_v32 = vpack.c.bf16 %v380_v26, %v379_v25  ;;  %v9703_v34 = vpack.c.bf16 %v382_v30, %v381_v29  ;;  %v440_v36 = vld [vmem:[#allocation2 + $0xb1] sm:$0xff]  ;;  %v9276_v42 = vld [vmem:[%s12129_s1 + $0x88] sm:$0xff]  }
  0x49   : > { %8584 = vmatmul.mubr.msk.bf16.gmra.mxu1 %vm226_vm0, %v9680_v19  ;;  %8547 = vmatprep.mubr.msk.bf16.mxu0 %vm226_vm0, %v9682_v20  ;;  %v9701_v33 = vpack.c.bf16 %v438_v28, %v437_v27  ;;  %v384_v39 = vld [vmem:[#allocation2 + $0xb0] sm:$0xff]  ;;  %v441_v44 = vld [vmem:[#allocation2 + $0xc1] sm:$0xff]  ;;  %v9722_v48 = vpack.c.bf16 %v440_v36, %v439_v35  ;;  %v443_v53 = vld [vmem:[#allocation2 + $0xd9] sm:$0xff] }
  0x4a   : > { %8587 = vmatprep.mubr.msk.bf16.mxu1 %vm226_vm0, %v9684_v21  ;;  %8616 = vmatpush3.bf16.msra.mxu0 %v9272_v8  ;;  %v442_v45 = vld [vmem:[#allocation2 + $0xc9] sm:$0xff]  ;;  %v385_v46 = vld [vmem:[#allocation2 + $0xc0] sm:$0xff]  ;;  %v9729_v50 = vpack.c.bf16 %v384_v39, %v383_v38  ;;  %v387_v55 = vld [vmem:[#allocation2 + $0xd8] sm:$0xff] }
  0x4b   : > { %8617 = vmatprep.subr.bf16.mxu0 %v9273_v22  ;;  %8655 = vmatprep.subr.bf16.mxu1 %v9276_v42  ;;  %v386_v47 = vld [vmem:[#allocation2 + $0xc8] sm:$0xff]  ;;  %v9731_v51 = vpack.c.bf16 %v442_v45, %v441_v44  ;;  %v388_v56 = vld [vmem:[#allocation2 + $0xe0] sm:$0xff]  ;;  %v445_v57 = vld [vmem:[#allocation2 + $0xf1] sm:$0xff] }
  0x4c   : > { %8656 = vmatpush3.bf16.msra.mxu1 %v9276_v42  ;;  %v9733_v52 = vpack.c.bf16 %v386_v47, %v385_v46  ;;  %v444_v54 = vld [vmem:[#allocation2 + $0xe1] sm:$0xff]  ;;  %v446_v58 = vld [vmem:[#allocation2 + $0xf9] sm:$0xff]  ;;  %v389_v59 = vld [vmem:[#allocation2 + $0xf0] sm:$0xff]  ;;  %v9746_v63 = vpack.c.bf16 %v388_v56, %v387_v55 }
  0x4d   : > { %8657 = vmatprep.subr.bf16.mxu1 %v9277_v43  ;;  %v390_v60 = vld [vmem:[#allocation2 + $0xf8] sm:$0xff]  ;;  %v9744_v61 = vpack.c.bf16 %v444_v54, %v443_v53  ;;  %v9748_v0 = vpack.c.bf16 %v446_v58, %v445_v57  ;;  %v447_v4 = vld [vmem:[#allocation2 + $0x109] sm:$0xff]  ;;  %v449_v10 = vld [vmem:[#allocation2 + $0x121] sm:$0xff] }
  0x4e   : > { %8618 = vmatpush3.bf16.msra.mxu0 %v9273_v22  ;;  %v9750_v1 = vpack.c.bf16 %v390_v60, %v389_v59  ;;  %v448_v5 = vld [vmem:[#allocation2 + $0x111] sm:$0xff]  ;;  %v391_v6 = vld [vmem:[#allocation2 + $0x108] sm:$0xff]  ;;  %v393_v12 = vld [vmem:[#allocation2 + $0x120] sm:$0xff] }
  0x4f   : > { %8691 = vmatprep.subr.bf16.mxu0 %v9727_v49  ;;  %v392_v8 = vld [vmem:[#allocation2 + $0x110] sm:$0xff]  ;;  %v9761_v9 = vld [vmem:[%s12129_s1 + $0xb8] sm:$0xff]   ;;  %v394_v13 = vld [vmem:[#allocation2 + $0x128] sm:$0xff]  ;;  %v9766_v14 = vpack.c.bf16 %v448_v5, %v447_v4 }
  0x50   : > { %8548 = vmatmul.mubr.msk.bf16.gmra.mxu0 %vm226_vm0, %v9697_v31  ;;  %8658 = vmatpush3.bf16.msra.mxu1 %v9277_v43  ;;  %v450_v11 = vld [vmem:[#allocation2 + $0x129] sm:$0xff]  ;;  %v8170_v15 = vld [vmem:[%s9596_s14 + $0x78] sm:$0xff]   ;;  %v9769_v16 = vpack.c.bf16 %v392_v8, %v391_v6  ;;  %v9773_v24 = vpack.c.bf16 %v394_v13, %v393_v12  ;;  %v452_v26 = vld [vmem:[#allocation2 + $0x141] sm:$0xff] }
  0x51   : > { %8588 = vmatmul.mubr.msk.bf16.gmra.mxu1 %vm226_vm0, %v9699_v32  ;;  %8551 = vmatprep.mubr.msk.bf16.mxu0 %vm226_vm0, %v9701_v33  ;;  %v9771_v17 = vpack.c.bf16 %v450_v11, %v449_v10  ;;  %v8154_v22 = vunpack.c.l.bf16 %v8170_v15  ;;  %v8155_v23 = vunpack.c.h.bf16 %v8170_v15  ;;  %v451_v25 = vld [vmem:[#allocation2 + $0x139] sm:$0xff]  ;;  %v453_v29 = vld [vmem:[#allocation2 + $0x151] sm:$0xff]  ;;  %v948_v41 = vld [vmem:[#allocation2 + $0x2] sm:$0xff] }
  0x52   : > { %8591 = vmatprep.mubr.msk.bf16.mxu1 %vm226_vm0, %v9703_v34  ;;  %8731 = vmatprep.subr.bf16.mxu1 %v9761_v9  ;;  %v395_v27 = vld [vmem:[#allocation2 + $0x138] sm:$0xff]  ;;  %v396_v28 = vld [vmem:[#allocation2 + $0x140] sm:$0xff]  ;;  %v397_v35 = vld [vmem:[#allocation2 + $0x150] sm:$0xff]  ;;  %v9785_v37 = vpack.c.bf16 %v452_v26, %v451_v25 }
  0x53   : > { %367 = vst.msk [vmem:[#allocation2 + $0x181] sm:$0xff] %vm226_vm0, %v8154_v22  ;;  %368 = vst.msk [vmem:[#allocation2 + $0x189] sm:$0xff] %vm226_vm0, %v8155_v23  ;;  %v454_v30 = vld [vmem:[#allocation2 + $0x159] sm:$0xff]  ;;  %v9787_v38 = vpack.c.bf16 %v396_v28, %v395_v27  ;;  %v949_v42 = vld [vmem:[#allocation2 + $0xa] sm:$0xff] }
  0x54   : > { %v398_v36 = vld [vmem:[#allocation2 + $0x158] sm:$0xff]  ;;  %v9789_v39 = vpack.c.bf16 %v454_v30, %v453_v29  ;;  %v455_v43 = vld [vmem:[#allocation2 + $0x169] sm:$0xff]  ;;  %v980_v54 = vpack.c.bf16 %v949_v42, %v948_v41  ;;  %v9285_v22 = vld [vmem:[%s12129_s1 + $0xa0] sm:$0xff]  }
  0x55   : > { %v9791_v40 = vpack.c.bf16 %v398_v36, %v397_v35  ;;  %v456_v44 = vld [vmem:[#allocation2 + $0x171] sm:$0xff]  ;;  %v399_v45 = vld [vmem:[#allocation2 + $0x168] sm:$0xff]  ;;  %v950_v55 = vld [vmem:[#allocation2 + $0x1a] sm:$0xff] }
  0x56   : > { %v400_v46 = vld [vmem:[#allocation2 + $0x170] sm:$0xff]  ;;  %v9801_v47 = vpack.c.bf16 %v456_v44, %v455_v43  ;;  %v951_v56 = vld [vmem:[#allocation2 + $0x22] sm:$0xff]  ;;  %v953_v58 = vld [vmem:[#allocation2 + $0x3a] sm:$0xff] }
  0x57   : > { %v9803_v53 = vpack.c.bf16 %v400_v46, %v399_v45  ;;  %v952_v57 = vld [vmem:[#allocation2 + $0x32] sm:$0xff]  ;;  %v9812_v59 = vpack.c.bf16 %v951_v56, %v950_v55  ;;  %v954_v5 = vld [vmem:[#allocation2 + $0x4a] sm:$0xff]  ;;  %v961_v23 = vld [vmem:[#allocation2 + $0x9a] sm:$0xff] }
  0x58   : > { %8552 = vmatmul.mubr.msk.bf16.gmra.mxu0 %vm226_vm0, %v9722_v48  ;;  %v9814_v60 = vpack.c.bf16 %v953_v58, %v952_v57  ;;  %v9279_v4 = vld [vmem:[%s12129_s1 + $0x70] sm:$0xff]   ;;  %v9280_v11 = vld [vmem:[%s12129_s1 + $0x68] sm:$0xff]   ;;  %v9857_v25 = vld [vmem:[%s12129_s1 + $0xf8] sm:$0xff]  }
  0x59   : > { %8592 = vmatmul.mubr.msk.bf16.gmra.mxu1 %vm226_vm0, %v9729_v50  ;;  %8555 = vmatprep.mubr.msk.bf16.mxu0 %vm226_vm0, %v9731_v51  ;;  %v955_v6 = vld [vmem:[#allocation2 + $0x52] sm:$0xff]  ;;  %v957_v10 = vld [vmem:[#allocation2 + $0x6a] sm:$0xff]  ;;  %v967_v41 = vld [vmem:[#allocation2 + $0xe2] sm:$0xff] }
  0x5a   : > { %8595 = vmatprep.mubr.msk.bf16.mxu1 %vm226_vm0, %v9733_v52  ;;  %v9283_v8 = vld [vmem:[%s12129_s1 + $0xb0] sm:$0xff]   ;;  %v9284_v12 = vld [vmem:[%s12129_s1 + $0xa8] sm:$0xff]   ;;  %v9838_v13 = vpack.c.bf16 %v955_v6, %v954_v5  ;;  %v9864_v26 = vld [vmem:[%s12129_s1 + $0xd8] sm:$0xff]  }
  0x5b   : > { %v962_v28 = vld [vmem:[#allocation2 + $0xaa] sm:$0xff]  ;;  %v963_v29 = vld [vmem:[#allocation2 + $0xb2] sm:$0xff]  ;;  %v969_v42 = vld [vmem:[#allocation2 + $0xfa] sm:$0xff] }
  0x5c   : > { %v965_v30 = vld [vmem:[#allocation2 + $0xca] sm:$0xff]  ;;  %v9880_v35 = vpack.c.bf16 %v963_v29, %v962_v28  ;;  %v971_v45 = vld [vmem:[#allocation2 + $0x112] sm:$0xff]  ;;  %v975_v56 = vld [vmem:[#allocation2 + $0x142] sm:$0xff] }
  0x5d   : > { %v973_v46 = vld [vmem:[#allocation2 + $0x12a] sm:$0xff]  ;;  %v977_v57 = vld [vmem:[#allocation2 + $0x15a] sm:$0xff]  ;;  %v979_v5 = vld [vmem:[#allocation2 + $0x172] sm:$0xff] }
  0x5e   : > { %v1421_v6 = vld [vmem:[#allocation2 + $0x181] sm:$0xff] }
  0x5f   : > { %v2397_v29 = vld [vmem:[#allocation2 + $0x81] sm:$0xff] }
  0x60   : > { %8556 = vmatmul.mubr.msk.bf16.gmra.mxu0 %vm226_vm0, %v9744_v61 }
  0x61   : > { %8596 = vmatmul.mubr.msk.bf16.gmra.mxu1 %vm226_vm0, %v9746_v63  ;;  %8559 = vmatprep.mubr.msk.bf16.mxu0 %vm226_vm0, %v9748_v0 }
  0x62   : > { %8599 = vmatprep.mubr.msk.bf16.mxu1 %vm226_vm0, %v9750_v1 }
  0x68   : > { %8560 = vmatmul.mubr.msk.bf16.gmra.mxu0 %vm226_vm0, %v9766_v14 }
  0x69   : > { %8600 = vmatmul.mubr.msk.bf16.gmra.mxu1 %vm226_vm0, %v9769_v16  ;;  %8563 = vmatprep.mubr.msk.bf16.mxu0 %vm226_vm0, %v9771_v17 }
  0x6a   : > { %8603 = vmatprep.mubr.msk.bf16.mxu1 %vm226_vm0, %v9773_v24 }
  0x70   : > { %8564 = vmatmul.mubr.msk.bf16.gmra.mxu0 %vm226_vm0, %v9785_v37 }
  0x71   : > { %8604 = vmatmul.mubr.msk.bf16.gmra.mxu1 %vm226_vm0, %v9787_v38  ;;  %8567 = vmatprep.mubr.msk.bf16.mxu0 %vm226_vm0, %v9789_v39 }
  0x72   : > { %8607 = vmatprep.mubr.msk.bf16.mxu1 %vm226_vm0, %v9791_v40 }
  0x78   : > { %8568 = vmatmul.mubr.msk.bf16.gmra.mxu0 %vm226_vm0, %v9801_v47 }
  0x79   : > { %8608 = vmatmul.mubr.msk.bf16.gmra.mxu1 %vm226_vm0, %v9803_v53  ;;  %8619 = vmatprep.mubr.msk.bf16.mxu0 %vm226_vm0, %v980_v54 }
  0x7a   : > { %8659 = vmatprep.mubr.msk.bf16.mxu1 %vm226_vm0, %v9650_v62  ;;  %v956_v62 = vld [vmem:[#allocation2 + $0x62] sm:$0xff] }
  0x7b   : > { %v9840_v15 = vpack.c.bf16 %v957_v10, %v956_v62 }
  0x80   : > { %8620 = vmatmul.mubr.msk.bf16.vlgmr.msra.gmra.mxu0 %vm226_vm0, %v9812_v59 }
  0x81   : > { %8660 = vmatmul.mubr.msk.bf16.vlgmr.msra.gmra.mxu1 %vm226_vm0, %v9654_v3  ;;  %8692 = vmatpush3.bf16.msra.mxu0 %v9727_v49  ;;  %v958_v3 = vld [vmem:[#allocation2 + $0x7a] sm:$0xff]  ;;  %v959_v49 = vld [vmem:[#allocation2 + $0x82] sm:$0xff] }
  0x82   : > { %8623 = vmatprep.mubr.msk.bf16.mxu0 %vm226_vm0, %v9814_v60  ;;  %8663 = vmatprep.mubr.msk.bf16.mxu1 %vm226_vm0, %v9678_v18  ;;  %v9281_v18 = vld [vmem:[%s12129_s1 + $0x60] sm:$0xff]  }
  0x83   : > { %8693 = vmatprep.subr.bf16.mxu0 %v9279_v4  ;;  %8732 = vmatpush3.bf16.msra.mxu1 %v9761_v9  ;;  %v960_v9 = vld [vmem:[#allocation2 + $0x92] sm:$0xff] }
  0x84   : > { %8733 = vmatprep.subr.bf16.mxu1 %v9283_v8  ;;  %v9868_v27 = vpack.c.bf16 %v961_v23, %v960_v9 }
  0x85   : > { %8694 = vmatpush3.bf16.msra.mxu0 %v9279_v4 }
  0x86   : > { %8695 = vmatprep.subr.bf16.mxu0 %v9280_v11 }
  0x87   : > { %8734 = vmatpush3.bf16.msra.mxu1 %v9283_v8  ;;  %v1422_v8 = vld [vmem:[#allocation2 + $0x189] sm:$0xff] }
  0x88   : > { %8624 = vmatmul.mubr.msk.bf16.gmra.mxu0 %vm226_vm0, %v9838_v13  ;;  %8735 = vmatprep.subr.bf16.mxu1 %v9284_v12 }
  0x89   : > { %8664 = vmatmul.mubr.msk.bf16.gmra.mxu1 %vm226_vm0, %v9682_v20  ;;  %8627 = vmatprep.mubr.msk.bf16.mxu0 %vm226_vm0, %v9840_v15  ;;  %v9866_v20 = vpack.c.bf16 %v959_v49, %v958_v3  ;;  %v2395_v3 = vld [vmem:[#allocation2 + $0x69] sm:$0xff]  ;;  %v2337_v49 = vld [vmem:[#allocation2 + $0x60] sm:$0xff] }
  0x8a   : > { %8667 = vmatprep.mubr.msk.bf16.mxu1 %vm226_vm0, %v9697_v31  ;;  %8696 = vmatpush3.bf16.msra.mxu0 %v9280_v11  ;;  %v964_v31 = vld [vmem:[#allocation2 + $0xc2] sm:$0xff]  ;;  %v2393_v11 = vld [vmem:[#allocation2 + $0x51] sm:$0xff] }
  0x8b   : > { %8697 = vmatprep.subr.bf16.mxu0 %v9281_v18  ;;  %8736 = vmatpush3.bf16.msra.mxu1 %v9284_v12  ;;  %v9882_v36 = vpack.c.bf16 %v965_v30, %v964_v31  ;;  %v2335_v12 = vld [vmem:[#allocation2 + $0x48] sm:$0xff]  ;;  %v2339_v31 = vld [vmem:[#allocation2 + $0x78] sm:$0xff]  ;;  %v2340_v30 = vld [vmem:[#allocation2 + $0x80] sm:$0xff] }
  0x8c   : > { %8737 = vmatprep.subr.bf16.mxu1 %v9285_v22 }
  0x8e   : > { %8698 = vmatpush3.bf16.msra.mxu0 %v9281_v18  ;;  %v2338_v18 = vld [vmem:[#allocation2 + $0x68] sm:$0xff] }
  0x8f   : > { %8738 = vmatpush3.bf16.msra.mxu1 %v9285_v22  ;;  %8771 = vmatprep.subr.bf16.mxu0 %v9857_v25 }
  0x90   : > { %8628 = vmatmul.mubr.msk.bf16.gmra.mxu0 %vm226_vm0, %v9866_v20  ;;  %8811 = vmatprep.subr.bf16.mxu1 %v9864_v26 }
  0x91   : > { %8668 = vmatmul.mubr.msk.bf16.gmra.mxu1 %vm226_vm0, %v9701_v33  ;;  %8631 = vmatprep.mubr.msk.bf16.mxu0 %vm226_vm0, %v9868_v27  ;;  %v966_v33 = vld [vmem:[#allocation2 + $0xda] sm:$0xff] }
  0x92   : > { %8671 = vmatprep.mubr.msk.bf16.mxu1 %vm226_vm0, %v9722_v48  ;;  %v968_v48 = vld [vmem:[#allocation2 + $0xf2] sm:$0xff]  ;;  %v9892_v43 = vpack.c.bf16 %v967_v41, %v966_v33  ;;  %v9296_v41 = vld [vmem:[%s12129_s1 + $0x108] sm:$0xff]  }
  0x93   : > { %v9894_v44 = vpack.c.bf16 %v969_v42, %v968_v48  ;;  %v2399_v33 = vld [vmem:[#allocation2 + $0x99] sm:$0xff]  ;;  %v2341_v42 = vld [vmem:[#allocation2 + $0x90] sm:$0xff] }
  0x98   : > { %8632 = vmatmul.mubr.msk.bf16.gmra.mxu0 %vm226_vm0, %v9880_v35 }
  0x99   : > { %8672 = vmatmul.mubr.msk.bf16.gmra.mxu1 %vm226_vm0, %v9731_v51  ;;  %8635 = vmatprep.mubr.msk.bf16.mxu0 %vm226_vm0, %v9882_v36  ;;  %v970_v51 = vld [vmem:[#allocation2 + $0x10a] sm:$0xff] }
  0x9a   : > { %8675 = vmatprep.mubr.msk.bf16.mxu1 %vm226_vm0, %v9744_v61  ;;  %v972_v61 = vld [vmem:[#allocation2 + $0x122] sm:$0xff]  ;;  %v9904_v54 = vpack.c.bf16 %v971_v45, %v970_v51 }
  0x9b   : > { %v9906_v55 = vpack.c.bf16 %v973_v46, %v972_v61  ;;  %v2368_v61 = vpack.c.bf16 %v2340_v30, %v2339_v31  ;;  %v2408_v30 = vld [vmem:[#allocation2 + $0x109] sm:$0xff] }
  0xa0   : > { %8636 = vmatmul.mubr.msk.bf16.gmra.mxu0 %vm226_vm0, %v9892_v43 }
  0xa1   : > { %8676 = vmatmul.mubr.msk.bf16.gmra.mxu1 %vm226_vm0, %v9748_v0  ;;  %8639 = vmatprep.mubr.msk.bf16.mxu0 %vm226_vm0, %v9894_v44  ;;  %v974_v0 = vld [vmem:[#allocation2 + $0x13a] sm:$0xff] }
  0xa2   : > { %8679 = vmatprep.mubr.msk.bf16.mxu1 %vm226_vm0, %v9766_v14  ;;  %v976_v14 = vld [vmem:[#allocation2 + $0x152] sm:$0xff]  ;;  %v993_v58 = vpack.c.bf16 %v975_v56, %v974_v0  ;;  %v9297_v56 = vld [vmem:[%s12129_s1 + $0x100] sm:$0xff]  }
  0xa3   : > { %v994_v4 = vpack.c.bf16 %v977_v57, %v976_v14 }
  0xa8   : > { %8640 = vmatmul.mubr.msk.bf16.gmra.mxu0 %vm226_vm0, %v9904_v54 }
  0xa9   : > { %8680 = vmatmul.mubr.msk.bf16.gmra.mxu1 %vm226_vm0, %v9771_v17  ;;  %8643 = vmatprep.mubr.msk.bf16.mxu0 %vm226_vm0, %v9906_v55  ;;  %v978_v17 = vld [vmem:[#allocation2 + $0x16a] sm:$0xff] }
  0xaa   : > { %8683 = vmatprep.mubr.msk.bf16.mxu1 %vm226_vm0, %v9785_v37  ;;  %v995_v62 = vpack.c.bf16 %v979_v5, %v978_v17  ;;  %v9922_v37 = vpack.c.bf16 %v1422_v8, %v1421_v6  ;;  %v2343_v17 = vld [vmem:[#allocation2 + $0xa8] sm:$0xff]  ;;  %v2344_v6 = vld [vmem:[#allocation2 + $0xb0] sm:$0xff] }
  0xab   : > { %v2402_v8 = vld [vmem:[#allocation2 + $0xc1] sm:$0xff] }
  0xb0   : > { %8644 = vmatmul.mubr.msk.bf16.gmra.mxu0 %vm226_vm0, %v993_v58 }
  0xb1   : > { %8684 = vmatmul.mubr.msk.bf16.gmra.mxu1 %vm226_vm0, %v9789_v39  ;;  %8647 = vmatprep.mubr.msk.bf16.mxu0 %vm226_vm0, %v994_v4  ;;  %v9287_v39 = vld [vmem:[%s12129_s1 + $0xf0] sm:$0xff]  }
  0xb2   : > { %8687 = vmatprep.mubr.msk.bf16.mxu1 %vm226_vm0, %v9801_v47  ;;  %v9291_v47 = vld [vmem:[%s12129_s1 + $0xd0] sm:$0xff]  }
  0xb8   : > { %8648 = vmatmul.mubr.msk.bf16.gmra.mxu0 %vm226_vm0, %v995_v62 }
  0xb9   : > { %8688 = vmatmul.mubr.msk.bf16.gmra.mxu1 %vm226_vm0, %v9922_v37  ;;  %8699 = vmatprep.mubr.msk.bf16.mxu0 %vm226_vm0, %v9652_v2  ;;  %v9288_v2 = vld [vmem:[%s12129_s1 + $0xe8] sm:$0xff]  }
  0xba   : > { %8739 = vmatprep.mubr.msk.bf16.mxu1 %vm226_vm0, %v9812_v59  ;;  %v9293_v59 = vld [vmem:[%s12129_s1 + $0xc0] sm:$0xff]  }
  0xc0   : > { %8700 = vmatmul.mubr.msk.bf16.vlgmr.msra.gmra.mxu0 %vm226_vm0, %v9663_v7  ;;  %v9292_v7 = vld [vmem:[%s12129_s1 + $0xc8] sm:$0xff]  }
  0xc1   : > { %8740 = vmatmul.mubr.msk.bf16.vlgmr.msra.gmra.mxu1 %vm226_vm0, %v9814_v60  ;;  %8772 = vmatpush3.bf16.msra.mxu0 %v9857_v25  ;;  %v2367_v25 = vpack.c.bf16 %v2338_v18, %v2337_v49 }
  0xc2   : > { %8703 = vmatprep.mubr.msk.bf16.mxu0 %vm226_vm0, %v9680_v19  ;;  %8743 = vmatprep.mubr.msk.bf16.mxu1 %vm226_vm0, %v9838_v13  ;;  %v9289_v19 = vld [vmem:[%s12129_s1 + $0xe0] sm:$0xff]   ;;  %v2336_v13 = vld [vmem:[#allocation2 + $0x50] sm:$0xff] }
  0xc3   : > { %8773 = vmatprep.subr.bf16.mxu0 %v9287_v39  ;;  %8812 = vmatpush3.bf16.msra.mxu1 %v9864_v26  ;;  %v2366_v9 = vpack.c.bf16 %v2336_v13, %v2335_v12  ;;  %v9295_v26 = vld [vmem:[%s12129_s1 + $0x110] sm:$0xff]   ;;  %v2407_v12 = vld [vmem:[#allocation2 + $0xf9] sm:$0xff] }
  0xc4   : > { %8813 = vmatprep.subr.bf16.mxu1 %v9291_v47 }
  0xc5   : > { %8774 = vmatpush3.bf16.msra.mxu0 %v9287_v39 }
  0xc6   : > { %8775 = vmatprep.subr.bf16.mxu0 %v9288_v2 }
  0xc7   : > { %8814 = vmatpush3.bf16.msra.mxu1 %v9291_v47  ;;  %v2345_v47 = vld [vmem:[#allocation2 + $0xc0] sm:$0xff] }
  0xc8   : > { %8704 = vmatmul.mubr.msk.bf16.gmra.mxu0 %vm226_vm0, %v9684_v21  ;;  %8815 = vmatprep.subr.bf16.mxu1 %v9292_v7  ;;  %v9294_v21 = vld [vmem:[%s12129_s1 + $0x118] sm:$0xff]  }
  0xc9   : > { %8744 = vmatmul.mubr.msk.bf16.gmra.mxu1 %vm226_vm0, %v9840_v15  ;;  %8707 = vmatprep.mubr.msk.bf16.mxu0 %vm226_vm0, %v9699_v32  ;;  %v1364_v32 = vld [vmem:[#allocation2 + $0x180] sm:$0xff] }
  0xca   : > { %8747 = vmatprep.mubr.msk.bf16.mxu1 %vm226_vm0, %v9866_v20  ;;  %8776 = vmatpush3.bf16.msra.mxu0 %v9288_v2  ;;  %v2394_v15 = vld [vmem:[#allocation2 + $0x61] sm:$0xff] }
  0xcb   : > { %8777 = vmatprep.subr.bf16.mxu0 %v9289_v19  ;;  %8816 = vmatpush3.bf16.msra.mxu1 %v9292_v7  ;;  %v2424_v23 = vpack.c.bf16 %v2395_v3, %v2394_v15  ;;  %v2346_v2 = vld [vmem:[#allocation2 + $0xc8] sm:$0xff]  ;;  %v2349_v15 = vld [vmem:[#allocation2 + $0xf0] sm:$0xff]  ;;  %v2350_v3 = vld [vmem:[#allocation2 + $0xf8] sm:$0xff] }
  0xcc   : > { %8817 = vmatprep.subr.bf16.mxu1 %v9293_v59 }
  0xce   : > { %8778 = vmatpush3.bf16.msra.mxu0 %v9289_v19 }
  0xcf   : > { %8818 = vmatpush3.bf16.msra.mxu1 %v9293_v59  ;;  %8851 = vmatprep.subr.bf16.mxu0 %v9294_v21 }
  0xd0   : > { %8708 = vmatmul.mubr.msk.bf16.gmra.mxu0 %vm226_vm0, %v9703_v34  ;;  %v1365_v34 = vld [vmem:[#allocation2 + $0x188] sm:$0xff] }
  0xd1   : > { %8748 = vmatmul.mubr.msk.bf16.gmra.mxu1 %vm226_vm0, %v9868_v27  ;;  %8711 = vmatprep.mubr.msk.bf16.mxu0 %vm226_vm0, %v9729_v50  ;;  %v1944_v50 = vld [vmem:[#allocation2 + $0x182] sm:$0xff]  ;;  %v2396_v27 = vld [vmem:[#allocation2 + $0x79] sm:$0xff] }
  0xd2   : > { %8751 = vmatprep.mubr.msk.bf16.mxu1 %vm226_vm0, %v9880_v35  ;;  %v2425_v51 = vpack.c.bf16 %v2397_v29, %v2396_v27 }
  0xd8   : > { %8712 = vmatmul.mubr.msk.bf16.gmra.mxu0 %vm226_vm0, %v9733_v52  ;;  %v1945_v52 = vld [vmem:[#allocation2 + $0x18a] sm:$0xff] }
  0xd9   : > { %8752 = vmatmul.mubr.msk.bf16.gmra.mxu1 %vm226_vm0, %v9882_v36  ;;  %8715 = vmatprep.mubr.msk.bf16.mxu0 %vm226_vm0, %v9746_v63  ;;  %v2390_v63 = vld [vmem:[#allocation2 + $0x31] sm:$0xff]  ;;  %v10009_v60 = vpack.c.bf16 %v1945_v52, %v1944_v50  ;;  %v2371_v50 = vpack.c.bf16 %v2346_v2, %v2345_v47 }
  0xda   : > { %8755 = vmatprep.mubr.msk.bf16.mxu1 %vm226_vm0, %v9892_v43  ;;  %v2398_v36 = vld [vmem:[#allocation2 + $0x91] sm:$0xff] }
  0xdb   : > { %12155 = vst [vmem:[#allocation6_spill] sm:$0xff] %v10009_v60  ;;  %v2342_v43 = vld [vmem:[#allocation2 + $0x98] sm:$0xff]  ;;  %v2426_v46 = vpack.c.bf16 %v2399_v33, %v2398_v36  ;;  %v2351_v33 = vld [vmem:[#allocation2 + $0x108] sm:$0xff] }
  0xdc   : > { %v2409_v36 = vld [vmem:[#allocation2 + $0x111] sm:$0xff] }
  0xe0   : > { %8716 = vmatmul.mubr.msk.bf16.gmra.mxu0 %vm226_vm0, %v9750_v1  ;;  %v2391_v1 = vld [vmem:[#allocation2 + $0x39] sm:$0xff] }
  0xe1   : > { %8756 = vmatmul.mubr.msk.bf16.gmra.mxu1 %vm226_vm0, %v9894_v44  ;;  %8719 = vmatprep.mubr.msk.bf16.mxu0 %vm226_vm0, %v9769_v16  ;;  %v2333_v16 = vld [vmem:[#allocation2 + $0x30] sm:$0xff] }
  0xe2   : > { %8759 = vmatprep.mubr.msk.bf16.mxu1 %vm226_vm0, %v9904_v54 }
  0xe8   : > { %8720 = vmatmul.mubr.msk.bf16.gmra.mxu0 %vm226_vm0, %v9773_v24  ;;  %v2334_v24 = vld [vmem:[#allocation2 + $0x38] sm:$0xff] }
  0xe9   : > { %8760 = vmatmul.mubr.msk.bf16.gmra.mxu1 %vm226_vm0, %v9906_v55  ;;  %8723 = vmatprep.mubr.msk.bf16.mxu0 %vm226_vm0, %v9787_v38  ;;  %v10007_v38 = vpack.c.bf16 %v1365_v34, %v1364_v32  ;;  %v2365_v10 = vpack.c.bf16 %v2334_v24, %v2333_v16  ;;  %v2369_v55 = vpack.c.bf16 %v2342_v43, %v2341_v42  ;;  %v2404_v16 = vld [vmem:[#allocation2 + $0xd9] sm:$0xff]  ;;  %v2405_v24 = vld [vmem:[#allocation2 + $0xe1] sm:$0xff]  ;;  %v2352_v42 = vld [vmem:[#allocation2 + $0x110] sm:$0xff] }
  0xea   : > { %8763 = vmatprep.mubr.msk.bf16.mxu1 %vm226_vm0, %v993_v58  ;;  %v2400_v58 = vld [vmem:[#allocation2 + $0xa9] sm:$0xff]  ;;  %v2429_v18 = vpack.c.bf16 %v2405_v24, %v2404_v16  ;;  %v2410_v43 = vld [vmem:[#allocation2 + $0x121] sm:$0xff] }
  0xeb   : > { %v2356_v24 = vld [vmem:[#allocation2 + $0x140] sm:$0xff] }
  0xf0   : > { %8724 = vmatmul.mubr.msk.bf16.gmra.mxu0 %vm226_vm0, %v9791_v40  ;;  %v2422_v40 = vpack.c.bf16 %v2391_v1, %v2390_v63 }
  0xf1   : > { %8764 = vmatmul.mubr.msk.bf16.gmra.mxu1 %vm226_vm0, %v994_v4  ;;  %8727 = vmatprep.mubr.msk.bf16.mxu0 %vm226_vm0, %v9803_v53  ;;  %v2392_v53 = vld [vmem:[#allocation2 + $0x49] sm:$0xff]  ;;  %v2401_v4 = vld [vmem:[#allocation2 + $0xb1] sm:$0xff] }
  0xf2   : > { %8767 = vmatprep.mubr.msk.bf16.mxu1 %vm226_vm0, %v995_v62  ;;  %v2423_v22 = vpack.c.bf16 %v2393_v11, %v2392_v53  ;;  %v2403_v62 = vld [vmem:[#allocation2 + $0xc9] sm:$0xff]  ;;  %v2427_v19 = vpack.c.bf16 %v2401_v4, %v2400_v58  ;;  %v2348_v53 = vld [vmem:[#allocation2 + $0xe0] sm:$0xff]  ;;  %v2406_v11 = vld [vmem:[#allocation2 + $0xf1] sm:$0xff]  ;;  %v2431_v58 = vpack.c.bf16 %v2409_v36, %v2408_v30 }
  0xf3   : > { %v2428_v32 = vpack.c.bf16 %v2403_v62, %v2402_v8 }
  0xf8   : > { %8728 = vmatmul.mubr.msk.bf16.gmra.mxu0 %vm226_vm0, %v10007_v38 }
  0xf9   : > { %8768 = vmatmul.mubr.msk.bf16.gmra.mxu1 %vm226_vm0, %v10009_v60  ;;  %8779 = vmatprep.mubr.msk.bf16.mxu0 %vm226_vm0, %v2422_v40  ;;  %v2347_v40 = vld [vmem:[#allocation2 + $0xd8] sm:$0xff] }
  0xfa   : > { %8819 = vmatprep.mubr.msk.bf16.mxu1 %vm226_vm0, %v2365_v10 }
 0x100   : > { %v10020_v20 = vpop.f32.mrf.mxu0  ;;  %8780 = vmatmul.mubr.msk.bf16.vlgmr.msra.gmra.mxu0 %vm226_vm0, %v2423_v22 }
 0x101   : > { %v10023_v28 = vpop.f32.mrf.mxu1  ;;  %8820 = vmatmul.mubr.msk.bf16.vlgmr.msra.gmra.mxu1 %vm226_vm0, %v2366_v9  ;;  %8852 = vmatpush3.bf16.msra.mxu0 %v9294_v21  ;;  %v2370_v21 = vpack.c.bf16 %v2344_v6, %v2343_v17  ;;  %v2372_v9 = vpack.c.bf16 %v2348_v53, %v2347_v40  ;;  %v2374_v17 = vpack.c.bf16 %v2352_v42, %v2351_v33  ;;  %v2414_v40 = vld [vmem:[#allocation2 + $0x151] sm:$0xff]  ;;  %v2415_v53 = vld [vmem:[#allocation2 + $0x159] sm:$0xff] }
 0x102   : > { %v10026_v35 = vpop.f32.mrf.mxu0  ;;  %8783 = vmatprep.mubr.msk.bf16.mxu0 %vm226_vm0, %v2424_v23  ;;  %8823 = vmatprep.mubr.msk.bf16.mxu1 %vm226_vm0, %v2367_v25  ;;  %v2430_v23 = vpack.c.bf16 %v2407_v12, %v2406_v11  ;;  %v2357_v12 = vld [vmem:[#allocation2 + $0x150] sm:$0xff] }
 0x103   : > { %v10033_v48 = vpop.f32.mrf.mxu1  ;;  %8853 = vmatprep.subr.bf16.mxu0 %v9295_v26 }
 0x104   : > { %v10035_v44 = vpop.f32.mrf.mxu0 }
 0x105   : > { %v10037_v45 = vpop.f32.mrf.mxu1  ;;  %8854 = vmatpush3.bf16.msra.mxu0 %v9295_v26  ;;  %v2373_v26 = vpack.c.bf16 %v2350_v3, %v2349_v15  ;;  %v2358_v15 = vld [vmem:[#allocation2 + $0x158] sm:$0xff] }
 0x106   : > { %v10039_v54 = vpop.f32.mrf.mxu0  ;;  %8855 = vmatprep.subr.bf16.mxu0 %v9296_v41  ;;  %v2377_v36 = vpack.c.bf16 %v2358_v15, %v2357_v12  ;;  %v2420_v15 = vld [vmem:[#allocation2 + $0x199] sm:$0xff] }
 0x107   : > { %v10041_v0 = vpop.f32.mrf.mxu1 }
 0x108   : > { %v10046_v14 = vpop.f32.mrf.mxu0  ;;  %8784 = vmatmul.mubr.msk.bf16.gmra.mxu0 %vm226_vm0, %v2425_v51  ;;  %v2411_v51 = vld [vmem:[#allocation2 + $0x129] sm:$0xff] }
 0x109   : > { %v10049_v57 = vpop.f32.mrf.mxu1  ;;  %8824 = vmatmul.mubr.msk.bf16.gmra.mxu1 %vm226_vm0, %v2368_v61  ;;  %8787 = vmatprep.mubr.msk.bf16.mxu0 %vm226_vm0, %v2426_v46  ;;  %v2353_v46 = vld [vmem:[#allocation2 + $0x120] sm:$0xff]  ;;  %v2432_v6 = vpack.c.bf16 %v2411_v51, %v2410_v43  ;;  %v2416_v51 = vld [vmem:[#allocation2 + $0x169] sm:$0xff] }
 0x10a   : > { %v10053_v5 = vpop.f32.mrf.mxu0  ;;  %8827 = vmatprep.mubr.msk.bf16.mxu1 %vm226_vm0, %v2369_v55  ;;  %8856 = vmatpush3.bf16.msra.mxu0 %v9296_v41  ;;  %v2354_v55 = vld [vmem:[#allocation2 + $0x128] sm:$0xff] }
 0x10b   : > { %v10056_v39 = vpop.f32.mrf.mxu1  ;;  %8857 = vmatprep.subr.bf16.mxu0 %v9297_v56  ;;  %v2375_v62 = vpack.c.bf16 %v2354_v55, %v2353_v46  ;;  %v2417_v46 = vld [vmem:[#allocation2 + $0x171] sm:$0xff] }
 0x10c   : > { %v10058_v7 = vpop.f32.mrf.mxu0 }
 0x10d   : > { %v10060_v59 = vpop.f32.mrf.mxu1 }
 0x10e   : > { %v10062_v34 = vpop.f32.mrf.mxu0  ;;  %8858 = vmatpush3.bf16.msra.mxu0 %v9297_v56 }
 0x10f   : > { %v10064_v52 = vpop.f32.mrf.mxu1 }
 0x110   : > { %v10066_v63 = vpop.f32.mrf.mxu0  ;;  %8788 = vmatmul.mubr.msk.bf16.gmra.mxu0 %vm226_vm0, %v2427_v19 }
 0x111   : > { %v10069_v1 = vpop.f32.mrf.mxu1  ;;  %8828 = vmatmul.mubr.msk.bf16.gmra.mxu1 %vm226_vm0, %v2370_v21  ;;  %8791 = vmatprep.mubr.msk.bf16.mxu0 %vm226_vm0, %v2428_v32  ;;  %v2412_v21 = vld [vmem:[#allocation2 + $0x139] sm:$0xff]  ;;  %v2413_v32 = vld [vmem:[#allocation2 + $0x141] sm:$0xff] }
 0x112   : > { %v10073_v10 = vpop.f32.mrf.mxu0  ;;  %8831 = vmatprep.mubr.msk.bf16.mxu1 %vm226_vm0, %v2371_v50  ;;  %v2355_v50 = vld [vmem:[#allocation2 + $0x138] sm:$0xff] }
 0x113   : > { %v10076_v13 = vpop.f32.mrf.mxu1 }
 0x114   : > { %v10078_v49 = vpop.f32.mrf.mxu0 }
 0x115   : > { %v10080_v22 = vpop.f32.mrf.mxu1 }
 0x116   : > { %v10082_v25 = vpop.f32.mrf.mxu0 }
 0x117   : > { %v10084_v27 = vpop.f32.mrf.mxu1 }
 0x118   : > { %v10086_v29 = vpop.f32.mrf.mxu0  ;;  %8792 = vmatmul.mubr.msk.bf16.gmra.mxu0 %vm226_vm0, %v2429_v18  ;;  %v2433_v18 = vpack.c.bf16 %v2413_v32, %v2412_v21  ;;  %v2435_v21 = vpack.c.bf16 %v2417_v46, %v2416_v51  ;;  %v2913_v51 = vld [vmem:[#allocation2 + $0x32] sm:$0xff]  ;;  %v2914_v46 = vld [vmem:[#allocation2 + $0x3a] sm:$0xff] }
 0x119   : > { %v10089_v31 = vpop.f32.mrf.mxu1  ;;  %8832 = vmatmul.mubr.msk.bf16.gmra.mxu1 %vm226_vm0, %v2372_v9  ;;  %8795 = vmatprep.mubr.msk.bf16.mxu0 %vm226_vm0, %v2430_v23  ;;  %v2376_v23 = vpack.c.bf16 %v2356_v24, %v2355_v50 }
 0x11a   : > { %v10093_v41 = vpop.f32.mrf.mxu0  ;;  %8835 = vmatprep.mubr.msk.bf16.mxu1 %vm226_vm0, %v2373_v26  ;;  %v2434_v26 = vpack.c.bf16 %v2415_v53, %v2414_v40 }
 0x11b   : > { %v10096_v61 = vpop.f32.mrf.mxu1 }
 0x11c   : > { %v10098_v56 = vpop.f32.mrf.mxu0 }
 0x11d   : > { %v10100_v4 = vpop.f32.mrf.mxu1 }
 0x11e   : > { %v10102_v8 = vpop.f32.mrf.mxu0 }
 0x11f   : > { %v10104_v47 = vpop.f32.mrf.mxu1 }
 0x120   : > { %v10106_v2 = vpop.f32.mrf.mxu0  ;;  %8796 = vmatmul.mubr.msk.bf16.gmra.mxu0 %vm226_vm0, %v2431_v58  ;;  %v2359_v58 = vld [vmem:[#allocation2 + $0x168] sm:$0xff] }
 0x121   : > { %v10109_v19 = vpop.f32.mrf.mxu1  ;;  %8836 = vmatmul.mubr.msk.bf16.gmra.mxu1 %vm226_vm0, %v2374_v17  ;;  %8799 = vmatprep.mubr.msk.bf16.mxu0 %vm226_vm0, %v2432_v6  ;;  %v2360_v17 = vld [vmem:[#allocation2 + $0x170] sm:$0xff] }
 0x122   : > { %v10113_v16 = vpop.f32.mrf.mxu0  ;;  %8839 = vmatprep.mubr.msk.bf16.mxu1 %vm226_vm0, %v2375_v62  ;;  %v2378_v50 = vpack.c.bf16 %v2360_v17, %v2359_v58 }
 0x123   : > { %v10116_v11 = vpop.f32.mrf.mxu1 }
 0x124   : > { %v10118_v3 = vpop.f32.mrf.mxu0 }
 0x125   : > { %v10120_v9 = vpop.f32.mrf.mxu1 }
 0x126   : > { %v10122_v30 = vpop.f32.mrf.mxu0 }
 0x127   : > { %v10124_v33 = vpop.f32.mrf.mxu1 }
 0x128   : > { %v10126_v42 = vpop.f32.mrf.mxu0  ;;  %8800 = vmatmul.mubr.msk.bf16.gmra.mxu0 %vm226_vm0, %v2433_v18  ;;  %v2421_v18 = vld [vmem:[#allocation2 + $0x1a1] sm:$0xff] }
 0x129   : > { %v10129_v43 = vpop.f32.mrf.mxu1  ;;  %8840 = vmatmul.mubr.msk.bf16.gmra.mxu1 %vm226_vm0, %v2376_v23  ;;  %8803 = vmatprep.mubr.msk.bf16.mxu0 %vm226_vm0, %v2434_v26  ;;  %v2363_v23 = vld [vmem:[#allocation2 + $0x198] sm:$0xff] }
 0x12a   : > { %v10133_v55 = vpop.f32.mrf.mxu0  ;;  %8843 = vmatprep.mubr.msk.bf16.mxu1 %vm226_vm0, %v2377_v36  ;;  %v2364_v36 = vld [vmem:[#allocation2 + $0x1a0] sm:$0xff] }
 0x12b   : > { %v10136_v6 = vpop.f32.mrf.mxu1  ;;  %v2380_v60 = vpack.c.bf16 %v2364_v36, %v2363_v23  ;;  %v2917_v23 = vld [vmem:[#allocation2 + $0x62] sm:$0xff]  ;;  %v2918_v36 = vld [vmem:[#allocation2 + $0x6a] sm:$0xff] }
 0x12c   : > { %v10138_v62 = vpop.f32.mrf.mxu0 }
 0x12d   : > { %v10140_v32 = vpop.f32.mrf.mxu1 }
 0x12e   : > { %v10142_v24 = vpop.f32.mrf.mxu0 }
 0x12f   : > { %v10144_v40 = vpop.f32.mrf.mxu1 }
 0x130   : > { %v10146_v53 = vpop.f32.mrf.mxu0  ;;  %8804 = vmatmul.mubr.msk.bf16.gmra.mxu0 %vm226_vm0, %v2435_v21  ;;  %v2437_v21 = vpack.c.bf16 %v2421_v18, %v2420_v15  ;;  %v2916_v15 = vld [vmem:[#allocation2 + $0x52] sm:$0xff] }
 0x131   : > { %12156 = vst [vmem:[#allocation7_spill] sm:$0xff] %v10146_v53  ;;  %v10149_v12 = vpop.f32.mrf.mxu1  ;;  %8844 = vmatmul.mubr.msk.bf16.gmra.mxu1 %vm226_vm0, %v2378_v50  ;;  %8807 = vmatprep.mubr.msk.bf16.mxu0 %vm226_vm0, %v9922_v37  ;;  %v2945_v37 = vpack.c.bf16 %v2914_v46, %v2913_v51 }
 0x132   : > { %12157 = vst [vmem:[#allocation8_spill] sm:$0xff] %v10149_v12  ;;  %v10154_v26 = vpop.f32.mrf.mxu0  ;;  %8847 = vmatprep.mubr.msk.bf16.mxu1 %vm226_vm0, %v10007_v38 }
 0x133   : > { %12158 = vst [vmem:[#allocation9_spill] sm:$0xff] %v10154_v26  ;;  %v10158_v58 = vpop.f32.mrf.mxu1 }
 0x134   : > { %v10160_v17 = vpop.f32.mrf.mxu0 }
 0x135   : > { %12159 = vst [vmem:[#allocation10_spill] sm:$0xff] %v10160_v17  ;;  %v10162_v50 = vpop.f32.mrf.mxu1  ;;  %v2915_v17 = vld [vmem:[#allocation2 + $0x4a] sm:$0xff] }
 0x136   : > { %12160 = vst [vmem:[#allocation11_spill] sm:$0xff] %v10162_v50  ;;  %v10164_v12 = vpop.f32.mrf.mxu0 }
 0x137   : > { %12161 = vst [vmem:[#allocation12_spill] sm:$0xff] %v10164_v12  ;;  %v10166_v53 = vpop.f32.mrf.mxu1 }
 0x138   : > { %12162 = vst [vmem:[#allocation13_spill] sm:$0xff] %v10166_v53  ;;  %v10168_v26 = vpop.f32.mrf.mxu0  ;;  %8808 = vmatmul.mubr.msk.bf16.gmra.mxu0 %vm226_vm0, %v2437_v21  ;;  %v2946_v53 = vpack.c.bf16 %v2916_v15, %v2915_v17  ;;  %v2947_v21 = vpack.c.bf16 %v2918_v36, %v2917_v23  ;;  %v2919_v17 = vld [vmem:[#allocation2 + $0x7a] sm:$0xff]  ;;  %v2920_v15 = vld [vmem:[#allocation2 + $0x82] sm:$0xff]  ;;  %v2921_v36 = vld [vmem:[#allocation2 + $0x92] sm:$0xff] }
 0x139   : > { %12163 = vst [vmem:[#allocation14_spill] sm:$0xff] %v10168_v26  ;;  %v10171_v38 = vpop.f32.mrf.mxu1  ;;  %8848 = vmatmul.mubr.msk.bf16.gmra.mxu1 %vm226_vm0, %v2380_v60  ;;  %8859 = vmatprep.mubr.msk.bf16.mxu0 %vm226_vm0, %v2945_v37  ;;  %v830_v60 = vadd.f32 %v10023_v28, %v10020_v20  ;;  %v833_v20 = vadd.f32 %v10037_v45, %v10035_v44 }
 0x13a   : > { %12164 = vst [vmem:[#allocation15_spill] sm:$0xff] %v10171_v38  ;;  %v10175_v18 = vpop.f32.mrf.mxu0  ;;  %v846_v44 = vadd.f32 %v10049_v57, %v10046_v14  ;;  %v2924_v14 = vld [vmem:[#allocation2 + $0xb2] sm:$0xff] }
 0x13b   : > { %12165 = vst [vmem:[#allocation16_spill] sm:$0xff] %v10175_v18  ;;  %v10177_v51 = vpop.f32.mrf.mxu1  ;;  %v822_v18 = vadd.f32 %v10033_v48, %v10026_v35  ;;  %v2948_v35 = vpack.c.bf16 %v2920_v15, %v2919_v17  ;;  %v825_v48 = vadd.f32 %v10041_v0, %v10039_v54  ;;  %v838_v54 = vadd.f32 %v10056_v39, %v10053_v5  ;;  %v2925_v17 = vld [vmem:[#allocation2 + $0xc2] sm:$0xff] }
 0x13c   : > { %12166 = vst [vmem:[#allocation17_spill] sm:$0xff] %v10177_v51  ;;  %v10179_v46 = vpop.f32.mrf.mxu0  ;;  %v849_v15 = vadd.f32 %v10060_v59, %v10058_v7  ;;  %v862_v7 = vadd.f32 %v10069_v1, %v10066_v63  ;;  %v2928_v63 = vld [vmem:[#allocation2 + $0xe2] sm:$0xff] }
 0x13d   : > { %v10181_v26 = vpop.f32.mrf.mxu1 }
 0x13e   : > { %v10183_v12 = vpop.f32.mrf.mxu0 }
 0x13f   : > { %12167 = vst [vmem:[#allocation18_spill] sm:$0xff] %v10183_v12  ;;  %v10187_v37 = vpop.f32.mrf.mxu1  ;;  %v2922_v12 = vld [vmem:[#allocation2 + $0x9a] sm:$0xff] }
 0x140   : > { %12168 = vst [vmem:[#allocation19_spill] sm:$0xff] %v10187_v37  ;;  %v8621_v38 = vpop.f32.mrf.mxu0  ;;  %8860 = vmatmul.mubr.msk.bf16.vlgmr.msra.gmra.mxu0 %vm226_vm0, %v2946_v53 }
 0x141   : > { %v1240_v51 = vadd.f32 %v8621_v38, %v830_v60  ;;  %v10192_v50 = vpop.f32.mrf.mxu1  ;;  %8863 = vmatprep.mubr.msk.bf16.mxu0 %vm226_vm0, %v2947_v21  ;;  %v2949_v60 = vpack.c.bf16 %v2922_v12, %v2921_v36  ;;  %v2923_v12 = vld [vmem:[#allocation2 + $0xaa] sm:$0xff] }
 0x142   : > { %12169 = vst [vmem:[#allocation20_spill] sm:$0xff] %v10192_v50  ;;  %v1111_v23 = vpop.f32.mrf.mxu0  ;;  %v2950_v39 = vpack.c.bf16 %v2924_v14, %v2923_v12  ;;  %v865_v12 = vadd.f32 %v10080_v22, %v10078_v49  ;;  %v878_v49 = vadd.f32 %v10089_v31, %v10086_v29  ;;  %v2932_v29 = vld [vmem:[#allocation2 + $0x112] sm:$0xff] }
 0x143   : > { %1272 = vst.msk [vmem:[#allocation4 + $0x10] sm:$0xff] %vm226_vm0, %v1240_v51  ;;  %v1238_v28 = vadd.f32 %v1111_v23, %v822_v18  ;;  %v10198_v53 = vpop.f32.mrf.mxu1 }
 0x144   : > { %v8622_v37 = vpop.f32.mrf.mxu0 }
 0x145   : > { %1270 = vst.msk [vmem:[#allocation4] sm:$0xff] %vm226_vm0, %v1238_v28  ;;  %v1241_v38 = vadd.f32 %v8622_v37, %v833_v20  ;;  %v10203_v21 = vpop.f32.mrf.mxu1  ;;  %v841_v20 = vadd.f32 %v10064_v52, %v10062_v34  ;;  %v854_v34 = vadd.f32 %v10076_v13, %v10073_v10 }
 0x146   : > { %v1114_v50 = vpop.f32.mrf.mxu0 }
 0x147   : > { %1273 = vst.msk [vmem:[#allocation4 + $0x18] sm:$0xff] %vm226_vm0, %v1241_v38  ;;  %v1239_v45 = vadd.f32 %v1114_v50, %v825_v48  ;;  %v10208_v18 = vpop.f32.mrf.mxu1  ;;  %v2926_v50 = vld [vmem:[#allocation2 + $0xca] sm:$0xff] }
 0x148   : > { %v8625_v51 = vpop.f32.mrf.mxu0  ;;  %8864 = vmatmul.mubr.msk.bf16.gmra.mxu0 %vm226_vm0, %v2948_v35  ;;  %v2951_v48 = vpack.c.bf16 %v2926_v50, %v2925_v17  ;;  %v857_v17 = vadd.f32 %v10084_v27, %v10082_v25  ;;  %v870_v25 = vadd.f32 %v10096_v61, %v10093_v41 }
 0x149   : > { %1271 = vst.msk [vmem:[#allocation4 + $0x8] sm:$0xff] %vm226_vm0, %v1239_v45  ;;  %v1244_v0 = vadd.f32 %v8625_v51, %v846_v44  ;;  %v10214_v37 = vpop.f32.mrf.mxu1  ;;  %8867 = vmatprep.mubr.msk.bf16.mxu0 %vm226_vm0, %v2949_v60  ;;  %v2927_v51 = vld [vmem:[#allocation2 + $0xda] sm:$0xff] }
 0x14a   : > { %v1127_v57 = vpop.f32.mrf.mxu0  ;;  %v2952_v13 = vpack.c.bf16 %v2928_v63, %v2927_v51  ;;  %v873_v51 = vadd.f32 %v10104_v47, %v10102_v8  ;;  %v886_v8 = vadd.f32 %v10116_v11, %v10113_v16 }
 0x14b   : > { %1276 = vst.msk [vmem:[#allocation4 + $0x30] sm:$0xff] %vm226_vm0, %v1244_v0  ;;  %v1242_v23 = vadd.f32 %v1127_v57, %v838_v54  ;;  %v10220_v36 = vpop.f32.mrf.mxu1  ;;  %v2929_v54 = vld [vmem:[#allocation2 + $0xf2] sm:$0xff]  ;;  %v2930_v0 = vld [vmem:[#allocation2 + $0xfa] sm:$0xff] }
 0x14c   : > { %v8626_v5 = vpop.f32.mrf.mxu0 }
 0x14d   : > { %1274 = vst.msk [vmem:[#allocation4 + $0x20] sm:$0xff] %vm226_vm0, %v1242_v23  ;;  %v1245_v28 = vadd.f32 %v8626_v5, %v849_v15  ;;  %v10225_v35 = vpop.f32.mrf.mxu1  ;;  %v2953_v23 = vpack.c.bf16 %v2930_v0, %v2929_v54 }
 0x14e   : > { %v1130_v38 = vpop.f32.mrf.mxu0 }
 0x14f   : > { %1277 = vst.msk [vmem:[#allocation4 + $0x38] sm:$0xff] %vm226_vm0, %v1245_v28  ;;  %v1243_v59 = vadd.f32 %v1130_v38, %v841_v20  ;;  %v10230_v60 = vpop.f32.mrf.mxu1  ;;  %v2933_v38 = vld [vmem:[#allocation2 + $0x122] sm:$0xff] }
 0x150   : > { %v8629_v44 = vpop.f32.mrf.mxu0  ;;  %8868 = vmatmul.mubr.msk.bf16.gmra.mxu0 %vm226_vm0, %v2950_v39 }
 0x151   : > { %1275 = vst.msk [vmem:[#allocation4 + $0x28] sm:$0xff] %vm226_vm0, %v1243_v59  ;;  %v1248_v52 = vadd.f32 %v8629_v44, %v862_v7  ;;  %v10236_v45 = vpop.f32.mrf.mxu1  ;;  %8871 = vmatprep.mubr.msk.bf16.mxu0 %vm226_vm0, %v2951_v48  ;;  %v2931_v48 = vld [vmem:[#allocation2 + $0x10a] sm:$0xff]  ;;  %v9298_v59 = vld [vmem:[%s12131_s3 + $0x38] sm:$0xff]   ;;  %v881_v44 = vadd.f32 %v10100_v4, %v10098_v56  ;;  %v894_v56 = vadd.f32 %v10109_v19, %v10106_v2  ;;  %v2936_v2 = vld [vmem:[#allocation2 + $0x142] sm:$0xff] }
 0x152   : > { %v1143_v1 = vpop.f32.mrf.mxu0  ;;  %v2934_v7 = vld [vmem:[#allocation2 + $0x12a] sm:$0xff]  ;;  %8891 = vmatprep.subr.bf16.mxu1 %v9298_v59 }
 0x153   : > { %1280 = vst.msk [vmem:[#allocation4 + $0x50] sm:$0xff] %vm226_vm0, %v1248_v52  ;;  %v1246_v14 = vadd.f32 %v1143_v1, %v854_v34  ;;  %v10242_v57 = vpop.f32.mrf.mxu1  ;;  %v2954_v52 = vpack.c.bf16 %v2932_v29, %v2931_v48  ;;  %v2955_v54 = vpack.c.bf16 %v2934_v7, %v2933_v38  ;;  %8892 = vmatpush3.bf16.msra.mxu1 %v9298_v59  ;;  %v2939_v7 = vld [vmem:[#allocation2 + $0x16a] sm:$0xff] }
 0x154   : > { %v8630_v10 = vpop.f32.mrf.mxu0  ;;  %v9299_v59 = vld [vmem:[%s12131_s3 + $0x30] sm:$0xff]  }
 0x155   : > { %1278 = vst.msk [vmem:[#allocation4 + $0x40] sm:$0xff] %vm226_vm0, %v1246_v14  ;;  %v1249_v50 = vadd.f32 %v8630_v10, %v865_v12  ;;  %v10247_v15 = vpop.f32.mrf.mxu1  ;;  %8893 = vmatprep.subr.bf16.mxu1 %v9299_v59 }
 0x156   : > { %v1146_v5 = vpop.f32.mrf.mxu0 }
 0x157   : > { %1281 = vst.msk [vmem:[#allocation4 + $0x58] sm:$0xff] %vm226_vm0, %v1249_v50  ;;  %v1247_v22 = vadd.f32 %v1146_v5, %v857_v17  ;;  %v10252_v39 = vpop.f32.mrf.mxu1  ;;  %v2937_v17 = vld [vmem:[#allocation2 + $0x152] sm:$0xff]  ;;  %v2938_v50 = vld [vmem:[#allocation2 + $0x15a] sm:$0xff]  ;;  %8894 = vmatpush3.bf16.msra.mxu1 %v9299_v59 }
 0x158   : > { %v8633_v20 = vpop.f32.mrf.mxu0  ;;  %8872 = vmatmul.mubr.msk.bf16.gmra.mxu0 %vm226_vm0, %v2952_v13  ;;  %v2935_v13 = vld [vmem:[#allocation2 + $0x13a] sm:$0xff] }
 0x159   : > { %1279 = vst.msk [vmem:[#allocation4 + $0x48] sm:$0xff] %vm226_vm0, %v1247_v22  ;;  %v1252_v27 = vadd.f32 %v8633_v20, %v878_v49  ;;  %v10258_v28 = vpop.f32.mrf.mxu1  ;;  %8875 = vmatprep.mubr.msk.bf16.mxu0 %vm226_vm0, %v2953_v23  ;;  %v897_v23 = vadd.f32 %v10120_v9, %v10118_v3  ;;  %v2956_v11 = vpack.c.bf16 %v2936_v2, %v2935_v13  ;;  %v12173_v13 = vld [vmem:[#allocation6_spill] sm:$0xff] }
 0x15a   : > { %v1159_v31 = vpop.f32.mrf.mxu0  ;;  %v889_v22 = vadd.f32 %v10124_v33, %v10122_v30  ;;  %v910_v3 = vadd.f32 %v10129_v43, %v10126_v42  ;;  %v902_v30 = vadd.f32 %v10136_v6, %v10133_v55  ;;  %v2940_v42 = vld [vmem:[#allocation2 + $0x172] sm:$0xff]  ;;  %v2943_v2 = vld [vmem:[#allocation2 + $0x19a] sm:$0xff] }
 0x15b   : > { %1284 = vst.msk [vmem:[#allocation4 + $0x70] sm:$0xff] %vm226_vm0, %v1252_v27  ;;  %v1250_v41 = vadd.f32 %v1159_v31, %v870_v25  ;;  %v10267_v61 = vpop.f32.mrf.mxu1  ;;  %v2957_v27 = vpack.c.bf16 %v2938_v50, %v2937_v17  ;;  %v12174_v50 = vld [vmem:[#allocation10_spill] sm:$0xff] }
 0x15c   : > { %v8634_v34 = vpop.f32.mrf.mxu0 }
 0x15d   : > { %1282 = vst.msk [vmem:[#allocation4 + $0x60] sm:$0xff] %vm226_vm0, %v1250_v41  ;;  %v1253_v63 = vadd.f32 %v8634_v34, %v881_v44  ;;  %v10272_v1 = vpop.f32.mrf.mxu1  ;;  %v913_v44 = vadd.f32 %v10140_v32, %v10138_v62  ;;  %v2958_v34 = vpack.c.bf16 %v2940_v42, %v2939_v7  ;;  %v12171_v62 = vld [vmem:[#allocation8_spill] sm:$0xff] }
 0x15e   : > { %v1162_v0 = vpop.f32.mrf.mxu0 }
 0x15f   : > { %1285 = vst.msk [vmem:[#allocation4 + $0x78] sm:$0xff] %vm226_vm0, %v1253_v63  ;;  %v1251_v4 = vadd.f32 %v1162_v0, %v873_v51  ;;  %v10277_v12 = vpop.f32.mrf.mxu1  ;;  %v12170_v0 = vld [vmem:[#allocation7_spill] sm:$0xff] }
 0x160   : > { %v8637_v14 = vpop.f32.mrf.mxu0  ;;  %8876 = vmatmul.mubr.msk.bf16.gmra.mxu0 %vm226_vm0, %v2954_v52  ;;  %v905_v52 = vadd.f32 %v10144_v40, %v10142_v24  ;;  %v926_v32 = vadd.f32 %v12171_v62, %v12170_v0  ;;  %v945_v0 = vadd.f32 %v10181_v26, %v10179_v46 }
 0x161   : > { %1283 = vst.msk [vmem:[#allocation4 + $0x68] sm:$0xff] %vm226_vm0, %v1251_v4  ;;  %v1256_v47 = vadd.f32 %v8637_v14, %v894_v56  ;;  %v10283_v10 = vpop.f32.mrf.mxu1  ;;  %8879 = vmatprep.mubr.msk.bf16.mxu0 %vm226_vm0, %v2955_v54 }
 0x162   : > { %v1175_v19 = vpop.f32.mrf.mxu0 }
 0x163   : > { %1288 = vst.msk [vmem:[#allocation4 + $0x90] sm:$0xff] %vm226_vm0, %v1256_v47  ;;  %v1254_v5 = vadd.f32 %v1175_v19, %v886_v8  ;;  %v10289_v49 = vpop.f32.mrf.mxu1  ;;  %v12172_v8 = vld [vmem:[#allocation9_spill] sm:$0xff]  ;;  %v2944_v19 = vld [vmem:[#allocation2 + $0x1a2] sm:$0xff] }
 0x164   : > { %v8638_v16 = vpop.f32.mrf.mxu0  ;;  %v918_v24 = vadd.f32 %v10158_v58, %v12172_v8  ;;  %v12183_v8 = vld [vmem:[#allocation19_spill] sm:$0xff] }
 0x165   : > { %1286 = vst.msk [vmem:[#allocation4 + $0x80] sm:$0xff] %vm226_vm0, %v1254_v5  ;;  %v1257_v20 = vadd.f32 %v8638_v16, %v897_v23  ;;  %v10294_v25 = vpop.f32.mrf.mxu1  ;;  %v12175_v23 = vld [vmem:[#allocation11_spill] sm:$0xff] }
 0x166   : > { %v1178_v48 = vpop.f32.mrf.mxu0  ;;  %v929_v5 = vadd.f32 %v12175_v23, %v12174_v50 }
 0x167   : > { %1289 = vst.msk [vmem:[#allocation4 + $0x98] sm:$0xff] %vm226_vm0, %v1257_v20  ;;  %v1255_v9 = vadd.f32 %v1178_v48, %v889_v22  ;;  %v10299_v29 = vpop.f32.mrf.mxu1  ;;  %v2960_v22 = vpack.c.bf16 %v2944_v19, %v2943_v2  ;;  %v12176_v20 = vld [vmem:[#allocation12_spill] sm:$0xff] }
 0x168   : > { %v8641_v31 = vpop.f32.mrf.mxu0  ;;  %8880 = vmatmul.mubr.msk.bf16.gmra.mxu0 %vm226_vm0, %v2956_v11 }
 0x169   : > { %1287 = vst.msk [vmem:[#allocation4 + $0x88] sm:$0xff] %vm226_vm0, %v1255_v9  ;;  %v1260_v33 = vadd.f32 %v8641_v31, %v910_v3  ;;  %v10305_v38 = vpop.f32.mrf.mxu1  ;;  %8883 = vmatprep.mubr.msk.bf16.mxu0 %vm226_vm0, %v2957_v27  ;;  %v12177_v27 = vld [vmem:[#allocation13_spill] sm:$0xff] }
 0x16a   : > { %v1191_v43 = vpop.f32.mrf.mxu0  ;;  %v921_v48 = vadd.f32 %v12177_v27, %v12176_v20  ;;  %v1304_v20 = vld [vmem:[#allocation4 + $0x10] sm:$0xff] }
 0x16b   : > { %1292 = vst.msk [vmem:[#allocation4 + $0xb0] sm:$0xff] %vm226_vm0, %v1260_v33  ;;  %v1258_v55 = vadd.f32 %v1191_v43, %v902_v30  ;;  %v10314_v6 = vpop.f32.mrf.mxu1  ;;  %v12178_v30 = vld [vmem:[#allocation14_spill] sm:$0xff]  ;;  %v12179_v33 = vld [vmem:[#allocation15_spill] sm:$0xff] }
 0x16c   : > { %v8642_v41 = vpop.f32.mrf.mxu0  ;;  %v942_v7 = vadd.f32 %v12179_v33, %v12178_v30  ;;  %v1302_v33 = vld [vmem:[#allocation4] sm:$0xff] }
 0x16d   : > { %1290 = vst.msk [vmem:[#allocation4 + $0xa0] sm:$0xff] %vm226_vm0, %v1258_v55  ;;  %v1261_v51 = vadd.f32 %v8642_v41, %v913_v44  ;;  %v10319_v63 = vpop.f32.mrf.mxu1  ;;  %v12180_v44 = vld [vmem:[#allocation16_spill] sm:$0xff]  ;;  %v12181_v55 = vld [vmem:[#allocation17_spill] sm:$0xff] }
 0x16e   : > { %v1194_v54 = vpop.f32.mrf.mxu0  ;;  %v934_v41 = vadd.f32 %v12181_v55, %v12180_v44 }
 0x16f   : > { %1293 = vst.msk [vmem:[#allocation4 + $0xb8] sm:$0xff] %vm226_vm0, %v1261_v51  ;;  %v1259_v56 = vadd.f32 %v1194_v54, %v905_v52  ;;  %v10324_v4 = vpop.f32.mrf.mxu1  ;;  %v9300_v54 = vld [vmem:[%s12131_s3 + $0x28] sm:$0xff]  }
 0x170   : > { %v8645_v14 = vpop.f32.mrf.mxu0  ;;  %8884 = vmatmul.mubr.msk.bf16.gmra.mxu0 %vm226_vm0, %v2958_v34  ;;  %8895 = vmatprep.subr.bf16.mxu1 %v9300_v54 }
 0x171   : > { %1291 = vst.msk [vmem:[#allocation4 + $0xa8] sm:$0xff] %vm226_vm0, %v1259_v56  ;;  %v1264_v40 = vadd.f32 %v8645_v14, %v926_v32  ;;  %v10330_v47 = vpop.f32.mrf.mxu1  ;;  %8887 = vmatprep.mubr.msk.bf16.mxu0 %vm226_vm0, %v12173_v13  ;;  %v12182_v14 = vld [vmem:[#allocation18_spill] sm:$0xff]  ;;  %8896 = vmatpush3.bf16.msra.mxu1 %v9300_v54 }
 0x172   : > { %v1207_v17 = vpop.f32.mrf.mxu0 }
 0x173   : > { %1296 = vst.msk [vmem:[#allocation4 + $0xd0] sm:$0xff] %vm226_vm0, %v1264_v40  ;;  %v1262_v16 = vadd.f32 %v1207_v17, %v918_v24  ;;  %v10337_v11 = vpop.f32.mrf.mxu1  ;;  %v937_v24 = vadd.f32 %v12183_v8, %v12182_v14  ;;  %v12184_v17 = vld [vmem:[#allocation20_spill] sm:$0xff] }
 0x174   : > { %v8646_v58 = vpop.f32.mrf.mxu0 }
 0x175   : > { %1294 = vst.msk [vmem:[#allocation4 + $0xc0] sm:$0xff] %vm226_vm0, %v1262_v16  ;;  %v1265_v3 = vadd.f32 %v8646_v58, %v929_v5  ;;  %v10342_v9 = vpop.f32.mrf.mxu1 }
 0x176   : > { %v1210_v31 = vpop.f32.mrf.mxu0 }
 0x177   : > { %1297 = vst.msk [vmem:[#allocation4 + $0xd8] sm:$0xff] %vm226_vm0, %v1265_v3  ;;  %v1263_v42 = vadd.f32 %v1210_v31, %v921_v48  ;;  %v10347_v43 = vpop.f32.mrf.mxu1 }
 0x178   : > { %v8649_v59 = vpop.f32.mrf.mxu0  ;;  %8888 = vmatmul.mubr.msk.bf16.gmra.mxu0 %vm226_vm0, %v2960_v22 }
 0x179   : > { %1295 = vst.msk [vmem:[#allocation4 + $0xc8] sm:$0xff] %vm226_vm0, %v1263_v42  ;;  %v1268_v34 = vadd.f32 %v8649_v59, %v942_v7  ;;  %v10353_v52 = vpop.f32.mrf.mxu1 }
 0x17a   : > { %v1223_v51 = vpop.f32.mrf.mxu0 }
 0x17b   : > { %1300 = vst.msk [vmem:[#allocation4 + $0xf0] sm:$0xff] %vm226_vm0, %v1268_v34  ;;  %v1266_v62 = vadd.f32 %v1223_v51, %v934_v41  ;;  %v10361_v32 = vpop.f32.mrf.mxu1  ;;  %v1305_v41 = vld [vmem:[#allocation4 + $0x18] sm:$0xff] }
 0x17c   : > { %v8650_v56 = vpop.f32.mrf.mxu0 }
 0x17d   : > { %1298 = vst.msk [vmem:[#allocation4 + $0xe0] sm:$0xff] %vm226_vm0, %v1266_v62  ;;  %v1269_v40 = vadd.f32 %v8650_v56, %v945_v0  ;;  %v10366_v13 = vpop.f32.mrf.mxu1  ;;  %v1303_v62 = vld [vmem:[#allocation4 + $0x8] sm:$0xff] }
 0x17e   : > { %v1226_v2 = vpop.f32.mrf.mxu0 }
 0x17f   : > { %1301 = vst.msk [vmem:[#allocation4 + $0xf8] sm:$0xff] %vm226_vm0, %v1269_v40  ;;  %v1267_v26 = vadd.f32 %v1226_v2, %v937_v24  ;;  %v10369_v46 = vpop.f32.mrf.mxu1  ;;  %v1308_v40 = vld [vmem:[#allocation4 + $0x30] sm:$0xff] }
 0x180   : > { %v8701_v19 = vpop.f32.mrf.mxu0 }
 0x181   : > { %1299 = vst.msk [vmem:[#allocation4 + $0xe8] sm:$0xff] %vm226_vm0, %v1267_v26  ;;  %v1796_v50 = vadd.f32 %v8701_v19, %v12184_v17  ;;  %v8741_v23 = vpop.f32.mrf.mxu1  ;;  %v9303_v26 = vld [vmem:[%s12131_s3 + $0x10] sm:$0xff]  }
 0x182   : > { %v1787_v5 = vpop.f32.mrf.mxu0 }
 0x183   : > { %v2206_v16 = vadd.f32 %v8741_v23, %v1796_v50  ;;  %v1788_v58 = vadd.f32 %v1787_v5, %v10198_v53  ;;  %v2077_v22 = vpop.f32.mrf.mxu1  ;;  %v9302_v53 = vld [vmem:[%s12131_s3 + $0x18] sm:$0xff]   ;;  %v1306_v23 = vld [vmem:[#allocation4 + $0x20] sm:$0xff] }
 0x184   : > { %v8702_v27 = vpop.f32.mrf.mxu0  ;;  %8931 = vmatprep.subr.bf16.mxu0 %v9302_v53 }
 0x185   : > { %v2238_v48 = vadd.f32 %v2206_v16, %v1304_v20  ;;  %v2204_v3 = vadd.f32 %v2077_v22, %v1788_v58  ;;  %v1799_v31 = vadd.f32 %v8702_v27, %v10203_v21  ;;  %v8742_v30 = vpop.f32.mrf.mxu1  ;;  %8932 = vmatpush3.bf16.msra.mxu0 %v9302_v53  ;;  %v1309_v20 = vld [vmem:[#allocation4 + $0x38] sm:$0xff] }
 0x186   : > { %v1790_v7 = vpop.f32.mrf.mxu0  ;;  %8933 = vmatprep.subr.bf16.mxu0 %v9303_v26 }
 0x187   : > { %2270 = vst.msk [vmem:[#allocation4 + $0x10] sm:$0xff] %vm226_vm0, %v2238_v48  ;;  %v2236_v42 = vadd.f32 %v2204_v3, %v1302_v33  ;;  %v2207_v59 = vadd.f32 %v8742_v30, %v1799_v31  ;;  %v1791_v44 = vadd.f32 %v1790_v7, %v10208_v18  ;;  %v2080_v55 = vpop.f32.mrf.mxu1  ;;  %v9304_v48 = vld [vmem:[%s12131_s3 + $0x8] sm:$0xff]   ;;  %v9301_v33 = vld [vmem:[%s12131_s3 + $0x20] sm:$0xff]  }
 0x188   : > { %v8705_v34 = vpop.f32.mrf.mxu0  ;;  %8897 = vmatprep.subr.bf16.mxu1 %v9301_v33 }
 0x189   : > { %2268 = vst.msk [vmem:[#allocation4] sm:$0xff] %vm226_vm0, %v2236_v42  ;;  %v2239_v51 = vadd.f32 %v2207_v59, %v1305_v41  ;;  %v2205_v21 = vadd.f32 %v2080_v55, %v1791_v44  ;;  %v1812_v54 = vadd.f32 %v8705_v34, %v10214_v37  ;;  %v8745_v0 = vpop.f32.mrf.mxu1  ;;  %8934 = vmatpush3.bf16.msra.mxu0 %v9303_v26  ;;  %v1312_v41 = vld [vmem:[#allocation4 + $0x50] sm:$0xff]  ;;  %v3415_v26 = vld [vmem:[#allocation3 + $0x8] sm:$0xff] }
 0x18a   : > { %v1803_v56 = vpop.f32.mrf.mxu0  ;;  %8935 = vmatprep.subr.bf16.mxu0 %v9304_v48  ;;  %8898 = vmatpush3.bf16.msra.mxu1 %v9301_v33 }
 0x18b   : > { %2271 = vst.msk [vmem:[#allocation4 + $0x18] sm:$0xff] %vm226_vm0, %v2239_v51  ;;  %v2237_v18 = vadd.f32 %v2205_v21, %v1303_v62  ;;  %v2210_v14 = vadd.f32 %v8745_v0, %v1812_v54  ;;  %v1804_v8 = vadd.f32 %v1803_v56, %v10220_v36  ;;  %v2093_v24 = vpop.f32.mrf.mxu1  ;;  %v1310_v0 = vld [vmem:[#allocation4 + $0x40] sm:$0xff] }
 0x18c   : > { %v8706_v2 = vpop.f32.mrf.mxu0  ;;  %v3471_v56 = vld [vmem:[#allocation3 + $0x9] sm:$0xff] }
 0x18d   : > { %2269 = vst.msk [vmem:[#allocation4 + $0x8] sm:$0xff] %vm226_vm0, %v2237_v18  ;;  %v2242_v37 = vadd.f32 %v2210_v14, %v1308_v40  ;;  %v2208_v19 = vadd.f32 %v2093_v24, %v1804_v8  ;;  %v1815_v17 = vadd.f32 %v8706_v2, %v10225_v35  ;;  %v8746_v50 = vpop.f32.mrf.mxu1  ;;  %8936 = vmatpush3.bf16.msra.mxu0 %v9304_v48  ;;  %v3414_v2 = vld [vmem:[#allocation3] sm:$0xff] }
 0x18e   : > { %v1806_v5 = vpop.f32.mrf.mxu0 }
 0x18f   : > { %2274 = vst.msk [vmem:[#allocation4 + $0x30] sm:$0xff] %vm226_vm0, %v2242_v37  ;;  %v2240_v36 = vadd.f32 %v2208_v19, %v1306_v23  ;;  %v2211_v16 = vadd.f32 %v8746_v50, %v1815_v17  ;;  %v1807_v58 = vadd.f32 %v1806_v5, %v10230_v60  ;;  %v2096_v22 = vpop.f32.mrf.mxu1  ;;  %v1307_v60 = vld [vmem:[#allocation4 + $0x28] sm:$0xff]  ;;  %v1313_v37 = vld [vmem:[#allocation4 + $0x58] sm:$0xff] }
 0x190   : > { %v8709_v27 = vpop.f32.mrf.mxu0 }
 0x191   : > { %2272 = vst.msk [vmem:[#allocation4 + $0x20] sm:$0xff] %vm226_vm0, %v2240_v36  ;;  %v2243_v35 = vadd.f32 %v2211_v16, %v1309_v20  ;;  %v2209_v3 = vadd.f32 %v2096_v22, %v1807_v58  ;;  %v1828_v31 = vadd.f32 %v8709_v27, %v10236_v45  ;;  %v8749_v30 = vpop.f32.mrf.mxu1  ;;  %v9305_v45 = vld [vmem:[%s12131_s3] sm:$0xff]   ;;  %v1311_v36 = vld [vmem:[#allocation4 + $0x48] sm:$0xff]  ;;  %v1316_v27 = vld [vmem:[#allocation4 + $0x70] sm:$0xff] }
 0x192   : > { %v1819_v7 = vpop.f32.mrf.mxu0  ;;  %8937 = vmatprep.subr.bf16.mxu0 %v9305_v45 }
 0x193   : > { %2275 = vst.msk [vmem:[#allocation4 + $0x38] sm:$0xff] %vm226_vm0, %v2243_v35  ;;  %v2241_v42 = vadd.f32 %v2209_v3, %v1307_v60  ;;  %v2214_v59 = vadd.f32 %v8749_v30, %v1828_v31  ;;  %v1820_v44 = vadd.f32 %v1819_v7, %v10242_v57  ;;  %v2109_v55 = vpop.f32.mrf.mxu1  ;;  %v3470_v57 = vld [vmem:[#allocation3 + $0x1] sm:$0xff]  ;;  %8938 = vmatpush3.bf16.msra.mxu0 %v9305_v45  ;;  %v1314_v30 = vld [vmem:[#allocation4 + $0x60] sm:$0xff] }
 0x194   : > { %v8710_v34 = vpop.f32.mrf.mxu0  ;;  %v3502_v40 = vpack.c.bf16 %v3471_v56, %v3470_v57 }
 0x195   : > { %2273 = vst.msk [vmem:[#allocation4 + $0x28] sm:$0xff] %vm226_vm0, %v2241_v42  ;;  %v2246_v53 = vadd.f32 %v2214_v59, %v1312_v41  ;;  %v2212_v51 = vadd.f32 %v2109_v55, %v1820_v44  ;;  %v1831_v21 = vadd.f32 %v8710_v34, %v10247_v15  ;;  %v8750_v54 = vpop.f32.mrf.mxu1  ;;  %v3446_v15 = vpack.c.bf16 %v3415_v26, %v3414_v2 }
 0x196   : > { %v1822_v62 = vpop.f32.mrf.mxu0  ;;  %8899 = vmatprep.mubr.msk.bf16.mxu1 %vm226_vm0, %v3502_v40 }
 0x197   : > { %2278 = vst.msk [vmem:[#allocation4 + $0x50] sm:$0xff] %vm226_vm0, %v2246_v53  ;;  %v2244_v18 = vadd.f32 %v2212_v51, %v1310_v0  ;;  %v2215_v14 = vadd.f32 %v8750_v54, %v1831_v21  ;;  %v1823_v8 = vadd.f32 %v1822_v62, %v10252_v39  ;;  %v2112_v24 = vpop.f32.mrf.mxu1  ;;  %8939 = vmatprep.mubr.msk.bf16.mxu0 %vm226_vm0, %v3446_v15  ;;  %v1315_v53 = vld [vmem:[#allocation4 + $0x68] sm:$0xff]  ;;  %v1320_v62 = vld [vmem:[#allocation4 + $0x90] sm:$0xff] }
 0x198   : > { %v8713_v19 = vpop.f32.mrf.mxu0 }
 0x199   : > { %2276 = vst.msk [vmem:[#allocation4 + $0x40] sm:$0xff] %vm226_vm0, %v2244_v18  ;;  %v2247_v17 = vadd.f32 %v2215_v14, %v1313_v37  ;;  %v2213_v50 = vadd.f32 %v2112_v24, %v1823_v8  ;;  %v1844_v23 = vadd.f32 %v8713_v19, %v10258_v28  ;;  %v8753_v5 = vpop.f32.mrf.mxu1  ;;  %v1318_v8 = vld [vmem:[#allocation4 + $0x80] sm:$0xff]  ;;  %v1321_v37 = vld [vmem:[#allocation4 + $0x98] sm:$0xff] }
 0x19a   : > { %v1835_v16 = vpop.f32.mrf.mxu0 }
 0x19b   : > { %2279 = vst.msk [vmem:[#allocation4 + $0x58] sm:$0xff] %vm226_vm0, %v2247_v17  ;;  %v2245_v39 = vadd.f32 %v2213_v50, %v1311_v36  ;;  %v2218_v58 = vadd.f32 %v8753_v5, %v1844_v23  ;;  %v1836_v22 = vadd.f32 %v1835_v16, %v10267_v61  ;;  %v2125_v20 = vpop.f32.mrf.mxu1  ;;  %v1317_v61 = vld [vmem:[#allocation4 + $0x78] sm:$0xff] }
 0x19c   : > { %v8714_v48 = vpop.f32.mrf.mxu0 }
 0x19d   : > { %2277 = vst.msk [vmem:[#allocation4 + $0x48] sm:$0xff] %vm226_vm0, %v2245_v39  ;;  %v2250_v35 = vadd.f32 %v2218_v58, %v1316_v27  ;;  %v2216_v28 = vadd.f32 %v2125_v20, %v1836_v22  ;;  %v1847_v3 = vadd.f32 %v8714_v48, %v10272_v1  ;;  %v8754_v31 = vpop.f32.mrf.mxu1  ;;  %v10423_v1 = vld [vmem:[%s12131_s3 + $0x58] sm:$0xff]  }
 0x19e   : > { %v1838_v33 = vpop.f32.mrf.mxu0  ;;  %8971 = vmatprep.subr.bf16.mxu1 %v10423_v1 }
 0x19f   : > { %2282 = vst.msk [vmem:[#allocation4 + $0x70] sm:$0xff] %vm226_vm0, %v2250_v35  ;;  %v2248_v60 = vadd.f32 %v2216_v28, %v1314_v30  ;;  %v2219_v7 = vadd.f32 %v8754_v31, %v1847_v3  ;;  %v1839_v42 = vadd.f32 %v1838_v33, %v10277_v12  ;;  %v2128_v59 = vpop.f32.mrf.mxu1 }
 0x1a0   : > { %v8717_v44 = vpop.f32.mrf.mxu0 }
 0x1a1   : > { %2280 = vst.msk [vmem:[#allocation4 + $0x60] sm:$0xff] %vm226_vm0, %v2248_v60  ;;  %v2251_v55 = vadd.f32 %v2219_v7, %v1317_v61  ;;  %v2217_v41 = vadd.f32 %v2128_v59, %v1839_v42  ;;  %v1860_v34 = vadd.f32 %v8717_v44, %v10283_v10  ;;  %v8757_v45 = vpop.f32.mrf.mxu1 }
 0x1a2   : > { %v1851_v51 = vpop.f32.mrf.mxu0 }
 0x1a3   : > { %2283 = vst.msk [vmem:[#allocation4 + $0x78] sm:$0xff] %vm226_vm0, %v2251_v55  ;;  %v2249_v12 = vadd.f32 %v2217_v41, %v1315_v53  ;;  %v2222_v21 = vadd.f32 %v8757_v45, %v1860_v34  ;;  %v1852_v54 = vadd.f32 %v1851_v51, %v10289_v49  ;;  %v2141_v0 = vpop.f32.mrf.mxu1 }
 0x1a4   : > { %v8718_v57 = vpop.f32.mrf.mxu0 }
 0x1a5   : > { %2281 = vst.msk [vmem:[#allocation4 + $0x68] sm:$0xff] %vm226_vm0, %v2249_v12  ;;  %v2254_v10 = vadd.f32 %v2222_v21, %v1320_v62  ;;  %v2220_v56 = vadd.f32 %v2141_v0, %v1852_v54  ;;  %v1863_v18 = vadd.f32 %v8718_v57, %v10294_v25  ;;  %v8758_v14 = vpop.f32.mrf.mxu1  ;;  %v1319_v25 = vld [vmem:[#allocation4 + $0x88] sm:$0xff] }
 0x1a6   : > { %v1854_v24 = vpop.f32.mrf.mxu0 }
 0x1a7   : > { %2286 = vst.msk [vmem:[#allocation4 + $0x90] sm:$0xff] %vm226_vm0, %v2254_v10  ;;  %v2252_v40 = vadd.f32 %v2220_v56, %v1318_v8  ;;  %v2223_v2 = vadd.f32 %v8758_v14, %v1863_v18  ;;  %v1855_v49 = vadd.f32 %v1854_v24, %v10299_v29  ;;  %v2144_v26 = vpop.f32.mrf.mxu1  ;;  %v1324_v29 = vld [vmem:[#allocation4 + $0xb0] sm:$0xff] }
 0x1a8   : > { %v8721_v19 = vpop.f32.mrf.mxu0 }
 0x1a9   : > { %2284 = vst.msk [vmem:[#allocation4 + $0x80] sm:$0xff] %vm226_vm0, %v2252_v40  ;;  %v2255_v15 = vadd.f32 %v2223_v2, %v1321_v37  ;;  %v2221_v17 = vadd.f32 %v2144_v26, %v1855_v49  ;;  %v1876_v50 = vadd.f32 %v8721_v19, %v10305_v38  ;;  %v8761_v23 = vpop.f32.mrf.mxu1  ;;  %v1322_v38 = vld [vmem:[#allocation4 + $0xa0] sm:$0xff] }
 0x1aa   : > { %v1867_v5 = vpop.f32.mrf.mxu0 }
 0x1ab   : > { %2287 = vst.msk [vmem:[#allocation4 + $0x98] sm:$0xff] %vm226_vm0, %v2255_v15  ;;  %v2253_v36 = vadd.f32 %v2221_v17, %v1319_v25  ;;  %v2226_v16 = vadd.f32 %v8761_v23, %v1876_v50  ;;  %v1868_v39 = vadd.f32 %v1867_v5, %v10314_v6  ;;  %v2157_v58 = vpop.f32.mrf.mxu1  ;;  %v1325_v6 = vld [vmem:[#allocation4 + $0xb8] sm:$0xff] }
 0x1ac   : > { %v8722_v22 = vpop.f32.mrf.mxu0 }
 0x1ad   : > { %2285 = vst.msk [vmem:[#allocation4 + $0x88] sm:$0xff] %vm226_vm0, %v2253_v36  ;;  %v2258_v20 = vadd.f32 %v2226_v16, %v1324_v29  ;;  %v2224_v27 = vadd.f32 %v2157_v58, %v1868_v39  ;;  %v1879_v48 = vadd.f32 %v8722_v22, %v10319_v63  ;;  %v8762_v35 = vpop.f32.mrf.mxu1  ;;  %v1323_v63 = vld [vmem:[#allocation4 + $0xa8] sm:$0xff] }
 0x1ae   : > { %v1870_v28 = vpop.f32.mrf.mxu0 }
 0x1af   : > { %2290 = vst.msk [vmem:[#allocation4 + $0xb0] sm:$0xff] %vm226_vm0, %v2258_v20  ;;  %v2256_v3 = vadd.f32 %v2224_v27, %v1322_v38  ;;  %v2227_v31 = vadd.f32 %v8762_v35, %v1879_v48  ;;  %v1871_v30 = vadd.f32 %v1870_v28, %v10324_v4  ;;  %v2160_v33 = vpop.f32.mrf.mxu1  ;;  %v1328_v4 = vld [vmem:[#allocation4 + $0xd0] sm:$0xff]  ;;  %v1331_v48 = vld [vmem:[#allocation4 + $0xe8] sm:$0xff] }
 0x1b0   : > { %v8725_v60 = vpop.f32.mrf.mxu0 }
 0x1b1   : > { %2288 = vst.msk [vmem:[#allocation4 + $0xa0] sm:$0xff] %vm226_vm0, %v2256_v3  ;;  %v2259_v7 = vadd.f32 %v2227_v31, %v1325_v6  ;;  %v2225_v42 = vadd.f32 %v2160_v33, %v1871_v30  ;;  %v1892_v59 = vadd.f32 %v8725_v60, %v10330_v47  ;;  %v8765_v61 = vpop.f32.mrf.mxu1  ;;  %v1326_v47 = vld [vmem:[#allocation4 + $0xc0] sm:$0xff]  ;;  %v10462_v30 = vld [vmem:[%s12131_s3 + $0x98] sm:$0xff]  }
 0x1b2   : > { %v1883_v44 = vpop.f32.mrf.mxu0  ;;  %9011 = vmatprep.subr.bf16.mxu0 %v10462_v30 }
 0x1b3   : > { %2291 = vst.msk [vmem:[#allocation4 + $0xb8] sm:$0xff] %vm226_vm0, %v2259_v7  ;;  %v2257_v55 = vadd.f32 %v2225_v42, %v1323_v63  ;;  %v2230_v41 = vadd.f32 %v8765_v61, %v1892_v59  ;;  %v1884_v34 = vadd.f32 %v1883_v44, %v10337_v11  ;;  %v2173_v45 = vpop.f32.mrf.mxu1  ;;  %v1329_v11 = vld [vmem:[#allocation4 + $0xd8] sm:$0xff] }
 0x1b4   : > { %v8726_v53 = vpop.f32.mrf.mxu0 }
 0x1b5   : > { %2289 = vst.msk [vmem:[#allocation4 + $0xa8] sm:$0xff] %vm226_vm0, %v2257_v55  ;;  %v2262_v51 = vadd.f32 %v2230_v41, %v1328_v4  ;;  %v2228_v12 = vadd.f32 %v2173_v45, %v1884_v34  ;;  %v1895_v21 = vadd.f32 %v8726_v53, %v10342_v9  ;;  %v8766_v54 = vpop.f32.mrf.mxu1  ;;  %v1327_v9 = vld [vmem:[#allocation4 + $0xc8] sm:$0xff] }
 0x1b6   : > { %v1886_v0 = vpop.f32.mrf.mxu0 }
 0x1b7   : > { %2294 = vst.msk [vmem:[#allocation4 + $0xd0] sm:$0xff] %vm226_vm0, %v2262_v51  ;;  %v2260_v62 = vadd.f32 %v2228_v12, %v1326_v47  ;;  %v2231_v57 = vadd.f32 %v8766_v54, %v1895_v21  ;;  %v1887_v10 = vadd.f32 %v1886_v0, %v10347_v43  ;;  %v2176_v56 = vpop.f32.mrf.mxu1  ;;  %v1332_v43 = vld [vmem:[#allocation4 + $0xf0] sm:$0xff] }
 0x1b8   : > { %v8729_v18 = vpop.f32.mrf.mxu0 }
 0x1b9   : > { %2292 = vst.msk [vmem:[#allocation4 + $0xc0] sm:$0xff] %vm226_vm0, %v2260_v62  ;;  %v2263_v14 = vadd.f32 %v2231_v57, %v1329_v11  ;;  %v2229_v8 = vadd.f32 %v2176_v56, %v1887_v10  ;;  %v1908_v24 = vadd.f32 %v8729_v18, %v10353_v52  ;;  %v8769_v40 = vpop.f32.mrf.mxu1  ;;  %v1330_v52 = vld [vmem:[#allocation4 + $0xe0] sm:$0xff] }
 0x1ba   : > { %v1899_v2 = vpop.f32.mrf.mxu0 }
 0x1bb   : > { %2295 = vst.msk [vmem:[#allocation4 + $0xd8] sm:$0xff] %vm226_vm0, %v2263_v14  ;;  %v2261_v49 = vadd.f32 %v2229_v8, %v1327_v9  ;;  %v2234_v26 = vadd.f32 %v8769_v40, %v1908_v24  ;;  %v1900_v37 = vadd.f32 %v1899_v2, %v10361_v32  ;;  %v2189_v19 = vpop.f32.mrf.mxu1  ;;  %v1333_v32 = vld [vmem:[#allocation4 + $0xf8] sm:$0xff] }
 0x1bc   : > { %v8730_v15 = vpop.f32.mrf.mxu0 }
 0x1bd   : > { %2293 = vst.msk [vmem:[#allocation4 + $0xc8] sm:$0xff] %vm226_vm0, %v2261_v49  ;;  %v2266_v17 = vadd.f32 %v2234_v26, %v1332_v43  ;;  %v2232_v50 = vadd.f32 %v2189_v19, %v1900_v37  ;;  %v1911_v23 = vadd.f32 %v8730_v15, %v10366_v13  ;;  %v8770_v25 = vpop.f32.mrf.mxu1 }
 0x1be   : > { %v1902_v5 = vpop.f32.mrf.mxu0 }
 0x1bf   : > { %2298 = vst.msk [vmem:[#allocation4 + $0xf0] sm:$0xff] %vm226_vm0, %v2266_v17  ;;  %v2264_v36 = vadd.f32 %v2232_v50, %v1330_v52  ;;  %v2235_v16 = vadd.f32 %v8770_v25, %v1911_v23  ;;  %v1903_v39 = vadd.f32 %v1902_v5, %v10369_v46  ;;  %v2192_v58 = vpop.f32.mrf.mxu1 }
 0x1c0   : > { %v8781_v29 = vpop.f32.mrf.mxu0 }
 0x1c1   : > { %2296 = vst.msk [vmem:[#allocation4 + $0xe0] sm:$0xff] %vm226_vm0, %v2264_v36  ;;  %v2267_v22 = vadd.f32 %v2235_v16, %v1333_v32  ;;  %v2233_v20 = vadd.f32 %v2192_v58, %v1903_v39  ;;  %v8821_v27 = vpop.f32.mrf.mxu1  ;;  %v2302_v16 = vld [vmem:[#allocation4 + $0x10] sm:$0xff]  ;;  %v10546_v39 = vld [vmem:[%s12130_s2] ss:$0 sm:$0xff] }
 0x1c2   : > { %v2553_v35 = vpop.f32.mrf.mxu0  ;;  %v2795_v23 = vadd.f32 %v8821_v27, %v8781_v29 }
 0x1c3   : > { %2299 = vst.msk [vmem:[#allocation4 + $0xf8] sm:$0xff] %vm226_vm0, %v2267_v22  ;;  %v2265_v13 = vadd.f32 %v2233_v20, %v1331_v48  ;;  %v2786_v38 = vpop.f32.mrf.mxu1  ;;  %v2300_v48 = vld [vmem:[#allocation4] sm:$0xff] }
 0x1c4   : > { %v8782_v28 = vpop.f32.mrf.mxu0  ;;  %v2787_v52 = vadd.f32 %v2786_v38, %v2553_v35 }
 0x1c5   : > { %2297 = vst.msk [vmem:[#allocation4 + $0xe8] sm:$0xff] %vm226_vm0, %v2265_v13  ;;  %v8822_v3 = vpop.f32.mrf.mxu1 }
 0x1c6   : > { %v2556_v31 = vpop.f32.mrf.mxu0  ;;  %v2798_v32 = vadd.f32 %v8822_v3, %v8782_v28  ;;  %v2301_v3 = vld [vmem:[#allocation4 + $0x8] sm:$0xff] }
 0x1c7   : > { %v2789_v33 = vpop.f32.mrf.mxu1 }
 0x1c8   : > { %v8785_v46 = vpop.f32.mrf.mxu0 }
 0x1c9   : > { %v8825_v7 = vpop.f32.mrf.mxu1 }
 0x1ca   : > { %v10464_v6 = vpop.f32.mrf.mxu0  ;;  %v2811_v38 = vadd.f32 %v8825_v7, %v8785_v46 }
 0x1cb   : > { %v2802_v61 = vpop.f32.mrf.mxu1 }
 0x1cc   : > { %v10467_v60 = vpop.f32.mrf.mxu0  ;;  %v2803_v28 = vadd.f32 %v2802_v61, %v10464_v6 }
 0x1cd   : > { %v10477_v55 = vpop.f32.mrf.mxu1 }
 0x1ce   : > { %v10469_v42 = vpop.f32.mrf.mxu0  ;;  %v2814_v7 = vadd.f32 %v10477_v55, %v10467_v60 }
 0x1cf   : > { %v10483_v45 = vpop.f32.mrf.mxu1 }
 0x1d0   : > { %v10471_v59 = vpop.f32.mrf.mxu0 }
 0x1d1   : > { %v10489_v51 = vpop.f32.mrf.mxu1 }
 0x1d2   : > { %v10473_v63 = vpop.f32.mrf.mxu0 }
 0x1d3   : > { %v10495_v54 = vpop.f32.mrf.mxu1 }
 0x1d4   : > { %v10475_v44 = vpop.f32.mrf.mxu0 }
 0x1d5   : > { %v10501_v62 = vpop.f32.mrf.mxu1 }
 0x1d6   : > { %v10479_v41 = vpop.f32.mrf.mxu0 }
 0x1d7   : > { %v10507_v56 = vpop.f32.mrf.mxu1 }
 0x1d8   : > { %v10481_v34 = vpop.f32.mrf.mxu0 }
 0x1d9   : > { %v10513_v14 = vpop.f32.mrf.mxu1 }
 0x1da   : > { %v10485_v4 = vpop.f32.mrf.mxu0 }
 0x1db   : > { %v10519_v40 = vpop.f32.mrf.mxu1 }
 0x1dc   : > { %v10487_v53 = vpop.f32.mrf.mxu0 }
 0x1dd   : > { %v10525_v49 = vpop.f32.mrf.mxu1 }
 0x1de   : > { %v10491_v12 = vpop.f32.mrf.mxu0 }
 0x1df   : > { %v10531_v19 = vpop.f32.mrf.mxu1 }
 0x1e0   : > { %v10493_v21 = vpop.f32.mrf.mxu0 }
 0x1e1   : > { %v10537_v17 = vpop.f32.mrf.mxu1 }
 0x1e2   : > { %v10497_v47 = vpop.f32.mrf.mxu0 }
 0x1e3   : > { %v10541_v5 = vpop.f32.mrf.mxu1 }
 0x1e4   : > { %v10499_v0 = vpop.f32.mrf.mxu0 }
 0x1e6   : > { %v10503_v57 = vpop.f32.mrf.mxu0 }
 0x1e8   : > { %v10505_v10 = vpop.f32.mrf.mxu0 }
 0x1ea   : > { %v10509_v11 = vpop.f32.mrf.mxu0 }
 0x1ec   : > { %v10511_v18 = vpop.f32.mrf.mxu0 }
 0x1ee   : > { %v10515_v8 = vpop.f32.mrf.mxu0 }
 0x1f0   : > { %v10517_v24 = vpop.f32.mrf.mxu0 }
 0x1f2   : > { %v10521_v9 = vpop.f32.mrf.mxu0 }
 0x1f4   : > { %v10523_v2 = vpop.f32.mrf.mxu0 }
 0x1f5   : > { %12185 = vst [vmem:[#allocation7_spill] sm:$0xff] %v10523_v2 }
 0x1f6   : > { %v10527_v26 = vpop.f32.mrf.mxu0 }
 0x1f7   : > { %12186 = vst [vmem:[#allocation8_spill] sm:$0xff] %v10527_v26 }
 0x1f8   : > { %v10529_v37 = vpop.f32.mrf.mxu0 }
 0x1f9   : > { %12187 = vst [vmem:[#allocation9_spill] sm:$0xff] %v10529_v37 }
 0x1fa   : > { %v10533_v43 = vpop.f32.mrf.mxu0 }
 0x1fb   : > { %12188 = vst [vmem:[#allocation6_spill] sm:$0xff] %v10533_v43 }
 0x1fc   : > { %v10535_v15 = vpop.f32.mrf.mxu0 }
 0x1fd   : > { %12189 = vst [vmem:[#allocation10_spill] sm:$0xff] %v10535_v15  ;;  %v2790_v15 = vadd.f32 %v2789_v33, %v2556_v31 }
 0x1fe   : > { %v10539_v50 = vpop.f32.mrf.mxu0 }
 0x1ff   : > { %12190 = vst [vmem:[#allocation11_spill] sm:$0xff] %v10539_v50  ;;  %v10548_v50 = vpop.f32.mrf.mxu1 }
 0x200   : > { %v8861_v25 = vpop.f32.mrf.mxu0 }
 0x201   : > { %v3205_v36 = vadd.f32 %v8861_v25, %v2795_v23  ;;  %v2303_v23 = vld [vmem:[#allocation4 + $0x18] sm:$0xff] }
 0x202   : > { %v3076_v58 = vpop.f32.mrf.mxu0 }
 0x203   : > { %v3237_v22 = vadd.f32 %v3205_v36, %v2302_v16  ;;  %v3203_v20 = vadd.f32 %v3076_v58, %v2787_v52  ;;  %v10553_v36 = vpop.f32.mrf.mxu1  ;;  %v2306_v58 = vld [vmem:[#allocation4 + $0x30] sm:$0xff] }
 0x204   : > { %v8862_v13 = vpop.f32.mrf.mxu0 }
 0x205   : > { %v3276_v29 = vadd.f32 %v10546_v39, %v3237_v22  ;;  %v3235_v27 = vadd.f32 %v3203_v20, %v2300_v48  ;;  %v3206_v35 = vadd.f32 %v8862_v13, %v2798_v32  ;;  %v2827_v13 = vadd.f32 %v10489_v51, %v10471_v59 }
 0x206   : > { %v3079_v25 = vpop.f32.mrf.mxu0 }
 0x207   : > { %v3308_v43 = vmax.f32 %v3276_v29, 0.0  ;;  %v3274_v37 = vadd.f32 %v10546_v39, %v3235_v27  ;;  %v3238_v26 = vadd.f32 %v3206_v35, %v2303_v23  ;;  %v3204_v2 = vadd.f32 %v3079_v25, %v2790_v15  ;;  %v2307_v29 = vld [vmem:[#allocation4 + $0x38] sm:$0xff]  ;;  %v2305_v25 = vld [vmem:[#allocation4 + $0x28] sm:$0xff] }
 0x208   : > { %v8865_v52 = vpop.f32.mrf.mxu0  ;;  %v2819_v23 = vadd.f32 %v10495_v54, %v10473_v63 }
 0x209   : > { %3384 = vst.msk [vmem:[#allocation3 + $0x31] sm:$0xff] %vm226_vm0, %v3308_v43  ;;  %v3306_v31 = vmax.f32 %v3274_v37, 0.0  ;;  %v3277_v33 = vadd.f32 %v10546_v39, %v3238_v26  ;;  %v3236_v16 = vadd.f32 %v3204_v2, %v2301_v3  ;;  %v3209_v46 = vadd.f32 %v8865_v52, %v2811_v38  ;;  %v2304_v37 = vld [vmem:[#allocation4 + $0x20] sm:$0xff]  ;;  %v10563_v26 = vpop.f32.mrf.mxu1 }
 0x20a   : > { %v3092_v32 = vpop.f32.mrf.mxu0  ;;  %v2806_v43 = vadd.f32 %v10483_v45, %v10469_v42 }
 0x20b   : > { %3382 = vst.msk [vmem:[#allocation3 + $0x19] sm:$0xff] %vm226_vm0, %v3306_v31  ;;  %v3309_v15 = vmax.f32 %v3277_v33, 0.0  ;;  %v3275_v6 = vadd.f32 %v10546_v39, %v3236_v16  ;;  %v3241_v61 = vadd.f32 %v3209_v46, %v2306_v58  ;;  %v3207_v22 = vadd.f32 %v3092_v32, %v2803_v28  ;;  %v10573_v3 = vpop.f32.mrf.mxu1  ;;  %v2310_v16 = vld [vmem:[#allocation4 + $0x50] sm:$0xff] }
 0x20c   : > { %v8866_v20 = vpop.f32.mrf.mxu0  ;;  %v2830_v33 = vadd.f32 %v10501_v62, %v10475_v44  ;;  %v2822_v32 = vadd.f32 %v10507_v56, %v10479_v41  ;;  %v2835_v41 = vadd.f32 %v10519_v40, %v10485_v4 }
 0x20d   : > { %3385 = vst.msk [vmem:[#allocation3 + $0x39] sm:$0xff] %vm226_vm0, %v3309_v15  ;;  %v3307_v2 = vmax.f32 %v3275_v6, 0.0  ;;  %v3280_v60 = vadd.f32 %v10546_v39, %v3241_v61  ;;  %v3239_v55 = vadd.f32 %v3207_v22, %v2304_v37  ;;  %v3210_v48 = vadd.f32 %v8866_v20, %v2814_v7  ;;  %v2308_v15 = vld [vmem:[#allocation4 + $0x40] sm:$0xff]  ;;  %v10583_v61 = vpop.f32.mrf.mxu1 }
 0x20e   : > { %v3095_v27 = vpop.f32.mrf.mxu0 }
 0x20f   : > { %3383 = vst.msk [vmem:[#allocation3 + $0x21] sm:$0xff] %vm226_vm0, %v3307_v2  ;;  %v3312_v35 = vmax.f32 %v3280_v60, 0.0  ;;  %v3278_v42 = vadd.f32 %v10546_v39, %v3239_v55  ;;  %v3242_v45 = vadd.f32 %v3210_v48, %v2307_v29  ;;  %v3208_v38 = vadd.f32 %v3095_v27, %v2806_v43  ;;  %v2311_v43 = vld [vmem:[#allocation4 + $0x58] sm:$0xff] }
 0x210   : > { %v8869_v28 = vpop.f32.mrf.mxu0  ;;  %v2843_v60 = vadd.f32 %v10513_v14, %v10481_v34 }
 0x211   : > { %3388 = vst.msk [vmem:[#allocation3 + $0x61] sm:$0xff] %vm226_vm0, %v3312_v35  ;;  %v3310_v52 = vmax.f32 %v3278_v42, 0.0  ;;  %v3281_v59 = vadd.f32 %v10546_v39, %v3242_v45  ;;  %v3240_v51 = vadd.f32 %v3208_v38, %v2305_v25  ;;  %v3213_v31 = vadd.f32 %v8869_v28, %v2827_v13  ;;  %v3474_v13 = vld [vmem:[#allocation3 + $0x31] sm:$0xff] }
 0x212   : > { %v3108_v46 = vpop.f32.mrf.mxu0  ;;  %v3472_v45 = vld [vmem:[#allocation3 + $0x19] sm:$0xff] }
 0x213   : > { %3386 = vst.msk [vmem:[#allocation3 + $0x49] sm:$0xff] %vm226_vm0, %v3310_v52  ;;  %v3313_v7 = vmax.f32 %v3281_v59, 0.0  ;;  %v3279_v63 = vadd.f32 %v10546_v39, %v3240_v51  ;;  %v3245_v54 = vadd.f32 %v3213_v31, %v2310_v16  ;;  %v3211_v58 = vadd.f32 %v3108_v46, %v2819_v23  ;;  %v3416_v38 = vld [vmem:[#allocation3 + $0x18] sm:$0xff]  ;;  %v3418_v23 = vld [vmem:[#allocation3 + $0x30] sm:$0xff]  ;;  %v10601_v52 = vpop.f32.mrf.mxu1  ;;  %v9307_v16 = vld [vmem:[%s12131_s3 + $0x50] sm:$0xff]  }
 0x214   : > { %v8870_v6 = vpop.f32.mrf.mxu0  ;;  %v3475_v20 = vld [vmem:[#allocation3 + $0x39] sm:$0xff] }
 0x215   : > { %3389 = vst.msk [vmem:[#allocation3 + $0x69] sm:$0xff] %vm226_vm0, %v3313_v7  ;;  %v3311_v22 = vmax.f32 %v3279_v63, 0.0  ;;  %v3284_v44 = vadd.f32 %v10546_v39, %v3245_v54  ;;  %v3243_v62 = vadd.f32 %v3211_v58, %v2308_v15  ;;  %v3214_v37 = vadd.f32 %v8870_v6, %v2830_v33  ;;  %v3419_v2 = vld [vmem:[#allocation3 + $0x38] sm:$0xff]  ;;  %v9311_v46 = vld [vmem:[%s12131_s3 + $0x90] sm:$0xff]  }
 0x216   : > { %v3111_v56 = vpop.f32.mrf.mxu0  ;;  %v3473_v55 = vld [vmem:[#allocation3 + $0x21] sm:$0xff]  ;;  %v2309_v25 = vld [vmem:[#allocation4 + $0x48] sm:$0xff]  ;;  %v10597_v4 = vpack.c.bf16 %v3475_v20, %v3474_v13  ;;  %v10599_v40 = vpack.c.bf16 %v3419_v2, %v3418_v23  ;;  %v2846_v7 = vadd.f32 %v10525_v49, %v10487_v53  ;;  %v2838_v53 = vadd.f32 %v10531_v19, %v10491_v12  ;;  %v2312_v49 = vld [vmem:[#allocation4 + $0x60] sm:$0xff] }
 0x217   : > { %v3417_v48 = vld [vmem:[#allocation3 + $0x20] sm:$0xff]  ;;  %3387 = vst.msk [vmem:[#allocation3 + $0x51] sm:$0xff] %vm226_vm0, %v3311_v22  ;;  %v3316_v29 = vmax.f32 %v3284_v44, 0.0  ;;  %v3282_v27 = vadd.f32 %v10546_v39, %v3243_v62  ;;  %v3246_v35 = vadd.f32 %v3214_v37, %v2311_v43  ;;  %v3212_v42 = vadd.f32 %v3111_v56, %v2822_v32  ;;  %v9308_v62 = vld [vmem:[%s12131_s3 + $0x48] sm:$0xff]   ;;  %v10630_v43 = vpop.f32.mrf.mxu1  ;;  %v2315_v56 = vld [vmem:[#allocation4 + $0x78] sm:$0xff] }
 0x218   : > { %v8873_v28 = vpop.f32.mrf.mxu0  ;;  %v10593_v34 = vpack.c.bf16 %v3473_v55, %v3472_v45  ;;  %v10595_v14 = vpack.c.bf16 %v3417_v48, %v3416_v38  ;;  %v2314_v63 = vld [vmem:[#allocation4 + $0x70] sm:$0xff] }
 0x219   : > { %3392 = vst.msk [vmem:[#allocation3 + $0x91] sm:$0xff] %vm226_vm0, %v3316_v29  ;;  %v3314_v59 = vmax.f32 %v3282_v27, 0.0  ;;  %v3285_v51 = vadd.f32 %v10546_v39, %v3246_v35  ;;  %v3244_v31 = vadd.f32 %v3212_v42, %v2309_v25  ;;  %v3217_v33 = vadd.f32 %v8873_v28, %v2843_v60  ;;  %v3478_v19 = vld [vmem:[#allocation3 + $0x61] sm:$0xff] }
 0x21a   : > { %8900 = vmatmul.mubr.msk.bf16.vlgmr.msra.gmra.mxu1 %vm226_vm0, %v10593_v34  ;;  %8940 = vmatmul.mubr.msk.bf16.vlgmr.msra.gmra.mxu0 %vm226_vm0, %v10595_v14  ;;  %v3124_v54 = vpop.f32.mrf.mxu0  ;;  %v3476_v38 = vld [vmem:[#allocation3 + $0x49] sm:$0xff]  ;;  %v3422_v25 = vld [vmem:[#allocation3 + $0x60] sm:$0xff] }
 0x21b   : > { %3390 = vst.msk [vmem:[#allocation3 + $0x79] sm:$0xff] %vm226_vm0, %v3314_v59  ;;  %v3317_v58 = vmax.f32 %v3285_v51, 0.0  ;;  %v3283_v32 = vadd.f32 %v10546_v39, %v3244_v31  ;;  %v3249_v15 = vadd.f32 %v3217_v33, %v2314_v63  ;;  %v3215_v6 = vadd.f32 %v3124_v54, %v2835_v41  ;;  %8903 = vmatprep.mubr.msk.bf16.mxu1 %vm226_vm0, %v10597_v4  ;;  %v3420_v23 = vld [vmem:[#allocation3 + $0x48] sm:$0xff]  ;;  %v10651_v59 = vpop.f32.mrf.mxu1  ;;  %v9309_v63 = vld [vmem:[%s12131_s3 + $0x40] sm:$0xff]   ;;  %v2318_v54 = vld [vmem:[#allocation4 + $0x90] sm:$0xff] }
 0x21c   : > { %8943 = vmatprep.mubr.msk.bf16.mxu0 %vm226_vm0, %v10599_v40  ;;  %8972 = vmatpush3.bf16.msra.mxu1 %v10423_v1  ;;  %v8874_v22 = vpop.f32.mrf.mxu0  ;;  %v3479_v44 = vld [vmem:[#allocation3 + $0x69] sm:$0xff]  ;;  %v9312_v1 = vld [vmem:[%s12131_s3 + $0x88] sm:$0xff]   ;;  %v2851_v41 = vadd.f32 %v10541_v5, %v10497_v47 }
 0x21d   : > { %9012 = vmatpush3.bf16.msra.mxu0 %v10462_v30  ;;  %3393 = vst.msk [vmem:[#allocation3 + $0x99] sm:$0xff] %vm226_vm0, %v3317_v58  ;;  %v3315_v37 = vmax.f32 %v3283_v32, 0.0  ;;  %v3288_v20 = vadd.f32 %v10546_v39, %v3249_v15  ;;  %v3247_v2 = vadd.f32 %v3215_v6, %v2312_v49  ;;  %v3218_v12 = vadd.f32 %v8874_v22, %v2846_v7  ;;  %v3423_v60 = vld [vmem:[#allocation3 + $0x68] sm:$0xff] }
 0x21e   : > { %8973 = vmatprep.subr.bf16.mxu1 %v9307_v16  ;;  %9013 = vmatprep.subr.bf16.mxu0 %v9311_v46  ;;  %v2859_v30 = vadd.f32 %v10537_v17, %v10493_v21  ;;  %v3127_v55 = vpop.f32.mrf.mxu0  ;;  %v3477_v48 = vld [vmem:[#allocation3 + $0x51] sm:$0xff]  ;;  %v10641_v29 = vpack.c.bf16 %v3479_v44, %v3478_v19  ;;  %v10649_v5 = vpack.c.bf16 %v3423_v60, %v3422_v25  ;;  %v10678_v44 = vld [vmem:[%s12131_s3 + $0x78] sm:$0xff]  }
 0x21f   : > { %v3421_v13 = vld [vmem:[#allocation3 + $0x50] sm:$0xff]  ;;  %3391 = vst.msk [vmem:[#allocation3 + $0x81] sm:$0xff] %vm226_vm0, %v3315_v37  ;;  %v3320_v27 = vmax.f32 %v3288_v20, 0.0  ;;  %v3286_v35 = vadd.f32 %v10546_v39, %v3247_v2  ;;  %v3250_v42 = vadd.f32 %v3218_v12, %v2315_v56  ;;  %v3216_v45 = vadd.f32 %v3127_v55, %v2838_v53  ;;  %v2313_v21 = vld [vmem:[#allocation4 + $0x68] sm:$0xff]  ;;  %v10680_v37 = vpop.f32.mrf.mxu1 }
 0x220   : > { %v8877_v17 = vpop.f32.mrf.mxu0  ;;  %v10645_v28 = vpack.c.bf16 %v3477_v48, %v3476_v38  ;;  %v10647_v47 = vpack.c.bf16 %v3421_v13, %v3420_v23  ;;  %8974 = vmatpush3.bf16.msra.mxu1 %v9307_v16  ;;  %v9313_v16 = vld [vmem:[%s12131_s3 + $0x80] sm:$0xff]   ;;  %v2875_v60 = vadd.f32 %v10563_v26, %v10505_v10  ;;  %v2317_v10 = vld [vmem:[#allocation4 + $0x88] sm:$0xff] }
 0x221   : > { %9014 = vmatpush3.bf16.msra.mxu0 %v9311_v46  ;;  %3396 = vst.msk [vmem:[#allocation3 + $0xc1] sm:$0xff] %vm226_vm0, %v3320_v27  ;;  %v3318_v51 = vmax.f32 %v3286_v35, 0.0  ;;  %v3289_v31 = vadd.f32 %v10546_v39, %v3250_v42  ;;  %v3248_v33 = vadd.f32 %v3216_v45, %v2313_v21  ;;  %v3221_v7 = vadd.f32 %v8877_v17, %v2859_v30  ;;  %v2319_v30 = vld [vmem:[#allocation4 + $0x98] sm:$0xff]  ;;  %v3426_v23 = vld [vmem:[#allocation3 + $0x90] sm:$0xff]  ;;  %v10703_v21 = vpop.f32.mrf.mxu1 }
 0x222   : > { %8975 = vmatprep.subr.bf16.mxu1 %v9308_v62  ;;  %9015 = vmatprep.subr.bf16.mxu0 %v9312_v1  ;;  %v2862_v46 = vadd.f32 %v10548_v50, %v10499_v0  ;;  %v3140_v58 = vpop.f32.mrf.mxu0  ;;  %v2854_v0 = vadd.f32 %v10553_v36, %v10503_v57  ;;  %v2316_v50 = vld [vmem:[#allocation4 + $0x80] sm:$0xff]  ;;  %v3480_v45 = vld [vmem:[#allocation3 + $0x79] sm:$0xff] }
 0x223   : > { %8904 = vmatmul.mubr.msk.bf16.gmra.mxu1 %vm226_vm0, %v10645_v28  ;;  %8944 = vmatmul.mubr.msk.bf16.gmra.mxu0 %vm226_vm0, %v10647_v47  ;;  %3394 = vst.msk [vmem:[#allocation3 + $0xa9] sm:$0xff] %vm226_vm0, %v3318_v51  ;;  %v3321_v32 = vmax.f32 %v3289_v31, 0.0  ;;  %v3287_v15 = vadd.f32 %v10546_v39, %v3248_v33  ;;  %v3253_v6 = vadd.f32 %v3221_v7, %v2318_v54  ;;  %v3482_v57 = vld [vmem:[#allocation3 + $0x91] sm:$0xff] }
 0x224   : > { %v3219_v53 = vadd.f32 %v3140_v58, %v2851_v41  ;;  %8907 = vmatprep.mubr.msk.bf16.mxu1 %vm226_vm0, %v10641_v29  ;;  %8947 = vmatprep.mubr.msk.bf16.mxu0 %vm226_vm0, %v10649_v5  ;;  %v8878_v49 = vpop.f32.mrf.mxu0  ;;  %v3483_v22 = vld [vmem:[#allocation3 + $0x99] sm:$0xff]  ;;  %v2878_v7 = vadd.f32 %v10583_v61, %v10511_v18  ;;  %v2870_v18 = vadd.f32 %v10601_v52, %v10515_v8  ;;  %v2320_v61 = vld [vmem:[#allocation4 + $0xa0] sm:$0xff] }
 0x225   : > { %8976 = vmatpush3.bf16.msra.mxu1 %v9308_v62  ;;  %9016 = vmatpush3.bf16.msra.mxu0 %v9312_v1  ;;  %3397 = vst.msk [vmem:[#allocation3 + $0xc9] sm:$0xff] %vm226_vm0, %v3321_v32  ;;  %v3319_v20 = vmax.f32 %v3287_v15, 0.0  ;;  %v3292_v2 = vadd.f32 %v10546_v39, %v3253_v6  ;;  %v3222_v19 = vadd.f32 %v8878_v49, %v2862_v46  ;;  %v3427_v36 = vld [vmem:[#allocation3 + $0x98] sm:$0xff]  ;;  %v10687_v62 = vld [vmem:[%s12131_s3 + $0xb8] sm:$0xff]   ;;  %v2322_v46 = vld [vmem:[#allocation4 + $0xb0] sm:$0xff]  ;;  %v8849_v6 = vpop.f32.mrf.mxu1 }
 0x226   : > { %v3251_v12 = vadd.f32 %v3219_v53, %v2316_v50  ;;  %8977 = vmatprep.subr.bf16.mxu1 %v9309_v63  ;;  %9017 = vmatprep.subr.bf16.mxu0 %v9313_v16  ;;  %v2867_v1 = vadd.f32 %v10573_v3, %v10509_v11  ;;  %v3143_v41 = vpop.f32.mrf.mxu0  ;;  %v3481_v56 = vld [vmem:[#allocation3 + $0x81] sm:$0xff]  ;;  %v10693_v48 = vpack.c.bf16 %v3483_v22, %v3482_v57  ;;  %v3424_v38 = vld [vmem:[#allocation3 + $0x78] sm:$0xff] }
 0x227   : > { %v3425_v55 = vld [vmem:[#allocation3 + $0x80] sm:$0xff]  ;;  %3395 = vst.msk [vmem:[#allocation3 + $0xb1] sm:$0xff] %vm226_vm0, %v3319_v20  ;;  %v3324_v13 = vmax.f32 %v3292_v2, 0.0  ;;  %v3254_v35 = vadd.f32 %v3222_v19, %v2319_v30  ;;  %v3220_v42 = vadd.f32 %v3143_v41, %v2854_v0  ;;  %v10697_v25 = vpack.c.bf16 %v3481_v56, %v3480_v45  ;;  %v2323_v49 = vld [vmem:[#allocation4 + $0xb8] sm:$0xff] }
 0x228   : > { %v3290_v27 = vadd.f32 %v10546_v39, %v3251_v12  ;;  %v8881_v26 = vpop.f32.mrf.mxu0  ;;  %v10699_v11 = vpack.c.bf16 %v3425_v55, %v3424_v38  ;;  %v10701_v3 = vpack.c.bf16 %v3427_v36, %v3426_v23  ;;  %v2891_v12 = vadd.f32 %v10630_v43, %v10517_v24  ;;  %v3486_v36 = vld [vmem:[#allocation3 + $0xc1] sm:$0xff] }
 0x229   : > { %8978 = vmatpush3.bf16.msra.mxu1 %v9309_v63  ;;  %9018 = vmatpush3.bf16.msra.mxu0 %v9313_v16  ;;  %3400 = vst.msk [vmem:[#allocation3 + $0xf1] sm:$0xff] %vm226_vm0, %v3324_v13  ;;  %v3293_v51 = vadd.f32 %v10546_v39, %v3254_v35  ;;  %v3252_v31 = vadd.f32 %v3220_v42, %v2317_v10  ;;  %v3430_v13 = vld [vmem:[#allocation3 + $0xc0] sm:$0xff]  ;;  %v2898_v42 = vpop.f32.mrf.mxu1 }
 0x22a   : > { %v3322_v17 = vmax.f32 %v3290_v27, 0.0  ;;  %v3225_v33 = vadd.f32 %v8881_v26, %v2875_v60  ;;  %9051 = vmatprep.subr.bf16.mxu1 %v10678_v44  ;;  %9091 = vmatprep.subr.bf16.mxu0 %v10687_v62  ;;  %v3156_v63 = vpop.f32.mrf.mxu0  ;;  %v2883_v19 = vadd.f32 %v10651_v59, %v10521_v9  ;;  %v3484_v56 = vld [vmem:[#allocation3 + $0xa9] sm:$0xff]  ;;  %v2321_v27 = vld [vmem:[#allocation4 + $0xa8] sm:$0xff] }
 0x22b   : > { %8908 = vmatmul.mubr.msk.bf16.gmra.mxu1 %vm226_vm0, %v10697_v25  ;;  %8948 = vmatmul.mubr.msk.bf16.gmra.mxu0 %vm226_vm0, %v10699_v11  ;;  %v3325_v16 = vmax.f32 %v3293_v51, 0.0  ;;  %v3291_v54 = vadd.f32 %v10546_v39, %v3252_v31  ;;  %v3223_v32 = vadd.f32 %v3156_v63, %v2867_v1  ;;  %v3428_v55 = vld [vmem:[#allocation3 + $0xa8] sm:$0xff]  ;;  %v12191_v26 = vld [vmem:[#allocation7_spill] sm:$0xff]  ;;  %v2326_v51 = vld [vmem:[#allocation4 + $0xd0] sm:$0xff] }
 0x22c   : > { %3398 = vst.msk [vmem:[#allocation3 + $0xd9] sm:$0xff] %vm226_vm0, %v3322_v17  ;;  %v3257_v58 = vadd.f32 %v3225_v33, %v2322_v46  ;;  %8911 = vmatprep.mubr.msk.bf16.mxu1 %vm226_vm0, %v10693_v48  ;;  %8951 = vmatprep.mubr.msk.bf16.mxu0 %vm226_vm0, %v10701_v3  ;;  %v8882_v15 = vpop.f32.mrf.mxu0  ;;  %v3487_v20 = vld [vmem:[#allocation3 + $0xc9] sm:$0xff]  ;;  %v2894_v17 = vadd.f32 %v10680_v37, %v12191_v26  ;;  %v12192_v37 = vld [vmem:[#allocation8_spill] sm:$0xff] }
 0x22d   : > { %3401 = vst.msk [vmem:[#allocation3 + $0xf9] sm:$0xff] %vm226_vm0, %v3325_v16  ;;  %v3323_v53 = vmax.f32 %v3291_v54, 0.0  ;;  %v3255_v50 = vadd.f32 %v3223_v32, %v2320_v61  ;;  %v3226_v22 = vadd.f32 %v8882_v15, %v2878_v7  ;;  %v3431_v2 = vld [vmem:[#allocation3 + $0xc8] sm:$0xff]  ;;  %v10735_v9 = vpack.c.bf16 %v3487_v20, %v3486_v36  ;;  %v2324_v54 = vld [vmem:[#allocation4 + $0xc0] sm:$0xff]  ;;  %v8850_v32 = vpop.f32.mrf.mxu1 }
 0x22e   : > { %v3296_v0 = vadd.f32 %v10546_v39, %v3257_v58  ;;  %v3159_v8 = vpop.f32.mrf.mxu0  ;;  %v3485_v52 = vld [vmem:[#allocation3 + $0xb1] sm:$0xff]  ;;  %v10737_v59 = vpack.c.bf16 %v3431_v2, %v3430_v13  ;;  %v2886_v16 = vadd.f32 %v10703_v21, %v12192_v37 }
 0x22f   : > { %v3429_v57 = vld [vmem:[#allocation3 + $0xb0] sm:$0xff]  ;;  %3399 = vst.msk [vmem:[#allocation3 + $0xe1] sm:$0xff] %vm226_vm0, %v3323_v53  ;;  %v3294_v1 = vadd.f32 %v10546_v39, %v3255_v50  ;;  %v3258_v30 = vadd.f32 %v3226_v22, %v2323_v49  ;;  %v3224_v41 = vadd.f32 %v3159_v8, %v2870_v18  ;;  %v10731_v24 = vpack.c.bf16 %v3485_v52, %v3484_v56  ;;  %v2327_v53 = vld [vmem:[#allocation4 + $0xd8] sm:$0xff] }
 0x230   : > { %v3328_v60 = vmax.f32 %v3296_v0, 0.0  ;;  %v8885_v35 = vpop.f32.mrf.mxu0  ;;  %v10733_v43 = vpack.c.bf16 %v3429_v57, %v3428_v55  ;;  %v12193_v22 = vld [vmem:[#allocation9_spill] sm:$0xff]  ;;  %v12194_v2 = vld [vmem:[#allocation6_spill] sm:$0xff]  ;;  %v2325_v55 = vld [vmem:[#allocation4 + $0xc8] sm:$0xff] }
 0x231   : > { %v3326_v45 = vmax.f32 %v3294_v1, 0.0  ;;  %v3297_v38 = vadd.f32 %v10546_v39, %v3258_v30  ;;  %v3256_v23 = vadd.f32 %v3224_v41, %v2321_v27  ;;  %v3229_v10 = vadd.f32 %v8885_v35, %v2891_v12  ;;  %v3490_v52 = vld [vmem:[#allocation3 + $0xf1] sm:$0xff] }
 0x232   : > { %3404 = vst.msk [vmem:[#allocation3 + $0x121] sm:$0xff] %vm226_vm0, %v3328_v60  ;;  %v3172_v31 = vpop.f32.mrf.mxu0  ;;  %v2907_v20 = vadd.f32 %v8849_v6, %v12193_v22  ;;  %v2899_v12 = vadd.f32 %v2898_v42, %v12194_v2  ;;  %v3434_v56 = vld [vmem:[#allocation3 + $0xf0] sm:$0xff] }
 0x233   : > { %8912 = vmatmul.mubr.msk.bf16.gmra.mxu1 %vm226_vm0, %v10731_v24  ;;  %8952 = vmatmul.mubr.msk.bf16.gmra.mxu0 %vm226_vm0, %v10733_v43  ;;  %3402 = vst.msk [vmem:[#allocation3 + $0x109] sm:$0xff] %vm226_vm0, %v3326_v45  ;;  %v3329_v33 = vmax.f32 %v3297_v38, 0.0  ;;  %v3295_v7 = vadd.f32 %v10546_v39, %v3256_v23  ;;  %v3261_v46 = vadd.f32 %v3229_v10, %v2326_v51  ;;  %v3488_v30 = vld [vmem:[#allocation3 + $0xd9] sm:$0xff]  ;;  %v2901_v45 = vpop.f32.mrf.mxu1 }
 0x234   : > { %v3227_v63 = vadd.f32 %v3172_v31, %v2883_v19  ;;  %8915 = vmatprep.mubr.msk.bf16.mxu1 %vm226_vm0, %v10735_v9  ;;  %8955 = vmatprep.mubr.msk.bf16.mxu0 %vm226_vm0, %v10737_v59  ;;  %v8886_v58 = vpop.f32.mrf.mxu0  ;;  %v3491_v50 = vld [vmem:[#allocation3 + $0xf9] sm:$0xff] }
 0x235   : > { %3405 = vst.msk [vmem:[#allocation3 + $0x129] sm:$0xff] %vm226_vm0, %v3329_v33  ;;  %v3327_v18 = vmax.f32 %v3295_v7, 0.0  ;;  %v3300_v61 = vadd.f32 %v10546_v39, %v3261_v46  ;;  %v3230_v0 = vadd.f32 %v8886_v58, %v2894_v17  ;;  %v3435_v49 = vld [vmem:[#allocation3 + $0xf8] sm:$0xff]  ;;  %v10765_v35 = vpack.c.bf16 %v3491_v50, %v3490_v52  ;;  %v12195_v17 = vld [vmem:[#allocation10_spill] sm:$0xff]  ;;  %v2330_v31 = vld [vmem:[#allocation4 + $0xf0] sm:$0xff] }
 0x236   : > { %v3259_v15 = vadd.f32 %v3227_v63, %v2324_v54  ;;  %v3175_v19 = vpop.f32.mrf.mxu0  ;;  %v3489_v8 = vld [vmem:[#allocation3 + $0xe1] sm:$0xff]  ;;  %v3432_v41 = vld [vmem:[#allocation3 + $0xd8] sm:$0xff]  ;;  %v10767_v42 = vpack.c.bf16 %v3435_v49, %v3434_v56  ;;  %v2910_v51 = vadd.f32 %v8850_v32, %v12195_v17  ;;  %v2328_v58 = vld [vmem:[#allocation4 + $0xe0] sm:$0xff] }
 0x237   : > { %v3433_v21 = vld [vmem:[#allocation3 + $0xe0] sm:$0xff]  ;;  %3403 = vst.msk [vmem:[#allocation3 + $0x111] sm:$0xff] %vm226_vm0, %v3327_v18  ;;  %v3332_v57 = vmax.f32 %v3300_v61, 0.0  ;;  %v3262_v60 = vadd.f32 %v3230_v0, %v2327_v53  ;;  %v3228_v1 = vadd.f32 %v3175_v19, %v2886_v16  ;;  %v10761_v27 = vpack.c.bf16 %v3489_v8, %v3488_v30  ;;  %v12196_v16 = vld [vmem:[#allocation11_spill] sm:$0xff]  ;;  %v2331_v53 = vld [vmem:[#allocation4 + $0xf8] sm:$0xff] }
 0x238   : > { %v3298_v36 = vadd.f32 %v10546_v39, %v3259_v15  ;;  %v8889_v13 = vpop.f32.mrf.mxu0  ;;  %v10763_v6 = vpack.c.bf16 %v3433_v21, %v3432_v41  ;;  %v2902_v54 = vadd.f32 %v2901_v45, %v12196_v16 }
 0x239   : > { %3408 = vst.msk [vmem:[#allocation3 + $0x151] sm:$0xff] %vm226_vm0, %v3332_v57  ;;  %v3301_v23 = vadd.f32 %v10546_v39, %v3262_v60  ;;  %v3260_v10 = vadd.f32 %v3228_v1, %v2325_v55  ;;  %v3233_v26 = vadd.f32 %v8889_v13, %v2907_v20  ;;  %v2329_v60 = vld [vmem:[#allocation4 + $0xe8] sm:$0xff]  ;;  %v3438_v56 = vld [vmem:[#allocation3 + $0x120] sm:$0xff] }
 0x23a   : > { %v3330_v38 = vmax.f32 %v3298_v36, 0.0  ;;  %v3188_v33 = vpop.f32.mrf.mxu0  ;;  %v3492_v52 = vld [vmem:[#allocation3 + $0x109] sm:$0xff]  ;;  %v3494_v36 = vld [vmem:[#allocation3 + $0x121] sm:$0xff] }
 0x23b   : > { %8916 = vmatmul.mubr.msk.bf16.gmra.mxu1 %vm226_vm0, %v10761_v27  ;;  %8956 = vmatmul.mubr.msk.bf16.gmra.mxu0 %vm226_vm0, %v10763_v6  ;;  %v3333_v7 = vmax.f32 %v3301_v23, 0.0  ;;  %v3299_v46 = vadd.f32 %v10546_v39, %v3260_v10  ;;  %v3265_v63 = vadd.f32 %v3233_v26, %v2330_v31  ;;  %v3231_v37 = vadd.f32 %v3188_v33, %v2899_v12  ;;  %v3436_v57 = vld [vmem:[#allocation3 + $0x108] sm:$0xff] }
 0x23c   : > { %3406 = vst.msk [vmem:[#allocation3 + $0x139] sm:$0xff] %vm226_vm0, %v3330_v38  ;;  %8919 = vmatprep.mubr.msk.bf16.mxu1 %vm226_vm0, %v10765_v35  ;;  %8959 = vmatprep.mubr.msk.bf16.mxu0 %vm226_vm0, %v10767_v42  ;;  %v8890_v32 = vpop.f32.mrf.mxu0  ;;  %v3495_v50 = vld [vmem:[#allocation3 + $0x129] sm:$0xff] }
 0x23d   : > { %3409 = vst.msk [vmem:[#allocation3 + $0x159] sm:$0xff] %vm226_vm0, %v3333_v7  ;;  %v3331_v18 = vmax.f32 %v3299_v46, 0.0  ;;  %v3304_v61 = vadd.f32 %v10546_v39, %v3265_v63  ;;  %v3263_v15 = vadd.f32 %v3231_v37, %v2328_v58  ;;  %v3234_v0 = vadd.f32 %v8890_v32, %v2910_v51  ;;  %v3439_v2 = vld [vmem:[#allocation3 + $0x128] sm:$0xff] }
 0x23e   : > { %v3191_v49 = vpop.f32.mrf.mxu0  ;;  %v3493_v22 = vld [vmem:[#allocation3 + $0x111] sm:$0xff]  ;;  %v10791_v41 = vpack.c.bf16 %v3495_v50, %v3494_v36  ;;  %v10795_v38 = vpack.c.bf16 %v3439_v2, %v3438_v56  ;;  %v3993_v32 = vld [vmem:[#allocation3 + $0x2] sm:$0xff] }
 0x23f   : > { %v3437_v20 = vld [vmem:[#allocation3 + $0x110] sm:$0xff]  ;;  %3407 = vst.msk [vmem:[#allocation3 + $0x141] sm:$0xff] %vm226_vm0, %v3331_v18  ;;  %v3336_v12 = vmax.f32 %v3304_v61, 0.0  ;;  %v3302_v19 = vadd.f32 %v10546_v39, %v3263_v15  ;;  %v3266_v8 = vadd.f32 %v3234_v0, %v2331_v53  ;;  %v3232_v21 = vadd.f32 %v3191_v49, %v2902_v54  ;;  %v3996_v2 = vld [vmem:[#allocation3 + $0x22] sm:$0xff] }
 0x240   : > { %v10787_v1 = vpack.c.bf16 %v3493_v22, %v3492_v52  ;;  %v10789_v30 = vpack.c.bf16 %v3437_v20, %v3436_v57  ;;  %v3498_v37 = vld [vmem:[#allocation3 + $0x151] sm:$0xff]  ;;  %v3995_v20 = vld [vmem:[#allocation3 + $0x1a] sm:$0xff]  ;;  %v4001_v56 = vld [vmem:[#allocation3 + $0x62] sm:$0xff] }
 0x241   : > { %3412 = vst.msk [vmem:[#allocation3 + $0x181] sm:$0xff] %vm226_vm0, %v3336_v12  ;;  %v3334_v55 = vmax.f32 %v3302_v19, 0.0  ;;  %v3305_v13 = vadd.f32 %v10546_v39, %v3266_v8  ;;  %v3264_v45 = vadd.f32 %v3232_v21, %v2329_v60  ;;  %v3442_v16 = vld [vmem:[#allocation3 + $0x150] sm:$0xff]  ;;  %v3998_v19 = vld [vmem:[#allocation3 + $0x3a] sm:$0xff]  ;;  %v10836_v8 = vpack.c.bf16 %v3996_v2, %v3995_v20 }
 0x242   : > { %v3994_v18 = vld [vmem:[#allocation3 + $0xa] sm:$0xff]  ;;  %v3997_v12 = vld [vmem:[#allocation3 + $0x32] sm:$0xff]  ;;  %v9315_v52 = vld [vmem:[%s12131_s3 + $0x70] sm:$0xff]  }
 0x243   : > { %8920 = vmatmul.mubr.msk.bf16.gmra.mxu1 %vm226_vm0, %v10787_v1  ;;  %8960 = vmatmul.mubr.msk.bf16.gmra.mxu0 %vm226_vm0, %v10789_v30  ;;  %3410 = vst.msk [vmem:[#allocation3 + $0x169] sm:$0xff] %vm226_vm0, %v3334_v55  ;;  %v3337_v23 = vmax.f32 %v3305_v13, 0.0  ;;  %v3303_v10 = vadd.f32 %v10546_v39, %v3264_v45  ;;  %v3496_v17 = vld [vmem:[#allocation3 + $0x139] sm:$0xff]  ;;  %v4025_v22 = vpack.c.bf16 %v3994_v18, %v3993_v32  ;;  %v3999_v36 = vld [vmem:[#allocation3 + $0x4a] sm:$0xff] }
 0x244   : > { %8923 = vmatprep.mubr.msk.bf16.mxu1 %vm226_vm0, %v10791_v41  ;;  %8963 = vmatprep.mubr.msk.bf16.mxu0 %vm226_vm0, %v10795_v38  ;;  %v3440_v51 = vld [vmem:[#allocation3 + $0x138] sm:$0xff]  ;;  %v10838_v21 = vpack.c.bf16 %v3998_v19, %v3997_v12  ;;  %v9319_v57 = vld [vmem:[%s12131_s3 + $0xb0] sm:$0xff]   ;;  %v4002_v55 = vld [vmem:[#allocation3 + $0x6a] sm:$0xff] }
 0x245   : > { %3413 = vst.msk [vmem:[#allocation3 + $0x189] sm:$0xff] %vm226_vm0, %v3337_v23  ;;  %v3335_v26 = vmax.f32 %v3303_v10, 0.0  ;;  %v3499_v31 = vld [vmem:[#allocation3 + $0x159] sm:$0xff]  ;;  %v10883_v45 = vld [vmem:[%s12131_s3 + $0xf8] sm:$0xff]  }
 0x246   : > { %v3497_v33 = vld [vmem:[#allocation3 + $0x141] sm:$0xff]  ;;  %v3443_v46 = vld [vmem:[#allocation3 + $0x158] sm:$0xff]  ;;  %v10813_v54 = vpack.c.bf16 %v3499_v31, %v3498_v37  ;;  %v4007_v31 = vld [vmem:[#allocation3 + $0xaa] sm:$0xff] }
 0x247   : > { %v3441_v7 = vld [vmem:[#allocation3 + $0x140] sm:$0xff]  ;;  %3411 = vst.msk [vmem:[#allocation3 + $0x171] sm:$0xff] %vm226_vm0, %v3335_v26  ;;  %v10809_v63 = vpack.c.bf16 %v3497_v33, %v3496_v17  ;;  %v10815_v58 = vpack.c.bf16 %v3443_v46, %v3442_v16  ;;  %v4000_v60 = vld [vmem:[#allocation3 + $0x52] sm:$0xff]  ;;  %v4010_v46 = vld [vmem:[#allocation3 + $0xca] sm:$0xff] }
 0x248   : > { %v10811_v39 = vpack.c.bf16 %v3441_v7, %v3440_v51  ;;  %v10862_v13 = vpack.c.bf16 %v4000_v60, %v3999_v36  ;;  %v4003_v23 = vld [vmem:[#allocation3 + $0x7a] sm:$0xff]  ;;  %v4004_v10 = vld [vmem:[#allocation3 + $0x82] sm:$0xff]  ;;  %v4005_v26 = vld [vmem:[#allocation3 + $0x92] sm:$0xff] }
 0x249   : > { %v4006_v17 = vld [vmem:[#allocation3 + $0x9a] sm:$0xff]  ;;  %v10890_v51 = vpack.c.bf16 %v4004_v10, %v4003_v23  ;;  %v4008_v33 = vld [vmem:[#allocation3 + $0xb2] sm:$0xff]  ;;  %v4009_v7 = vld [vmem:[#allocation3 + $0xc2] sm:$0xff] }
 0x24a   : > { %v3500_v61 = vld [vmem:[#allocation3 + $0x169] sm:$0xff]  ;;  %v10904_v37 = vpack.c.bf16 %v4008_v33, %v4007_v31  ;;  %v10906_v16 = vpack.c.bf16 %v4010_v46, %v4009_v7  ;;  %v4013_v32 = vld [vmem:[#allocation3 + $0xf2] sm:$0xff]  ;;  %v4014_v18 = vld [vmem:[#allocation3 + $0xfa] sm:$0xff] }
 0x24b   : > { %8924 = vmatmul.mubr.msk.bf16.gmra.mxu1 %vm226_vm0, %v10809_v63  ;;  %8964 = vmatmul.mubr.msk.bf16.gmra.mxu0 %vm226_vm0, %v10811_v39  ;;  %v3444_v53 = vld [vmem:[#allocation3 + $0x168] sm:$0xff]  ;;  %v4021_v2 = vld [vmem:[#allocation3 + $0x152] sm:$0xff]  ;;  %v4022_v12 = vld [vmem:[#allocation3 + $0x15a] sm:$0xff] }
 0x24c   : > { %8927 = vmatprep.mubr.msk.bf16.mxu1 %vm226_vm0, %v10813_v54  ;;  %8967 = vmatprep.mubr.msk.bf16.mxu0 %vm226_vm0, %v10815_v58  ;;  %v5439_v23 = vld [vmem:[#allocation3 + $0x61] sm:$0xff] }
 0x24d   : > { %v5382_v10 = vld [vmem:[#allocation3 + $0x60] sm:$0xff] }
 0x24e   : > { %v3501_v15 = vld [vmem:[#allocation3 + $0x171] sm:$0xff] }
 0x24f   : > { %v3445_v0 = vld [vmem:[#allocation3 + $0x170] sm:$0xff]  ;;  %v10825_v50 = vpack.c.bf16 %v3501_v15, %v3500_v61  ;;  %v10918_v15 = vpack.c.bf16 %v4014_v18, %v4013_v32  ;;  %v5444_v18 = vld [vmem:[#allocation3 + $0x99] sm:$0xff] }
 0x250   : > { %v10827_v49 = vpack.c.bf16 %v3445_v0, %v3444_v53  ;;  %v4017_v53 = vld [vmem:[#allocation3 + $0x122] sm:$0xff]  ;;  %v4018_v0 = vld [vmem:[#allocation3 + $0x12a] sm:$0xff] }
 0x251   : > { %v10930_v20 = vpack.c.bf16 %v4018_v0, %v4017_v53 }
 0x253   : > { %8928 = vmatmul.mubr.msk.bf16.gmra.mxu1 %vm226_vm0, %v10825_v50  ;;  %8968 = vmatmul.mubr.msk.bf16.gmra.mxu0 %vm226_vm0, %v10827_v49 }
 0x254   : > { %9019 = vmatprep.mubr.msk.bf16.mxu0 %vm226_vm0, %v10593_v34  ;;  %8979 = vmatprep.mubr.msk.bf16.mxu1 %vm226_vm0, %v4025_v22  ;;  %v9316_v34 = vld [vmem:[%s12131_s3 + $0x68] sm:$0xff]  }
 0x25b   : > { %8980 = vmatmul.mubr.msk.bf16.vlgmr.msra.gmra.mxu1 %vm226_vm0, %v10836_v8  ;;  %9020 = vmatmul.mubr.msk.bf16.vlgmr.msra.gmra.mxu0 %vm226_vm0, %v10597_v4  ;;  %v9320_v4 = vld [vmem:[%s12131_s3 + $0xa8] sm:$0xff]  }
 0x25c   : > { %8983 = vmatprep.mubr.msk.bf16.mxu1 %vm226_vm0, %v10838_v21  ;;  %9023 = vmatprep.mubr.msk.bf16.mxu0 %vm226_vm0, %v10645_v28  ;;  %v10864_v28 = vpack.c.bf16 %v4002_v55, %v4001_v56  ;;  %v5381_v56 = vld [vmem:[#allocation3 + $0x50] sm:$0xff] }
 0x25d   : > { %9052 = vmatpush3.bf16.msra.mxu1 %v10678_v44  ;;  %9092 = vmatpush3.bf16.msra.mxu0 %v10687_v62  ;;  %v9317_v44 = vld [vmem:[%s12131_s3 + $0x60] sm:$0xff]  }
 0x25e   : > { %9053 = vmatprep.subr.bf16.mxu1 %v9315_v52  ;;  %9093 = vmatprep.subr.bf16.mxu0 %v9319_v57  ;;  %v9321_v62 = vld [vmem:[%s12131_s3 + $0xa0] sm:$0xff]  }
 0x25f   : > { %v5440_v55 = vld [vmem:[#allocation3 + $0x69] sm:$0xff] }
 0x261   : > { %9054 = vmatpush3.bf16.msra.mxu1 %v9315_v52  ;;  %9094 = vmatpush3.bf16.msra.mxu0 %v9319_v57  ;;  %v4039_v52 = vpack.c.bf16 %v4022_v12, %v4021_v2  ;;  %v4024_v57 = vld [vmem:[#allocation3 + $0x172] sm:$0xff] }
 0x262   : > { %9055 = vmatprep.subr.bf16.mxu1 %v9316_v34  ;;  %9095 = vmatprep.subr.bf16.mxu0 %v9320_v4 }
 0x263   : > { %8984 = vmatmul.mubr.msk.bf16.gmra.mxu1 %vm226_vm0, %v10862_v13  ;;  %9024 = vmatmul.mubr.msk.bf16.gmra.mxu0 %vm226_vm0, %v10641_v29  ;;  %v10888_v29 = vld [vmem:[%s12131_s3 + $0xd8] sm:$0xff]  }
 0x264   : > { %8987 = vmatprep.mubr.msk.bf16.mxu1 %vm226_vm0, %v10864_v28  ;;  %9027 = vmatprep.mubr.msk.bf16.mxu0 %vm226_vm0, %v10697_v25  ;;  %v10892_v25 = vpack.c.bf16 %v4006_v17, %v4005_v26  ;;  %v9331_v17 = vld [vmem:[%s12131_s3 + $0x110] sm:$0xff]  }
 0x265   : > { %9056 = vmatpush3.bf16.msra.mxu1 %v9316_v34  ;;  %9096 = vmatpush3.bf16.msra.mxu0 %v9320_v4  ;;  %v4467_v34 = vld [vmem:[#allocation3 + $0x189] sm:$0xff] }
 0x266   : > { %9057 = vmatprep.subr.bf16.mxu1 %v9317_v44  ;;  %9097 = vmatprep.subr.bf16.mxu0 %v9321_v62 }
 0x269   : > { %9058 = vmatpush3.bf16.msra.mxu1 %v9317_v44  ;;  %9098 = vmatpush3.bf16.msra.mxu0 %v9321_v62  ;;  %v5380_v44 = vld [vmem:[#allocation3 + $0x48] sm:$0xff] }
 0x26a   : > { %9131 = vmatprep.subr.bf16.mxu1 %v10883_v45  ;;  %9171 = vmatprep.subr.bf16.mxu0 %v10888_v29 }
 0x26b   : > { %8988 = vmatmul.mubr.msk.bf16.gmra.mxu1 %vm226_vm0, %v10890_v51  ;;  %9028 = vmatmul.mubr.msk.bf16.gmra.mxu0 %vm226_vm0, %v10693_v48  ;;  %v4011_v48 = vld [vmem:[#allocation3 + $0xda] sm:$0xff] }
 0x26c   : > { %8991 = vmatprep.mubr.msk.bf16.mxu1 %vm226_vm0, %v10892_v25  ;;  %9031 = vmatprep.mubr.msk.bf16.mxu0 %vm226_vm0, %v10731_v24  ;;  %v4012_v24 = vld [vmem:[#allocation3 + $0xe2] sm:$0xff] }
 0x26d   : > { %v10916_v61 = vpack.c.bf16 %v4012_v24, %v4011_v48  ;;  %v9332_v48 = vld [vmem:[%s12131_s3 + $0x108] sm:$0xff]  }
 0x273   : > { %8992 = vmatmul.mubr.msk.bf16.gmra.mxu1 %vm226_vm0, %v10904_v37  ;;  %9032 = vmatmul.mubr.msk.bf16.gmra.mxu0 %vm226_vm0, %v10735_v9  ;;  %v4015_v9 = vld [vmem:[#allocation3 + $0x10a] sm:$0xff] }
 0x274   : > { %8995 = vmatprep.mubr.msk.bf16.mxu1 %vm226_vm0, %v10906_v16  ;;  %9035 = vmatprep.mubr.msk.bf16.mxu0 %vm226_vm0, %v10761_v27  ;;  %v4016_v27 = vld [vmem:[#allocation3 + $0x112] sm:$0xff] }
 0x275   : > { %v10928_v22 = vpack.c.bf16 %v4016_v27, %v4015_v9  ;;  %v5441_v9 = vld [vmem:[#allocation3 + $0x79] sm:$0xff] }
 0x276   : > { %v5384_v27 = vld [vmem:[#allocation3 + $0x78] sm:$0xff] }
 0x27b   : > { %8996 = vmatmul.mubr.msk.bf16.gmra.mxu1 %vm226_vm0, %v10916_v61  ;;  %9036 = vmatmul.mubr.msk.bf16.gmra.mxu0 %vm226_vm0, %v10765_v35  ;;  %v4019_v35 = vld [vmem:[#allocation3 + $0x13a] sm:$0xff] }
 0x27c   : > { %8999 = vmatprep.mubr.msk.bf16.mxu1 %vm226_vm0, %v10918_v15  ;;  %9039 = vmatprep.mubr.msk.bf16.mxu0 %vm226_vm0, %v10787_v1  ;;  %v4020_v1 = vld [vmem:[#allocation3 + $0x142] sm:$0xff] }
 0x27d   : > { %v4038_v19 = vpack.c.bf16 %v4020_v1, %v4019_v35  ;;  %v5443_v35 = vld [vmem:[#allocation3 + $0x91] sm:$0xff] }
 0x27e   : > { %v5386_v1 = vld [vmem:[#allocation3 + $0x90] sm:$0xff]  ;;  %v5471_v12 = vpack.c.bf16 %v5444_v18, %v5443_v35 }
 0x27f   : > { %v5394_v18 = vld [vmem:[#allocation3 + $0xf0] sm:$0xff] }
 0x283   : > { %9000 = vmatmul.mubr.msk.bf16.gmra.mxu1 %vm226_vm0, %v10928_v22  ;;  %9040 = vmatmul.mubr.msk.bf16.gmra.mxu0 %vm226_vm0, %v10791_v41  ;;  %v4023_v41 = vld [vmem:[#allocation3 + $0x16a] sm:$0xff] }
 0x284   : > { %9003 = vmatprep.mubr.msk.bf16.mxu1 %vm226_vm0, %v10930_v20  ;;  %9043 = vmatprep.mubr.msk.bf16.mxu0 %vm226_vm0, %v10809_v63  ;;  %v4466_v63 = vld [vmem:[#allocation3 + $0x181] sm:$0xff]  ;;  %v4040_v36 = vpack.c.bf16 %v4024_v57, %v4023_v41 }
 0x285   : > { %v10946_v60 = vpack.c.bf16 %v4467_v34, %v4466_v63 }
 0x28b   : > { %9004 = vmatmul.mubr.msk.bf16.gmra.mxu1 %vm226_vm0, %v4038_v19  ;;  %9044 = vmatmul.mubr.msk.bf16.gmra.mxu0 %vm226_vm0, %v10813_v54  ;;  %v9323_v54 = vld [vmem:[%s12131_s3 + $0xf0] sm:$0xff]  }
 0x28c   : > { %9007 = vmatprep.mubr.msk.bf16.mxu1 %vm226_vm0, %v4039_v52  ;;  %9047 = vmatprep.mubr.msk.bf16.mxu0 %vm226_vm0, %v10825_v50  ;;  %v9327_v50 = vld [vmem:[%s12131_s3 + $0xd0] sm:$0xff]  }
 0x293   : > { %9008 = vmatmul.mubr.msk.bf16.gmra.mxu1 %vm226_vm0, %v4040_v36  ;;  %9048 = vmatmul.mubr.msk.bf16.gmra.mxu0 %vm226_vm0, %v10946_v60 }
 0x294   : > { %9059 = vmatprep.mubr.msk.bf16.mxu1 %vm226_vm0, %v10595_v14  ;;  %9099 = vmatprep.mubr.msk.bf16.mxu0 %vm226_vm0, %v10836_v8  ;;  %v9324_v14 = vld [vmem:[%s12131_s3 + $0xe8] sm:$0xff]   ;;  %v9329_v8 = vld [vmem:[%s12131_s3 + $0xc0] sm:$0xff]  }
 0x29b   : > { %9060 = vmatmul.mubr.msk.bf16.vlgmr.msra.gmra.mxu1 %vm226_vm0, %v10599_v40  ;;  %9100 = vmatmul.mubr.msk.bf16.vlgmr.msra.gmra.mxu0 %vm226_vm0, %v10838_v21  ;;  %v9328_v40 = vld [vmem:[%s12131_s3 + $0xc8] sm:$0xff]   ;;  %v9330_v21 = vld [vmem:[%s12131_s3 + $0x118] sm:$0xff]  }
 0x29c   : > { %9063 = vmatprep.mubr.msk.bf16.mxu1 %vm226_vm0, %v10647_v47  ;;  %9103 = vmatprep.mubr.msk.bf16.mxu0 %vm226_vm0, %v10862_v13  ;;  %v9325_v47 = vld [vmem:[%s12131_s3 + $0xe0] sm:$0xff]   ;;  %v5383_v13 = vld [vmem:[#allocation3 + $0x68] sm:$0xff] }
 0x29d   : > { %9132 = vmatpush3.bf16.msra.mxu1 %v10883_v45  ;;  %9172 = vmatpush3.bf16.msra.mxu0 %v10888_v29  ;;  %v5411_v45 = vpack.c.bf16 %v5381_v56, %v5380_v44  ;;  %v5469_v29 = vpack.c.bf16 %v5440_v55, %v5439_v23  ;;  %v5412_v26 = vpack.c.bf16 %v5383_v13, %v5382_v10  ;;  %v5450_v23 = vld [vmem:[#allocation3 + $0xe1] sm:$0xff] }
 0x29e   : > { %9133 = vmatprep.subr.bf16.mxu1 %v9323_v54  ;;  %9173 = vmatprep.subr.bf16.mxu0 %v9327_v50  ;;  %v5393_v10 = vld [vmem:[#allocation3 + $0xe0] sm:$0xff] }
 0x2a1   : > { %9134 = vmatpush3.bf16.msra.mxu1 %v9323_v54  ;;  %9174 = vmatpush3.bf16.msra.mxu0 %v9327_v50  ;;  %v5446_v50 = vld [vmem:[#allocation3 + $0xb1] sm:$0xff] }
 0x2a2   : > { %9135 = vmatprep.subr.bf16.mxu1 %v9324_v14  ;;  %9175 = vmatprep.subr.bf16.mxu0 %v9328_v40 }
 0x2a3   : > { %9064 = vmatmul.mubr.msk.bf16.gmra.mxu1 %vm226_vm0, %v10649_v5  ;;  %9104 = vmatmul.mubr.msk.bf16.gmra.mxu0 %vm226_vm0, %v10864_v28  ;;  %v4410_v5 = vld [vmem:[#allocation3 + $0x188] sm:$0xff] }
 0x2a4   : > { %9067 = vmatprep.mubr.msk.bf16.mxu1 %vm226_vm0, %v10699_v11  ;;  %9107 = vmatprep.mubr.msk.bf16.mxu0 %vm226_vm0, %v10890_v51  ;;  %v4989_v11 = vld [vmem:[#allocation3 + $0x182] sm:$0xff] }
 0x2a5   : > { %9136 = vmatpush3.bf16.msra.mxu1 %v9324_v14  ;;  %9176 = vmatpush3.bf16.msra.mxu0 %v9328_v40  ;;  %v5437_v28 = vld [vmem:[#allocation3 + $0x49] sm:$0xff] }
 0x2a6   : > { %9137 = vmatprep.subr.bf16.mxu1 %v9325_v47  ;;  %9177 = vmatprep.subr.bf16.mxu0 %v9329_v8  ;;  %v5389_v14 = vld [vmem:[#allocation3 + $0xb0] sm:$0xff] }
 0x2a9   : > { %9138 = vmatpush3.bf16.msra.mxu1 %v9325_v47  ;;  %9178 = vmatpush3.bf16.msra.mxu0 %v9329_v8  ;;  %v5448_v8 = vld [vmem:[#allocation3 + $0xc9] sm:$0xff] }
 0x2aa   : > { %9211 = vmatprep.subr.bf16.mxu1 %v9330_v21 }
 0x2ab   : > { %9068 = vmatmul.mubr.msk.bf16.gmra.mxu1 %vm226_vm0, %v10701_v3  ;;  %9108 = vmatmul.mubr.msk.bf16.gmra.mxu0 %vm226_vm0, %v10892_v25  ;;  %v4990_v3 = vld [vmem:[#allocation3 + $0x18a] sm:$0xff] }
 0x2ac   : > { %9071 = vmatprep.mubr.msk.bf16.mxu1 %vm226_vm0, %v10733_v43  ;;  %9111 = vmatprep.mubr.msk.bf16.mxu0 %vm226_vm0, %v10904_v37  ;;  %v5436_v43 = vld [vmem:[#allocation3 + $0x39] sm:$0xff]  ;;  %v5442_v37 = vld [vmem:[#allocation3 + $0x81] sm:$0xff] }
 0x2b3   : > { %9072 = vmatmul.mubr.msk.bf16.gmra.mxu1 %vm226_vm0, %v10737_v59  ;;  %9112 = vmatmul.mubr.msk.bf16.gmra.mxu0 %vm226_vm0, %v10906_v16  ;;  %v5379_v59 = vld [vmem:[#allocation3 + $0x38] sm:$0xff]  ;;  %v5385_v16 = vld [vmem:[#allocation3 + $0x80] sm:$0xff] }
 0x2b4   : > { %9075 = vmatprep.mubr.msk.bf16.mxu1 %vm226_vm0, %v10763_v6  ;;  %9115 = vmatprep.mubr.msk.bf16.mxu0 %vm226_vm0, %v10916_v61  ;;  %v4409_v6 = vld [vmem:[#allocation3 + $0x180] sm:$0xff]  ;;  %v5387_v61 = vld [vmem:[#allocation3 + $0x98] sm:$0xff] }
 0x2bb   : > { %9076 = vmatmul.mubr.msk.bf16.gmra.mxu1 %vm226_vm0, %v10767_v42  ;;  %9116 = vmatmul.mubr.msk.bf16.gmra.mxu0 %vm226_vm0, %v10918_v15  ;;  %v11031_v42 = vpack.c.bf16 %v4410_v5, %v4409_v6 }
 0x2bc   : > { %9079 = vmatprep.mubr.msk.bf16.mxu1 %vm226_vm0, %v10789_v30  ;;  %9119 = vmatprep.mubr.msk.bf16.mxu0 %vm226_vm0, %v10928_v22  ;;  %v11033_v30 = vpack.c.bf16 %v4990_v3, %v4989_v11  ;;  %v5470_v22 = vpack.c.bf16 %v5442_v37, %v5441_v9  ;;  %v5445_v11 = vld [vmem:[#allocation3 + $0xa9] sm:$0xff] }
 0x2bd   : > { %v5388_v3 = vld [vmem:[#allocation3 + $0xa8] sm:$0xff]  ;;  %v5472_v6 = vpack.c.bf16 %v5446_v50, %v5445_v11 }
 0x2be   : > { %v5453_v50 = vld [vmem:[#allocation3 + $0x109] sm:$0xff]  ;;  %v5455_v11 = vld [vmem:[#allocation3 + $0x121] sm:$0xff] }
 0x2c3   : > { %9080 = vmatmul.mubr.msk.bf16.gmra.mxu1 %vm226_vm0, %v10795_v38  ;;  %9120 = vmatmul.mubr.msk.bf16.gmra.mxu0 %vm226_vm0, %v10930_v20  ;;  %v5435_v38 = vld [vmem:[#allocation3 + $0x31] sm:$0xff]  ;;  %v5413_v20 = vpack.c.bf16 %v5385_v16, %v5384_v27 }
 0x2c4   : > { %9083 = vmatprep.mubr.msk.bf16.mxu1 %vm226_vm0, %v10811_v39  ;;  %9123 = vmatprep.mubr.msk.bf16.mxu0 %vm226_vm0, %v4038_v19  ;;  %v5378_v39 = vld [vmem:[#allocation3 + $0x30] sm:$0xff]  ;;  %v5414_v19 = vpack.c.bf16 %v5387_v61, %v5386_v1 }
 0x2c5   : > { %v5410_v4 = vpack.c.bf16 %v5379_v59, %v5378_v39  ;;  %v5447_v39 = vld [vmem:[#allocation3 + $0xc1] sm:$0xff] }
 0x2cb   : > { %9084 = vmatmul.mubr.msk.bf16.gmra.mxu1 %vm226_vm0, %v10815_v58  ;;  %9124 = vmatmul.mubr.msk.bf16.gmra.mxu0 %vm226_vm0, %v4039_v52  ;;  %v5467_v58 = vpack.c.bf16 %v5436_v43, %v5435_v38  ;;  %v9333_v52 = vld [vmem:[%s12131_s3 + $0x100] sm:$0xff]   ;;  %v5415_v38 = vpack.c.bf16 %v5389_v14, %v5388_v3  ;;  %v5396_v14 = vld [vmem:[#allocation3 + $0x108] sm:$0xff]  ;;  %v5398_v3 = vld [vmem:[#allocation3 + $0x120] sm:$0xff] }
 0x2cc   : > { %9087 = vmatprep.mubr.msk.bf16.mxu1 %vm226_vm0, %v10827_v49  ;;  %9127 = vmatprep.mubr.msk.bf16.mxu0 %vm226_vm0, %v4040_v36  ;;  %v5438_v49 = vld [vmem:[#allocation3 + $0x51] sm:$0xff] }
 0x2cd   : > { %v5468_v62 = vpack.c.bf16 %v5438_v49, %v5437_v28  ;;  %v5473_v49 = vpack.c.bf16 %v5448_v8, %v5447_v39 }
 0x2d3   : > { %9088 = vmatmul.mubr.msk.bf16.gmra.mxu1 %vm226_vm0, %v11031_v42  ;;  %9128 = vmatmul.mubr.msk.bf16.gmra.mxu0 %vm226_vm0, %v11033_v30 }
 0x2d4   : > { %9139 = vmatprep.mubr.msk.bf16.mxu1 %vm226_vm0, %v5467_v58  ;;  %9179 = vmatprep.mubr.msk.bf16.mxu0 %vm226_vm0, %v5410_v4  ;;  %v5390_v58 = vld [vmem:[#allocation3 + $0xc0] sm:$0xff] }
 0x2da   : > { %v8901_v51 = vpop.f32.mrf.mxu1  ;;  %v8941_v25 = vpop.f32.mrf.mxu0 }
 0x2db   : > { %9140 = vmatmul.mubr.msk.bf16.vlgmr.msra.gmra.mxu1 %vm226_vm0, %v5468_v62  ;;  %9180 = vmatmul.mubr.msk.bf16.vlgmr.msra.gmra.mxu0 %vm226_vm0, %v5411_v45  ;;  %v11046_v31 = vadd.f32 %v8941_v25, %v8901_v51  ;;  %v5395_v51 = vld [vmem:[#allocation3 + $0xf8] sm:$0xff] }
 0x2dc   : > { %9143 = vmatprep.mubr.msk.bf16.mxu1 %vm226_vm0, %v5469_v29  ;;  %9183 = vmatprep.mubr.msk.bf16.mxu0 %vm226_vm0, %v5412_v26  ;;  %v3633_v33 = vpop.f32.mrf.mxu1  ;;  %v3866_v7 = vpop.f32.mrf.mxu0  ;;  %v5418_v27 = vpack.c.bf16 %v5395_v51, %v5394_v18  ;;  %v5400_v51 = vld [vmem:[#allocation3 + $0x138] sm:$0xff] }
 0x2dd   : > { %9212 = vmatpush3.bf16.msra.mxu1 %v9330_v21  ;;  %v11050_v46 = vadd.f32 %v3866_v7, %v3633_v33  ;;  %v5391_v21 = vld [vmem:[#allocation3 + $0xc8] sm:$0xff]  ;;  %v5449_v33 = vld [vmem:[#allocation3 + $0xd9] sm:$0xff] }
 0x2de   : > { %9213 = vmatprep.subr.bf16.mxu1 %v9331_v17  ;;  %v8902_v24 = vpop.f32.mrf.mxu1  ;;  %v8942_v32 = vpop.f32.mrf.mxu0  ;;  %v5416_v56 = vpack.c.bf16 %v5391_v21, %v5390_v58  ;;  %v5392_v7 = vld [vmem:[#allocation3 + $0xd8] sm:$0xff] }
 0x2df   : > { %v11055_v15 = vadd.f32 %v8942_v32, %v8902_v24  ;;  %v5417_v24 = vpack.c.bf16 %v5393_v10, %v5392_v7  ;;  %v5451_v32 = vld [vmem:[#allocation3 + $0xf1] sm:$0xff]  ;;  %v5460_v10 = vld [vmem:[#allocation3 + $0x159] sm:$0xff] }
 0x2e0   : > { %v3636_v53 = vpop.f32.mrf.mxu1  ;;  %v3869_v0 = vpop.f32.mrf.mxu0 }
 0x2e1   : > { %9214 = vmatpush3.bf16.msra.mxu1 %v9331_v17  ;;  %v11057_v2 = vadd.f32 %v3869_v0, %v3636_v53  ;;  %v5452_v17 = vld [vmem:[#allocation3 + $0xf9] sm:$0xff] }
 0x2e2   : > { %9215 = vmatprep.subr.bf16.mxu1 %v9332_v48  ;;  %v5475_v9 = vpack.c.bf16 %v5452_v17, %v5451_v32  ;;  %v5457_v17 = vld [vmem:[#allocation3 + $0x139] sm:$0xff] }
 0x2e3   : > { %v8905_v41 = vpop.f32.mrf.mxu1  ;;  %v8945_v57 = vpop.f32.mrf.mxu0  ;;  %9144 = vmatmul.mubr.msk.bf16.gmra.mxu1 %vm226_vm0, %v5470_v22  ;;  %9184 = vmatmul.mubr.msk.bf16.gmra.mxu0 %vm226_vm0, %v5413_v20 }
 0x2e4   : > { %v11064_v34 = vadd.f32 %v8945_v57, %v8905_v41  ;;  %9147 = vmatprep.mubr.msk.bf16.mxu1 %vm226_vm0, %v5471_v12  ;;  %9187 = vmatprep.mubr.msk.bf16.mxu0 %vm226_vm0, %v5414_v19  ;;  %v5454_v12 = vld [vmem:[#allocation3 + $0x111] sm:$0xff]  ;;  %v5456_v57 = vld [vmem:[#allocation3 + $0x129] sm:$0xff] }
 0x2e5   : > { %v3649_v63 = vpop.f32.mrf.mxu1  ;;  %v3882_v36 = vpop.f32.mrf.mxu0  ;;  %9216 = vmatpush3.bf16.msra.mxu1 %v9332_v48  ;;  %v5474_v48 = vpack.c.bf16 %v5450_v23, %v5449_v33  ;;  %v5397_v19 = vld [vmem:[#allocation3 + $0x110] sm:$0xff]  ;;  %v5476_v8 = vpack.c.bf16 %v5454_v12, %v5453_v50 }
 0x2e6   : > { %v11068_v54 = vadd.f32 %v3882_v36, %v3649_v63  ;;  %9217 = vmatprep.subr.bf16.mxu1 %v9333_v52  ;;  %v5399_v63 = vld [vmem:[#allocation3 + $0x128] sm:$0xff]  ;;  %v5419_v21 = vpack.c.bf16 %v5397_v19, %v5396_v14  ;;  %v5462_v19 = vld [vmem:[#allocation3 + $0x171] sm:$0xff] }
 0x2e7   : > { %v8906_v40 = vpop.f32.mrf.mxu1  ;;  %v8946_v47 = vpop.f32.mrf.mxu0  ;;  %v5461_v50 = vld [vmem:[#allocation3 + $0x169] sm:$0xff] }
 0x2e8   : > { %v11070_v5 = vadd.f32 %v8946_v47, %v8906_v40  ;;  %v5404_v14 = vld [vmem:[#allocation3 + $0x168] sm:$0xff] }
 0x2e9   : > { %v3652_v43 = vpop.f32.mrf.mxu1  ;;  %v3885_v59 = vpop.f32.mrf.mxu0  ;;  %9218 = vmatpush3.bf16.msra.mxu1 %v9333_v52 }
 0x2ea   : > { %v11072_v4 = vadd.f32 %v3885_v59, %v3652_v43  ;;  %v5477_v59 = vpack.c.bf16 %v5456_v57, %v5455_v11 }
 0x2eb   : > { %v8909_v55 = vpop.f32.mrf.mxu1  ;;  %v8949_v13 = vpop.f32.mrf.mxu0  ;;  %9148 = vmatmul.mubr.msk.bf16.gmra.mxu1 %vm226_vm0, %v5472_v6  ;;  %9188 = vmatmul.mubr.msk.bf16.gmra.mxu0 %vm226_vm0, %v5415_v38  ;;  %v5420_v6 = vpack.c.bf16 %v5399_v63, %v5398_v3 }
 0x2ec   : > { %v11076_v28 = vadd.f32 %v8949_v13, %v8909_v55  ;;  %9151 = vmatprep.mubr.msk.bf16.mxu1 %vm226_vm0, %v5473_v49  ;;  %9191 = vmatprep.mubr.msk.bf16.mxu0 %vm226_vm0, %v5416_v56  ;;  %v5458_v13 = vld [vmem:[#allocation3 + $0x141] sm:$0xff] }
 0x2ed   : > { %v3665_v44 = vpop.f32.mrf.mxu1  ;;  %v3898_v62 = vpop.f32.mrf.mxu0 }
 0x2ee   : > { %v11080_v45 = vadd.f32 %v3898_v62, %v3665_v44  ;;  %v5401_v44 = vld [vmem:[#allocation3 + $0x140] sm:$0xff] }
 0x2ef   : > { %v8910_v29 = vpop.f32.mrf.mxu1  ;;  %v8950_v26 = vpop.f32.mrf.mxu0 }
 0x2f0   : > { %v11082_v25 = vadd.f32 %v8950_v26, %v8910_v29  ;;  %v5403_v29 = vld [vmem:[#allocation3 + $0x158] sm:$0xff] }
 0x2f1   : > { %v3668_v37 = vpop.f32.mrf.mxu1  ;;  %v3901_v16 = vpop.f32.mrf.mxu0 }
 0x2f2   : > { %v11084_v61 = vadd.f32 %v3901_v16, %v3668_v37  ;;  %v5478_v37 = vpack.c.bf16 %v5458_v13, %v5457_v17  ;;  %v5421_v16 = vpack.c.bf16 %v5401_v44, %v5400_v51  ;;  %v5958_v51 = vld [vmem:[#allocation3 + $0x32] sm:$0xff] }
 0x2f3   : > { %v8913_v53 = vpop.f32.mrf.mxu1  ;;  %v8953_v0 = vpop.f32.mrf.mxu0  ;;  %9152 = vmatmul.mubr.msk.bf16.gmra.mxu1 %vm226_vm0, %v5474_v48  ;;  %9192 = vmatmul.mubr.msk.bf16.gmra.mxu0 %vm226_vm0, %v5417_v24  ;;  %v5459_v48 = vld [vmem:[#allocation3 + $0x151] sm:$0xff] }
 0x2f4   : > { %v11088_v22 = vadd.f32 %v8953_v0, %v8913_v53  ;;  %9155 = vmatprep.mubr.msk.bf16.mxu1 %vm226_vm0, %v5475_v9  ;;  %9195 = vmatprep.mubr.msk.bf16.mxu0 %vm226_vm0, %v5418_v27  ;;  %v5402_v24 = vld [vmem:[#allocation3 + $0x150] sm:$0xff]  ;;  %v5479_v18 = vpack.c.bf16 %v5460_v10, %v5459_v48 }
 0x2f5   : > { %v3681_v20 = vpop.f32.mrf.mxu1  ;;  %v3914_v35 = vpop.f32.mrf.mxu0  ;;  %v5422_v9 = vpack.c.bf16 %v5403_v29, %v5402_v24 }
 0x2f6   : > { %v11092_v1 = vadd.f32 %v3914_v35, %v3681_v20 }
 0x2f7   : > { %v8914_v52 = vpop.f32.mrf.mxu1  ;;  %v8954_v41 = vpop.f32.mrf.mxu0 }
 0x2f8   : > { %v11094_v36 = vadd.f32 %v8954_v41, %v8914_v52  ;;  %v5405_v52 = vld [vmem:[#allocation3 + $0x170] sm:$0xff] }
 0x2f9   : > { %v3684_v40 = vpop.f32.mrf.mxu1  ;;  %v3917_v47 = vpop.f32.mrf.mxu0 }
 0x2fa   : > { %v11096_v43 = vadd.f32 %v3917_v47, %v3684_v40 }
 0x2fb   : > { %v8917_v38 = vpop.f32.mrf.mxu1  ;;  %v8957_v39 = vpop.f32.mrf.mxu0  ;;  %9156 = vmatmul.mubr.msk.bf16.gmra.mxu1 %vm226_vm0, %v5476_v8  ;;  %9196 = vmatmul.mubr.msk.bf16.gmra.mxu0 %vm226_vm0, %v5419_v21  ;;  %v5480_v8 = vpack.c.bf16 %v5462_v19, %v5461_v50  ;;  %v5423_v21 = vpack.c.bf16 %v5405_v52, %v5404_v14 }
 0x2fc   : > { %v11100_v58 = vadd.f32 %v8957_v39, %v8917_v38  ;;  %9159 = vmatprep.mubr.msk.bf16.mxu1 %vm226_vm0, %v5477_v59  ;;  %9199 = vmatprep.mubr.msk.bf16.mxu0 %vm226_vm0, %v5420_v6  ;;  %v5465_v6 = vld [vmem:[#allocation3 + $0x199] sm:$0xff]  ;;  %v5466_v39 = vld [vmem:[#allocation3 + $0x1a1] sm:$0xff] }
 0x2fd   : > { %v3697_v49 = vpop.f32.mrf.mxu1  ;;  %v3930_v56 = vpop.f32.mrf.mxu0  ;;  %v5482_v29 = vpack.c.bf16 %v5466_v39, %v5465_v6 }
 0x2fe   : > { %v11104_v55 = vadd.f32 %v3930_v56, %v3697_v49  ;;  %v5408_v49 = vld [vmem:[#allocation3 + $0x198] sm:$0xff]  ;;  %v5409_v56 = vld [vmem:[#allocation3 + $0x1a0] sm:$0xff] }
 0x2ff   : > { %v8918_v62 = vpop.f32.mrf.mxu1  ;;  %v8958_v23 = vpop.f32.mrf.mxu0  ;;  %v5425_v17 = vpack.c.bf16 %v5409_v56, %v5408_v49 }
 0x300   : > { %v11106_v26 = vadd.f32 %v8958_v23, %v8918_v62 }
 0x301   : > { %v3700_v33 = vpop.f32.mrf.mxu1  ;;  %v3933_v7 = vpop.f32.mrf.mxu0 }
 0x302   : > { %v11108_v32 = vadd.f32 %v3933_v7, %v3700_v33  ;;  %v5959_v33 = vld [vmem:[#allocation3 + $0x3a] sm:$0xff] }
 0x303   : > { %v8921_v27 = vpop.f32.mrf.mxu1  ;;  %v8961_v53 = vpop.f32.mrf.mxu0  ;;  %9160 = vmatmul.mubr.msk.bf16.gmra.mxu1 %vm226_vm0, %v5478_v37  ;;  %9200 = vmatmul.mubr.msk.bf16.gmra.mxu0 %vm226_vm0, %v5421_v16 }
 0x304   : > { %v11112_v0 = vadd.f32 %v8961_v53, %v8921_v27  ;;  %9163 = vmatprep.mubr.msk.bf16.mxu1 %vm226_vm0, %v5479_v18  ;;  %9203 = vmatprep.mubr.msk.bf16.mxu0 %vm226_vm0, %v5422_v9 }
 0x305   : > { %v3713_v20 = vpop.f32.mrf.mxu1  ;;  %v3946_v35 = vpop.f32.mrf.mxu0 }
 0x306   : > { %v11116_v12 = vadd.f32 %v3946_v35, %v3713_v20  ;;  %v5960_v20 = vld [vmem:[#allocation3 + $0x4a] sm:$0xff]  ;;  %v5961_v35 = vld [vmem:[#allocation3 + $0x52] sm:$0xff] }
 0x307   : > { %v8922_v41 = vpop.f32.mrf.mxu1  ;;  %v8962_v57 = vpop.f32.mrf.mxu0 }
 0x308   : > { %v11118_v63 = vadd.f32 %v8962_v57, %v8922_v41  ;;  %v5962_v41 = vld [vmem:[#allocation3 + $0x62] sm:$0xff]  ;;  %v5963_v57 = vld [vmem:[#allocation3 + $0x6a] sm:$0xff] }
 0x309   : > { %v3716_v40 = vpop.f32.mrf.mxu1  ;;  %v3949_v47 = vpop.f32.mrf.mxu0 }
 0x30a   : > { %v11120_v11 = vadd.f32 %v3949_v47, %v3716_v40  ;;  %v5991_v47 = vpack.c.bf16 %v5961_v35, %v5960_v20  ;;  %v5968_v20 = vld [vmem:[#allocation3 + $0xaa] sm:$0xff] }
 0x30b   : > { %v8925_v3 = vpop.f32.mrf.mxu1  ;;  %v8965_v59 = vpop.f32.mrf.mxu0  ;;  %9164 = vmatmul.mubr.msk.bf16.gmra.mxu1 %vm226_vm0, %v5480_v8  ;;  %9204 = vmatmul.mubr.msk.bf16.gmra.mxu0 %vm226_vm0, %v5423_v21  ;;  %v5992_v21 = vpack.c.bf16 %v5963_v57, %v5962_v41  ;;  %v5971_v41 = vld [vmem:[#allocation3 + $0xca] sm:$0xff] }
 0x30c   : > { %v11124_v38 = vadd.f32 %v8965_v59, %v8925_v3  ;;  %9167 = vmatprep.mubr.msk.bf16.mxu1 %vm226_vm0, %v10946_v60  ;;  %9207 = vmatprep.mubr.msk.bf16.mxu0 %vm226_vm0, %v11031_v42  ;;  %v5990_v42 = vpack.c.bf16 %v5959_v33, %v5958_v51 }
 0x30d   : > { %v3729_v13 = vpop.f32.mrf.mxu1  ;;  %v3962_v44 = vpop.f32.mrf.mxu0 }
 0x30e   : > { %v11130_v62 = vadd.f32 %v3962_v44, %v3729_v13  ;;  %v5964_v13 = vld [vmem:[#allocation3 + $0x7a] sm:$0xff]  ;;  %v5965_v44 = vld [vmem:[#allocation3 + $0x82] sm:$0xff] }
 0x30f   : > { %v8926_v23 = vpop.f32.mrf.mxu1  ;;  %v8966_v10 = vpop.f32.mrf.mxu0 }
 0x310   : > { %v11132_v7 = vadd.f32 %v8966_v10, %v8926_v23 }
 0x311   : > { %v3732_v37 = vpop.f32.mrf.mxu1  ;;  %v3965_v60 = vpop.f32.mrf.mxu0 }
 0x312   : > { %v11134_v16 = vadd.f32 %v3965_v60, %v3732_v37  ;;  %v5993_v37 = vpack.c.bf16 %v5965_v44, %v5964_v13 }
 0x313   : > { %v8929_v48 = vpop.f32.mrf.mxu1  ;;  %v8969_v24 = vpop.f32.mrf.mxu0  ;;  %9168 = vmatmul.mubr.msk.bf16.gmra.mxu1 %vm226_vm0, %v5482_v29  ;;  %9208 = vmatmul.mubr.msk.bf16.gmra.mxu0 %vm226_vm0, %v5425_v17  ;;  %v5966_v29 = vld [vmem:[#allocation3 + $0x92] sm:$0xff]  ;;  %v5967_v17 = vld [vmem:[#allocation3 + $0x9a] sm:$0xff] }
 0x314   : > { %v11138_v18 = vadd.f32 %v8969_v24, %v8929_v48  ;;  %9219 = vmatprep.mubr.msk.bf16.mxu1 %vm226_vm0, %v5990_v42  ;;  %v5994_v42 = vpack.c.bf16 %v5967_v17, %v5966_v29 }
 0x315   : > { %v3745_v9 = vpop.f32.mrf.mxu1  ;;  %v3978_v27 = vpop.f32.mrf.mxu0 }
 0x316   : > { %v11141_v53 = vadd.f32 %v3978_v27, %v3745_v9 }
 0x317   : > { %v8930_v19 = vpop.f32.mrf.mxu1  ;;  %v8970_v52 = vpop.f32.mrf.mxu0 }
 0x318   : > { %v11143_v50 = vadd.f32 %v8970_v52, %v8930_v19  ;;  %v5970_v52 = vld [vmem:[#allocation3 + $0xc2] sm:$0xff] }
 0x319   : > { %v3748_v14 = vpop.f32.mrf.mxu1  ;;  %v3981_v40 = vpop.f32.mrf.mxu0 }
 0x31a   : > { %v11145_v8 = vadd.f32 %v3981_v40, %v3748_v14 }
 0x31b   : > { %v8981_v3 = vpop.f32.mrf.mxu1  ;;  %v11147_v59 = vpop.f32.mrf.mxu0  ;;  %9220 = vmatmul.mubr.msk.bf16.vlgmr.msra.gmra.mxu1 %vm226_vm0, %v5991_v47 }
 0x31c   : > { %v11151_v6 = vadd.f32 %v8981_v3, %v11046_v31  ;;  %9223 = vmatprep.mubr.msk.bf16.mxu1 %vm226_vm0, %v5992_v21  ;;  %v5996_v21 = vpack.c.bf16 %v5971_v41, %v5970_v52 }
 0x31d   : > { %v4156_v39 = vpop.f32.mrf.mxu1  ;;  %v11154_v49 = vpop.f32.mrf.mxu0 }
 0x31e   : > { %v11157_v56 = vadd.f32 %v4156_v39, %v11050_v46 }
 0x31f   : > { %v8982_v23 = vpop.f32.mrf.mxu1  ;;  %v11159_v10 = vpop.f32.mrf.mxu0 }
 0x320   : > { %v11162_v51 = vadd.f32 %v8982_v23, %v11055_v15  ;;  %v5972_v23 = vld [vmem:[#allocation3 + $0xda] sm:$0xff] }
 0x321   : > { %v4159_v31 = vpop.f32.mrf.mxu1  ;;  %v11164_v33 = vpop.f32.mrf.mxu0 }
 0x322   : > { %v11167_v60 = vadd.f32 %v4159_v31, %v11057_v2  ;;  %v5969_v2 = vld [vmem:[#allocation3 + $0xb2] sm:$0xff] }
 0x323   : > { %v8985_v46 = vpop.f32.mrf.mxu1  ;;  %v11169_v48 = vpop.f32.mrf.mxu0  ;;  %9224 = vmatmul.mubr.msk.bf16.gmra.mxu1 %vm226_vm0, %v5993_v37  ;;  %v5995_v40 = vpack.c.bf16 %v5969_v2, %v5968_v20  ;;  %v5974_v31 = vld [vmem:[#allocation3 + $0xf2] sm:$0xff]  ;;  %v5975_v37 = vld [vmem:[#allocation3 + $0xfa] sm:$0xff] }
 0x324   : > { %v11173_v24 = vadd.f32 %v8985_v46, %v11064_v34  ;;  %9227 = vmatprep.mubr.msk.bf16.mxu1 %vm226_vm0, %v5994_v42  ;;  %v5998_v2 = vpack.c.bf16 %v5975_v37, %v5974_v31 }
 0x325   : > { %v4172_v15 = vpop.f32.mrf.mxu1  ;;  %v11176_v9 = vpop.f32.mrf.mxu0 }
 0x326   : > { %v11179_v27 = vadd.f32 %v4172_v15, %v11068_v54 }
 0x327   : > { %v8986_v35 = vpop.f32.mrf.mxu1  ;;  %v11181_v19 = vpop.f32.mrf.mxu0 }
 0x328   : > { %v11184_v57 = vadd.f32 %v8986_v35, %v11070_v5 }
 0x329   : > { %v4175_v34 = vpop.f32.mrf.mxu1  ;;  %v11186_v14 = vpop.f32.mrf.mxu0 }
 0x32a   : > { %v11189_v47 = vadd.f32 %v4175_v34, %v11072_v4  ;;  %v5973_v4 = vld [vmem:[#allocation3 + $0xe2] sm:$0xff] }
 0x32b   : > { %v8989_v54 = vpop.f32.mrf.mxu1  ;;  %v11191_v3 = vpop.f32.mrf.mxu0  ;;  %9228 = vmatmul.mubr.msk.bf16.gmra.mxu1 %vm226_vm0, %v5995_v40  ;;  %v5997_v15 = vpack.c.bf16 %v5973_v4, %v5972_v23  ;;  %v5976_v40 = vld [vmem:[#allocation3 + $0x10a] sm:$0xff] }
 0x32c   : > { %v11195_v39 = vadd.f32 %v8989_v54, %v11076_v28  ;;  %9231 = vmatprep.mubr.msk.bf16.mxu1 %vm226_vm0, %v5996_v21  ;;  %v5979_v23 = vld [vmem:[#allocation3 + $0x12a] sm:$0xff] }
 0x32d   : > { %v4188_v5 = vpop.f32.mrf.mxu1  ;;  %v11198_v13 = vpop.f32.mrf.mxu0 }
 0x32e   : > { %v11201_v44 = vadd.f32 %v4188_v5, %v11080_v45  ;;  %v5978_v5 = vld [vmem:[#allocation3 + $0x122] sm:$0xff] }
 0x32f   : > { %v8990_v29 = vpop.f32.mrf.mxu1  ;;  %v11203_v17 = vpop.f32.mrf.mxu0 }
 0x330   : > { %v11206_v42 = vadd.f32 %v8990_v29, %v11082_v25 }
 0x331   : > { %v4191_v28 = vpop.f32.mrf.mxu1  ;;  %v11208_v46 = vpop.f32.mrf.mxu0 }
 0x332   : > { %v11211_v20 = vadd.f32 %v4191_v28, %v11084_v61  ;;  %v5977_v61 = vld [vmem:[#allocation3 + $0x112] sm:$0xff]  ;;  %v6000_v28 = vpack.c.bf16 %v5979_v23, %v5978_v5  ;;  %v5983_v23 = vld [vmem:[#allocation3 + $0x15a] sm:$0xff] }
 0x333   : > { %v8993_v45 = vpop.f32.mrf.mxu1  ;;  %v11213_v35 = vpop.f32.mrf.mxu0  ;;  %9232 = vmatmul.mubr.msk.bf16.gmra.mxu1 %vm226_vm0, %v5997_v15  ;;  %v5999_v31 = vpack.c.bf16 %v5977_v61, %v5976_v40  ;;  %v5980_v40 = vld [vmem:[#allocation3 + $0x13a] sm:$0xff]  ;;  %v5982_v5 = vld [vmem:[#allocation3 + $0x152] sm:$0xff] }
 0x334   : > { %v11217_v52 = vadd.f32 %v8993_v45, %v11088_v22  ;;  %9235 = vmatprep.mubr.msk.bf16.mxu1 %vm226_vm0, %v5998_v2 }
 0x335   : > { %v4204_v25 = vpop.f32.mrf.mxu1  ;;  %v11220_v41 = vpop.f32.mrf.mxu0 }
 0x336   : > { %v11223_v34 = vadd.f32 %v4204_v25, %v11092_v1 }
 0x337   : > { %v8994_v21 = vpop.f32.mrf.mxu1  ;;  %v11225_v54 = vpop.f32.mrf.mxu0 }
 0x338   : > { %v11228_v4 = vadd.f32 %v8994_v21, %v11094_v36 }
 0x339   : > { %v4207_v22 = vpop.f32.mrf.mxu1  ;;  %v11230_v29 = vpop.f32.mrf.mxu0 }
 0x33a   : > { %v11233_v37 = vadd.f32 %v4207_v22, %v11096_v43  ;;  %v5981_v43 = vld [vmem:[#allocation3 + $0x142] sm:$0xff] }
 0x33b   : > { %v8997_v1 = vpop.f32.mrf.mxu1  ;;  %v11235_v15 = vpop.f32.mrf.mxu0  ;;  %9236 = vmatmul.mubr.msk.bf16.gmra.mxu1 %vm226_vm0, %v5999_v31 }
 0x33c   : > { %v11239_v2 = vadd.f32 %v8997_v1, %v11100_v58  ;;  %9239 = vmatprep.mubr.msk.bf16.mxu1 %vm226_vm0, %v6000_v28  ;;  %v6001_v28 = vpack.c.bf16 %v5981_v43, %v5980_v40  ;;  %v5984_v40 = vld [vmem:[#allocation3 + $0x16a] sm:$0xff] }
 0x33d   : > { %v4220_v36 = vpop.f32.mrf.mxu1  ;;  %v11242_v45 = vpop.f32.mrf.mxu0 }
 0x33e   : > { %12197 = vst [vmem:[#allocation12_spill] sm:$0xff] %v11239_v2  ;;  %v11245_v25 = vadd.f32 %v4220_v36, %v11104_v55  ;;  %v6002_v2 = vpack.c.bf16 %v5983_v23, %v5982_v5 }
 0x33f   : > { %v8998_v61 = vpop.f32.mrf.mxu1  ;;  %v11247_v21 = vpop.f32.mrf.mxu0 }
 0x340   : > { %12198 = vst [vmem:[#allocation13_spill] sm:$0xff] %v11245_v25  ;;  %v11250_v22 = vadd.f32 %v8998_v61, %v11106_v26 }
 0x341   : > { %v4223_v58 = vpop.f32.mrf.mxu1  ;;  %v11252_v31 = vpop.f32.mrf.mxu0 }
 0x342   : > { %12199 = vst [vmem:[#allocation14_spill] sm:$0xff] %v11250_v22  ;;  %v11255_v1 = vadd.f32 %v4223_v58, %v11108_v32  ;;  %v5985_v32 = vld [vmem:[#allocation3 + $0x172] sm:$0xff] }
 0x343   : > { %v9001_v55 = vpop.f32.mrf.mxu1  ;;  %v11257_v36 = vpop.f32.mrf.mxu0  ;;  %9240 = vmatmul.mubr.msk.bf16.gmra.mxu1 %vm226_vm0, %v6001_v28 }
 0x344   : > { %v11261_v25 = vadd.f32 %v9001_v55, %v11112_v0  ;;  %9243 = vmatprep.mubr.msk.bf16.mxu1 %vm226_vm0, %v6002_v2  ;;  %v6003_v0 = vpack.c.bf16 %v5985_v32, %v5984_v40 }
 0x345   : > { %v4236_v26 = vpop.f32.mrf.mxu1  ;;  %v11264_v61 = vpop.f32.mrf.mxu0 }
 0x346   : > { %12200 = vst [vmem:[#allocation15_spill] sm:$0xff] %v11261_v25  ;;  %v11267_v22 = vadd.f32 %v4236_v26, %v11116_v12  ;;  %v5989_v26 = vld [vmem:[#allocation3 + $0x1a2] sm:$0xff] }
 0x347   : > { %v9002_v43 = vpop.f32.mrf.mxu1  ;;  %v11269_v5 = vpop.f32.mrf.mxu0 }
 0x348   : > { %v11272_v23 = vadd.f32 %v9002_v43, %v11118_v63  ;;  %v5988_v63 = vld [vmem:[#allocation3 + $0x19a] sm:$0xff] }
 0x349   : > { %v4239_v58 = vpop.f32.mrf.mxu1  ;;  %v11274_v28 = vpop.f32.mrf.mxu0 }
 0x34a   : > { %12201 = vst [vmem:[#allocation16_spill] sm:$0xff] %v11272_v23  ;;  %v11277_v2 = vadd.f32 %v4239_v58, %v11120_v11  ;;  %v6005_v58 = vpack.c.bf16 %v5989_v26, %v5988_v63 }
 0x34b   : > { %v9005_v55 = vpop.f32.mrf.mxu1  ;;  %v11279_v25 = vpop.f32.mrf.mxu0  ;;  %9244 = vmatmul.mubr.msk.bf16.gmra.mxu1 %vm226_vm0, %v6003_v0 }
 0x34c   : > { %12202 = vst [vmem:[#allocation17_spill] sm:$0xff] %v11277_v2  ;;  %v11283_v12 = vadd.f32 %v9005_v55, %v11124_v38  ;;  %9247 = vmatprep.mubr.msk.bf16.mxu1 %vm226_vm0, %v11033_v30 }
 0x34d   : > { %v4252_v43 = vpop.f32.mrf.mxu1  ;;  %v11287_v23 = vpop.f32.mrf.mxu0 }
 0x34e   : > { %12203 = vst [vmem:[#allocation18_spill] sm:$0xff] %v11283_v12  ;;  %v11290_v40 = vadd.f32 %v4252_v43, %v11130_v62 }
 0x34f   : > { %v9006_v11 = vpop.f32.mrf.mxu1  ;;  %v11292_v32 = vpop.f32.mrf.mxu0 }
 0x350   : > { %12204 = vst [vmem:[#allocation19_spill] sm:$0xff] %v11290_v40  ;;  %v11295_v0 = vadd.f32 %v9006_v11, %v11132_v7 }
 0x351   : > { %v4255_v38 = vpop.f32.mrf.mxu1  ;;  %v11297_v55 = vpop.f32.mrf.mxu0 }
 0x352   : > { %v11300_v30 = vadd.f32 %v4255_v38, %v11134_v16 }
 0x353   : > { %v9009_v12 = vpop.f32.mrf.mxu1  ;;  %v11302_v2 = vpop.f32.mrf.mxu0  ;;  %9248 = vmatmul.mubr.msk.bf16.gmra.mxu1 %vm226_vm0, %v6005_v58 }
 0x354   : > { %12205 = vst [vmem:[#allocation20_spill] sm:$0xff] %v11300_v30  ;;  %v11306_v62 = vadd.f32 %v9009_v12, %v11138_v18 }
 0x355   : > { %v4268_v43 = vpop.f32.mrf.mxu1  ;;  %v11308_v40 = vpop.f32.mrf.mxu0 }
 0x356   : > { %12206 = vst [vmem:[#allocation7_spill] sm:$0xff] %v11306_v62  ;;  %12207 = vst [vmem:[#allocation8_spill] sm:$0xff] %v11308_v40  ;;  %v11311_v7 = vadd.f32 %v4268_v43, %v11141_v53 }
 0x357   : > { %v9010_v63 = vpop.f32.mrf.mxu1  ;;  %v11313_v26 = vpop.f32.mrf.mxu0 }
 0x358   : > { %12208 = vst [vmem:[#allocation9_spill] sm:$0xff] %v11311_v7  ;;  %12209 = vst [vmem:[#allocation6_spill] sm:$0xff] %v11313_v26  ;;  %v11316_v16 = vadd.f32 %v9010_v63, %v11143_v50 }
 0x359   : > { %v4271_v11 = vpop.f32.mrf.mxu1  ;;  %v11318_v38 = vpop.f32.mrf.mxu0 }
 0x35a   : > { %12210 = vst [vmem:[#allocation10_spill] sm:$0xff] %v11316_v16  ;;  %12211 = vst [vmem:[#allocation11_spill] sm:$0xff] %v11318_v38  ;;  %v11321_v58 = vadd.f32 %v4271_v11, %v11145_v8 }
 0x35b   : > { %v9061_v18 = vpop.f32.mrf.mxu1  ;;  %v9101_v12 = vpop.f32.mrf.mxu0 }
 0x35c   : > { %12212 = vst [vmem:[#allocation21_spill] sm:$0xff] %v11321_v58  ;;  %v4841_v62 = vadd.f32 %v9061_v18, %v11147_v59 }
 0x35d   : > { %v4832_v40 = vpop.f32.mrf.mxu1  ;;  %v5122_v30 = vpop.f32.mrf.mxu0 }
 0x35e   : > { %v5251_v53 = vadd.f32 %v9101_v12, %v4841_v62  ;;  %v4833_v43 = vadd.f32 %v4832_v40, %v11154_v49 }
 0x35f   : > { %v9062_v7 = vpop.f32.mrf.mxu1  ;;  %v9102_v26 = vpop.f32.mrf.mxu0 }
 0x360   : > { %v11326_v50 = vadd.f32 %v5251_v53, %v11151_v6  ;;  %v5249_v63 = vadd.f32 %v5122_v30, %v4833_v43  ;;  %v4844_v16 = vadd.f32 %v9062_v7, %v11159_v10 }
 0x361   : > { %v4835_v38 = vpop.f32.mrf.mxu1  ;;  %v5125_v8 = vpop.f32.mrf.mxu0 }
 0x362   : > { %v11330_v11 = vadd.f32 %v5249_v63, %v11157_v56  ;;  %v5252_v58 = vadd.f32 %v9102_v26, %v4844_v16  ;;  %v4836_v59 = vadd.f32 %v4835_v38, %v11164_v33 }
 0x363   : > { %v9065_v18 = vpop.f32.mrf.mxu1  ;;  %v9105_v62 = vpop.f32.mrf.mxu0 }
 0x364   : > { %v11334_v49 = vadd.f32 %v5252_v58, %v11162_v51  ;;  %v5250_v40 = vadd.f32 %v5125_v8, %v4836_v59  ;;  %v4857_v6 = vadd.f32 %v9065_v18, %v11169_v48 }
 0x365   : > { %v4848_v12 = vpop.f32.mrf.mxu1  ;;  %v5138_v30 = vpop.f32.mrf.mxu0 }
 0x366   : > { %v11338_v10 = vadd.f32 %v5250_v40, %v11167_v60  ;;  %v5255_v7 = vadd.f32 %v9105_v62, %v4857_v6  ;;  %v4849_v56 = vadd.f32 %v4848_v12, %v11176_v9 }
 0x367   : > { %v9066_v53 = vpop.f32.mrf.mxu1  ;;  %v9106_v26 = vpop.f32.mrf.mxu0 }
 0x368   : > { %v11342_v33 = vadd.f32 %v5255_v7, %v11173_v24  ;;  %v5253_v16 = vadd.f32 %v5138_v30, %v4849_v56  ;;  %v4860_v51 = vadd.f32 %v9066_v53, %v11181_v19 }
 0x369   : > { %v4851_v38 = vpop.f32.mrf.mxu1  ;;  %v5141_v58 = vpop.f32.mrf.mxu0 }
 0x36a   : > { %v11346_v48 = vadd.f32 %v5253_v16, %v11179_v27  ;;  %v5256_v43 = vadd.f32 %v9106_v26, %v4860_v51  ;;  %v4852_v60 = vadd.f32 %v4851_v38, %v11186_v14 }
 0x36b   : > { %v9069_v63 = vpop.f32.mrf.mxu1  ;;  %v9109_v8 = vpop.f32.mrf.mxu0 }
 0x36c   : > { %v11350_v9 = vadd.f32 %v5256_v43, %v11184_v57  ;;  %v5254_v59 = vadd.f32 %v5141_v58, %v4852_v60  ;;  %v4873_v24 = vadd.f32 %v9069_v63, %v11191_v3 }
 0x36d   : > { %v4864_v18 = vpop.f32.mrf.mxu1  ;;  %v5154_v62 = vpop.f32.mrf.mxu0 }
 0x36e   : > { %v11354_v19 = vadd.f32 %v5254_v59, %v11189_v47  ;;  %v5259_v40 = vadd.f32 %v9109_v8, %v4873_v24  ;;  %v4865_v27 = vadd.f32 %v4864_v18, %v11198_v13 }
 0x36f   : > { %v9070_v6 = vpop.f32.mrf.mxu1  ;;  %v9110_v12 = vpop.f32.mrf.mxu0 }
 0x370   : > { %v11358_v14 = vadd.f32 %v5259_v40, %v11195_v39  ;;  %v5257_v30 = vadd.f32 %v5154_v62, %v4865_v27  ;;  %v4876_v57 = vadd.f32 %v9070_v6, %v11203_v17 }
 0x371   : > { %v4867_v7 = vpop.f32.mrf.mxu1  ;;  %v5157_v56 = vpop.f32.mrf.mxu0 }
 0x372   : > { %v11362_v3 = vadd.f32 %v5257_v30, %v11201_v44  ;;  %v5260_v53 = vadd.f32 %v9110_v12, %v4876_v57  ;;  %v4868_v47 = vadd.f32 %v4867_v7, %v11208_v46 }
 0x373   : > { %v9073_v26 = vpop.f32.mrf.mxu1  ;;  %v9113_v16 = vpop.f32.mrf.mxu0 }
 0x374   : > { %v11366_v13 = vadd.f32 %v5260_v53, %v11206_v42  ;;  %v5258_v51 = vadd.f32 %v5157_v56, %v4868_v47  ;;  %v4889_v39 = vadd.f32 %v9073_v26, %v11213_v35  ;;  %v12214_v56 = vld [vmem:[#allocation12_spill] sm:$0xff] }
 0x375   : > { %v4880_v38 = vpop.f32.mrf.mxu1  ;;  %v5170_v58 = vpop.f32.mrf.mxu0 }
 0x376   : > { %v11370_v17 = vadd.f32 %v5258_v51, %v11211_v20  ;;  %v5263_v43 = vadd.f32 %v9113_v16, %v4889_v39  ;;  %v4881_v44 = vadd.f32 %v4880_v38, %v11220_v41  ;;  %v12216_v16 = vld [vmem:[#allocation13_spill] sm:$0xff] }
 0x377   : > { %v9074_v60 = vpop.f32.mrf.mxu1  ;;  %v9114_v63 = vpop.f32.mrf.mxu0 }
 0x378   : > { %v11374_v46 = vadd.f32 %v5263_v43, %v11217_v52  ;;  %v5261_v8 = vadd.f32 %v5170_v58, %v4881_v44  ;;  %v4892_v42 = vadd.f32 %v9074_v60, %v11225_v54  ;;  %v12218_v58 = vld [vmem:[#allocation14_spill] sm:$0xff] }
 0x379   : > { %v4883_v59 = vpop.f32.mrf.mxu1  ;;  %v5173_v24 = vpop.f32.mrf.mxu0 }
 0x37a   : > { %v11378_v35 = vadd.f32 %v5261_v8, %v11223_v34  ;;  %v5264_v18 = vadd.f32 %v9114_v63, %v4892_v42  ;;  %v4884_v20 = vadd.f32 %v4883_v59, %v11230_v29 }
 0x37b   : > { %v9077_v62 = vpop.f32.mrf.mxu1  ;;  %v9117_v40 = vpop.f32.mrf.mxu0 }
 0x37c   : > { %v11382_v41 = vadd.f32 %v5264_v18, %v11228_v4  ;;  %v5262_v27 = vadd.f32 %v5173_v24, %v4884_v20  ;;  %v4905_v52 = vadd.f32 %v9077_v62, %v11235_v15  ;;  %v12221_v18 = vld [vmem:[#allocation15_spill] sm:$0xff] }
 0x37d   : > { %v4896_v6 = vpop.f32.mrf.mxu1  ;;  %v5186_v12 = vpop.f32.mrf.mxu0 }
 0x37e   : > { %v11386_v54 = vadd.f32 %v5262_v27, %v11233_v37  ;;  %v5267_v30 = vadd.f32 %v9117_v40, %v4905_v52  ;;  %v4897_v34 = vadd.f32 %v4896_v6, %v11242_v45 }
 0x37f   : > { %v9078_v57 = vpop.f32.mrf.mxu1  ;;  %v9118_v7 = vpop.f32.mrf.mxu0 }
 0x380   : > { %12213 = vst [vmem:[#allocation22_spill] sm:$0xff] %v11386_v54  ;;  %v11390_v29 = vadd.f32 %v5267_v30, %v12214_v56  ;;  %v5265_v53 = vadd.f32 %v5186_v12, %v4897_v34  ;;  %v4908_v4 = vadd.f32 %v9078_v57, %v11247_v21  ;;  %v12224_v30 = vld [vmem:[#allocation16_spill] sm:$0xff] }
 0x381   : > { %v4899_v47 = vpop.f32.mrf.mxu1  ;;  %v5189_v26 = vpop.f32.mrf.mxu0 }
 0x382   : > { %12215 = vst [vmem:[#allocation12_spill] sm:$0xff] %v11390_v29  ;;  %v11394_v15 = vadd.f32 %v5265_v53, %v12216_v16  ;;  %v5268_v51 = vadd.f32 %v9118_v7, %v4908_v4  ;;  %v4900_v37 = vadd.f32 %v4899_v47, %v11252_v31  ;;  %v12226_v53 = vld [vmem:[#allocation17_spill] sm:$0xff]  ;;  %v12228_v16 = vld [vmem:[#allocation18_spill] sm:$0xff] }
 0x383   : > { %v9081_v39 = vpop.f32.mrf.mxu1  ;;  %v9121_v38 = vpop.f32.mrf.mxu0 }
 0x384   : > { %12217 = vst [vmem:[#allocation13_spill] sm:$0xff] %v11394_v15  ;;  %v11398_v45 = vadd.f32 %v5268_v51, %v12218_v58  ;;  %v5266_v43 = vadd.f32 %v5189_v26, %v4900_v37  ;;  %v4921_v44 = vadd.f32 %v9081_v39, %v11257_v36  ;;  %v12230_v58 = vld [vmem:[#allocation19_spill] sm:$0xff] }
 0x385   : > { %v4912_v60 = vpop.f32.mrf.mxu1  ;;  %v5202_v63 = vpop.f32.mrf.mxu0 }
 0x386   : > { %12219 = vst [vmem:[#allocation14_spill] sm:$0xff] %v11398_v45  ;;  %v11402_v21 = vadd.f32 %v5266_v43, %v11255_v1  ;;  %v5271_v8 = vadd.f32 %v9121_v38, %v4921_v44  ;;  %v4913_v42 = vadd.f32 %v4912_v60, %v11264_v61 }
 0x387   : > { %v9082_v59 = vpop.f32.mrf.mxu1  ;;  %v9122_v24 = vpop.f32.mrf.mxu0 }
 0x388   : > { %12220 = vst [vmem:[#allocation23_spill] sm:$0xff] %v11402_v21  ;;  %v11406_v31 = vadd.f32 %v5271_v8, %v12221_v18  ;;  %v5269_v20 = vadd.f32 %v5202_v63, %v4913_v42  ;;  %v4924_v62 = vadd.f32 %v9082_v59, %v11269_v5  ;;  %v12233_v18 = vld [vmem:[#allocation20_spill] sm:$0xff] }
 0x389   : > { %v4915_v40 = vpop.f32.mrf.mxu1  ;;  %v5205_v27 = vpop.f32.mrf.mxu0 }
 0x38a   : > { %12222 = vst [vmem:[#allocation15_spill] sm:$0xff] %v11406_v31  ;;  %v11410_v36 = vadd.f32 %v5269_v20, %v11267_v22  ;;  %v5272_v52 = vadd.f32 %v9122_v24, %v4924_v62  ;;  %v4916_v1 = vadd.f32 %v4915_v40, %v11274_v28  ;;  %v12235_v62 = vld [vmem:[#allocation8_spill] sm:$0xff] }
 0x38b   : > { %v9085_v6 = vpop.f32.mrf.mxu1  ;;  %v9125_v12 = vpop.f32.mrf.mxu0 }
 0x38c   : > { %12223 = vst [vmem:[#allocation24_spill] sm:$0xff] %v11410_v36  ;;  %v11414_v61 = vadd.f32 %v5272_v52, %v12224_v30  ;;  %v5270_v34 = vadd.f32 %v5205_v27, %v4916_v1  ;;  %v4937_v57 = vadd.f32 %v9085_v6, %v11279_v25  ;;  %v12236_v1 = vld [vmem:[#allocation7_spill] sm:$0xff] }
 0x38d   : > { %v4928_v7 = vpop.f32.mrf.mxu1  ;;  %v5218_v56 = vpop.f32.mrf.mxu0 }
 0x38e   : > { %12225 = vst [vmem:[#allocation16_spill] sm:$0xff] %v11414_v61  ;;  %v11418_v5 = vadd.f32 %v5270_v34, %v12226_v53  ;;  %v5275_v4 = vadd.f32 %v9125_v12, %v4937_v57  ;;  %v4929_v22 = vadd.f32 %v4928_v7, %v11287_v23  ;;  %v12238_v12 = vld [vmem:[#allocation6_spill] sm:$0xff]  ;;  %v12239_v57 = vld [vmem:[#allocation9_spill] sm:$0xff] }
 0x38f   : > { %v9086_v47 = vpop.f32.mrf.mxu1  ;;  %v9126_v26 = vpop.f32.mrf.mxu0 }
 0x390   : > { %12227 = vst [vmem:[#allocation17_spill] sm:$0xff] %v11418_v5  ;;  %v11422_v28 = vadd.f32 %v5275_v4, %v12228_v16  ;;  %v5273_v51 = vadd.f32 %v5218_v56, %v4929_v22  ;;  %v4940_v37 = vadd.f32 %v9086_v47, %v11292_v32  ;;  %v12241_v56 = vld [vmem:[#allocation11_spill] sm:$0xff]  ;;  %v12242_v47 = vld [vmem:[#allocation10_spill] sm:$0xff] }
 0x391   : > { %v4931_v39 = vpop.f32.mrf.mxu1  ;;  %v5221_v38 = vpop.f32.mrf.mxu0 }
 0x392   : > { %12229 = vst [vmem:[#allocation18_spill] sm:$0xff] %v11422_v28  ;;  %v11426_v25 = vadd.f32 %v5273_v51, %v12230_v58  ;;  %v5276_v43 = vadd.f32 %v9126_v26, %v4940_v37  ;;  %v4932_v44 = vadd.f32 %v4931_v39, %v11297_v55  ;;  %v12244_v39 = vld [vmem:[#allocation21_spill] sm:$0xff] }
 0x393   : > { %v9089_v60 = vpop.f32.mrf.mxu1  ;;  %v9129_v63 = vpop.f32.mrf.mxu0 }
 0x394   : > { %12231 = vst [vmem:[#allocation19_spill] sm:$0xff] %v11426_v25  ;;  %v11430_v23 = vadd.f32 %v5276_v43, %v11295_v0  ;;  %v5274_v8 = vadd.f32 %v5221_v38, %v4932_v44  ;;  %v4953_v42 = vadd.f32 %v9089_v60, %v11302_v2 }
 0x395   : > { %v4944_v59 = vpop.f32.mrf.mxu1  ;;  %v5234_v24 = vpop.f32.mrf.mxu0 }
 0x396   : > { %12232 = vst [vmem:[#allocation25_spill] sm:$0xff] %v11430_v23  ;;  %v11434_v32 = vadd.f32 %v5274_v8, %v12233_v18  ;;  %v5279_v20 = vadd.f32 %v9129_v63, %v4953_v42  ;;  %v4945_v40 = vadd.f32 %v4944_v59, %v12235_v62 }
 0x397   : > { %v9090_v27 = vpop.f32.mrf.mxu1  ;;  %v9130_v52 = vpop.f32.mrf.mxu0 }
 0x398   : > { %12234 = vst [vmem:[#allocation20_spill] sm:$0xff] %v11434_v32  ;;  %v11438_v55 = vadd.f32 %v5279_v20, %v12236_v1  ;;  %v5277_v6 = vadd.f32 %v5234_v24, %v4945_v40  ;;  %v4956_v0 = vadd.f32 %v9090_v27, %v12238_v12 }
 0x399   : > { %v4947_v30 = vpop.f32.mrf.mxu1  ;;  %v5237_v34 = vpop.f32.mrf.mxu0 }
 0x39a   : > { %12237 = vst [vmem:[#allocation8_spill] sm:$0xff] %v11438_v55  ;;  %v11442_v2 = vadd.f32 %v5277_v6, %v12239_v57  ;;  %v5280_v7 = vadd.f32 %v9130_v52, %v4956_v0  ;;  %v4948_v53 = vadd.f32 %v4947_v30, %v12241_v56 }
 0x39b   : > { %v9141_v4 = vpop.f32.mrf.mxu1  ;;  %v9181_v22 = vpop.f32.mrf.mxu0 }
 0x39c   : > { %12240 = vst [vmem:[#allocation7_spill] sm:$0xff] %v11442_v2  ;;  %v11446_v26 = vadd.f32 %v5280_v7, %v12242_v47  ;;  %v5278_v16 = vadd.f32 %v5237_v34, %v4948_v53  ;;  %v5840_v45 = vadd.f32 %v9181_v22, %v9141_v4 }
 0x39d   : > { %v5598_v51 = vpop.f32.mrf.mxu1  ;;  %v5831_v37 = vpop.f32.mrf.mxu0 }
 0x39e   : > { %12243 = vst [vmem:[#allocation6_spill] sm:$0xff] %v11446_v26  ;;  %v11449_v38 = vadd.f32 %v5278_v16, %v12244_v39 }
 0x39f   : > { %v9142_v58 = vpop.f32.mrf.mxu1  ;;  %v9182_v43 = vpop.f32.mrf.mxu0 }
 0x3a0   : > { %12245 = vst [vmem:[#allocation9_spill] sm:$0xff] %v11449_v38 }
 0x3a1   : > { %v5601_v44 = vpop.f32.mrf.mxu1  ;;  %v5834_v63 = vpop.f32.mrf.mxu0 }
 0x3a3   : > { %v9145_v60 = vpop.f32.mrf.mxu1  ;;  %v9185_v59 = vpop.f32.mrf.mxu0 }
 0x3a5   : > { %v11451_v8 = vpop.f32.mrf.mxu1  ;;  %v5847_v20 = vpop.f32.mrf.mxu0 }
 0x3a7   : > { %v11453_v42 = vpop.f32.mrf.mxu1  ;;  %v9186_v27 = vpop.f32.mrf.mxu0 }
 0x3a9   : > { %v11455_v24 = vpop.f32.mrf.mxu1  ;;  %v11467_v6 = vpop.f32.mrf.mxu0 }
 0x3ab   : > { %v11457_v18 = vpop.f32.mrf.mxu1  ;;  %v11473_v30 = vpop.f32.mrf.mxu0 }
 0x3ad   : > { %v11459_v62 = vpop.f32.mrf.mxu1  ;;  %v11479_v7 = vpop.f32.mrf.mxu0 }
 0x3af   : > { %v11461_v40 = vpop.f32.mrf.mxu1  ;;  %v11485_v47 = vpop.f32.mrf.mxu0 }
 0x3b1   : > { %v11463_v52 = vpop.f32.mrf.mxu1  ;;  %v11491_v38 = vpop.f32.mrf.mxu0 }
 0x3b3   : > { %v11465_v1 = vpop.f32.mrf.mxu1  ;;  %v11497_v55 = vpop.f32.mrf.mxu0 }
 0x3b5   : > { %v11469_v12 = vpop.f32.mrf.mxu1  ;;  %v11503_v25 = vpop.f32.mrf.mxu0 }
 0x3b7   : > { %v11471_v0 = vpop.f32.mrf.mxu1  ;;  %v11509_v61 = vpop.f32.mrf.mxu0 }
 0x3b9   : > { %v11475_v34 = vpop.f32.mrf.mxu1  ;;  %v11515_v21 = vpop.f32.mrf.mxu0 }
 0x3bb   : > { %v11477_v57 = vpop.f32.mrf.mxu1 }
 0x3bd   : > { %v11481_v56 = vpop.f32.mrf.mxu1 }
 0x3bf   : > { %v11483_v53 = vpop.f32.mrf.mxu1 }
 0x3c0   : > { %12246 = vst [vmem:[#allocation11_spill] sm:$0xff] %v11483_v53  ;;  %v5835_v53 = vadd.f32 %v5834_v63, %v5601_v44  ;;  %v5851_v63 = vadd.f32 %v11467_v6, %v11455_v24 }
 0x3c1   : > { %v11487_v16 = vpop.f32.mrf.mxu1 }
 0x3c2   : > { %12247 = vst [vmem:[#allocation10_spill] sm:$0xff] %v11487_v16 }
 0x3c3   : > { %v11489_v39 = vpop.f32.mrf.mxu1 }
 0x3c4   : > { %12248 = vst [vmem:[#allocation21_spill] sm:$0xff] %v11489_v39  ;;  %v5832_v39 = vadd.f32 %v5831_v37, %v5598_v51 }
 0x3c5   : > { %v11493_v26 = vpop.f32.mrf.mxu1 }
 0x3c6   : > { %12249 = vst [vmem:[#allocation26_spill] sm:$0xff] %v11493_v26 }
 0x3c7   : > { %v11495_v2 = vpop.f32.mrf.mxu1 }
 0x3c8   : > { %12250 = vst [vmem:[#allocation27_spill] sm:$0xff] %v11495_v2 }
 0x3c9   : > { %v11499_v32 = vpop.f32.mrf.mxu1 }
 0x3ca   : > { %12251 = vst [vmem:[#allocation28_spill] sm:$0xff] %v11499_v32  ;;  %v11521_v32 = vpop.f32.mrf.mxu0 }
 0x3cb   : > { %v11501_v23 = vpop.f32.mrf.mxu1 }
 0x3cc   : > { %12252 = vst [vmem:[#allocation29_spill] sm:$0xff] %v11501_v23  ;;  %v11525_v15 = vpop.f32.mrf.mxu0 }
 0x3cd   : > { %v11505_v28 = vpop.f32.mrf.mxu1 }
 0x3ce   : > { %12253 = vst [vmem:[#allocation30_spill] sm:$0xff] %v11505_v28 }
 0x3cf   : > { %v11507_v5 = vpop.f32.mrf.mxu1 }
 0x3d0   : > { %12254 = vst [vmem:[#allocation31_spill] sm:$0xff] %v11507_v5 }
 0x3d1   : > { %v11511_v36 = vpop.f32.mrf.mxu1 }
 0x3d2   : > { %12255 = vst [vmem:[#allocation32_spill] sm:$0xff] %v11511_v36  ;;  %v5843_v36 = vadd.f32 %v9182_v43, %v9142_v58  ;;  %v5848_v43 = vadd.f32 %v5847_v20, %v11451_v8  ;;  %v5872_v20 = vadd.f32 %v11473_v30, %v11457_v18 }
 0x3d3   : > { %v11513_v31 = vpop.f32.mrf.mxu1 }
 0x3d4   : > { %12256 = vst [vmem:[#allocation33_spill] sm:$0xff] %v11513_v31  ;;  %v11530_v31 = vld [vmem:[%s12132_s4] ss:$0 sm:$0xff] }
 0x3d5   : > { %v11517_v2 = vpop.f32.mrf.mxu1 }
 0x3d6   : > { %12257 = vst [vmem:[#allocation34_spill] sm:$0xff] %v11517_v2 }
 0x3d7   : > { %v11519_v26 = vpop.f32.mrf.mxu1 }
 0x3d8   : > { %12258 = vst [vmem:[#allocation35_spill] sm:$0xff] %v11519_v26 }
 0x3d9   : > { %v11523_v23 = vpop.f32.mrf.mxu1 }
 0x3da   : > { %12259 = vst [vmem:[#allocation36_spill] sm:$0xff] %v11523_v23 }
 0x3db   : > { %v9221_v28 = vpop.f32.mrf.mxu1 }
 0x3dc   : > { %v6250_v5 = vadd.f32 %v9221_v28, %v5840_v45  ;;  %v5856_v45 = vadd.f32 %v9185_v59, %v9145_v60  ;;  %v11537_v28 = vpop.f32.mrf.mxu0 }
 0x3dd   : > { %v6121_v16 = vpop.f32.mrf.mxu1 }
 0x3de   : > { %v6282_v2 = vadd.f32 %v6250_v5, %v11326_v50  ;;  %v6248_v26 = vadd.f32 %v6121_v16, %v5832_v39 }
 0x3df   : > { %v9222_v29 = vpop.f32.mrf.mxu1 }
 0x3e0   : > { %v6280_v23 = vadd.f32 %v6248_v26, %v11330_v11  ;;  %v6251_v4 = vadd.f32 %v9222_v29, %v5843_v36  ;;  %v11535_v22 = vadd.f32 %v11530_v31, %v6282_v2  ;;  %v11553_v2 = vpop.f32.mrf.mxu0 }
 0x3e1   : > { %v6124_v51 = vpop.f32.mrf.mxu1 }
 0x3e2   : > { %v6283_v37 = vadd.f32 %v6251_v4, %v11334_v49  ;;  %v6249_v54 = vadd.f32 %v6124_v51, %v5835_v53  ;;  %v6353_v58 = vmax.f32 %v11535_v22, 0.0  ;;  %v11542_v50 = vadd.f32 %v11530_v31, %v6280_v23 }
 0x3e3   : > { %v9225_v5 = vpop.f32.mrf.mxu1  ;;  %v5859_v49 = vadd.f32 %v9186_v27, %v11453_v42  ;;  %v11575_v27 = vpop.f32.mrf.mxu0 }
 0x3e4   : > { %v6281_v11 = vadd.f32 %v6249_v54, %v11338_v10  ;;  %v6254_v29 = vadd.f32 %v9225_v5, %v5856_v45  ;;  %6419 = vrot.lane.b32.xlu0 %v6353_v58, %s9343_s9  ;;  %v11550_v36 = vadd.f32 %v11530_v31, %v6283_v37  ;;  %v6351_v26 = vmax.f32 %v11542_v50, 0.0 }
 0x3e5   : > { %v6137_v23 = vpop.f32.mrf.mxu1  ;;  %v5864_v45 = vadd.f32 %v11479_v7, %v11459_v62  ;;  %v11594_v30 = vpop.f32.mrf.mxu0 }
 0x3e6   : > { %v6286_v44 = vadd.f32 %v6254_v29, %v11342_v33  ;;  %v6252_v60 = vadd.f32 %v6137_v23, %v5848_v43  ;;  %v6354_v10 = vmax.f32 %v11550_v36, 0.0  ;;  %v11559_v54 = vadd.f32 %v11530_v31, %v6281_v11 }
 0x3e7   : > { %v9226_v8 = vpop.f32.mrf.mxu1  ;;  %v5867_v29 = vadd.f32 %v11491_v38, %v11463_v52  ;;  %v11613_v23 = vpop.f32.mrf.mxu0 }
 0x3e8   : > { %v6284_v59 = vadd.f32 %v6252_v60, %v11346_v48  ;;  %v6255_v42 = vadd.f32 %v9226_v8, %v5859_v49  ;;  %6421 = vrot.lane.b32.xlu1 %v6354_v10, %s9343_s9  ;;  %6415 = vrot.lane.b32.xlu0 %v6351_v26, %s9343_s9  ;;  %v11571_v33 = vadd.f32 %v11530_v31, %v6286_v44  ;;  %v6352_v48 = vmax.f32 %v11559_v54, 0.0 }
 0x3e9   : > { %v6140_v24 = vpop.f32.mrf.mxu1 }
 0x3ea   : > { %v6287_v6 = vadd.f32 %v6255_v42, %v11350_v9  ;;  %v6253_v53 = vadd.f32 %v6140_v24, %v5851_v63  ;;  %v6357_v16 = vmax.f32 %v11571_v33, 0.0  ;;  %v11581_v39 = vadd.f32 %v11530_v31, %v6284_v59 }
 0x3eb   : > { %v9229_v4 = vpop.f32.mrf.mxu1  ;;  %v5875_v9 = vadd.f32 %v11485_v47, %v11461_v40  ;;  %v5891_v42 = vadd.f32 %v11509_v61, %v11471_v0  ;;  %v5883_v61 = vadd.f32 %v11515_v21, %v11475_v34 }
 0x3ec   : > { %v6285_v51 = vadd.f32 %v6253_v53, %v11354_v19  ;;  %v6258_v18 = vadd.f32 %v9229_v4, %v5872_v20  ;;  %6427 = vrot.lane.b32.xlu1 %v6357_v16, %s9343_s9  ;;  %6417 = vrot.lane.b32.xlu0 %v6352_v48, %s9343_s9  ;;  %v11597_v5 = vadd.f32 %v11530_v31, %v6287_v6  ;;  %v6355_v7 = vmax.f32 %v11581_v39, 0.0  ;;  %v11635_v20 = vpop.f32.mrf.mxu0 }
 0x3ed   : > { %v6153_v37 = vpop.f32.mrf.mxu1 }
 0x3ee   : > { %v6290_v19 = vadd.f32 %v6258_v18, %v11358_v14  ;;  %v6256_v62 = vadd.f32 %v6153_v37, %v5864_v45  ;;  %v11602_v43 = vadd.f32 %v11530_v31, %v6285_v51  ;;  %v5888_v14 = vadd.f32 %v11497_v55, %v11465_v1  ;;  %v9205_v18 = vpop.f32.mrf.mxu0 }
 0x3ef   : > { %v9230_v11 = vpop.f32.mrf.mxu1  ;;  %v6358_v60 = vmax.f32 %v11597_v5, 0.0  ;;  %v5880_v55 = vadd.f32 %v11503_v25, %v11469_v12  ;;  %v5904_v51 = vadd.f32 %v11521_v32, %v11477_v57  ;;  %v5896_v32 = vadd.f32 %v11525_v15, %v11481_v56  ;;  %v12260_v57 = vld [vmem:[#allocation22_spill] sm:$0xff] }
 0x3f0   : > { %v6288_v40 = vadd.f32 %v6256_v62, %v11362_v3  ;;  %v6259_v47 = vadd.f32 %v9230_v11, %v5875_v9  ;;  %6423 = vrot.lane.b32.xlu1 %v6355_v7, %s9343_s9  ;;  %v6356_v49 = vmax.f32 %v11602_v43, 0.0  ;;  %v11624_v52 = vadd.f32 %v11530_v31, %v6290_v19 }
 0x3f1   : > { %v6156_v44 = vpop.f32.mrf.mxu1 }
 0x3f2   : > { %v6291_v63 = vadd.f32 %v6259_v47, %v11366_v13  ;;  %v6257_v38 = vadd.f32 %v6156_v44, %v5867_v29  ;;  %6425 = vrot.lane.b32.xlu0 %v6356_v49, %s9343_s9  ;;  %v11621_v3 = vadd.f32 %v11530_v31, %v6288_v40  ;;  %v12261_v40 = vld [vmem:[#allocation11_spill] sm:$0xff] }
 0x3f3   : > { %v9233_v8 = vpop.f32.mrf.mxu1  ;;  %v5907_v47 = vadd.f32 %v11537_v28, %v12261_v40 }
 0x3f4   : > { %v6289_v1 = vadd.f32 %v6257_v38, %v11370_v17  ;;  %v6262_v59 = vadd.f32 %v9233_v8, %v5888_v14  ;;  %6429 = vrot.lane.b32.xlu1 %v6358_v60, %s9343_s9  ;;  %v6359_v13 = vmax.f32 %v11621_v3, 0.0  ;;  %v11638_v6 = vadd.f32 %v11530_v31, %v6291_v63  ;;  %v5927_v14 = vpop.f32.mrf.mxu0  ;;  %v12262_v38 = vld [vmem:[#allocation12_spill] sm:$0xff] }
 0x3f5   : > { %v6169_v24 = vpop.f32.mrf.mxu1  ;;  %v6361_v17 = vmax.f32 %v11624_v52, 0.0 }
 0x3f6   : > { %v6294_v25 = vadd.f32 %v6262_v59, %v11374_v46  ;;  %v6260_v12 = vadd.f32 %v6169_v24, %v5880_v55  ;;  %6431 = vrot.lane.b32.xlu0 %v6359_v13, %s9343_s9  ;;  %v11646_v53 = vadd.f32 %v11530_v31, %v6289_v1  ;;  %v6362_v37 = vmax.f32 %v11638_v6, 0.0  ;;  %v12263_v59 = vld [vmem:[#allocation10_spill] sm:$0xff] }
 0x3f7   : > { %v9234_v4 = vpop.f32.mrf.mxu1  ;;  %v5899_v28 = vadd.f32 %v11553_v2, %v12263_v59  ;;  %v12270_v59 = vld [vmem:[#allocation15_spill] sm:$0xff] }
 0x3f8   : > { %v6292_v0 = vadd.f32 %v6260_v12, %v11378_v35  ;;  %v6263_v45 = vadd.f32 %v9234_v4, %v5891_v42  ;;  %6435 = vrot.lane.b32.xlu1 %v6361_v17, %s9343_s9  ;;  %v6360_v46 = vmax.f32 %v11646_v53, 0.0  ;;  %v11666_v21 = vadd.f32 %v11530_v31, %v6294_v25  ;;  %v12264_v42 = vld [vmem:[#allocation13_spill] sm:$0xff] }
 0x3f9   : > { %v6172_v9 = vpop.f32.mrf.mxu1  ;;  %v12265_v4 = vld [vmem:[#allocation21_spill] sm:$0xff] }
 0x3fa   : > { %v6295_v19 = vadd.f32 %v6263_v45, %v11382_v41  ;;  %v6261_v62 = vadd.f32 %v6172_v9, %v5883_v61  ;;  %6433 = vrot.lane.b32.xlu0 %v6360_v46, %s9343_s9  ;;  %v11663_v35 = vadd.f32 %v11530_v31, %v6292_v0  ;;  %v12153_v56 = vmax.f32 %v11666_v21, 0.0  ;;  %v9206_v0 = vpop.f32.mrf.mxu0  ;;  %v12266_v9 = vld [vmem:[#allocation14_spill] sm:$0xff] }
 0x3fb   : > { %v9237_v34 = vpop.f32.mrf.mxu1  ;;  %v5920_v61 = vadd.f32 %v11575_v27, %v12265_v4  ;;  %v12271_v4 = vld [vmem:[#allocation28_spill] sm:$0xff] }
 0x3fc   : > { %v6293_v11 = vadd.f32 %v6261_v62, %v12260_v57  ;;  %v6266_v29 = vadd.f32 %v9237_v34, %v5904_v51  ;;  %6437 = vrot.lane.b32.xlu1 %v6362_v37, %s9343_s9  ;;  %v12154_v41 = vmax.f32 %v11663_v35, 0.0  ;;  %v11678_v63 = vadd.f32 %v11530_v31, %v6295_v19  ;;  %v12267_v57 = vld [vmem:[#allocation26_spill] sm:$0xff] }
 0x3fd   : > { %v6185_v44 = vpop.f32.mrf.mxu1  ;;  %v5912_v27 = vadd.f32 %v11594_v30, %v12267_v57 }
 0x3fe   : > { %v6298_v8 = vadd.f32 %v6266_v29, %v12262_v38  ;;  %v6264_v15 = vadd.f32 %v6185_v44, %v5896_v32  ;;  %6439 = vrot.lane.b32.xlu0 %v12154_v41, %s9343_s9  ;;  %v11686_v55 = vadd.f32 %v11530_v31, %v6293_v11  ;;  %v12151_v51 = vmax.f32 %v11678_v63, 0.0  ;;  %v12268_v11 = vld [vmem:[#allocation23_spill] sm:$0xff] }
 0x3ff   : > { %v9238_v1 = vpop.f32.mrf.mxu1  ;;  %v12269_v44 = vld [vmem:[#allocation27_spill] sm:$0xff] }
 0x400   : > { %v6296_v24 = vadd.f32 %v6264_v15, %v12264_v42  ;;  %v6267_v25 = vadd.f32 %v9238_v1, %v5907_v47  ;;  %6443 = vrot.lane.b32.xlu1 %v12153_v56, %s9343_s9  ;;  %v12152_v12 = vmax.f32 %v11686_v55, 0.0  ;;  %v11706_v34 = vadd.f32 %v11530_v31, %v6298_v8  ;;  %v5930_v15 = vpop.f32.mrf.mxu0 }
 0x401   : > { %v6188_v45 = vpop.f32.mrf.mxu1  ;;  %v5923_v38 = vadd.f32 %v11613_v23, %v12269_v44  ;;  %v5915_v23 = vadd.f32 %v11635_v20, %v12271_v4 }
 0x402   : > { %v6299_v19 = vadd.f32 %v6267_v25, %v12266_v9  ;;  %v6265_v62 = vadd.f32 %v6188_v45, %v5899_v28  ;;  %6441 = vrot.lane.b32.xlu0 %v12152_v12, %s9343_s9  ;;  %v11703_v2 = vadd.f32 %v11530_v31, %v6296_v24  ;;  %v12138_v42 = vmax.f32 %v11706_v34, 0.0  ;;  %v9209_v57 = vpop.f32.mrf.mxu0 }
 0x403   : > { %v9241_v32 = vpop.f32.mrf.mxu1 }
 0x404   : > { %v6297_v29 = vadd.f32 %v6265_v62, %v12268_v11  ;;  %v6270_v40 = vadd.f32 %v9241_v32, %v5920_v61  ;;  %6445 = vrot.lane.b32.xlu1 %v12151_v51, %s9343_s9  ;;  %v12141_v47 = vmax.f32 %v11703_v2, 0.0  ;;  %v11718_v8 = vadd.f32 %v11530_v31, %v6299_v19  ;;  %v12272_v61 = vld [vmem:[#allocation24_spill] sm:$0xff]  ;;  %v12273_v62 = vld [vmem:[#allocation29_spill] sm:$0xff] }
 0x405   : > { %v6201_v1 = vpop.f32.mrf.mxu1  ;;  %v5936_v32 = vadd.f32 %v9205_v18, %v12273_v62  ;;  %v5943_v62 = vpop.f32.mrf.mxu0 }
 0x406   : > { %v6302_v28 = vadd.f32 %v6270_v40, %v12270_v59  ;;  %v6268_v30 = vadd.f32 %v6201_v1, %v5912_v27  ;;  %6447 = vrot.lane.b32.xlu0 %v12141_v47, %s9343_s9  ;;  %v11726_v24 = vadd.f32 %v11530_v31, %v6297_v29  ;;  %v12137_v11 = vmax.f32 %v11718_v8, 0.0  ;;  %v12274_v29 = vld [vmem:[#allocation16_spill] sm:$0xff]  ;;  %v12275_v59 = vld [vmem:[#allocation30_spill] sm:$0xff] }
 0x407   : > { %v9242_v25 = vpop.f32.mrf.mxu1  ;;  %v5928_v18 = vadd.f32 %v5927_v14, %v12275_v59  ;;  %v12280_v59 = vld [vmem:[#allocation19_spill] sm:$0xff] }
 0x408   : > { %v6300_v45 = vadd.f32 %v6268_v30, %v12272_v61  ;;  %v6271_v9 = vadd.f32 %v9242_v25, %v5923_v38  ;;  %6451 = vrot.lane.b32.xlu1 %v12138_v42, %s9343_s9  ;;  %v12135_v19 = vmax.f32 %v11726_v24, 0.0  ;;  %v11745_v38 = vadd.f32 %v11530_v31, %v6302_v28  ;;  %v12276_v30 = vld [vmem:[#allocation17_spill] sm:$0xff]  ;;  %v12277_v61 = vld [vmem:[#allocation31_spill] sm:$0xff]  ;;  %v12278_v28 = vld [vmem:[#allocation18_spill] sm:$0xff] }
 0x409   : > { %v6204_v27 = vpop.f32.mrf.mxu1 }
 0x40a   : > { %v6303_v40 = vadd.f32 %v6271_v9, %v12274_v29  ;;  %v6269_v44 = vadd.f32 %v6204_v27, %v5915_v23  ;;  %6449 = vrot.lane.b32.xlu0 %v12135_v19, %s9343_s9  ;;  %v11742_v20 = vadd.f32 %v11530_v31, %v6300_v45  ;;  %v5939_v9 = vadd.f32 %v9206_v0, %v12277_v61 }
 0x40b   : > { %v9245_v1 = vpop.f32.mrf.mxu1  ;;  %v12140_v14 = vmax.f32 %v11745_v38, 0.0 }
 0x40c   : > { %v6301_v25 = vadd.f32 %v6269_v44, %v12276_v30  ;;  %v6274_v4 = vadd.f32 %v9245_v1, %v5936_v32  ;;  %6453 = vrot.lane.b32.xlu1 %v12137_v11, %s9343_s9  ;;  %v12136_v23 = vmax.f32 %v11742_v20, 0.0  ;;  %v11755_v27 = vadd.f32 %v11530_v31, %v6303_v40  ;;  %v12279_v1 = vld [vmem:[#allocation32_spill] sm:$0xff] }
 0x40d   : > { %v6217_v45 = vpop.f32.mrf.mxu1  ;;  %v5931_v0 = vadd.f32 %v5930_v15, %v12279_v1  ;;  %v12284_v1 = vld [vmem:[#allocation20_spill] sm:$0xff] }
 0x40e   : > { %v6306_v29 = vadd.f32 %v6274_v4, %v12278_v28  ;;  %v6272_v19 = vadd.f32 %v6217_v45, %v5928_v18  ;;  %6455 = vrot.lane.b32.xlu0 %v12136_v23, %s9343_s9  ;;  %v11763_v32 = vadd.f32 %v11530_v31, %v6301_v25  ;;  %v12281_v18 = vld [vmem:[#allocation33_spill] sm:$0xff]  ;;  %v9210_v45 = vpop.f32.mrf.mxu0  ;;  %v12150_v23 = vmax.f32 %v11755_v27, 0.0 }
 0x40f   : > { %v9246_v44 = vpop.f32.mrf.mxu1  ;;  %v5952_v4 = vadd.f32 %v9209_v57, %v12281_v18  ;;  %v12282_v25 = vld [vmem:[#allocation25_spill] sm:$0xff] }
 0x410   : > { %v6304_v30 = vadd.f32 %v6272_v19, %v12280_v59  ;;  %v6275_v61 = vadd.f32 %v9246_v44, %v5939_v9  ;;  %6459 = vrot.lane.b32.xlu1 %v12140_v14, %s9343_s9  ;;  %v12139_v40 = vmax.f32 %v11763_v32, 0.0  ;;  %v11781_v19 = vadd.f32 %v11530_v31, %v6306_v29  ;;  %v12283_v44 = vld [vmem:[#allocation34_spill] sm:$0xff]  ;;  %v12286_v29 = vld [vmem:[#allocation8_spill] sm:$0xff] }
 0x411   : > { %v6220_v28 = vpop.f32.mrf.mxu1  ;;  %v5944_v57 = vadd.f32 %v5943_v62, %v12283_v44  ;;  %v12288_v44 = vld [vmem:[#allocation7_spill] sm:$0xff] }
 0x412   : > { %v6307_v11 = vadd.f32 %v6275_v61, %v12282_v25  ;;  %v6273_v42 = vadd.f32 %v6220_v28, %v5931_v0  ;;  %6457 = vrot.lane.b32.xlu0 %v12139_v40, %s9343_s9  ;;  %v11778_v15 = vadd.f32 %v11530_v31, %v6304_v30  ;;  %v12285_v61 = vld [vmem:[#allocation35_spill] sm:$0xff]  ;;  %v5946_v25 = vpop.f32.mrf.mxu0 }
 0x413   : > { %v9249_v9 = vpop.f32.mrf.mxu1  ;;  %v5955_v28 = vadd.f32 %v9210_v45, %v12285_v61 }
 0x414   : > { %v6305_v59 = vadd.f32 %v6273_v42, %v12284_v1  ;;  %v6278_v18 = vadd.f32 %v9249_v9, %v5952_v4  ;;  %6461 = vrot.lane.b32.xlu1 %v12150_v23, %s9343_s9  ;;  %v12142_v0 = vmax.f32 %v11778_v15, 0.0  ;;  %v11791_v40 = vadd.f32 %v11530_v31, %v6307_v11  ;;  %v12287_v9 = vld [vmem:[#allocation36_spill] sm:$0xff] }
 0x415   : > { %v6233_v30 = vpop.f32.mrf.mxu1  ;;  %v12149_v42 = vmax.f32 %v11781_v19, 0.0  ;;  %v5947_v45 = vadd.f32 %v5946_v25, %v12287_v9 }
 0x416   : > { %v6310_v14 = vadd.f32 %v6278_v18, %v12286_v29  ;;  %v6276_v47 = vadd.f32 %v6233_v30, %v5944_v57  ;;  %6463 = vrot.lane.b32.xlu0 %v12142_v0, %s9343_s9  ;;  %v11799_v62 = vadd.f32 %v11530_v31, %v6305_v59  ;;  %v12146_v18 = vmax.f32 %v11791_v40, 0.0  ;;  %v12289_v30 = vld [vmem:[#allocation6_spill] sm:$0xff] }
 0x417   : > { %v9250_v4 = vpop.f32.mrf.mxu1 }
 0x418   : > { %v6308_v1 = vadd.f32 %v6276_v47, %v12288_v44  ;;  %v6279_v61 = vadd.f32 %v9250_v4, %v5955_v28  ;;  %6467 = vrot.lane.b32.xlu1 %v12149_v42, %s9343_s9  ;;  %v12148_v11 = vmax.f32 %v11799_v62, 0.0  ;;  %v11816_v47 = vadd.f32 %v11530_v31, %v6310_v14  ;;  %v12290_v28 = vld [vmem:[#allocation9_spill] sm:$0xff] }
 0x419   : > { %v6236_v57 = vpop.f32.mrf.mxu1 }
 0x41a   : > { %v6311_v29 = vadd.f32 %v6279_v61, %v12289_v30  ;;  %v6277_v0 = vadd.f32 %v6236_v57, %v5947_v45  ;;  %6465 = vrot.lane.b32.xlu0 %v12148_v11, %s9343_s9  ;;  %v11813_v59 = vadd.f32 %v11530_v31, %v6308_v1  ;;  %v12143_v45 = vmax.f32 %v11816_v47, 0.0 }
 0x41b   : > { %v9344_v1 = vmov 1983009808  }
 0x41c   : > { %v6309_v25 = vadd.f32 %v6277_v0, %v12290_v28  ;;  %6469 = vrot.lane.b32.xlu1 %v12146_v18, %s9343_s9  ;;  %v12145_v4 = vmax.f32 %v11813_v59, 0.0  ;;  %v11824_v9 = vadd.f32 %v11530_v31, %v6311_v29  ;;  %v6609_v61 = vunpack.c.l.s4 %v9344_v1 }
 0x41e   : > { %6471 = vrot.lane.b32.xlu0 %v12145_v4, %s9343_s9  ;;  %v11831_v14 = vadd.f32 %v11530_v31, %v6309_v25  ;;  %v12147_v44 = vmax.f32 %v11824_v9, 0.0  ;;  %v6611_v31 = vlaneseq  ;;  %v6610_v30 = vunpack.c.0.s8 %v6609_v61 }
 0x420   : > { %6475 = vrot.lane.b32.xlu1 %v12143_v45, %s9343_s9  ;;  %v12144_v0 = vmax.f32 %v11831_v14, 0.0  ;;  %v6612_v29 = vshrl.u32 %v6611_v31, 7 }
 0x422   : > { %6473 = vrot.lane.b32.xlu0 %v12144_v0, %s9343_s9  ;;  %v11848_v4 = vsub.s32 %v6610_v30, %v6612_v29 }
 0x424   : > { %6477 = vrot.lane.b32.xlu1 %v12147_v44, %s9343_s9 }
 0x456   : > { %v6420_v57 = vpop.permute.xlu0 %6419 }
 0x457   : > { %v6513_v28 = vmax.f32 %v6353_v58, %v6420_v57 }
 0x459   : > { %v6544_v18 = vsel %vm226_vm0, %v6513_v28, -inf }
 0x45a   : > { %v6422_v25 = vpop.permute.xlu1 %6421  ;;  %v6416_v45 = vpop.permute.xlu0 %6415 }
 0x45b   : > { %v6511_v0 = vmax.f32 %v6351_v26, %v6416_v45  ;;  %v6514_v44 = vmax.f32 %v6354_v10, %v6422_v25 }
 0x45d   : > { %v6543_v1 = vsel %vm226_vm0, %v6511_v0, -inf  ;;  %v6547_v45 = vsel %vm226_vm0, %v6514_v44, -inf }
 0x45e   : > { %v6545_v11 = vmax.f32 %v6543_v1, %v6544_v18  ;;  %v6428_v61 = vpop.permute.xlu1 %6427  ;;  %v6418_v31 = vpop.permute.xlu0 %6417 }
 0x45f   : > { %v6517_v22 = vmax.f32 %v6357_v16, %v6428_v61  ;;  %v6512_v58 = vmax.f32 %v6352_v48, %v6418_v31 }
 0x460   : > { %v6607_v50 = vcombine.high %v6545_v11, %v6545_v11  ;;  %v6614_v26 = vrot.slane %v6545_v11, %v11848_v4 }
 0x461   : > { %v6546_v57 = vsel %vm226_vm0, %v6512_v58, -inf  ;;  %v6550_v33 = vsel %vm226_vm0, %v6517_v22, -inf }
 0x462   : > { %v6621_v36 = vrot.slane %v6607_v50, %v11848_v4  ;;  %v6622_v10 = vcombine.high %v6614_v26, %v6614_v26  ;;  %v6943_v18 = vsel %vm229_vm1, %v6614_v26, -inf  ;;  %v6548_v0 = vmax.f32 %v6546_v57, %v6547_v45  ;;  %v6424_v30 = vpop.permute.xlu1 %6423 }
 0x463   : > { %v6944_v29 = vrot.slane %v6943_v18, 4  ;;  %v6515_v54 = vmax.f32 %v6355_v7, %v6424_v30 }
 0x464   : > { %v6623_v48 = vcombine.high %v6621_v36, %v6621_v36  ;;  %v6950_v16 = vsel %vm229_vm1, %v6622_v10, -inf  ;;  %v6957_v11 = vsel %vm229_vm1, %v6621_v36, -inf  ;;  %v6624_v44 = vcombine.high %v6548_v0, %v6548_v0  ;;  %v6426_v28 = vpop.permute.xlu0 %6425 }
 0x465   : > { %v6945_v25 = vmax.f32 %v6943_v18, %v6944_v29  ;;  %v6951_v1 = vrot.slane %v6950_v16, 4  ;;  %v6958_v61 = vrot.slane %v6957_v11, 4  ;;  %v6631_v31 = vrot.slane %v6548_v0, %v11848_v4 }
 0x466   : > { %v6964_v58 = vsel %vm229_vm1, %v6623_v48, -inf  ;;  %v6638_v22 = vrot.slane %v6624_v44, %v11848_v4  ;;  %v6549_v39 = vsel %vm226_vm0, %v6515_v54, -inf  ;;  %v11874_v7 = vmax.f32 %v6356_v49, %v6426_v28 }
 0x467   : > { %v6946_v50 = vrot.slane %v6945_v25, 2  ;;  %v6952_v26 = vmax.f32 %v6950_v16, %v6951_v1  ;;  %v6959_v45 = vmax.f32 %v6957_v11, %v6958_v61  ;;  %v6965_v57 = vrot.slane %v6964_v58, 4 }
 0x468   : > { %v6639_v36 = vcombine.high %v6631_v31, %v6631_v31  ;;  %v6640_v10 = vcombine.high %v6638_v22, %v6638_v22  ;;  %v6971_v18 = vsel %vm229_vm1, %v6631_v31, -inf  ;;  %v6985_v0 = vsel %vm229_vm1, %v6638_v22, -inf }
 0x469   : > { %v6947_v30 = vmax.f32 %v6945_v25, %v6946_v50  ;;  %v6953_v29 = vrot.slane %v6952_v26, 2  ;;  %v6960_v48 = vrot.slane %v6959_v45, 2  ;;  %v6966_v54 = vmax.f32 %v6964_v58, %v6965_v57 }
 0x46a   : > { %v6972_v44 = vrot.slane %v6971_v18, 4  ;;  %v6978_v43 = vsel %vm229_vm1, %v6639_v36, -inf  ;;  %v6986_v49 = vrot.slane %v6985_v0, 4  ;;  %v6992_v28 = vsel %vm229_vm1, %v6640_v10, -inf }
 0x46b   : > { %v6948_v16 = vrot.slane %v6947_v30, 1  ;;  %v6954_v11 = vmax.f32 %v6952_v26, %v6953_v29  ;;  %v6961_v1 = vmax.f32 %v6959_v45, %v6960_v48  ;;  %v6967_v61 = vrot.slane %v6966_v54, 2 }
 0x46c   : > { %v6973_v42 = vmax.f32 %v6971_v18, %v6972_v44  ;;  %v6979_v23 = vrot.slane %v6978_v43, 4  ;;  %v6987_v31 = vmax.f32 %v6985_v0, %v6986_v49  ;;  %v6993_v51 = vrot.slane %v6992_v28, 4 }
 0x46d   : > { %v6949_v22 = vmax.f32 %v6947_v30, %v6948_v16  ;;  %v6955_v25 = vrot.slane %v6954_v11, 1  ;;  %v6962_v50 = vrot.slane %v6961_v1, 1  ;;  %v6968_v12 = vmax.f32 %v6966_v54, %v6967_v61  ;;  %v6430_v16 = vpop.permute.xlu1 %6429 }
 0x46e   : > { %v6974_v58 = vrot.slane %v6973_v42, 2  ;;  %v6980_v57 = vmax.f32 %v6978_v43, %v6979_v23  ;;  %v6988_v36 = vrot.slane %v6987_v31, 2  ;;  %v6994_v56 = vmax.f32 %v6992_v28, %v6993_v51 }
 0x46f   : > { %v6956_v10 = vmax.f32 %v6954_v11, %v6955_v25  ;;  %v6963_v41 = vmax.f32 %v6961_v1, %v6962_v50  ;;  %v6969_v26 = vrot.slane %v6968_v12, 1  ;;  %v6551_v45 = vmax.f32 %v6549_v39, %v6550_v33 }
 0x470   : > { %v6975_v29 = vmax.f32 %v6973_v42, %v6974_v58  ;;  %v6981_v18 = vrot.slane %v6980_v57, 2  ;;  %v6989_v48 = vmax.f32 %v6987_v31, %v6988_v36  ;;  %v6995_v0 = vrot.slane %v6994_v56, 2 }
 0x471   : > { %v6970_v44 = vmax.f32 %v6968_v12, %v6969_v26  ;;  %v7456_v30 = vsel %vm7455_vm3, %v6956_v10, %v6949_v22  ;;  %v6641_v49 = vcombine.high %v6551_v45, %v6551_v45  ;;  %v6648_v54 = vrot.slane %v6551_v45, %v11848_v4  ;;  %v6432_v22 = vpop.permute.xlu0 %6431 }
 0x472   : > { %v7458_v23 = vsel %vm7457_vm4, %v6963_v41, %v7456_v30  ;;  %v6976_v43 = vrot.slane %v6975_v29, 1  ;;  %v6982_v51 = vmax.f32 %v6980_v57, %v6981_v18  ;;  %v6990_v28 = vrot.slane %v6989_v48, 1 }
 0x473   : > { %v7460_v11 = vsel %vm7459_vm5, %v6970_v44, %v7458_v23  ;;  %v6996_v33 = vmax.f32 %v6994_v56, %v6995_v0  ;;  %v6655_v42 = vrot.slane %v6641_v49, %v11848_v4  ;;  %v6656_v39 = vcombine.high %v6648_v54, %v6648_v54  ;;  %v6436_v49 = vpop.permute.xlu1 %6435 }
 0x474   : > { %v6977_v1 = vmax.f32 %v6975_v29, %v6976_v43  ;;  %v6983_v12 = vrot.slane %v6982_v51, 1  ;;  %v6991_v61 = vmax.f32 %v6989_v48, %v6990_v28  ;;  %v6999_v31 = vsel %vm229_vm1, %v6648_v54, -inf }
 0x475   : > { %v6997_v25 = vrot.slane %v6996_v33, 1  ;;  %v6657_v50 = vcombine.high %v6655_v42, %v6655_v42  ;;  %v7000_v41 = vrot.slane %v6999_v31, 4  ;;  %v7006_v58 = vsel %vm229_vm1, %v6656_v39, -inf  ;;  %v6434_v39 = vpop.permute.xlu0 %6433 }
 0x476   : > { %v6984_v57 = vmax.f32 %v6982_v51, %v6983_v12  ;;  %v7462_v36 = vsel %vm7461_vm6, %v6977_v1, %v7460_v11  ;;  %v7007_v10 = vrot.slane %v7006_v58, 4  ;;  %v7013_v56 = vsel %vm229_vm1, %v6655_v42, -inf }
 0x477   : > { %v6998_v26 = vmax.f32 %v6996_v33, %v6997_v25  ;;  %v7001_v45 = vmax.f32 %v6999_v31, %v7000_v41  ;;  %v7014_v29 = vrot.slane %v7013_v56, 4  ;;  %v7020_v18 = vsel %vm229_vm1, %v6657_v50, -inf }
 0x478   : > { %v7464_v48 = vsel %vm7463_vm7, %v6984_v57, %v7462_v36  ;;  %v7008_v0 = vmax.f32 %v7006_v58, %v7007_v10  ;;  %v7021_v44 = vrot.slane %v7020_v18, 4  ;;  %v6552_v30 = vsel %vm226_vm0, %v11874_v7, -inf }
 0x479   : > { %v7466_v54 = vsel %vm7465_vm8, %v6991_v61, %v7464_v48  ;;  %v7002_v23 = vrot.slane %v7001_v45, 2  ;;  %v7015_v43 = vmax.f32 %v7013_v56, %v7014_v29  ;;  %v6518_v51 = vmax.f32 %v6358_v60, %v6430_v16 }
 0x47a   : > { %v7468_v28 = vsel %vm7467_vm9, %v6998_v26, %v7466_v54  ;;  %v7009_v11 = vrot.slane %v7008_v0, 2  ;;  %v7022_v33 = vmax.f32 %v7020_v18, %v7021_v44  ;;  %v6519_v42 = vmax.f32 %v6359_v13, %v6432_v22 }
 0x47b   : > { %7526 = vst.msk [vmem:[%s11894_s19] sm:$0xff] %vm226_vm0, %v7468_v28  ;;  %v7003_v1 = vmax.f32 %v7001_v45, %v7002_v23  ;;  %v7016_v7 = vrot.slane %v7015_v43, 2  ;;  %v6553_v12 = vsel %vm226_vm0, %v6518_v51, -inf  ;;  %v6521_v61 = vmax.f32 %v6361_v17, %v6436_v49 }
 0x47c   : > { %v7010_v31 = vmax.f32 %v7008_v0, %v7009_v11  ;;  %v7023_v5 = vrot.slane %v7022_v33, 2  ;;  %v6554_v60 = vmax.f32 %v6552_v30, %v6553_v12  ;;  %v6555_v16 = vsel %vm226_vm0, %v6519_v42, -inf }
 0x47d   : > { %v7004_v25 = vrot.slane %v7003_v1, 1  ;;  %v7017_v50 = vmax.f32 %v7015_v43, %v7016_v7  ;;  %v6556_v3 = vsel %vm226_vm0, %v6521_v61, -inf  ;;  %v6520_v13 = vmax.f32 %v6360_v46, %v6434_v39  ;;  %v6438_v61 = vpop.permute.xlu1 %6437 }
 0x47e   : > { %v7011_v22 = vrot.slane %v7010_v31, 1  ;;  %v7024_v41 = vmax.f32 %v7022_v33, %v7023_v5  ;;  %v6658_v58 = vcombine.high %v6554_v60, %v6554_v60  ;;  %v6665_v57 = vrot.slane %v6554_v60, %v11848_v4 }
 0x47f   : > { %v7005_v36 = vmax.f32 %v7003_v1, %v7004_v25  ;;  %v7018_v52 = vrot.slane %v7017_v50, 1  ;;  %v6557_v17 = vmax.f32 %v6555_v16, %v6556_v3  ;;  %v11916_v10 = vsel %vm226_vm0, %v6520_v13, -inf }
 0x480   : > { %v7012_v56 = vmax.f32 %v7010_v31, %v7011_v22  ;;  %v7025_v26 = vrot.slane %v7024_v41, 1  ;;  %v6672_v45 = vrot.slane %v6658_v58, %v11848_v4  ;;  %v6673_v29 = vcombine.high %v6665_v57, %v6665_v57  ;;  %v6440_v31 = vpop.permute.xlu0 %6439 }
 0x481   : > { %v7019_v18 = vmax.f32 %v7017_v50, %v7018_v52  ;;  %v7027_v53 = vsel %vm229_vm1, %v6665_v57, -inf  ;;  %v6675_v46 = vcombine.high %v6557_v17, %v6557_v17  ;;  %v6682_v48 = vrot.slane %v6557_v17, %v11848_v4 }
 0x482   : > { %v7026_v0 = vmax.f32 %v7024_v41, %v7025_v26  ;;  %v7469_v44 = vsel %vm7455_vm3, %v7012_v56, %v7005_v36  ;;  %v6674_v30 = vcombine.high %v6672_v45, %v6672_v45  ;;  %v7028_v49 = vrot.slane %v7027_v53, 4 }
 0x483   : > { %v7470_v54 = vsel %vm7457_vm4, %v7019_v18, %v7469_v44  ;;  %v7034_v23 = vsel %vm229_vm1, %v6673_v29, -inf  ;;  %v7041_v43 = vsel %vm229_vm1, %v6672_v45, -inf  ;;  %v6689_v51 = vrot.slane %v6675_v46, %v11848_v4 }
 0x484   : > { %v7471_v28 = vsel %vm7459_vm5, %v7026_v0, %v7470_v54  ;;  %v7029_v11 = vmax.f32 %v7027_v53, %v7028_v49  ;;  %v7035_v33 = vrot.slane %v7034_v23, 4  ;;  %v7042_v42 = vrot.slane %v7041_v43, 4  ;;  %v6442_v49 = vpop.permute.xlu0 %6441 }
 0x485   : > { %v7048_v39 = vsel %vm229_vm1, %v6674_v30, -inf  ;;  %v6690_v1 = vcombine.high %v6682_v48, %v6682_v48  ;;  %v6691_v7 = vcombine.high %v6689_v51, %v6689_v51  ;;  %v7055_v12 = vsel %vm229_vm1, %v6682_v48, -inf  ;;  %v6444_v30 = vpop.permute.xlu1 %6443 }
 0x486   : > { %v7030_v5 = vrot.slane %v7029_v11, 2  ;;  %v7036_v60 = vmax.f32 %v7034_v23, %v7035_v33  ;;  %v7043_v16 = vmax.f32 %v7041_v43, %v7042_v42  ;;  %v7049_v25 = vrot.slane %v7048_v39, 4 }
 0x487   : > { %v7056_v50 = vrot.slane %v7055_v12, 4  ;;  %v7062_v3 = vsel %vm229_vm1, %v6690_v1, -inf  ;;  %v7069_v13 = vsel %vm229_vm1, %v6689_v51, -inf  ;;  %v7076_v22 = vsel %vm229_vm1, %v6691_v7, -inf }
 0x488   : > { %v7031_v41 = vmax.f32 %v7029_v11, %v7030_v5  ;;  %v7037_v58 = vrot.slane %v7036_v60, 2  ;;  %v7044_v57 = vrot.slane %v7043_v16, 2  ;;  %v7050_v36 = vmax.f32 %v7048_v39, %v7049_v25 }
 0x489   : > { %v7057_v52 = vmax.f32 %v7055_v12, %v7056_v50  ;;  %v7063_v17 = vrot.slane %v7062_v3, 4  ;;  %v7070_v56 = vrot.slane %v7069_v13, 4  ;;  %v7077_v26 = vrot.slane %v7076_v22, 4 }
 0x48a   : > { %v7032_v45 = vrot.slane %v7031_v41, 1  ;;  %v7038_v29 = vmax.f32 %v7036_v60, %v7037_v58  ;;  %v7045_v18 = vmax.f32 %v7043_v16, %v7044_v57  ;;  %v7051_v53 = vrot.slane %v7050_v36, 2 }
 0x48b   : > { %v7058_v46 = vrot.slane %v7057_v52, 2  ;;  %v7064_v48 = vmax.f32 %v7062_v3, %v7063_v17  ;;  %v7071_v0 = vmax.f32 %v7069_v13, %v7070_v56  ;;  %v7078_v44 = vmax.f32 %v7076_v22, %v7077_v26  ;;  %v6448_v56 = vpop.permute.xlu0 %6447 }
 0x48c   : > { %v7033_v54 = vmax.f32 %v7031_v41, %v7032_v45  ;;  %v7039_v23 = vrot.slane %v7038_v29, 1  ;;  %v7046_v43 = vrot.slane %v7045_v18, 1  ;;  %v7052_v51 = vmax.f32 %v7050_v36, %v7051_v53 }
 0x48d   : > { %v7059_v11 = vmax.f32 %v7057_v52, %v7058_v46  ;;  %v7065_v33 = vrot.slane %v7064_v48, 2  ;;  %v7072_v42 = vrot.slane %v7071_v0, 2  ;;  %v7079_v39 = vrot.slane %v7078_v44, 2 }
 0x48e   : > { %v7040_v1 = vmax.f32 %v7038_v29, %v7039_v23  ;;  %v7047_v7 = vmax.f32 %v7045_v18, %v7046_v43  ;;  %v7053_v12 = vrot.slane %v7052_v51, 1  ;;  %v7472_v5 = vsel %vm7461_vm6, %v7033_v54, %v7471_v28  ;;  %v6446_v28 = vpop.permute.xlu1 %6445 }
 0x48f   : > { %v7060_v60 = vrot.slane %v7059_v11, 1  ;;  %v7066_v16 = vmax.f32 %v7064_v48, %v7065_v33  ;;  %v7073_v25 = vmax.f32 %v7071_v0, %v7072_v42  ;;  %v7080_v50 = vmax.f32 %v7078_v44, %v7079_v39 }
 0x490   : > { %v7054_v3 = vmax.f32 %v7052_v51, %v7053_v12  ;;  %v7473_v13 = vsel %vm7463_vm7, %v7040_v1, %v7472_v5  ;;  %v6522_v22 = vmax.f32 %v6362_v37, %v6438_v61  ;;  %v12291_v41 = vmax.f32 %v11663_v35, 0.0 }
 0x491   : > { %v7474_v57 = vsel %vm7465_vm8, %v7047_v7, %v7473_v13  ;;  %v7061_v36 = vmax.f32 %v7059_v11, %v7060_v60  ;;  %v7067_v52 = vrot.slane %v7066_v16, 1  ;;  %v7074_v17 = vrot.slane %v7073_v25, 1 }
 0x492   : > { %v6523_v58 = vmax.f32 %v12291_v41, %v6440_v31  ;;  %v7475_v26 = vsel %vm7467_vm9, %v7054_v3, %v7474_v57  ;;  %v7081_v45 = vrot.slane %v7080_v50, 1  ;;  %v6559_v29 = vsel %vm226_vm0, %v6522_v22, -inf }
 0x493   : > { %7527 = vst.msk [vmem:[%s11894_s19 + $0x8] sm:$0xff] %vm226_vm0, %v7475_v26  ;;  %v7068_v6 = vmax.f32 %v7066_v16, %v7067_v52  ;;  %v7075_v37 = vmax.f32 %v7073_v25, %v7074_v17  ;;  %v6560_v35 = vmax.f32 %v11916_v10, %v6559_v29  ;;  %v12292_v61 = vmax.f32 %v11666_v21, 0.0 }
 0x494   : > { %v6561_v18 = vsel %vm226_vm0, %v6523_v58, -inf  ;;  %v7082_v53 = vmax.f32 %v7080_v50, %v7081_v45  ;;  %v12293_v46 = vmax.f32 %v11686_v55, 0.0  ;;  %v12294_v0 = vmax.f32 %v11678_v63, 0.0 }
 0x495   : > { %v6525_v31 = vmax.f32 %v12292_v61, %v6444_v30  ;;  %v12295_v54 = vmax.f32 %v11703_v2, 0.0  ;;  %v7476_v43 = vsel %vm7455_vm3, %v7068_v6, %v7061_v36  ;;  %v6692_v51 = vcombine.high %v6560_v35, %v6560_v35 }
 0x496   : > { %v6524_v48 = vmax.f32 %v12293_v46, %v6442_v49  ;;  %v6526_v44 = vmax.f32 %v12294_v0, %v6446_v28  ;;  %v6699_v11 = vrot.slane %v6560_v35, %v11848_v4  ;;  %v7477_v21 = vsel %vm7457_vm4, %v7075_v37, %v7476_v43 }
 0x497   : > { %v6527_v23 = vmax.f32 %v12295_v54, %v6448_v56  ;;  %v6562_v10 = vsel %vm226_vm0, %v6525_v31, -inf  ;;  %v6706_v63 = vrot.slane %v6692_v51, %v11848_v4  ;;  %v7478_v42 = vsel %vm7459_vm5, %v7082_v53, %v7477_v21 }
 0x498   : > { %v6563_v30 = vmax.f32 %v6561_v18, %v6562_v10  ;;  %v6564_v33 = vsel %vm226_vm0, %v6524_v48, -inf  ;;  %v6565_v55 = vsel %vm226_vm0, %v6526_v44, -inf  ;;  %v6707_v49 = vcombine.high %v6699_v11, %v6699_v11 }
 0x499   : > { %v7083_v2 = vsel %vm229_vm1, %v6699_v11, -inf  ;;  %v6566_v12 = vmax.f32 %v6564_v33, %v6565_v55  ;;  %v6708_v5 = vcombine.high %v6706_v63, %v6706_v63  ;;  %v7097_v16 = vsel %vm229_vm1, %v6706_v63, -inf }
 0x49a   : > { %v7084_v39 = vrot.slane %v7083_v2, 4  ;;  %v6709_v1 = vcombine.high %v6563_v30, %v6563_v30  ;;  %v6716_v7 = vrot.slane %v6563_v30, %v11848_v4  ;;  %v7090_v60 = vsel %vm229_vm1, %v6707_v49, -inf }
 0x49b   : > { %v11966_v25 = vsel %vm226_vm0, %v6527_v23, -inf  ;;  %v7091_v3 = vrot.slane %v7090_v60, 4  ;;  %v7098_v13 = vrot.slane %v7097_v16, 4  ;;  %v7104_v41 = vsel %vm229_vm1, %v6708_v5, -inf }
 0x49c   : > { %v7085_v50 = vmax.f32 %v7083_v2, %v7084_v39  ;;  %v6723_v22 = vrot.slane %v6709_v1, %v11848_v4  ;;  %v6724_v58 = vcombine.high %v6716_v7, %v6716_v7  ;;  %v7111_v57 = vsel %vm229_vm1, %v6716_v7, -inf }
 0x49d   : > { %v6726_v36 = vcombine.high %v6566_v12, %v6566_v12  ;;  %v7092_v17 = vmax.f32 %v7090_v60, %v7091_v3  ;;  %v7099_v28 = vmax.f32 %v7097_v16, %v7098_v13  ;;  %v7105_v56 = vrot.slane %v7104_v41, 4 }
 0x49e   : > { %v7086_v52 = vrot.slane %v7085_v50, 2  ;;  %v6725_v26 = vcombine.high %v6723_v22, %v6723_v22  ;;  %v7112_v45 = vrot.slane %v7111_v57, 4  ;;  %v7118_v29 = vsel %vm229_vm1, %v6724_v58, -inf }
 0x49f   : > { %v7125_v18 = vsel %vm229_vm1, %v6723_v22, -inf  ;;  %v7093_v37 = vrot.slane %v7092_v17, 2  ;;  %v7100_v35 = vrot.slane %v7099_v28, 2  ;;  %v7106_v61 = vmax.f32 %v7104_v41, %v7105_v56 }
 0x4a0   : > { %v7087_v6 = vmax.f32 %v7085_v50, %v7086_v52  ;;  %v7113_v31 = vmax.f32 %v7111_v57, %v7112_v45  ;;  %v7119_v53 = vrot.slane %v7118_v29, 4  ;;  %v7126_v46 = vrot.slane %v7125_v18, 4  ;;  %v6452_v52 = vpop.permute.xlu1 %6451 }
 0x4a1   : > { %v7132_v48 = vsel %vm229_vm1, %v6725_v26, -inf  ;;  %v7094_v44 = vmax.f32 %v7092_v17, %v7093_v37  ;;  %v7101_v54 = vmax.f32 %v7099_v28, %v7100_v35  ;;  %v7107_v23 = vrot.slane %v7106_v61, 2 }
 0x4a2   : > { %v7088_v0 = vrot.slane %v7087_v6, 1  ;;  %v7114_v43 = vrot.slane %v7113_v31, 2  ;;  %v7120_v51 = vmax.f32 %v7118_v29, %v7119_v53  ;;  %v7127_v11 = vmax.f32 %v7125_v18, %v7126_v46 }
 0x4a3   : > { %v7133_v10 = vrot.slane %v7132_v48, 4  ;;  %v7095_v30 = vrot.slane %v7094_v44, 1  ;;  %v7102_v33 = vrot.slane %v7101_v54, 1  ;;  %v7108_v55 = vmax.f32 %v7106_v61, %v7107_v23 }
 0x4a4   : > { %v7089_v21 = vmax.f32 %v7087_v6, %v7088_v0  ;;  %v7115_v63 = vmax.f32 %v7113_v31, %v7114_v43  ;;  %v7121_v49 = vrot.slane %v7120_v51, 2  ;;  %v7128_v2 = vrot.slane %v7127_v11, 2  ;;  %v6450_v6 = vpop.permute.xlu0 %6449 }
 0x4a5   : > { %v7134_v39 = vmax.f32 %v7132_v48, %v7133_v10  ;;  %v7096_v1 = vmax.f32 %v7094_v44, %v7095_v30  ;;  %v7103_v7 = vmax.f32 %v7101_v54, %v7102_v33  ;;  %v7109_v5 = vrot.slane %v7108_v55, 1 }
 0x4a6   : > { %v7479_v60 = vsel %vm7461_vm6, %v7089_v21, %v7478_v42  ;;  %v7116_v16 = vrot.slane %v7115_v63, 1  ;;  %v7122_v50 = vmax.f32 %v7120_v51, %v7121_v49  ;;  %v7129_v3 = vmax.f32 %v7127_v11, %v7128_v2  ;;  %v6454_v21 = vpop.permute.xlu1 %6453 }
 0x4a7   : > { %v7135_v13 = vrot.slane %v7134_v39, 2  ;;  %v7110_v22 = vmax.f32 %v7108_v55, %v7109_v5  ;;  %v7480_v41 = vsel %vm7463_vm7, %v7096_v1, %v7479_v60  ;;  %v6733_v58 = vrot.slane %v6566_v12, %v11848_v4 }
 0x4a8   : > { %v6740_v57 = vrot.slane %v6726_v36, %v11848_v4  ;;  %v7481_v17 = vsel %vm7465_vm8, %v7103_v7, %v7480_v41  ;;  %v7117_v28 = vmax.f32 %v7115_v63, %v7116_v16  ;;  %v7123_v56 = vrot.slane %v7122_v50, 1  ;;  %v6456_v7 = vpop.permute.xlu0 %6455 }
 0x4a9   : > { %v7130_v26 = vrot.slane %v7129_v3, 1  ;;  %v7482_v42 = vsel %vm7467_vm9, %v7110_v22, %v7481_v17  ;;  %v7136_v45 = vmax.f32 %v7134_v39, %v7135_v13  ;;  %v6741_v29 = vcombine.high %v6733_v58, %v6733_v58 }
 0x4aa   : > { %v6742_v18 = vcombine.high %v6740_v57, %v6740_v57  ;;  %7528 = vst.msk [vmem:[%s11894_s19 + $0x10] sm:$0xff] %vm226_vm0, %v7482_v42  ;;  %v7124_v37 = vmax.f32 %v7122_v50, %v7123_v56  ;;  %v7139_v12 = vsel %vm229_vm1, %v6733_v58, -inf  ;;  %v7153_v36 = vsel %vm229_vm1, %v6740_v57, -inf }
 0x4ab   : > { %v7131_v35 = vmax.f32 %v7129_v3, %v7130_v26  ;;  %v7137_v61 = vrot.slane %v7136_v45, 1  ;;  %v7140_v31 = vrot.slane %v7139_v12, 4  ;;  %v7146_v53 = vsel %vm229_vm1, %v6741_v29, -inf }
 0x4ac   : > { %v7154_v46 = vrot.slane %v7153_v36, 4  ;;  %v7483_v48 = vsel %vm7455_vm3, %v7124_v37, %v7117_v28  ;;  %v7147_v0 = vrot.slane %v7146_v53, 4  ;;  %v7160_v44 = vsel %vm229_vm1, %v6742_v18, -inf }
 0x4ad   : > { %v12296_v54 = vmax.f32 %v11706_v34, 0.0  ;;  %v7138_v43 = vmax.f32 %v7136_v45, %v7137_v61  ;;  %v7484_v51 = vsel %vm7457_vm4, %v7131_v35, %v7483_v48  ;;  %v7141_v11 = vmax.f32 %v7139_v12, %v7140_v31 }
 0x4ae   : > { %v7155_v10 = vmax.f32 %v7153_v36, %v7154_v46  ;;  %v7148_v30 = vmax.f32 %v7146_v53, %v7147_v0  ;;  %v7161_v33 = vrot.slane %v7160_v44, 4  ;;  %v12297_v63 = vmax.f32 %v11726_v24, 0.0 }
 0x4af   : > { %v6529_v23 = vmax.f32 %v12296_v54, %v6452_v52  ;;  %v7142_v2 = vrot.slane %v7141_v11, 2  ;;  %v7485_v1 = vsel %vm7459_vm5, %v7138_v43, %v7484_v51  ;;  %v12298_v50 = vmax.f32 %v11718_v8, 0.0 }
 0x4b0   : > { %v6528_v49 = vmax.f32 %v12297_v63, %v6450_v6  ;;  %v7156_v39 = vrot.slane %v7155_v10, 2  ;;  %v7149_v5 = vrot.slane %v7148_v30, 2  ;;  %v7162_v60 = vmax.f32 %v7160_v44, %v7161_v33 }
 0x4b1   : > { %v6568_v55 = vsel %vm226_vm0, %v6529_v23, -inf  ;;  %v6530_v3 = vmax.f32 %v12298_v50, %v6454_v21  ;;  %v7143_v13 = vmax.f32 %v7141_v11, %v7142_v2  ;;  %v12299_v17 = vmax.f32 %v11742_v20, 0.0 }
 0x4b2   : > { %v6569_v34 = vmax.f32 %v11966_v25, %v6568_v55  ;;  %v6570_v16 = vsel %vm226_vm0, %v6528_v49, -inf  ;;  %v7157_v22 = vmax.f32 %v7155_v10, %v7156_v39  ;;  %v7150_v58 = vmax.f32 %v7148_v30, %v7149_v5 }
 0x4b3   : > { %v7163_v57 = vrot.slane %v7162_v60, 2  ;;  %v6571_v52 = vsel %vm226_vm0, %v6530_v3, -inf  ;;  %v6531_v25 = vmax.f32 %v12299_v17, %v6456_v7  ;;  %v7144_v28 = vrot.slane %v7143_v13, 1 }
 0x4b4   : > { %v6743_v41 = vcombine.high %v6569_v34, %v6569_v34  ;;  %v6750_v24 = vrot.slane %v6569_v34, %v11848_v4  ;;  %v7158_v56 = vrot.slane %v7157_v22, 1  ;;  %v7151_v45 = vrot.slane %v7150_v58, 1 }
 0x4b5   : > { %v7164_v8 = vmax.f32 %v7162_v60, %v7163_v57  ;;  %v6572_v18 = vmax.f32 %v6570_v16, %v6571_v52  ;;  %v7145_v6 = vmax.f32 %v7143_v13, %v7144_v28 }
 0x4b6   : > { %v6757_v26 = vrot.slane %v6743_v41, %v11848_v4  ;;  %v6758_v42 = vcombine.high %v6750_v24, %v6750_v24  ;;  %v7167_v29 = vsel %vm229_vm1, %v6750_v24, -inf  ;;  %v7159_v37 = vmax.f32 %v7157_v22, %v7158_v56  ;;  %v6460_v22 = vpop.permute.xlu1 %6459  ;;  %v6458_v56 = vpop.permute.xlu0 %6457 }
 0x4b7   : > { %v7168_v12 = vrot.slane %v7167_v29, 4  ;;  %v7152_v36 = vmax.f32 %v7150_v58, %v7151_v45  ;;  %v7165_v61 = vrot.slane %v7164_v8, 1  ;;  %v7486_v53 = vsel %vm7461_vm6, %v7145_v6, %v7485_v1 }
 0x4b8   : > { %v6759_v35 = vcombine.high %v6757_v26, %v6757_v26  ;;  %v7174_v31 = vsel %vm229_vm1, %v6758_v42, -inf  ;;  %v7181_v20 = vsel %vm229_vm1, %v6757_v26, -inf  ;;  %v6760_v43 = vcombine.high %v6572_v18, %v6572_v18 }
 0x4b9   : > { %v7169_v46 = vmax.f32 %v7167_v29, %v7168_v12  ;;  %v7175_v48 = vrot.slane %v7174_v31, 4  ;;  %v7182_v0 = vrot.slane %v7181_v20, 4  ;;  %v7166_v44 = vmax.f32 %v7164_v8, %v7165_v61 }
 0x4ba   : > { %v7487_v54 = vsel %vm7463_vm7, %v7152_v36, %v7486_v53  ;;  %v7188_v23 = vsel %vm229_vm1, %v6759_v35, -inf  ;;  %v6767_v55 = vrot.slane %v6572_v18, %v11848_v4  ;;  %v6774_v63 = vrot.slane %v6760_v43, %v11848_v4 }
 0x4bb   : > { %v7488_v51 = vsel %vm7465_vm8, %v7159_v37, %v7487_v54  ;;  %v7170_v11 = vrot.slane %v7169_v46, 2  ;;  %v7176_v10 = vmax.f32 %v7174_v31, %v7175_v48  ;;  %v7183_v21 = vmax.f32 %v7181_v20, %v7182_v0 }
 0x4bc   : > { %v7489_v30 = vsel %vm7467_vm9, %v7166_v44, %v7488_v51  ;;  %v7189_v33 = vrot.slane %v7188_v23, 4  ;;  %v6573_v1 = vsel %vm226_vm0, %v6531_v25, -inf  ;;  %v6775_v7 = vcombine.high %v6767_v55, %v6767_v55  ;;  %v6462_v44 = vpop.permute.xlu1 %6461 }
 0x4bd   : > { %7529 = vst.msk [vmem:[%s11894_s19 + $0x18] sm:$0xff] %vm226_vm0, %v7489_v30  ;;  %v7171_v49 = vmax.f32 %v7169_v46, %v7170_v11  ;;  %v7177_v2 = vrot.slane %v7176_v10, 2  ;;  %v7184_v39 = vrot.slane %v7183_v21, 2  ;;  %v6776_v5 = vcombine.high %v6774_v63, %v6774_v63  ;;  %v6464_v30 = vpop.permute.xlu0 %6463 }
 0x4be   : > { %v7190_v34 = vmax.f32 %v7188_v23, %v7189_v33  ;;  %v7195_v60 = vsel %vm229_vm1, %v6767_v55, -inf  ;;  %v7202_v24 = vsel %vm229_vm1, %v6775_v7, -inf  ;;  %v7209_v58 = vsel %vm229_vm1, %v6774_v63, -inf }
 0x4bf   : > { %v7172_v16 = vrot.slane %v7171_v49, 1  ;;  %v7178_v50 = vmax.f32 %v7176_v10, %v7177_v2  ;;  %v7185_v3 = vmax.f32 %v7183_v21, %v7184_v39  ;;  %v7196_v13 = vrot.slane %v7195_v60, 4 }
 0x4c0   : > { %v7191_v41 = vrot.slane %v7190_v34, 2  ;;  %v7216_v57 = vsel %vm229_vm1, %v6776_v5, -inf  ;;  %v7203_v42 = vrot.slane %v7202_v24, 4  ;;  %v7210_v45 = vrot.slane %v7209_v58, 4 }
 0x4c1   : > { %v7173_v52 = vmax.f32 %v7171_v49, %v7172_v16  ;;  %v7179_v17 = vrot.slane %v7178_v50, 1  ;;  %v7186_v25 = vrot.slane %v7185_v3, 1  ;;  %v7197_v28 = vmax.f32 %v7195_v60, %v7196_v13 }
 0x4c2   : > { %v7192_v26 = vmax.f32 %v7190_v34, %v7191_v41  ;;  %v7217_v8 = vrot.slane %v7216_v57, 4  ;;  %v12300_v37 = vmax.f32 %v11745_v38, 0.0  ;;  %v7204_v36 = vmax.f32 %v7202_v24, %v7203_v42 }
 0x4c3   : > { %v7180_v29 = vmax.f32 %v7178_v50, %v7179_v17  ;;  %v7187_v18 = vmax.f32 %v7185_v3, %v7186_v25  ;;  %v7198_v6 = vrot.slane %v7197_v28, 2  ;;  %v7211_v61 = vmax.f32 %v7209_v58, %v7210_v45 }
 0x4c4   : > { %v6533_v35 = vmax.f32 %v12300_v37, %v6460_v22  ;;  %v7193_v12 = vrot.slane %v7192_v26, 1  ;;  %v7218_v31 = vmax.f32 %v7216_v57, %v7217_v8  ;;  %v12301_v48 = vmax.f32 %v11763_v32, 0.0 }
 0x4c5   : > { %v7490_v20 = vsel %vm7455_vm3, %v7180_v29, %v7173_v52  ;;  %v7199_v53 = vmax.f32 %v7197_v28, %v7198_v6  ;;  %v7205_v43 = vrot.slane %v7204_v36, 2  ;;  %v7212_v51 = vrot.slane %v7211_v61, 2 }
 0x4c6   : > { %v6574_v46 = vsel %vm226_vm0, %v6533_v35, -inf  ;;  %v6532_v0 = vmax.f32 %v12301_v48, %v6458_v56  ;;  %v7194_v54 = vmax.f32 %v7192_v26, %v7193_v12  ;;  %v7491_v23 = vsel %vm7457_vm4, %v7187_v18, %v7490_v20 }
 0x4c7   : > { %v7200_v38 = vrot.slane %v7199_v53, 1  ;;  %v7219_v11 = vrot.slane %v7218_v31, 2  ;;  %v6575_v10 = vmax.f32 %v6573_v1, %v6574_v46  ;;  %v7206_v33 = vmax.f32 %v7204_v36, %v7205_v43 }
 0x4c8   : > { %v6576_v21 = vsel %vm226_vm0, %v6532_v0, -inf  ;;  %v7213_v55 = vmax.f32 %v7211_v61, %v7212_v51  ;;  %v7492_v63 = vsel %vm7459_vm5, %v7194_v54, %v7491_v23  ;;  %v12302_v49 = vmax.f32 %v11755_v27, 0.0 }
 0x4c9   : > { %v7201_v2 = vmax.f32 %v7199_v53, %v7200_v38  ;;  %v7220_v39 = vmax.f32 %v7218_v31, %v7219_v11  ;;  %v6777_v34 = vcombine.high %v6575_v10, %v6575_v10  ;;  %v6784_v7 = vrot.slane %v6575_v10, %v11848_v4 }
 0x4ca   : > { %v6534_v32 = vmax.f32 %v12302_v49, %v6462_v44  ;;  %v7207_v5 = vrot.slane %v7206_v33, 1  ;;  %v7214_v60 = vrot.slane %v7213_v55, 1  ;;  %v12303_v1 = vmax.f32 %v11778_v15, 0.0 }
 0x4cb   : > { %v7221_v3 = vrot.slane %v7220_v39, 1  ;;  %v7493_v13 = vsel %vm7461_vm6, %v7201_v2, %v7492_v63  ;;  %v6791_v22 = vrot.slane %v6777_v34, %v11848_v4  ;;  %v6792_v41 = vcombine.high %v6784_v7, %v6784_v7 }
 0x4cc   : > { %v6577_v16 = vsel %vm226_vm0, %v6534_v32, -inf  ;;  %v6535_v50 = vmax.f32 %v12303_v1, %v6464_v30  ;;  %v7208_v27 = vmax.f32 %v7206_v33, %v7207_v5  ;;  %v7215_v24 = vmax.f32 %v7213_v55, %v7214_v60 }
 0x4cd   : > { %v7223_v58 = vsel %vm229_vm1, %v6784_v7, -inf  ;;  %v6578_v57 = vmax.f32 %v6576_v21, %v6577_v16  ;;  %v7222_v52 = vmax.f32 %v7220_v39, %v7221_v3  ;;  %v6793_v17 = vcombine.high %v6791_v22, %v6791_v22  ;;  %v6468_v21 = vpop.permute.xlu1 %6467 }
 0x4ce   : > { %v7224_v25 = vrot.slane %v7223_v58, 4  ;;  %v7230_v28 = vsel %vm229_vm1, %v6792_v41, -inf  ;;  %v7494_v15 = vsel %vm7463_vm7, %v7208_v27, %v7493_v13  ;;  %v7237_v26 = vsel %vm229_vm1, %v6791_v22, -inf }
 0x4cf   : > { %v7231_v56 = vrot.slane %v7230_v28, 4  ;;  %v6794_v42 = vcombine.high %v6578_v57, %v6578_v57  ;;  %v7495_v45 = vsel %vm7465_vm8, %v7215_v24, %v7494_v15  ;;  %v7238_v29 = vrot.slane %v7237_v26, 4 }
 0x4d0   : > { %v7225_v8 = vmax.f32 %v7223_v58, %v7224_v25  ;;  %v7244_v18 = vsel %vm229_vm1, %v6793_v17, -inf  ;;  %v7496_v6 = vsel %vm7467_vm9, %v7222_v52, %v7495_v45  ;;  %v6801_v12 = vrot.slane %v6578_v57, %v11848_v4  ;;  %v6466_v25 = vpop.permute.xlu0 %6465 }
 0x4d1   : > { %v7232_v37 = vmax.f32 %v7230_v28, %v7231_v56  ;;  %v7245_v35 = vrot.slane %v7244_v18, 4  ;;  %7530 = vst.msk [vmem:[%s11894_s19 + $0x20] sm:$0xff] %vm226_vm0, %v7496_v6  ;;  %v7239_v61 = vmax.f32 %v7237_v26, %v7238_v29  ;;  %v6808_v31 = vrot.slane %v6794_v42, %v11848_v4  ;;  %v6470_v28 = vpop.permute.xlu1 %6469 }
 0x4d2   : > { %v7226_v36 = vrot.slane %v7225_v8, 2  ;;  %v6579_v20 = vsel %vm226_vm0, %v6535_v50, -inf  ;;  %v6809_v48 = vcombine.high %v6801_v12, %v6801_v12  ;;  %v7251_v0 = vsel %vm229_vm1, %v6801_v12, -inf }
 0x4d3   : > { %v7233_v53 = vrot.slane %v7232_v37, 2  ;;  %v7246_v46 = vmax.f32 %v7244_v18, %v7245_v35  ;;  %v7240_v54 = vrot.slane %v7239_v61, 2  ;;  %v6810_v23 = vcombine.high %v6808_v31, %v6808_v31 }
 0x4d4   : > { %v7227_v44 = vmax.f32 %v7225_v8, %v7226_v36  ;;  %v7252_v43 = vrot.slane %v7251_v0, 4  ;;  %v7258_v11 = vsel %vm229_vm1, %v6809_v48, -inf  ;;  %v7265_v10 = vsel %vm229_vm1, %v6808_v31, -inf }
 0x4d5   : > { %v7234_v51 = vmax.f32 %v7232_v37, %v7233_v53  ;;  %v7247_v38 = vrot.slane %v7246_v46, 2  ;;  %v7241_v33 = vmax.f32 %v7239_v61, %v7240_v54  ;;  %v7259_v63 = vrot.slane %v7258_v11, 4 }
 0x4d6   : > { %v7228_v30 = vrot.slane %v7227_v44, 1  ;;  %v7253_v55 = vmax.f32 %v7251_v0, %v7252_v43  ;;  %v7266_v2 = vrot.slane %v7265_v10, 4  ;;  %v7272_v39 = vsel %vm229_vm1, %v6810_v23, -inf }
 0x4d7   : > { %v7235_v49 = vrot.slane %v7234_v51, 1  ;;  %v7248_v32 = vmax.f32 %v7246_v46, %v7247_v38  ;;  %v7242_v7 = vrot.slane %v7241_v33, 1  ;;  %v7260_v60 = vmax.f32 %v7258_v11, %v7259_v63 }
 0x4d8   : > { %v7229_v34 = vmax.f32 %v7227_v44, %v7228_v30  ;;  %v7254_v5 = vrot.slane %v7253_v55, 2  ;;  %v7267_v50 = vmax.f32 %v7265_v10, %v7266_v2  ;;  %v7273_v3 = vrot.slane %v7272_v39, 4 }
 0x4d9   : > { %v7236_v16 = vmax.f32 %v7234_v51, %v7235_v49  ;;  %v7249_v1 = vrot.slane %v7248_v32, 1  ;;  %v7243_v13 = vmax.f32 %v7241_v33, %v7242_v7  ;;  %v7261_v41 = vrot.slane %v7260_v60, 2 }
 0x4da   : > { %v7255_v22 = vmax.f32 %v7253_v55, %v7254_v5  ;;  %v12304_v27 = vmax.f32 %v11781_v19, 0.0  ;;  %v7268_v52 = vrot.slane %v7267_v50, 2  ;;  %v7274_v17 = vmax.f32 %v7272_v39, %v7273_v3 }
 0x4db   : > { %v7250_v58 = vmax.f32 %v7248_v32, %v7249_v1  ;;  %v7497_v57 = vsel %vm7455_vm3, %v7236_v16, %v7229_v34  ;;  %v7262_v26 = vmax.f32 %v7260_v60, %v7261_v41  ;;  %v12305_v37 = vmax.f32 %v11799_v62, 0.0 }
 0x4dc   : > { %v6537_v24 = vmax.f32 %v12304_v27, %v6468_v21  ;;  %v7498_v15 = vsel %vm7457_vm4, %v7243_v13, %v7497_v57  ;;  %v7256_v56 = vrot.slane %v7255_v22, 1  ;;  %v7269_v45 = vmax.f32 %v7267_v50, %v7268_v52 }
 0x4dd   : > { %v7275_v8 = vrot.slane %v7274_v17, 2  ;;  %v7499_v29 = vsel %vm7459_vm5, %v7250_v58, %v7498_v15  ;;  %v7263_v6 = vrot.slane %v7262_v26, 1  ;;  %v6536_v35 = vmax.f32 %v12305_v37, %v6466_v25 }
 0x4de   : > { %v6580_v42 = vsel %vm226_vm0, %v6537_v24, -inf  ;;  %v7257_v19 = vmax.f32 %v7255_v22, %v7256_v56  ;;  %v12306_v12 = vmax.f32 %v11791_v40, 0.0  ;;  %v7270_v61 = vrot.slane %v7269_v45, 1 }
 0x4df   : > { %v6581_v18 = vmax.f32 %v6579_v20, %v6580_v42  ;;  %v7276_v31 = vmax.f32 %v7274_v17, %v7275_v8  ;;  %v7264_v48 = vmax.f32 %v7262_v26, %v7263_v6  ;;  %v6582_v44 = vsel %vm226_vm0, %v6536_v35, -inf  ;;  %v6472_v26 = vpop.permute.xlu0 %6471  ;;  %v6476_v35 = vpop.permute.xlu1 %6475 }
 0x4e0   : > { %v6538_v36 = vmax.f32 %v12306_v12, %v6470_v28  ;;  %v7500_v0 = vsel %vm7461_vm6, %v7257_v19, %v7499_v29  ;;  %v7271_v54 = vmax.f32 %v7269_v45, %v7270_v61 }
 0x4e1   : > { %v6811_v53 = vcombine.high %v6581_v18, %v6581_v18  ;;  %v6818_v46 = vrot.slane %v6581_v18, %v11848_v4  ;;  %v7277_v23 = vrot.slane %v7276_v31, 1  ;;  %v7501_v40 = vsel %vm7463_vm7, %v7264_v48, %v7500_v0 }
 0x4e2   : > { %v6583_v20 = vsel %vm226_vm0, %v6538_v36, -inf  ;;  %v7502_v10 = vsel %vm7465_vm8, %v7271_v54, %v7501_v40 }
 0x4e3   : > { %v6825_v62 = vrot.slane %v6811_v53, %v11848_v4  ;;  %v6826_v43 = vcombine.high %v6818_v46, %v6818_v46  ;;  %v7279_v51 = vsel %vm229_vm1, %v6818_v46, -inf  ;;  %v6584_v38 = vmax.f32 %v6582_v44, %v6583_v20 }
 0x4e4   : > { %v7278_v11 = vmax.f32 %v7276_v31, %v7277_v23  ;;  %v7280_v30 = vrot.slane %v7279_v51, 4  ;;  %v12307_v31 = vmax.f32 %v11813_v59, 0.0  ;;  %v12308_v59 = vmax.f32 %v11816_v47, 0.0 }
 0x4e5   : > { %v6827_v21 = vcombine.high %v6825_v62, %v6825_v62  ;;  %v7286_v33 = vsel %vm229_vm1, %v6826_v43, -inf  ;;  %v7293_v55 = vsel %vm229_vm1, %v6825_v62, -inf  ;;  %v6828_v63 = vcombine.high %v6584_v38, %v6584_v38 }
 0x4e6   : > { %v6835_v49 = vrot.slane %v6584_v38, %v11848_v4  ;;  %v7503_v32 = vsel %vm7467_vm9, %v7278_v11, %v7502_v10  ;;  %v7281_v2 = vmax.f32 %v7279_v51, %v7280_v30  ;;  %v7287_v39 = vrot.slane %v7286_v33, 4  ;;  %v6474_v11 = vpop.permute.xlu0 %6473 }
 0x4e7   : > { %v7294_v34 = vrot.slane %v7293_v55, 4  ;;  %7531 = vst.msk [vmem:[%s11894_s19 + $0x28] sm:$0xff] %vm226_vm0, %v7503_v32  ;;  %v7300_v7 = vsel %vm229_vm1, %v6827_v21, -inf  ;;  %v6842_v5 = vrot.slane %v6828_v63, %v11848_v4  ;;  %v6539_v53 = vmax.f32 %v12307_v31, %v6472_v26 }
 0x4e8   : > { %v6843_v60 = vcombine.high %v6835_v49, %v6835_v49  ;;  %v7307_v16 = vsel %vm229_vm1, %v6835_v49, -inf  ;;  %v7282_v1 = vrot.slane %v7281_v2, 2  ;;  %v7288_v50 = vmax.f32 %v7286_v33, %v7287_v39 }
 0x4e9   : > { %v7295_v3 = vmax.f32 %v7293_v55, %v7294_v34  ;;  %v7301_v13 = vrot.slane %v7300_v7, 4  ;;  %v6844_v22 = vcombine.high %v6842_v5, %v6842_v5  ;;  %v7308_v41 = vrot.slane %v7307_v16, 4 }
 0x4ea   : > { %v7314_v27 = vsel %vm229_vm1, %v6843_v60, -inf  ;;  %v7321_v24 = vsel %vm229_vm1, %v6842_v5, -inf  ;;  %v7283_v58 = vmax.f32 %v7281_v2, %v7282_v1  ;;  %v7289_v57 = vrot.slane %v7288_v50, 2  ;;  %v6478_v2 = vpop.permute.xlu1 %6477 }
 0x4eb   : > { %v7296_v52 = vrot.slane %v7295_v3, 2  ;;  %v7302_v17 = vmax.f32 %v7300_v7, %v7301_v13  ;;  %v7309_v25 = vmax.f32 %v7307_v16, %v7308_v41  ;;  %v7315_v28 = vrot.slane %v7314_v27, 4 }
 0x4ec   : > { %v7322_v15 = vrot.slane %v7321_v24, 4  ;;  %v7328_v56 = vsel %vm229_vm1, %v6844_v22, -inf  ;;  %v7284_v42 = vrot.slane %v7283_v58, 1  ;;  %v7290_v45 = vmax.f32 %v7288_v50, %v7289_v57 }
 0x4ed   : > { %v7297_v8 = vmax.f32 %v7295_v3, %v7296_v52  ;;  %v7303_v29 = vrot.slane %v7302_v17, 2  ;;  %v7310_v18 = vrot.slane %v7309_v25, 2  ;;  %v7316_v19 = vmax.f32 %v7314_v27, %v7315_v28 }
 0x4ee   : > { %v7323_v6 = vmax.f32 %v7321_v24, %v7322_v15  ;;  %v7329_v37 = vrot.slane %v7328_v56, 4  ;;  %v7291_v12 = vrot.slane %v7290_v45, 1  ;;  %v7285_v20 = vmax.f32 %v7283_v58, %v7284_v42 }
 0x4ef   : > { %v7298_v36 = vrot.slane %v7297_v8, 1  ;;  %v7304_v61 = vmax.f32 %v7302_v17, %v7303_v29  ;;  %v7311_v46 = vmax.f32 %v7309_v25, %v7310_v18  ;;  %v7317_v48 = vrot.slane %v7316_v19, 2 }
 0x4f0   : > { %v7324_v0 = vrot.slane %v7323_v6, 2  ;;  %v7330_v44 = vmax.f32 %v7328_v56, %v7329_v37  ;;  %v7292_v54 = vmax.f32 %v7290_v45, %v7291_v12  ;;  %v6585_v30 = vsel %vm226_vm0, %v6539_v53, -inf }
 0x4f1   : > { %v7299_v23 = vmax.f32 %v7297_v8, %v7298_v36  ;;  %v7305_v62 = vrot.slane %v7304_v61, 1  ;;  %v7312_v43 = vrot.slane %v7311_v46, 1  ;;  %v7318_v40 = vmax.f32 %v7316_v19, %v7317_v48 }
 0x4f2   : > { %v7325_v51 = vmax.f32 %v7323_v6, %v7324_v0  ;;  %v7331_v38 = vrot.slane %v7330_v44, 2  ;;  %v7504_v21 = vsel %vm7455_vm3, %v7292_v54, %v7285_v20  ;;  %v6541_v33 = vmax.f32 %v12308_v59, %v6476_v35 }
 0x4f3   : > { %v7306_v10 = vmax.f32 %v7304_v61, %v7305_v62  ;;  %v7505_v55 = vsel %vm7457_vm4, %v7299_v23, %v7504_v21  ;;  %v7313_v63 = vmax.f32 %v7311_v46, %v7312_v43  ;;  %v7319_v49 = vrot.slane %v7318_v40, 1 }
 0x4f4   : > { %v7326_v32 = vrot.slane %v7325_v51, 1  ;;  %v7332_v39 = vmax.f32 %v7330_v44, %v7331_v38  ;;  %v6586_v7 = vsel %vm226_vm0, %v6541_v33, -inf  ;;  %v12309_v5 = vmax.f32 %v11831_v14, 0.0 }
 0x4f5   : > { %v7506_v34 = vsel %vm7459_vm5, %v7306_v10, %v7505_v55  ;;  %v7320_v16 = vmax.f32 %v7318_v40, %v7319_v49  ;;  %v6587_v47 = vmax.f32 %v6585_v30, %v6586_v7  ;;  %v12310_v13 = vmax.f32 %v11824_v9, 0.0 }
 0x4f6   : > { %v6540_v60 = vmax.f32 %v12309_v5, %v6474_v11  ;;  %v7327_v1 = vmax.f32 %v7325_v51, %v7326_v32  ;;  %v7507_v50 = vsel %vm7461_vm6, %v7313_v63, %v7506_v34  ;;  %v7333_v3 = vrot.slane %v7332_v39, 1 }
 0x4f7   : > { %v6542_v22 = vmax.f32 %v12310_v13, %v6478_v2  ;;  %v7508_v41 = vsel %vm7463_vm7, %v7320_v16, %v7507_v50  ;;  %v6845_v27 = vcombine.high %v6587_v47, %v6587_v47  ;;  %v6852_v24 = vrot.slane %v6587_v47, %v11848_v4 }
 0x4f8   : > { %v7334_v58 = vmax.f32 %v7332_v39, %v7333_v3  ;;  %v7509_v57 = vsel %vm7465_vm8, %v7327_v1, %v7508_v41  ;;  %v6588_v14 = vsel %vm226_vm0, %v6540_v60, -inf }
 0x4f9   : > { %v6589_v52 = vsel %vm226_vm0, %v6542_v22, -inf  ;;  %v6859_v17 = vrot.slane %v6845_v27, %v11848_v4  ;;  %v6860_v25 = vcombine.high %v6852_v24, %v6852_v24  ;;  %v7335_v28 = vsel %vm229_vm1, %v6852_v24, -inf }
 0x4fa   : > { %v6590_v15 = vmax.f32 %v6588_v14, %v6589_v52  ;;  %v7510_v9 = vsel %vm7467_vm9, %v7334_v58, %v7509_v57  ;;  %v7336_v56 = vrot.slane %v7335_v28, 4 }
 0x4fb   : > { %7532 = vst.msk [vmem:[%s11894_s19 + $0x30] sm:$0xff] %vm226_vm0, %v7510_v9  ;;  %v6861_v26 = vcombine.high %v6859_v17, %v6859_v17  ;;  %v7342_v42 = vsel %vm229_vm1, %v6860_v25, -inf  ;;  %v7349_v45 = vsel %vm229_vm1, %v6859_v17, -inf }
 0x4fc   : > { %v6862_v8 = vcombine.high %v6590_v15, %v6590_v15  ;;  %v7337_v29 = vmax.f32 %v7335_v28, %v7336_v56  ;;  %v7343_v18 = vrot.slane %v7342_v42, 4  ;;  %v7350_v19 = vrot.slane %v7349_v45, 4 }
 0x4fd   : > { %v6869_v6 = vrot.slane %v6590_v15, %v11848_v4  ;;  %v7356_v37 = vsel %vm229_vm1, %v6861_v26, -inf }
 0x4fe   : > { %v6876_v35 = vrot.slane %v6862_v8, %v11848_v4  ;;  %v7338_v12 = vrot.slane %v7337_v29, 2  ;;  %v7344_v36 = vmax.f32 %v7342_v42, %v7343_v18  ;;  %v7351_v61 = vmax.f32 %v7349_v45, %v7350_v19 }
 0x4ff   : > { %v7357_v31 = vrot.slane %v7356_v37, 4  ;;  %v6877_v53 = vcombine.high %v6869_v6, %v6869_v6  ;;  %v7363_v48 = vsel %vm229_vm1, %v6869_v6, -inf }
 0x500   : > { %v6878_v46 = vcombine.high %v6876_v35, %v6876_v35  ;;  %v7377_v0 = vsel %vm229_vm1, %v6876_v35, -inf  ;;  %v7339_v44 = vmax.f32 %v7337_v29, %v7338_v12  ;;  %v7345_v20 = vrot.slane %v7344_v36, 2 }
 0x501   : > { %v7352_v54 = vrot.slane %v7351_v61, 2  ;;  %v7358_v23 = vmax.f32 %v7356_v37, %v7357_v31  ;;  %v7364_v62 = vrot.slane %v7363_v48, 4  ;;  %v7370_v43 = vsel %vm229_vm1, %v6877_v53, -inf }
 0x502   : > { %v7378_v40 = vrot.slane %v7377_v0, 4  ;;  %v7384_v4 = vsel %vm229_vm1, %v6878_v46, -inf  ;;  %v7340_v51 = vrot.slane %v7339_v44, 1  ;;  %v7346_v38 = vmax.f32 %v7344_v36, %v7345_v20 }
 0x503   : > { %v7353_v11 = vmax.f32 %v7351_v61, %v7352_v54  ;;  %v7359_v10 = vrot.slane %v7358_v23, 2  ;;  %v7365_v21 = vmax.f32 %v7363_v48, %v7364_v62  ;;  %v7371_v30 = vrot.slane %v7370_v43, 4 }
 0x504   : > { %v7379_v59 = vmax.f32 %v7377_v0, %v7378_v40  ;;  %v7385_v33 = vrot.slane %v7384_v4, 4  ;;  %v7347_v55 = vrot.slane %v7346_v38, 1  ;;  %v7341_v7 = vmax.f32 %v7339_v44, %v7340_v51 }
 0x505   : > { %v7354_v63 = vrot.slane %v7353_v11, 1  ;;  %v7360_v49 = vmax.f32 %v7358_v23, %v7359_v10  ;;  %v7366_v32 = vrot.slane %v7365_v21, 2  ;;  %v7372_v2 = vmax.f32 %v7370_v43, %v7371_v30 }
 0x506   : > { %v7380_v39 = vrot.slane %v7379_v59, 2  ;;  %v7386_v34 = vmax.f32 %v7384_v4, %v7385_v33  ;;  %v7348_v5 = vmax.f32 %v7346_v38, %v7347_v55 }
 0x507   : > { %v7355_v60 = vmax.f32 %v7353_v11, %v7354_v63  ;;  %v7361_v16 = vrot.slane %v7360_v49, 1  ;;  %v7367_v1 = vmax.f32 %v7365_v21, %v7366_v32  ;;  %v7373_v50 = vrot.slane %v7372_v2, 2 }
 0x508   : > { %v7381_v47 = vmax.f32 %v7379_v59, %v7380_v39  ;;  %v7387_v3 = vrot.slane %v7386_v34, 2  ;;  %v7511_v22 = vsel %vm7455_vm3, %v7348_v5, %v7341_v7 }
 0x509   : > { %v7362_v13 = vmax.f32 %v7360_v49, %v7361_v16  ;;  %v7512_v41 = vsel %vm7457_vm4, %v7355_v60, %v7511_v22  ;;  %v7368_v27 = vrot.slane %v7367_v1, 1  ;;  %v7374_v24 = vmax.f32 %v7372_v2, %v7373_v50 }
 0x50a   : > { %v7382_v58 = vrot.slane %v7381_v47, 1  ;;  %v7388_v57 = vmax.f32 %v7386_v34, %v7387_v3 }
 0x50b   : > { %v7513_v14 = vsel %vm7459_vm5, %v7362_v13, %v7512_v41  ;;  %v7369_v52 = vmax.f32 %v7367_v1, %v7368_v27  ;;  %v7375_v17 = vrot.slane %v7374_v24, 1 }
 0x50c   : > { %v7383_v25 = vmax.f32 %v7381_v47, %v7382_v58  ;;  %v7389_v28 = vrot.slane %v7388_v57, 1 }
 0x50d   : > { %v7376_v15 = vmax.f32 %v7374_v24, %v7375_v17  ;;  %v7514_v9 = vsel %vm7461_vm6, %v7369_v52, %v7513_v14 }
 0x50e   : > { %v7390_v56 = vmax.f32 %v7388_v57, %v7389_v28 }
 0x50f   : > { %v7515_v26 = vsel %vm7463_vm7, %v7376_v15, %v7514_v9 }
 0x510   : > { %v7516_v42 = vsel %vm7465_vm8, %v7383_v25, %v7515_v26 }
 0x511   : > { %v7517_v45 = vsel %vm7467_vm9, %v7390_v56, %v7516_v42 }
 0x512   : > { %7533 = vst.msk [vmem:[%s11894_s19 + $0x38] sm:$0xff] %vm226_vm0, %v7517_v45 }
 0x513 PF: > { %s15_s18 = sadd.s32 1, %s9340_s18  }
 0x514   : > { %p12_p4 = scmp.ge.s32.totalorder %s15_s18, 4  }
 0x516   :  { %14 = sbr.rel (!%p12_p4) target bundleno = 1 (0x1), region = 92 }

</bundles_post_ra>
